<compile_context>
chip_gen: v7x
topology: tpu7x:2x2x1
jax: 0.10.0
libtpu: 0.0.40
codegen_flags: <defaults>
</compile_context>

<pallas_src>
import jax
import jax.numpy as jnp
from jax.experimental import pallas as pl
from jax.experimental.pallas import tpu as pltpu

TEXT_DIM = 768
IMAGE_DIM = 2048
EMBED_DIM = 512


def _round_up(x, m):
    return ((x + m - 1) // m) * m


# --------------------------------------------------------------------------
# Stage 1: Linear projection + L2 normalize (+ fold exp(logit_scale) into the
# image embedding), tiled over batch.
# --------------------------------------------------------------------------
def _project_normalize_kernel(scale_ref,  # SMEM (1, 1) f32: exp(logit_scale)
                              txt_ref,    # VMEM (bt, TEXT_DIM)   bf16
                              img_ref,    # VMEM (bt, IMAGE_DIM)  bf16
                              wt_ref,     # VMEM (TEXT_DIM, EMBED_DIM)  bf16 (W_text.T)
                              bt_ref,     # VMEM (1, EMBED_DIM)   f32
                              wi_ref,     # VMEM (IMAGE_DIM, EMBED_DIM) bf16 (W_image.T)
                              bi_ref,     # VMEM (1, EMBED_DIM)   f32
                              temb_ref,   # out VMEM (bt, EMBED_DIM) bf16
                              iemb_ref):  # out VMEM (bt, EMBED_DIM) bf16
    # nn.Linear: y = x @ W.T + b.  Weights arrive pre-transposed (in, out) and
    # in bf16 so the MXU runs native bf16 with f32 accumulation.
    t = jnp.dot(txt_ref[...], wt_ref[...], preferred_element_type=jnp.float32)
    t = t + bt_ref[...]
    # L2 normalize in f32 (matches x / x.norm(dim=-1, keepdim=True); no eps,
    # same behavior as the PyTorch reference).
    t = t * jax.lax.rsqrt(jnp.sum(t * t, axis=-1, keepdims=True))
    temb_ref[...] = t.astype(temb_ref.dtype)

    i = jnp.dot(img_ref[...], wi_ref[...], preferred_element_type=jnp.float32)
    i = i + bi_ref[...]
    i = i * jax.lax.rsqrt(jnp.sum(i * i, axis=-1, keepdims=True))
    # Fold exp(logit_scale) into the (normalized) image embedding once here so
    # the similarity stage is pure MXU + store; both similarity dots then see
    # the scaled operand, keeping lpi and lpt mutually consistent.
    i = i * scale_ref[0, 0]
    iemb_ref[...] = i.astype(iemb_ref.dtype)


# --------------------------------------------------------------------------
# Stage 2: similarity logits (scale already folded into iemb).
# Same body serves both the temb-resident path and the two-axis tiled path;
# only the BlockSpecs differ.
# --------------------------------------------------------------------------
def _similarity_kernel(iemb_ref,   # VMEM (bt, EMBED_DIM)        bf16 (scaled)
                       temb_ref,   # VMEM (b_pad|bt, EMBED_DIM)  bf16
                       lpi_ref,    # out VMEM (bt, b_pad|bt) f32: logits_per_image tile
                       lpt_ref):   # out VMEM (b_pad|bt, bt) f32: logits_per_text tile
    dn = (((1,), (1,)), ((), ()))  # contract embed dim of both operands (no transposes)
    lpi_ref[...] = jax.lax.dot_general(
        iemb_ref[...], temb_ref[...], dn, preferred_element_type=jnp.float32)
    # logits_per_text = logits_per_image.T.  Computed as a second (cheap) MXU
    # dot instead of an XLU transpose; the output BlockSpec places this tile
    # at the transposed grid position.
    lpt_ref[...] = jax.lax.dot_general(
        temb_ref[...], iemb_ref[...], dn, preferred_element_type=jnp.float32)


# --------------------------------------------------------------------------
# Wrapper
# --------------------------------------------------------------------------
def clip_head(text_features, image_features, w_text_t, b_text, w_image_t,
              b_image, logit_scale):
    """CLIP head: projections + L2 normalize + scaled similarity logits.

    text_features  : (B, TEXT_DIM)
    image_features : (B, IMAGE_DIM)
    w_text_t  : (TEXT_DIM, EMBED_DIM)   nn.Linear weight, pre-transposed at init (bf16)
    w_image_t : (IMAGE_DIM, EMBED_DIM)  nn.Linear weight, pre-transposed at init (bf16)
    b_text, b_image : (EMBED_DIM,)
    logit_scale : scalar f32 (raw parameter; exp() is hoisted to the wrapper)
    Returns (logits_per_image, logits_per_text), each (B, B) f32.
    """
    B = text_features.shape[0]
    # Batch tile: big (512) for large batches so each grid step amortizes the
    # per-step Pallas overhead; lane/sublane-aligned for small batches.
    bt = max(128, min(512, _round_up(B, 128)))
    b_pad = _round_up(B, bt)
    n_tiles = b_pad // bt

    f_dtype = jnp.bfloat16
    # No jnp.pad HBM pass over the features: the ragged last stage-1 block is
    # handled by Pallas; only the intermediates/outputs are allocated padded.
    txt = text_features.astype(f_dtype)
    img = image_features.astype(f_dtype)
    bt_bias = jnp.reshape(b_text.astype(jnp.float32), (1, EMBED_DIM))
    bi_bias = jnp.reshape(b_image.astype(jnp.float32), (1, EMBED_DIM))
    scale = jnp.reshape(jnp.exp(logit_scale.astype(jnp.float32)), (1, 1))

    # ---- Stage 1: projections + L2 normalize (batch-tiled, weights resident) ----
    temb, iemb = pl.pallas_call(
        _project_normalize_kernel,
        grid=(n_tiles,),
        in_specs=[
            pl.BlockSpec(memory_space=pltpu.MemorySpace.SMEM),
            pl.BlockSpec((bt, TEXT_DIM), lambda b: (b, 0)),
            pl.BlockSpec((bt, IMAGE_DIM), lambda b: (b, 0)),
            pl.BlockSpec((TEXT_DIM, EMBED_DIM), lambda b: (0, 0)),
            pl.BlockSpec((1, EMBED_DIM), lambda b: (0, 0)),
            pl.BlockSpec((IMAGE_DIM, EMBED_DIM), lambda b: (0, 0)),
            pl.BlockSpec((1, EMBED_DIM), lambda b: (0, 0)),
        ],
        out_specs=(
            pl.BlockSpec((bt, EMBED_DIM), lambda b: (b, 0)),
            pl.BlockSpec((bt, EMBED_DIM), lambda b: (b, 0)),
        ),
        out_shape=(
            jax.ShapeDtypeStruct((b_pad, EMBED_DIM), jnp.bfloat16),
            jax.ShapeDtypeStruct((b_pad, EMBED_DIM), jnp.bfloat16),
        ),
        compiler_params=pltpu.CompilerParams(
            dimension_semantics=("parallel",)),
    )(scale, txt, img, w_text_t.astype(f_dtype), bt_bias,
      w_image_t.astype(f_dtype), bi_bias)

    # ---- Stage 2: similarity logits ----
    # Default: keep the whole text-embedding matrix VMEM-resident (constant
    # index_map) and grid only over image-row tiles -> temb is read from HBM
    # exactly once.  Double-buffered working set at the b_pad<=2048 cap:
    #   2*temb + 2*iemb_tile + 2*(lpi+lpt tiles) <~ 13 MiB, safe on v5e/v6e
    #   (32 MiB scoped default) and v7x (64 MiB physical).
    if b_pad <= 2048:
        grid2 = (n_tiles,)
        in_specs2 = [
            pl.BlockSpec((bt, EMBED_DIM), lambda i: (i, 0)),
            pl.BlockSpec((b_pad, EMBED_DIM), lambda i: (0, 0)),   # resident
        ]
        out_specs2 = (
            pl.BlockSpec((bt, b_pad), lambda i: (i, 0)),
            pl.BlockSpec((b_pad, bt), lambda i: (0, i)),
        )
        dims2 = ("parallel",)
    else:
        # Large-batch fallback: (bt, bt)-tiled two-axis grid (bt = 512).
        grid2 = (n_tiles, n_tiles)
        in_specs2 = [
            pl.BlockSpec((bt, EMBED_DIM), lambda i, j: (i, 0)),
            pl.BlockSpec((bt, EMBED_DIM), lambda i, j: (j, 0)),
        ]
        out_specs2 = (
            pl.BlockSpec((bt, bt), lambda i, j: (i, j)),
            pl.BlockSpec((bt, bt), lambda i, j: (j, i)),
        )
        dims2 = ("parallel", "parallel")

    lpi, lpt = pl.pallas_call(
        _similarity_kernel,
        grid=grid2,
        in_specs=in_specs2,
        out_specs=out_specs2,
        out_shape=(
            jax.ShapeDtypeStruct((b_pad, b_pad), jnp.float32),
            jax.ShapeDtypeStruct((b_pad, b_pad), jnp.float32),
        ),
        compiler_params=pltpu.CompilerParams(
            dimension_semantics=dims2),
    )(iemb, temb)

    return lpi[:B, :B], lpt[:B, :B]


# ---------------- deterministic stand-in encoders (plain-JAX glue) ----------
# TODO(synk): stand-ins for pretrained ResNet-50 / BERT encoders.

def image_encoder_stub(image, w_enc):
    # image: (B, C, H, W) NCHW -> global average pool -> linear to IMAGE_DIM
    pooled = jnp.mean(image, axis=(2, 3))            # (B, C)
    return pooled @ w_enc                            # (B, IMAGE_DIM)


def text_encoder_stub(token_ids, embed_table, w_enc):
    # token_ids: (B, S) int32 -> embedding mean-pool -> linear to TEXT_DIM
    emb = jnp.take(embed_table, token_ids, axis=0)   # (B, S, E)
    pooled = jnp.mean(emb, axis=1)                   # (B, E)
    return pooled @ w_enc                            # (B, TEXT_DIM)


def reference_head(text_features, image_features, w_text, b_text, w_image,
                   b_image, logit_scale):
    t = text_features @ w_text.T + b_text
    i = image_features @ w_image.T + b_image
    t = t / jnp.linalg.norm(t, axis=-1, keepdims=True)
    i = i / jnp.linalg.norm(i, axis=-1, keepdims=True)
    lpi = jnp.exp(logit_scale) * (i @ t.T)
    return lpi, lpi.T


if __name__ == "__main__":
    key = jax.random.PRNGKey(0)
    keys = jax.random.split(key, 10)

    B, C, H, W = 2, 3, 16, 16
    SEQ, VOCAB, TOK_E = 8, 1000, 32

    # Inputs (PyTorch-style: NCHW image, integer token ids for text).
    image = jax.random.normal(keys[0], (B, C, H, W), jnp.float32)
    token_ids = jax.random.randint(keys[1], (B, SEQ), 0, VOCAB, jnp.int32)

    # Stand-in encoder parameters (deterministic).
    w_img_enc = jax.random.normal(keys[2], (C, IMAGE_DIM), jnp.float32) * 0.05
    tok_table = jax.random.normal(keys[3], (VOCAB, TOK_E), jnp.float32) * 0.05
    w_txt_enc = jax.random.normal(keys[4], (TOK_E, TEXT_DIM), jnp.float32) * 0.05

    # CLIPModel parameters (nn.Linear weight convention: (out, in)).
    w_text = jax.random.normal(keys[5], (EMBED_DIM, TEXT_DIM), jnp.float32) * 0.02
    b_text = jax.random.normal(keys[6], (EMBED_DIM,), jnp.float32) * 0.02
    w_image = jax.random.normal(keys[7], (EMBED_DIM, IMAGE_DIM), jnp.float32) * 0.02
    b_image = jax.random.normal(keys[8], (EMBED_DIM,), jnp.float32) * 0.02
    logit_scale = jnp.log(jnp.array(1.0 / 0.07, jnp.float32))   # = log(1/0.07)

    # Parameter-storage choices made once at "init" time (not per call):
    # pre-transposed to (in, out) layout and cast to bf16 for the MXU.
    w_text_t = jnp.transpose(w_text).astype(jnp.bfloat16)     # (TEXT_DIM, EMBED_DIM)
    w_image_t = jnp.transpose(w_image).astype(jnp.bfloat16)   # (IMAGE_DIM, EMBED_DIM)

    # Encoder stubs (glue).
    image_features = image_encoder_stub(image, w_img_enc)                 # (B, 2048)
    text_features = text_encoder_stub(token_ids, tok_table, w_txt_enc)    # (B, 768)

    # Pallas kernels: projections + normalize + scaled similarity.
    logits_per_image, logits_per_text = clip_head(
        text_features, image_features, w_text_t, b_text, w_image_t, b_image,
        logit_scale)
    jax.block_until_ready((logits_per_image, logits_per_text))

    # Correctness check against a pure-f32 JAX reference.  Tolerances reflect
    # bf16 MXU operands (f32 accumulation) in the kernel path.
    ref_lpi, ref_lpt = reference_head(text_features, image_features, w_text,
                                      b_text, w_image, b_image, logit_scale)
    assert jnp.allclose(logits_per_image, ref_lpi, atol=3e-2, rtol=3e-2)
    assert jnp.allclose(logits_per_text, ref_lpt, atol=3e-2, rtol=3e-2)
    # lpt is a second MXU dot (not a bit-exact transpose of lpi): fp32-rounding
    # level agreement only.
    assert jnp.allclose(logits_per_image, logits_per_text.T, atol=1e-3, rtol=1e-3)

    print("KERNEL_OK")
</pallas_src>

<mosaic_0001>
module attributes {stable_mosaic.version = 11 : i64} {
  func.func @_project_normalize_kernel(%arg0: i32, %arg1: memref<1x1xf32, #tpu.memory_space<smem>>, %arg2: memref<128x768xbf16, #tpu.memory_space<vmem>>, %arg3: memref<128x2048xbf16, #tpu.memory_space<vmem>>, %arg4: memref<768x512xbf16, #tpu.memory_space<vmem>>, %arg5: memref<1x512xf32, #tpu.memory_space<vmem>>, %arg6: memref<2048x512xbf16, #tpu.memory_space<vmem>>, %arg7: memref<1x512xf32, #tpu.memory_space<vmem>>, %arg8: memref<128x512xbf16, #tpu.memory_space<vmem>>, %arg9: memref<128x512xbf16, #tpu.memory_space<vmem>>) attributes {dimension_semantics = [#tpu.dimension_semantics<parallel>], iteration_bounds = array<i64: 1>, scalar_prefetch = 0 : i64, scratch_operands = 0 : i64, tpu.core_type = #tpu.core_type<tc>, window_params = [{transform_indices = @transform_0, window_bounds = array<i64: 1, 1>}, {transform_indices = @transform_1, window_bounds = array<i64: 128, 768>}, {transform_indices = @transform_2, window_bounds = array<i64: 128, 2048>}, {pipeline_mode = #tpu.pipeline_mode<synchronous>, transform_indices = @transform_3, window_bounds = array<i64: 768, 512>}, {pipeline_mode = #tpu.pipeline_mode<synchronous>, transform_indices = @transform_4, window_bounds = array<i64: 1, 512>}, {pipeline_mode = #tpu.pipeline_mode<synchronous>, transform_indices = @transform_5, window_bounds = array<i64: 2048, 512>}, {pipeline_mode = #tpu.pipeline_mode<synchronous>, transform_indices = @transform_6, window_bounds = array<i64: 1, 512>}, {transform_indices = @transform_7, window_bounds = array<i64: 128, 512>}, {transform_indices = @transform_8, window_bounds = array<i64: 128, 512>}]} {
    %c0 = arith.constant 0 : index
    %c0_0 = arith.constant 0 : index
    %0 = vector.load %arg2[%c0, %c0_0] : memref<128x768xbf16, #tpu.memory_space<vmem>>, vector<128x768xbf16>
    %c0_1 = arith.constant 0 : index
    %c0_2 = arith.constant 0 : index
    %1 = vector.load %arg4[%c0_1, %c0_2] : memref<768x512xbf16, #tpu.memory_space<vmem>>, vector<768x512xbf16>
    %cst = arith.constant dense<0.000000e+00> : vector<128x512xf32>
    %2 = tpu.matmul %0, %1, %cst {dimension_numbers = #tpu.dot_dimension_numbers<[1], [0], [0], [1], [0, 0, 1, 1], [], []>} : vector<128x768xbf16>, vector<768x512xbf16>, vector<128x512xf32> -> vector<128x512xf32>
    %c0_3 = arith.constant 0 : index
    %c0_4 = arith.constant 0 : index
    %3 = vector.load %arg5[%c0_3, %c0_4] : memref<1x512xf32, #tpu.memory_space<vmem>>, vector<1x512xf32>
    %4 = vector.broadcast %3 : vector<1x512xf32> to vector<128x512xf32>
    %5 = arith.addf %2, %4 : vector<128x512xf32>
    %6 = arith.mulf %5, %5 : vector<128x512xf32>
    %cst_5 = arith.constant dense<0.000000e+00> : vector<128xf32>
    %7 = vector.multi_reduction <add>, %6, %cst_5 [1] : vector<128x512xf32> to vector<128xf32>
    %8 = vector.shape_cast %7 : vector<128xf32> to vector<128x1xf32>
    %9 = math.rsqrt %8 : vector<128x1xf32>
    %10 = vector.broadcast %9 : vector<128x1xf32> to vector<128x512xf32>
    %11 = arith.mulf %5, %10 : vector<128x512xf32>
    %12 = arith.truncf %11 : vector<128x512xf32> to vector<128x512xbf16>
    %c0_6 = arith.constant 0 : index
    %c0_7 = arith.constant 0 : index
    %13 = vector.load %arg8[%c0_6, %c0_7] : memref<128x512xbf16, #tpu.memory_space<vmem>>, vector<128x512xbf16>
    tpu.vector_store %arg8[%c0_6, %c0_7], %12 {strides = array<i32>} : memref<128x512xbf16, #tpu.memory_space<vmem>>, vector<128x512xbf16>,
    %c0_8 = arith.constant 0 : index
    %c0_9 = arith.constant 0 : index
    %14 = vector.load %arg3[%c0_8, %c0_9] : memref<128x2048xbf16, #tpu.memory_space<vmem>>, vector<128x2048xbf16>
    %c0_10 = arith.constant 0 : index
    %c0_11 = arith.constant 0 : index
    %15 = vector.load %arg6[%c0_10, %c0_11] : memref<2048x512xbf16, #tpu.memory_space<vmem>>, vector<2048x512xbf16>
    %cst_12 = arith.constant dense<0.000000e+00> : vector<128x512xf32>
    %16 = tpu.matmul %14, %15, %cst_12 {dimension_numbers = #tpu.dot_dimension_numbers<[1], [0], [0], [1], [0, 0, 1, 1], [], []>} : vector<128x2048xbf16>, vector<2048x512xbf16>, vector<128x512xf32> -> vector<128x512xf32>
    %c0_13 = arith.constant 0 : index
    %c0_14 = arith.constant 0 : index
    %17 = vector.load %arg7[%c0_13, %c0_14] : memref<1x512xf32, #tpu.memory_space<vmem>>, vector<1x512xf32>
    %18 = vector.broadcast %17 : vector<1x512xf32> to vector<128x512xf32>
    %19 = arith.addf %16, %18 : vector<128x512xf32>
    %20 = arith.mulf %19, %19 : vector<128x512xf32>
    %cst_15 = arith.constant dense<0.000000e+00> : vector<128xf32>
    %21 = vector.multi_reduction <add>, %20, %cst_15 [1] : vector<128x512xf32> to vector<128xf32>
    %22 = vector.shape_cast %21 : vector<128xf32> to vector<128x1xf32>
    %23 = math.rsqrt %22 : vector<128x1xf32>
    %24 = vector.broadcast %23 : vector<128x1xf32> to vector<128x512xf32>
    %25 = arith.mulf %19, %24 : vector<128x512xf32>
    %c0_16 = arith.constant 0 : index
    %c0_17 = arith.constant 0 : index
    %26 = memref.load %arg1[%c0_16, %c0_17] : memref<1x1xf32, #tpu.memory_space<smem>>
    %27 = vector.broadcast %26 : f32 to vector<128x512xf32>
    %28 = arith.mulf %25, %27 : vector<128x512xf32>
    %29 = arith.truncf %28 : vector<128x512xf32> to vector<128x512xbf16>
    %c0_18 = arith.constant 0 : index
    %c0_19 = arith.constant 0 : index
    %30 = vector.load %arg9[%c0_18, %c0_19] : memref<128x512xbf16, #tpu.memory_space<vmem>>, vector<128x512xbf16>
    tpu.vector_store %arg9[%c0_18, %c0_19], %29 {strides = array<i32>} : memref<128x512xbf16, #tpu.memory_space<vmem>>, vector<128x512xbf16>,
    return
  }
  func.func @transform_0(%arg0: i32) -> (i32, i32) {
    %c0_i32 = arith.constant 0 : i32
    %c0_i32_0 = arith.constant 0 : i32
    %c0_i32_1 = arith.constant 0 : i32
    return %c0_i32, %c0_i32_0 : i32, i32
  }
  func.func @transform_1(%arg0: i32) -> (i32, i32) {
    %c0_i32 = arith.constant 0 : i32
    %c0_i32_0 = arith.constant 0 : i32
    return %arg0, %c0_i32 : i32, i32
  }
  func.func @transform_2(%arg0: i32) -> (i32, i32) {
    %c0_i32 = arith.constant 0 : i32
    %c0_i32_0 = arith.constant 0 : i32
    return %arg0, %c0_i32 : i32, i32
  }
  func.func @transform_3(%arg0: i32) -> (i32, i32) {
    %c0_i32 = arith.constant 0 : i32
    %c0_i32_0 = arith.constant 0 : i32
    %c0_i32_1 = arith.constant 0 : i32
    return %c0_i32, %c0_i32_0 : i32, i32
  }
  func.func @transform_4(%arg0: i32) -> (i32, i32) {
    %c0_i32 = arith.constant 0 : i32
    %c0_i32_0 = arith.constant 0 : i32
    %c0_i32_1 = arith.constant 0 : i32
    return %c0_i32, %c0_i32_0 : i32, i32
  }
  func.func @transform_5(%arg0: i32) -> (i32, i32) {
    %c0_i32 = arith.constant 0 : i32
    %c0_i32_0 = arith.constant 0 : i32
    %c0_i32_1 = arith.constant 0 : i32
    return %c0_i32, %c0_i32_0 : i32, i32
  }
  func.func @transform_6(%arg0: i32) -> (i32, i32) {
    %c0_i32 = arith.constant 0 : i32
    %c0_i32_0 = arith.constant 0 : i32
    %c0_i32_1 = arith.constant 0 : i32
    return %c0_i32, %c0_i32_0 : i32, i32
  }
  func.func @transform_7(%arg0: i32) -> (i32, i32) {
    %c0_i32 = arith.constant 0 : i32
    %c0_i32_0 = arith.constant 0 : i32
    return %arg0, %c0_i32 : i32, i32
  }
  func.func @transform_8(%arg0: i32) -> (i32, i32) {
    %c0_i32 = arith.constant 0 : i32
    %c0_i32_0 = arith.constant 0 : i32
    return %arg0, %c0_i32 : i32, i32
  }
}

</mosaic_0001>

<bundles_post_ra>
// kernel: tpu_custom_call.1
= control target key start
LH: loop header
LB: loop body
LE: loop exit
PB: predicated region body
PF: predicated region fallthrough
CT: control target
= control target key end

     0   :  { %15 = vsyncpa [#allocation4], 0  ;;  %s17288_s0 = inlined_call_operand.<no memory space> [shape: f32[1,1], index: 0, kind: input, shape index: {}]   ;;  %s17289_s1 = inlined_call_operand.hbm [shape: bf16[2,768], index: 1, kind: input, shape index: {}]   ;;  %s17290_s2 = inlined_call_operand.hbm [shape: bf16[2,2048], index: 2, kind: input, shape index: {}]   ;;  %s17291_s3 = inlined_call_operand.hbm [shape: bf16[768,512], index: 3, kind: input, shape index: {}]   ;;  %s17292_s4 = inlined_call_operand.hbm [shape: f32[1,512], index: 4, kind: input, shape index: {}]   ;;  %s17293_s5 = inlined_call_operand.hbm [shape: bf16[2048,512], index: 5, kind: input, shape index: {}]   ;;  %s17294_s6 = inlined_call_operand.hbm [shape: f32[1,512], index: 6, kind: input, shape index: {}]   ;;  %s17295_s7 = inlined_call_operand.hbm [shape: bf16[128,512], index: 7, kind: output, shape index: {0}]   ;;  %s17296_s8 = inlined_call_operand.hbm [shape: bf16[128,512], index: 8, kind: output, shape index: {1}]  }
   0x1   :  { %16 = vsyncpa [#allocation7], 0 }
   0x2   :  { %17 = vsyncpa [#allocation10], 0 }
   0x3   :  { %18 = vsyncpa [#allocation13], 0 }
   0x4   :  { %19 = vsyncpa [#allocation5], 0 }
   0x5   :  { %20 = vsyncpa [#allocation16], 0 }
   0x6   :  { %27 = vsyncadd [#allocation4], 6048  ;;  %s14814_s27 = smov [#allocation3]   ;;  %s14626_s9 = scalar_lea.hbm %s17289_s1, 96 }
   0x7   :  { %s28_s28 = sshll.u32 %s14814_s27, 4  ;;  %p14627_p0 = scmp.ne.s32.totalorder %s17289_s1, %s14626_s9  ;;  %s29_s28 = int_to_ptr.vmem [resolvable:$true] %s28_s28 }
   0x8   :  { %p14630_p1 = scmp.lt.u32.totalorder %s14626_s9, %s17289_s1 }
   0xa   :  { %p14632_p2 = pnand %p14630_p1, %p14627_p0 }
   0xc   :  { %14635 = shalt.err (!%p14632_p2)
}
   0xd   :  { %s14636_s14 = scalar_lea.vmem %s29_s28, 96  ;;  %s14640_s15 = scalar_lea.vmem %s29_s28, 6144 }
   0xe   :  { %p14637_p3 = scmp.ne.s32.totalorder %s29_s28, %s14636_s14  ;;  %p14641_p4 = scmp.lt.s32.totalorder %s29_s28, %s29_s28 }
   0xf   :  { %p14642_p5 = scmp.lt.s32.totalorder %s14640_s15, %s14636_s14 }
  0x11   :  { %p14643_p6 = por %p14642_p5, %p14641_p4 }
  0x13   :  { %p14644_p7 = pnand %p14643_p6, %p14637_p3 }
  0x15   :  { %14647 = shalt.err (!%p14644_p7)
}
  0x16   :  { %s14815_s16 = smov 96   ;;  %s14816_s17 = smov 6  }
  0x17   :  { %34 = dma.hbm_to_vmem [thread:$0]  %s17289_s1, 96, %s29_s28, [#allocation4], %s14815_s16, %s14815_s16, %s14816_s17  }
  0x18   :  { %39 = vsyncadd [#allocation7], 16128  ;;  %s14817_s20 = smov [#allocation6]   ;;  %s14648_s24 = scalar_lea.hbm %s17290_s2, 256 }
  0x19   :  { %s40_s21 = sshll.u32 %s14817_s20, 4  ;;  %p14649_p8 = scmp.ne.s32.totalorder %s17290_s2, %s14648_s24  ;;  %s41_s21 = int_to_ptr.vmem [resolvable:$true] %s40_s21 }
  0x1a   :  { %p14652_p9 = scmp.lt.u32.totalorder %s14648_s24, %s17290_s2 }
  0x1c   :  { %p14654_p10 = pnand %p14652_p9, %p14649_p8 }
  0x1e   :  { %14657 = shalt.err (!%p14654_p10)
}
  0x1f   :  { %s14658_s30 = scalar_lea.vmem %s41_s21, 256  ;;  %s14662_s1 = scalar_lea.vmem %s41_s21, 16384 }
  0x20   :  { %p14659_p11 = scmp.ne.s32.totalorder %s41_s21, %s14658_s30  ;;  %p14663_p12 = scmp.lt.s32.totalorder %s41_s21, %s41_s21 }
  0x21   :  { %p14664_p13 = scmp.lt.s32.totalorder %s14662_s1, %s14658_s30 }
  0x23   :  { %p14665_p0 = por %p14664_p13, %p14663_p12 }
  0x25   :  { %p14666_p1 = pnand %p14665_p0, %p14659_p11 }
  0x27   :  { %14669 = shalt.err (!%p14666_p1)
}
  0x28   :  { %s14818_s28 = smov 256   ;;  %s14819_s9 = smov 16  }
  0x29   :  { %46 = dma.hbm_to_vmem [thread:$0]  %s17290_s2, 256, %s41_s21, [#allocation7], %s14818_s28, %s14818_s28, %s14819_s9  }
  0x2a   :  { %s14820_s12 = smov [#allocation9]   ;;  %s14821_s14 = smov [#allocation8]  }
  0x2b   :  { %s65_s13 = sshll.u32 %s14820_s12, 4  ;;  %s52_s15 = sshll.u32 %s14821_s14, 4  ;;  %s66_s13 = int_to_ptr.vmem [resolvable:$true] %s65_s13  ;;  %s53_s15 = int_to_ptr.vmem [resolvable:$true] %s52_s15 }
  0x2c   :  { %s14670_s18 = scalar_lea.hbm %s17292_s4, 64 }
  0x2d   :  { %p14671_p2 = scmp.ne.s32.totalorder %s17292_s4, %s14670_s18  ;;  %p14674_p3 = scmp.lt.u32.totalorder %s14670_s18, %s17292_s4 }
  0x2f   :  { %p14676_p4 = pnand %p14674_p3, %p14671_p2 }
  0x31   :  { %14679 = shalt.err (!%p14676_p4)
}
  0x32   :  { %s14680_s2 = scalar_lea.vmem %s66_s13, 64  ;;  %p14685_p6 = scmp.lt.s32.totalorder %s66_s13, %s66_s13 }
  0x33   :  { %p14681_p5 = scmp.ne.s32.totalorder %s66_s13, %s14680_s2  ;;  %p14686_p7 = scmp.lt.s32.totalorder %s14680_s2, %s14680_s2 }
  0x35   :  { %p14687_p8 = por %p14686_p7, %p14685_p6 }
  0x37   :  { %p14688_p9 = pnand %p14687_p8, %p14681_p5 }
  0x39   :  { %14691 = shalt.err (!%p14688_p9)
}
  0x3a   :  { %68 = dma.hbm_to_vmem [thread:$0]  %s17292_s4, 64, %s66_s13, [#allocation10]  }
  0x3b   :  { %s14692_s27 = scalar_lea.hbm %s17291_s3, 24576 }
  0x3c   :  { %p14693_p10 = scmp.ne.s32.totalorder %s17291_s3, %s14692_s27  ;;  %p14696_p11 = scmp.lt.u32.totalorder %s14692_s27, %s17291_s3 }
  0x3e   :  { %p14698_p12 = pnand %p14696_p11, %p14693_p10 }
  0x40   :  { %14701 = shalt.err (!%p14698_p12)
}
  0x41   :  { %s14702_s11 = scalar_lea.vmem %s53_s15, 24576  ;;  %p14707_p0 = scmp.lt.s32.totalorder %s53_s15, %s53_s15 }
  0x42   :  { %p14703_p13 = scmp.ne.s32.totalorder %s53_s15, %s14702_s11  ;;  %p14708_p1 = scmp.lt.s32.totalorder %s14702_s11, %s14702_s11 }
  0x44   :  { %p14709_p2 = por %p14708_p1, %p14707_p0 }
  0x46   :  { %p14710_p3 = pnand %p14709_p2, %p14703_p13 }
  0x48   :  { %14713 = shalt.err (!%p14710_p3)
}
  0x49   :  { %58 = dma.hbm_to_vmem [thread:$0]  %s17291_s3, 24576, %s53_s15, [#allocation7], %s14818_s28, %s14818_s28, %s14819_s9  }
  0x4a   :  { %s14822_s13 = smov [#allocation11]   ;;  %s14823_s16 = smov [#allocation12]  }
  0x4b   :  { %s74_s14 = sshll.u32 %s14822_s13, 4  ;;  %s87_s17 = sshll.u32 %s14823_s16, 4  ;;  %s75_s14 = int_to_ptr.vmem [resolvable:$true] %s74_s14  ;;  %s88_s17 = int_to_ptr.vmem [resolvable:$true] %s87_s17 }
  0x4c   :  { %s14714_s20 = scalar_lea.hbm %s17293_s5, 65536 }
  0x4d   :  { %p14715_p4 = scmp.ne.s32.totalorder %s17293_s5, %s14714_s20  ;;  %p14718_p5 = scmp.lt.u32.totalorder %s14714_s20, %s17293_s5 }
  0x4f   :  { %p14720_p6 = pnand %p14718_p5, %p14715_p4 }
  0x51   :  { %14723 = shalt.err (!%p14720_p6)
}
  0x52   :  { %s14724_s3 = scalar_lea.vmem %s75_s14, 65536  ;;  %p14729_p8 = scmp.lt.s32.totalorder %s75_s14, %s75_s14 }
  0x53   :  { %p14725_p7 = scmp.ne.s32.totalorder %s75_s14, %s14724_s3  ;;  %p14730_p9 = scmp.lt.s32.totalorder %s14724_s3, %s14724_s3 }
  0x55   :  { %p14731_p10 = por %p14730_p9, %p14729_p8 }
  0x57   :  { %p14732_p11 = pnand %p14731_p10, %p14725_p7 }
  0x59   :  { %14735 = shalt.err (!%p14732_p11)
}
  0x5a   :  { %80 = dma.hbm_to_vmem [thread:$0]  %s17293_s5, 65536, %s75_s14, [#allocation10], %s14818_s28, %s14818_s28, %s14819_s9  }
  0x5b   :  { %s14736_s27 = scalar_lea.hbm %s17294_s6, 64 }
  0x5c   :  { %p14737_p12 = scmp.ne.s32.totalorder %s17294_s6, %s14736_s27  ;;  %p14740_p13 = scmp.lt.u32.totalorder %s14736_s27, %s17294_s6 }
  0x5e   :  { %p14742_p0 = pnand %p14740_p13, %p14737_p12 }
  0x60   :  { %14745 = shalt.err (!%p14742_p0)
}
  0x61   :  { %s14746_s11 = scalar_lea.vmem %s88_s17, 64  ;;  %p14751_p2 = scmp.lt.s32.totalorder %s88_s17, %s88_s17 }
  0x62   :  { %p14747_p1 = scmp.ne.s32.totalorder %s88_s17, %s14746_s11  ;;  %p14752_p3 = scmp.lt.s32.totalorder %s14746_s11, %s14746_s11 }
  0x64   :  { %p14753_p4 = por %p14752_p3, %p14751_p2 }
  0x66   :  { %p14754_p5 = pnand %p14753_p4, %p14747_p1 }
  0x68   :  { %14757 = shalt.err (!%p14754_p5)
}
  0x69   :  { %90 = dma.hbm_to_vmem [thread:$0]  %s17294_s6, 64, %s88_s17, [#allocation13]  }
  0x6a   :  { %14802 = dma.done.wait [#allocation4], 6144  }
  0x6b   :  { %14803 = vsyncadd [#allocation4], 4294961152 }
  0x6c   :  { %14804 = dma.done.wait [#allocation7], 40960  }
  0x6d   :  { %14805 = vsyncadd [#allocation7], 4294926336 }
  0x6e   :  { %14806 = dma.done.wait [#allocation10], 65600  }
  0x6f   :  { %14807 = vsyncadd [#allocation10], 4294901696 }
  0x70   :  { %14808 = dma.done.wait [#allocation13], 64  }
  0x71   :  { %14809 = vsyncadd [#allocation13], 4294967232  ;;  %v13218_v0 = vld [vmem:[#allocation8 + $0x4] ss:$16 sps:$4 sm:$0xff]   ;;  %v13220_v1 = vld [vmem:[#allocation8 + $0xc] ss:$16 sps:$4 sm:$0xff]   ;;  %v367_v39 = vlaneseq }
  0x72   :  { %2531 = vmatprep.subr.bf16.mxu0 %v13218_v0  ;;  %v13222_v2 = vld [vmem:[#allocation8] ss:$16 sps:$4 sm:$0xff]   ;;  %v13223_v3 = vld [vmem:[#allocation8 + $0x8] ss:$16 sps:$4 sm:$0xff]   ;;  %2870 = vmatprep.subr.bf16.mxu1 %v13220_v1  ;;  %v13224_v4 = vld [vmem:[#allocation8 + $0x24] ss:$16 sps:$4 sm:$0xff]  }
  0x73   :  { %2532 = vmatpush1.bf16.msra.mxu0 %v13222_v2  ;;  %2871 = vmatpush1.bf16.msra.mxu1 %v13223_v3  ;;  %v13226_v5 = vld [vmem:[#allocation8 + $0x2c] ss:$16 sps:$4 sm:$0xff]   ;;  %v13228_v6 = vld [vmem:[#allocation8 + $0x20] ss:$16 sps:$4 sm:$0xff]   ;;  %v13229_v7 = vld [vmem:[#allocation8 + $0x28] ss:$16 sps:$4 sm:$0xff]  }
  0x74   :  { %2533 = vmatprep.subr.bf16.mxu0 %v13224_v4  ;;  %2872 = vmatprep.subr.bf16.mxu1 %v13226_v5  ;;  %v13230_v8 = vld [vmem:[#allocation8 + $0x44] ss:$16 sps:$4 sm:$0xff]   ;;  %v13232_v9 = vld [vmem:[#allocation8 + $0x4c] ss:$16 sps:$4 sm:$0xff]   ;;  %v13234_v10 = vld [vmem:[#allocation8 + $0x40] ss:$16 sps:$4 sm:$0xff]  }
  0x75   :  { %v13235_v11 = vld [vmem:[#allocation8 + $0x48] ss:$16 sps:$4 sm:$0xff]   ;;  %v13236_v12 = vld [vmem:[#allocation8 + $0x64] ss:$16 sps:$4 sm:$0xff]   ;;  %v13238_v13 = vld [vmem:[#allocation8 + $0x6c] ss:$16 sps:$4 sm:$0xff]  }
  0x76   :  { %v13240_v14 = vld [vmem:[#allocation8 + $0x60] ss:$16 sps:$4 sm:$0xff]   ;;  %v13241_v15 = vld [vmem:[#allocation8 + $0x68] ss:$16 sps:$4 sm:$0xff]   ;;  %v13242_v16 = vld [vmem:[#allocation8 + $0x84] ss:$16 sps:$4 sm:$0xff]  }
  0x77   :  { %2534 = vmatpush1.bf16.msra.mxu0 %v13228_v6  ;;  %2873 = vmatpush1.bf16.msra.mxu1 %v13229_v7  ;;  %v13244_v17 = vld [vmem:[#allocation8 + $0x8c] ss:$16 sps:$4 sm:$0xff]   ;;  %v13246_v18 = vld [vmem:[#allocation8 + $0x80] ss:$16 sps:$4 sm:$0xff]   ;;  %v13247_v19 = vld [vmem:[#allocation8 + $0x88] ss:$16 sps:$4 sm:$0xff]  }
  0x78   :  { %2535 = vmatprep.subr.bf16.mxu0 %v13230_v8  ;;  %2874 = vmatprep.subr.bf16.mxu1 %v13232_v9  ;;  %v13248_v20 = vld [vmem:[#allocation8 + $0xa4] ss:$16 sps:$4 sm:$0xff]   ;;  %v13250_v21 = vld [vmem:[#allocation8 + $0xac] ss:$16 sps:$4 sm:$0xff]   ;;  %v13252_v22 = vld [vmem:[#allocation8 + $0xa0] ss:$16 sps:$4 sm:$0xff]  }
  0x79   :  { %v13253_v23 = vld [vmem:[#allocation8 + $0xa8] ss:$16 sps:$4 sm:$0xff]   ;;  %v13254_v24 = vld [vmem:[#allocation8 + $0xc4] ss:$16 sps:$4 sm:$0xff]   ;;  %v13256_v25 = vld [vmem:[#allocation8 + $0xcc] ss:$16 sps:$4 sm:$0xff]  }
  0x7a   :  { %v13258_v26 = vld [vmem:[#allocation8 + $0xc0] ss:$16 sps:$4 sm:$0xff]   ;;  %v13259_v27 = vld [vmem:[#allocation8 + $0xc8] ss:$16 sps:$4 sm:$0xff]   ;;  %v13260_v28 = vld [vmem:[#allocation8 + $0xe4] ss:$16 sps:$4 sm:$0xff]  }
  0x7b   :  { %2536 = vmatpush1.bf16.msra.mxu0 %v13234_v10  ;;  %2875 = vmatpush1.bf16.msra.mxu1 %v13235_v11  ;;  %v13262_v29 = vld [vmem:[#allocation8 + $0xec] ss:$16 sps:$4 sm:$0xff]   ;;  %v13264_v30 = vld [vmem:[#allocation8 + $0xe0] ss:$16 sps:$4 sm:$0xff]   ;;  %v13265_v31 = vld [vmem:[#allocation8 + $0xe8] ss:$16 sps:$4 sm:$0xff]  }
  0x7c   :  { %2537 = vmatprep.subr.bf16.mxu0 %v13236_v12  ;;  %2876 = vmatprep.subr.bf16.mxu1 %v13238_v13  ;;  %v13266_v32 = vld [vmem:[#allocation8 + $0x104] ss:$16 sps:$4 sm:$0xff]   ;;  %v13268_v33 = vld [vmem:[#allocation8 + $0x10c] ss:$16 sps:$4 sm:$0xff]   ;;  %v13270_v34 = vld [vmem:[#allocation8 + $0x100] ss:$16 sps:$4 sm:$0xff]  }
  0x7d   :  { %v13271_v35 = vld [vmem:[#allocation8 + $0x108] ss:$16 sps:$4 sm:$0xff]   ;;  %v13272_v36 = vld [vmem:[#allocation8 + $0x124] ss:$16 sps:$4 sm:$0xff]   ;;  %v13274_v37 = vld [vmem:[#allocation8 + $0x12c] ss:$16 sps:$4 sm:$0xff]  }
  0x7e   :  { %v13276_v38 = vld [vmem:[#allocation8 + $0x120] ss:$16 sps:$4 sm:$0xff]   ;;  %v14824_v40 = vmov 1966171168   ;;  %v13277_v42 = vld [vmem:[#allocation8 + $0x128] ss:$16 sps:$4 sm:$0xff]  }
  0x7f   :  { %2538 = vmatpush1.bf16.msra.mxu0 %v13240_v14  ;;  %2877 = vmatpush1.bf16.msra.mxu1 %v13241_v15  ;;  %v460_v41 = vunpack.c.l.s4 %v14824_v40  ;;  %v13278_v43 = vld [vmem:[#allocation8 + $0x144] ss:$16 sps:$4 sm:$0xff]   ;;  %v13280_v44 = vld [vmem:[#allocation8 + $0x14c] ss:$16 sps:$4 sm:$0xff]   ;;  %v13282_v45 = vld [vmem:[#allocation8 + $0x140] ss:$16 sps:$4 sm:$0xff]  }
  0x80   :  { %2539 = vmatprep.subr.bf16.mxu0 %v13242_v16  ;;  %2878 = vmatprep.subr.bf16.mxu1 %v13244_v17  ;;  %v13283_v46 = vld [vmem:[#allocation8 + $0x148] ss:$16 sps:$4 sm:$0xff]   ;;  %v14953_v47 = vshrl.u32 %v367_v39, 7  ;;  %v13284_v49 = vld [vmem:[#allocation8 + $0x164] ss:$16 sps:$4 sm:$0xff]   ;;  %s14826_s14 = smov [#allocation14]  }
  0x81   :  { %v461_v48 = vunpack.c.0.s8 %v460_v41  ;;  %v13286_v50 = vld [vmem:[#allocation8 + $0x16c] ss:$16 sps:$4 sm:$0xff]   ;;  %v13288_v51 = vld [vmem:[#allocation8 + $0x160] ss:$16 sps:$4 sm:$0xff]   ;;  %v13289_v52 = vld [vmem:[#allocation8 + $0x168] ss:$16 sps:$4 sm:$0xff]  }
  0x82   :  { %17404 = vst [vmem:[#allocation23_spill] sm:$0xff] %v14953_v47  ;;  %v13290_v53 = vld [vmem:[#allocation8 + $0x184] ss:$16 sps:$4 sm:$0xff]   ;;  %v13292_v54 = vld [vmem:[#allocation8 + $0x18c] ss:$16 sps:$4 sm:$0xff]   ;;  %s11638_s16 = sshll.u32 %s14826_s14, 4  ;;  %s17251_s16 = int_to_ptr.vmem [resolvable:$true] %s11638_s16 }
  0x83   :  { %2540 = vmatpush1.bf16.msra.mxu0 %v13246_v18  ;;  %2879 = vmatpush1.bf16.msra.mxu1 %v13247_v19  ;;  %v14956_v55 = vsub.s32 %v461_v48, %v14953_v47  ;;  %v13314_v56 = vld [vmem:[#allocation3] ss:$6 sps:$4 sm:$0xff]   ;;  %v13317_v57 = vld [vmem:[#allocation3 + $0xc] ss:$6 sps:$4 sm:$0xff]  }
  0x84   :  { %2541 = vmatprep.subr.bf16.mxu0 %v13248_v20  ;;  %2880 = vmatprep.subr.bf16.mxu1 %v13250_v21  ;;  %v13294_v58 = vld [vmem:[#allocation8 + $0x180] ss:$16 sps:$4 sm:$0xff]   ;;  %v13295_v62 = vld [vmem:[#allocation8 + $0x188] ss:$16 sps:$4 sm:$0xff]   ;;  %v13296_v0 = vld [vmem:[#allocation8 + $0x1a4] ss:$16 sps:$4 sm:$0xff]  }
  0x85   :  { %v13320_v59 = vld [vmem:[#allocation3 + $0x18] ss:$6 sps:$4 sm:$0xff]   ;;  %v465_v60 = vrot.slane %v13314_v56, %v14956_v55  ;;  %v479_v61 = vrot.slane %v13317_v57, %v14956_v55  ;;  %v13323_v63 = vld [vmem:[#allocation3 + $0x24] ss:$6 sps:$4 sm:$0xff]  }
  0x86   :  { %v13298_v1 = vld [vmem:[#allocation8 + $0x1ac] ss:$16 sps:$4 sm:$0xff]   ;;  %v493_v2 = vrot.slane %v13320_v59, %v14956_v55  ;;  %v507_v4 = vrot.slane %v13323_v63, %v14956_v55  ;;  %v13300_v6 = vld [vmem:[#allocation8 + $0x1a0] ss:$16 sps:$4 sm:$0xff]   ;;  %v13301_v7 = vld [vmem:[#allocation8 + $0x1a8] ss:$16 sps:$4 sm:$0xff]  }
  0x87   :  { %2542 = vmatpush1.bf16.msra.mxu0 %v13252_v22  ;;  %2881 = vmatpush1.bf16.msra.mxu1 %v13253_v23  ;;  %v516_v3 = vcombine.high %v465_v60, %v479_v61  ;;  %v515_v5 = vcombine.low %v465_v60, %v479_v61  ;;  %v13302_v11 = vld [vmem:[#allocation8 + $0x1c4] ss:$16 sps:$4 sm:$0xff]   ;;  %v13304_v12 = vld [vmem:[#allocation8 + $0x1cc] ss:$16 sps:$4 sm:$0xff]   ;;  %v13306_v13 = vld [vmem:[#allocation8 + $0x1c0] ss:$16 sps:$4 sm:$0xff]  }
  0x88   :  { %2543 = vmatprep.subr.bf16.mxu0 %v13254_v24  ;;  %2882 = vmatprep.subr.bf16.mxu1 %v13256_v25  ;;  %v520_v8 = vcombine.high %v493_v2, %v507_v4  ;;  %v519_v10 = vcombine.low %v493_v2, %v507_v4  ;;  %v13307_v14 = vld [vmem:[#allocation8 + $0x1c8] ss:$16 sps:$4 sm:$0xff]   ;;  %v13308_v18 = vld [vmem:[#allocation8 + $0x1e4] ss:$16 sps:$4 sm:$0xff]   ;;  %v13310_v19 = vld [vmem:[#allocation8 + $0x1ec] ss:$16 sps:$4 sm:$0xff]  }
  0x89   :  { %v543_v9 = vrot.slane %v516_v3, %v14956_v55  ;;  %v529_v16 = vrot.slane %v515_v5, %v14956_v55  ;;  %v13338_v22 = vld [vmem:[#allocation3 + $0x30] ss:$6 sps:$4 sm:$0xff]   ;;  %v13340_v23 = vld [vmem:[#allocation3 + $0x3c] ss:$6 sps:$4 sm:$0xff]  }
  0x8a   :  { %v571_v15 = vrot.slane %v520_v8, %v14956_v55  ;;  %v557_v17 = vrot.slane %v519_v10, %v14956_v55  ;;  %v13342_v24 = vld [vmem:[#allocation3 + $0x48] ss:$6 sps:$4 sm:$0xff]   ;;  %v13344_v25 = vld [vmem:[#allocation3 + $0x54] ss:$6 sps:$4 sm:$0xff]  }
  0x8b   :  { %2544 = vmatpush1.bf16.msra.mxu0 %v13258_v26  ;;  %2883 = vmatpush1.bf16.msra.mxu1 %v13259_v27  ;;  %v599_v27 = vrot.slane %v13338_v22, %v14956_v55  ;;  %v13326_v39 = vld [vmem:[#allocation8 + $0x200] ss:$16 sps:$4 sm:$0xff]   ;;  %v13329_v40 = vld [vmem:[#allocation8 + $0x208] ss:$16 sps:$4 sm:$0xff]   ;;  %v13348_v63 = vld [vmem:[#allocation8 + $0x244] ss:$16 sps:$4 sm:$0xff]  }
  0x8c   :  { %2545 = vmatprep.subr.bf16.mxu0 %v13260_v28  ;;  %2884 = vmatprep.subr.bf16.mxu1 %v13262_v29  ;;  %v582_v20 = vcombine.low %v543_v9, %v571_v15  ;;  %v14966_v21 = vcombine.high %v529_v16, %v557_v17  ;;  %v14968_v26 = vcombine.high %v543_v9, %v571_v15  ;;  %v13312_v29 = vld [vmem:[#allocation8 + $0x1e0] ss:$16 sps:$4 sm:$0xff]   ;;  %v13335_v59 = vld [vmem:[#allocation8 + $0x228] ss:$16 sps:$4 sm:$0xff]   ;;  %v13357_v9 = vld [vmem:[#allocation8 + $0x26c] ss:$16 sps:$4 sm:$0xff]  }
  0x8d   :  { %v613_v28 = vrot.slane %v13340_v23, %v14956_v55  ;;  %v13332_v57 = vld [vmem:[#allocation8 + $0x220] ss:$16 sps:$4 sm:$0xff]   ;;  %v13349_v2 = vld [vmem:[#allocation8 + $0x248] ss:$16 sps:$4 sm:$0xff]  }
  0x8e   :  { %2563 = vmatprep.mubr.bf16.mxu0 %v582_v20  ;;  %2902 = vmatprep.mubr.bf16.mxu1 %v582_v20  ;;  %v13355_v15 = vld [vmem:[#allocation8 + $0x268] ss:$16 sps:$4 sm:$0xff]  }
  0x8f   :  { %2546 = vmatpush1.bf16.msra.mxu0 %v13264_v30  ;;  %2885 = vmatpush1.bf16.msra.mxu1 %v13265_v31  ;;  %v627_v30 = vrot.slane %v13342_v24, %v14956_v55  ;;  %v641_v31 = vrot.slane %v13344_v25, %v14956_v55  ;;  %v13382_v20 = vld [vmem:[#allocation3 + $0xa8] ss:$6 sps:$4 sm:$0xff]   ;;  %v13384_v23 = vld [vmem:[#allocation3 + $0xb4] ss:$6 sps:$4 sm:$0xff]  }
  0x90   :  { %2547 = vmatprep.subr.bf16.mxu0 %v13266_v32  ;;  %2886 = vmatprep.subr.bf16.mxu1 %v13268_v33  ;;  %v13313_v32 = vld [vmem:[#allocation8 + $0x1e8] ss:$16 sps:$4 sm:$0xff]   ;;  %v650_v33 = vcombine.high %v599_v27, %v613_v28  ;;  %v13368_v24 = vld [vmem:[#allocation8 + $0x284] ss:$16 sps:$4 sm:$0xff]   ;;  %v13371_v25 = vld [vmem:[#allocation8 + $0x28c] ss:$16 sps:$4 sm:$0xff]  }
  0x92   :  { %v677_v41 = vrot.slane %v650_v33, %v14956_v55 }
  0x93   :  { %2548 = vmatpush1.bf16.msra.mxu0 %v13270_v34  ;;  %2887 = vmatpush1.bf16.msra.mxu1 %v13271_v35  ;;  %v649_v34 = vcombine.low %v599_v27, %v613_v28  ;;  %v13328_v35 = vld [vmem:[#allocation8 + $0x204] ss:$16 sps:$4 sm:$0xff]  }
  0x94   :  { %2549 = vmatprep.subr.bf16.mxu0 %v13272_v36  ;;  %2888 = vmatprep.subr.bf16.mxu1 %v13274_v37  ;;  %v13331_v36 = vld [vmem:[#allocation8 + $0x20c] ss:$16 sps:$4 sm:$0xff]   ;;  %v654_v37 = vcombine.high %v627_v30, %v641_v31 }
  0x97   :  { %2550 = vmatpush1.bf16.msra.mxu0 %v13276_v38  ;;  %2889 = vmatpush1.bf16.msra.mxu1 %v13277_v42  ;;  %v653_v38 = vcombine.low %v627_v30, %v641_v31  ;;  %v579_v42 = vcombine.low %v529_v16, %v557_v17  ;;  %v909_v30 = vrot.slane %v13384_v23, %v14956_v55  ;;  %v13422_v23 = vld [vmem:[#allocation3 + $0x108] ss:$6 sps:$4 sm:$0xff]  }
  0x98   :  { %2551 = vmatprep.subr.bf16.mxu0 %v13278_v43  ;;  %2890 = vmatprep.subr.bf16.mxu1 %v13280_v44  ;;  %v13334_v43 = vld [vmem:[#allocation8 + $0x224] ss:$16 sps:$4 sm:$0xff]   ;;  %v13337_v44 = vld [vmem:[#allocation8 + $0x22c] ss:$16 sps:$4 sm:$0xff]  }
  0x99   :  { %v691_v48 = vrot.slane %v653_v38, %v14956_v55  ;;  %v13374_v38 = vld [vmem:[#allocation8 + $0x2a4] ss:$16 sps:$4 sm:$0xff]  }
  0x9b   :  { %2552 = vmatpush1.bf16.msra.mxu0 %v13282_v45  ;;  %2891 = vmatpush1.bf16.msra.mxu1 %v13283_v46  ;;  %v705_v45 = vrot.slane %v654_v37, %v14956_v55  ;;  %v663_v46 = vrot.slane %v649_v34, %v14956_v55 }
  0x9c   :  { %2553 = vmatprep.subr.bf16.mxu0 %v13284_v49  ;;  %2892 = vmatprep.subr.bf16.mxu1 %v13286_v50  ;;  %v13358_v49 = vld [vmem:[#allocation3 + $0x60] ss:$6 sps:$4 sm:$0xff]  }
  0x9d   :  { %v14978_v50 = vcombine.high %v677_v41, %v705_v45  ;;  %v14980_v56 = vcombine.high %v663_v46, %v691_v48 }
  0x9f   :  { %2554 = vmatpush1.bf16.msra.mxu0 %v13288_v51  ;;  %2893 = vmatpush1.bf16.msra.mxu1 %v13289_v52  ;;  %v716_v51 = vcombine.low %v677_v41, %v705_v45  ;;  %v13360_v52 = vld [vmem:[#allocation3 + $0x6c] ss:$6 sps:$4 sm:$0xff]  }
  0xa0   :  { %2555 = vmatprep.subr.bf16.mxu0 %v13290_v53  ;;  %2894 = vmatprep.subr.bf16.mxu1 %v13292_v54  ;;  %v13362_v53 = vld [vmem:[#allocation3 + $0x78] ss:$6 sps:$4 sm:$0xff]   ;;  %v13364_v54 = vld [vmem:[#allocation3 + $0x84] ss:$6 sps:$4 sm:$0xff]   ;;  %v747_v60 = vrot.slane %v13360_v52, %v14956_v55 }
  0xa1   :  { %v761_v61 = vrot.slane %v13362_v53, %v14956_v55  ;;  %v13372_v41 = vld [vmem:[#allocation8 + $0x2a0] ss:$16 sps:$4 sm:$0xff]  }
  0xa2   :  { %v13400_v52 = vld [vmem:[#allocation3 + $0xcc] ss:$6 sps:$4 sm:$0xff]  }
  0xa3   :  { %2556 = vmatpush1.bf16.msra.mxu0 %v13294_v58  ;;  %2895 = vmatpush1.bf16.msra.mxu1 %v13295_v62  ;;  %v733_v58 = vrot.slane %v13358_v49, %v14956_v55  ;;  %v775_v62 = vrot.slane %v13364_v54, %v14956_v55  ;;  %v13402_v54 = vld [vmem:[#allocation3 + $0xd8] ss:$6 sps:$4 sm:$0xff]  }
  0xa4   :  { %2557 = vmatprep.subr.bf16.mxu0 %v13296_v0  ;;  %2896 = vmatprep.subr.bf16.mxu1 %v13298_v1  ;;  %v13351_v0 = vld [vmem:[#allocation8 + $0x24c] ss:$16 sps:$4 sm:$0xff]   ;;  %v13346_v1 = vld [vmem:[#allocation8 + $0x240] ss:$16 sps:$4 sm:$0xff]  }
  0xa5   :  { %v784_v3 = vcombine.high %v733_v58, %v747_v60  ;;  %v788_v4 = vcombine.high %v761_v61, %v775_v62  ;;  %v783_v5 = vcombine.low %v733_v58, %v747_v60  ;;  %v787_v8 = vcombine.low %v761_v61, %v775_v62  ;;  %v13386_v62 = vld [vmem:[#allocation8 + $0x2c0] ss:$16 sps:$4 sm:$0xff]  }
  0xa6   :  { %v1015_v60 = vrot.slane %v13400_v52, %v14956_v55  ;;  %v13429_v52 = vld [vmem:[#allocation8 + $0x348] ss:$16 sps:$4 sm:$0xff]  }
  0xa7   :  { %2558 = vmatpush1.bf16.msra.mxu0 %v13300_v6  ;;  %2897 = vmatpush1.bf16.msra.mxu1 %v13301_v7  ;;  %v713_v6 = vcombine.low %v663_v46, %v691_v48  ;;  %v13354_v7 = vld [vmem:[#allocation8 + $0x264] ss:$16 sps:$4 sm:$0xff]   ;;  %v811_v10 = vrot.slane %v784_v3, %v14956_v55  ;;  %v13391_v48 = vld [vmem:[#allocation8 + $0x2cc] ss:$16 sps:$4 sm:$0xff]  }
  0xa8   :  { %2559 = vmatprep.subr.bf16.mxu0 %v13302_v11  ;;  %2898 = vmatprep.subr.bf16.mxu1 %v13304_v12  ;;  %v839_v11 = vrot.slane %v788_v4, %v14956_v55  ;;  %v797_v12 = vrot.slane %v783_v5, %v14956_v55  ;;  %v13388_v46 = vld [vmem:[#allocation8 + $0x2c4] ss:$16 sps:$4 sm:$0xff]   ;;  %v13397_v5 = vld [vmem:[#allocation8 + $0x2ec] ss:$16 sps:$4 sm:$0xff]  }
  0xa9   :  { %v13394_v4 = vld [vmem:[#allocation8 + $0x2e4] ss:$16 sps:$4 sm:$0xff]  }
  0xaa   :  { %v850_v16 = vcombine.low %v811_v10, %v839_v11  ;;  %v14990_v17 = vcombine.high %v811_v10, %v839_v11 }
  0xab   :  { %2560 = vmatpush1.bf16.msra.mxu0 %v13306_v13  ;;  %2899 = vmatpush1.bf16.msra.mxu1 %v13307_v14  ;;  %v825_v13 = vrot.slane %v787_v8, %v14956_v55  ;;  %v13352_v14 = vld [vmem:[#allocation8 + $0x260] ss:$16 sps:$4 sm:$0xff]  }
  0xac   :  { %2561 = vmatprep.subr.bf16.mxu0 %v13308_v18  ;;  %2900 = vmatprep.subr.bf16.mxu1 %v13310_v19  ;;  %v13378_v18 = vld [vmem:[#allocation3 + $0x90] ss:$6 sps:$4 sm:$0xff]   ;;  %v13380_v19 = vld [vmem:[#allocation3 + $0x9c] ss:$6 sps:$4 sm:$0xff]  }
  0xad   :  { %v14992_v22 = vcombine.high %v797_v12, %v825_v13  ;;  %v867_v27 = vrot.slane %v13378_v18, %v14956_v55  ;;  %v881_v28 = vrot.slane %v13380_v19, %v14956_v55  ;;  %v847_v31 = vcombine.low %v797_v12, %v825_v13  ;;  %v13392_v8 = vld [vmem:[#allocation8 + $0x2e0] ss:$16 sps:$4 sm:$0xff]  }
  0xae   :  { %v13418_v18 = vld [vmem:[#allocation3 + $0xf0] ss:$6 sps:$4 sm:$0xff]  }
  0xaf   :  { %2562 = vmatpush1.bf16.msra.mxu0 %v13312_v29  ;;  %2901 = vmatpush1.bf16.msra.mxu1 %v13313_v32  ;;  %v895_v29 = vrot.slane %v13382_v20, %v14956_v55  ;;  %v13366_v32 = vld [vmem:[#allocation8 + $0x280] ss:$16 sps:$4 sm:$0xff]   ;;  %v918_v33 = vcombine.high %v867_v27, %v881_v28  ;;  %v917_v34 = vcombine.low %v867_v27, %v881_v28 }
  0xb0   :  { %2644 = vmatprep.subr.bf16.mxu0 %v13328_v35  ;;  %2983 = vmatprep.subr.bf16.mxu1 %v13331_v36  ;;  %v13369_v35 = vld [vmem:[#allocation8 + $0x288] ss:$16 sps:$4 sm:$0xff]   ;;  %v13420_v20 = vld [vmem:[#allocation3 + $0xfc] ss:$6 sps:$4 sm:$0xff]  }
  0xb1   :  { %v922_v36 = vcombine.high %v895_v29, %v909_v30  ;;  %v921_v37 = vcombine.low %v895_v29, %v909_v30  ;;  %v13406_v28 = vld [vmem:[#allocation8 + $0x300] ss:$16 sps:$4 sm:$0xff]   ;;  %v1135_v29 = vrot.slane %v13418_v18, %v14956_v55  ;;  %v13409_v30 = vld [vmem:[#allocation8 + $0x308] ss:$16 sps:$4 sm:$0xff]  }
  0xb2   :  { %2564 = vmatmul.mubr.bf16.vlgmr.msra.gmra.mrb[0].mxu0 %v579_v42  ;;  %2903 = vmatmul.mubr.bf16.vlgmr.msra.gmra.mrb[0].mxu1 %v579_v42  ;;  %v13375_v42 = vld [vmem:[#allocation8 + $0x2a8] ss:$16 sps:$4 sm:$0xff]   ;;  %v13446_v18 = vld [vmem:[#allocation8 + $0x380] ss:$16 sps:$4 sm:$0xff]  }
  0xb3   :  { %2645 = vmatpush1.bf16.msra.mxu0 %v13326_v39  ;;  %2984 = vmatpush1.bf16.msra.mxu1 %v13329_v40  ;;  %v13377_v39 = vld [vmem:[#allocation8 + $0x2ac] ss:$16 sps:$4 sm:$0xff]   ;;  %v945_v40 = vrot.slane %v918_v33, %v14956_v55  ;;  %v959_v45 = vrot.slane %v921_v37, %v14956_v55 }
  0xb4   :  { %2646 = vmatprep.subr.bf16.mxu0 %v13334_v43  ;;  %2985 = vmatprep.subr.bf16.mxu1 %v13337_v44  ;;  %v973_v43 = vrot.slane %v922_v36, %v14956_v55  ;;  %v931_v44 = vrot.slane %v917_v34, %v14956_v55  ;;  %v13414_v34 = vld [vmem:[#allocation8 + $0x324] ss:$16 sps:$4 sm:$0xff]   ;;  %v13412_v36 = vld [vmem:[#allocation8 + $0x320] ss:$16 sps:$4 sm:$0xff]  }
  0xb5   :  { %2573 = vmatprep.mubr.bf16.mxu0 %v716_v51  ;;  %2912 = vmatprep.mubr.bf16.mxu1 %v716_v51  ;;  %v13398_v51 = vld [vmem:[#allocation3 + $0xc0] ss:$6 sps:$4 sm:$0xff]  }
  0xb6   :  { %v984_v49 = vcombine.low %v945_v40, %v973_v43  ;;  %v15002_v53 = vcombine.high %v945_v40, %v973_v43  ;;  %v15004_v58 = vcombine.high %v931_v44, %v959_v45  ;;  %v981_v61 = vcombine.low %v931_v44, %v959_v45  ;;  %v13428_v45 = vld [vmem:[#allocation8 + $0x344] ss:$16 sps:$4 sm:$0xff]  }
  0xb7   :  { %2647 = vmatpush1.bf16.msra.mxu0 %v13332_v57  ;;  %2986 = vmatpush1.bf16.msra.mxu1 %v13335_v59  ;;  %v13404_v57 = vld [vmem:[#allocation3 + $0xe4] ss:$6 sps:$4 sm:$0xff]   ;;  %v1001_v59 = vrot.slane %v13398_v51, %v14956_v55  ;;  %v13426_v51 = vld [vmem:[#allocation8 + $0x340] ss:$16 sps:$4 sm:$0xff]  }
  0xb8   :  { %2648 = vmatprep.subr.bf16.mxu0 %v13348_v63  ;;  %2987 = vmatprep.subr.bf16.mxu1 %v13351_v0  ;;  %v1029_v63 = vrot.slane %v13402_v54, %v14956_v55  ;;  %v1043_v0 = vrot.slane %v13404_v57, %v14956_v55  ;;  %v13438_v57 = vld [vmem:[#allocation3 + $0x120] ss:$6 sps:$4 sm:$0xff]  }
  0xb9   :  { %v1051_v3 = vcombine.low %v1001_v59, %v1015_v60 }
  0xba   :  { %2574 = vmatmul.mubr.bf16.gmra.mrb[4].mxu0 %v713_v6  ;;  %2913 = vmatmul.mubr.bf16.gmra.mrb[4].mxu1 %v713_v6  ;;  %v1056_v6 = vcombine.high %v1029_v63, %v1043_v0 }
  0xbb   :  { %2649 = vmatpush1.bf16.msra.mxu0 %v13346_v1  ;;  %2988 = vmatpush1.bf16.msra.mxu1 %v13349_v2  ;;  %v13389_v1 = vld [vmem:[#allocation8 + $0x2c8] ss:$16 sps:$4 sm:$0xff]   ;;  %v1052_v2 = vcombine.high %v1001_v59, %v1015_v60  ;;  %v1065_v12 = vrot.slane %v1051_v3, %v14956_v55  ;;  %v13440_v59 = vld [vmem:[#allocation3 + $0x12c] ss:$6 sps:$4 sm:$0xff]  }
  0xbc   :  { %2650 = vmatprep.subr.bf16.mxu0 %v13354_v7  ;;  %2989 = vmatprep.subr.bf16.mxu1 %v13357_v9  ;;  %v1055_v7 = vcombine.low %v1029_v63, %v1043_v0  ;;  %v13395_v9 = vld [vmem:[#allocation8 + $0x2e8] ss:$16 sps:$4 sm:$0xff]   ;;  %v1107_v11 = vrot.slane %v1056_v6, %v14956_v55  ;;  %v13434_v63 = vld [vmem:[#allocation8 + $0x364] ss:$16 sps:$4 sm:$0xff]   ;;  %v13437_v0 = vld [vmem:[#allocation8 + $0x36c] ss:$16 sps:$4 sm:$0xff]  }
  0xbd   :  { %2583 = vmatprep.mubr.bf16.mxu0 %v850_v16  ;;  %2922 = vmatprep.mubr.bf16.mxu1 %v850_v16  ;;  %v1079_v10 = vrot.slane %v1052_v2, %v14956_v55  ;;  %v13442_v60 = vld [vmem:[#allocation3 + $0x138] ss:$6 sps:$4 sm:$0xff]   ;;  %v1283_v2 = vrot.slane %v13440_v59, %v14956_v55 }
  0xbe   :  { %v1093_v13 = vrot.slane %v1055_v7, %v14956_v55  ;;  %v1297_v3 = vrot.slane %v13442_v60, %v14956_v55  ;;  %v13466_v60 = vld [vmem:[#allocation8 + $0x3c0] ss:$16 sps:$4 sm:$0xff]  }
  0xbf   :  { %2651 = vmatpush1.bf16.msra.mxu0 %v13352_v14  ;;  %2990 = vmatpush1.bf16.msra.mxu1 %v13355_v15  ;;  %v13408_v14 = vld [vmem:[#allocation8 + $0x304] ss:$16 sps:$4 sm:$0xff]   ;;  %v13411_v15 = vld [vmem:[#allocation8 + $0x30c] ss:$16 sps:$4 sm:$0xff]   ;;  %v1118_v16 = vcombine.low %v1079_v10, %v1107_v11  ;;  %v15014_v19 = vcombine.high %v1079_v10, %v1107_v11 }
  0xc0   :  { %2652 = vmatprep.subr.bf16.mxu0 %v13368_v24  ;;  %2991 = vmatprep.subr.bf16.mxu1 %v13371_v25  ;;  %v13424_v24 = vld [vmem:[#allocation3 + $0x114] ss:$6 sps:$4 sm:$0xff]   ;;  %v15016_v25 = vcombine.high %v1065_v12, %v1093_v13  ;;  %v1115_v27 = vcombine.low %v1065_v12, %v1093_v13 }
  0xc1   :  { %v1177_v33 = vrot.slane %v13424_v24, %v14956_v55  ;;  %v13448_v13 = vld [vmem:[#allocation8 + $0x384] ss:$16 sps:$4 sm:$0xff]   ;;  %v13457_v24 = vld [vmem:[#allocation8 + $0x3ac] ss:$16 sps:$4 sm:$0xff]  }
  0xc2   :  { %2584 = vmatmul.mubr.bf16.gmra.mrb[8].mxu0 %v847_v31  ;;  %2923 = vmatmul.mubr.bf16.gmra.mrb[8].mxu1 %v847_v31  ;;  %v1149_v31 = vrot.slane %v13420_v20, %v14956_v55  ;;  %v13449_v20 = vld [vmem:[#allocation8 + $0x388] ss:$16 sps:$4 sm:$0xff]  }
  0xc3   :  { %2653 = vmatpush1.bf16.msra.mxu0 %v13366_v32  ;;  %2992 = vmatpush1.bf16.msra.mxu1 %v13369_v35  ;;  %v1163_v32 = vrot.slane %v13422_v23, %v14956_v55  ;;  %v13417_v35 = vld [vmem:[#allocation8 + $0x32c] ss:$16 sps:$4 sm:$0xff]   ;;  %v13454_v23 = vld [vmem:[#allocation8 + $0x3a4] ss:$16 sps:$4 sm:$0xff]  }
  0xc4   :  { %2654 = vmatprep.subr.bf16.mxu0 %v13374_v38  ;;  %2993 = vmatprep.subr.bf16.mxu1 %v13377_v39  ;;  %v1186_v37 = vcombine.high %v1135_v29, %v1149_v31  ;;  %v1185_v39 = vcombine.low %v1135_v29, %v1149_v31  ;;  %v13458_v29 = vld [vmem:[#allocation3 + $0x150] ss:$6 sps:$4 sm:$0xff]  }
  0xc5   :  { %2593 = vmatprep.mubr.bf16.mxu0 %v984_v49  ;;  %2932 = vmatprep.mubr.bf16.mxu1 %v984_v49  ;;  %v1190_v38 = vcombine.high %v1163_v32, %v1177_v33  ;;  %v1189_v40 = vcombine.low %v1163_v32, %v1177_v33  ;;  %v13462_v31 = vld [vmem:[#allocation3 + $0x168] ss:$6 sps:$4 sm:$0xff]   ;;  %v13464_v32 = vld [vmem:[#allocation3 + $0x174] ss:$6 sps:$4 sm:$0xff]  }
  0xc6   :  { %v1199_v44 = vrot.slane %v1185_v39, %v14956_v55  ;;  %v13455_v39 = vld [vmem:[#allocation8 + $0x3a8] ss:$16 sps:$4 sm:$0xff]  }
  0xc7   :  { %2655 = vmatpush1.bf16.msra.mxu0 %v13372_v41  ;;  %2994 = vmatpush1.bf16.msra.mxu1 %v13375_v42  ;;  %v13415_v41 = vld [vmem:[#allocation8 + $0x328] ss:$16 sps:$4 sm:$0xff]   ;;  %v15023_v42 = vrot.slane %v1186_v37, %v14956_v55  ;;  %v15026_v43 = vrot.slane %v1190_v38, %v14956_v55  ;;  %v1431_v37 = vrot.slane %v13462_v31, %v14956_v55 }
  0xc8   :  { %2656 = vmatprep.subr.bf16.mxu0 %v13388_v46  ;;  %2995 = vmatprep.subr.bf16.mxu1 %v13391_v48  ;;  %v13431_v46 = vld [vmem:[#allocation8 + $0x34c] ss:$16 sps:$4 sm:$0xff]   ;;  %v1227_v48 = vrot.slane %v1189_v40, %v14956_v55  ;;  %v1445_v38 = vrot.slane %v13464_v32, %v14956_v55  ;;  %v13511_v31 = vld [vmem:[#allocation8 + $0x4a8] ss:$16 sps:$4 sm:$0xff]   ;;  %v13516_v32 = vld [vmem:[#allocation8 + $0x4c4] ss:$16 sps:$4 sm:$0xff]  }
  0xc9   :  { %v1252_v49 = vcombine.low %v15023_v42, %v15026_v43 }
  0xca   :  { %2594 = vmatmul.mubr.bf16.gmra.mrb[12].mxu0 %v981_v61  ;;  %2933 = vmatmul.mubr.bf16.gmra.mrb[12].mxu1 %v981_v61  ;;  %v1249_v54 = vcombine.low %v1199_v44, %v1227_v48  ;;  %v15032_v61 = vcombine.high %v1199_v44, %v1227_v48  ;;  %v1458_v44 = vcombine.high %v1431_v37, %v1445_v38  ;;  %v13471_v48 = vld [vmem:[#allocation8 + $0x3cc] ss:$16 sps:$4 sm:$0xff]  }
  0xcb   :  { %2657 = vmatpush1.bf16.msra.mxu0 %v13386_v62  ;;  %2996 = vmatpush1.bf16.msra.mxu1 %v13389_v1  ;;  %v13444_v62 = vld [vmem:[#allocation3 + $0x144] ss:$6 sps:$4 sm:$0xff]   ;;  %v1269_v1 = vrot.slane %v13438_v57, %v14956_v55 }
  0xcc   :  { %2658 = vmatprep.subr.bf16.mxu0 %v13394_v4  ;;  %2997 = vmatprep.subr.bf16.mxu1 %v13397_v5  ;;  %v1311_v4 = vrot.slane %v13444_v62, %v14956_v55  ;;  %v13432_v5 = vld [vmem:[#allocation8 + $0x360] ss:$16 sps:$4 sm:$0xff]   ;;  %v13469_v62 = vld [vmem:[#allocation8 + $0x3c8] ss:$16 sps:$4 sm:$0xff]  }
  0xcd   :  { %2603 = vmatprep.mubr.bf16.mxu0 %v1118_v16  ;;  %2942 = vmatprep.mubr.bf16.mxu1 %v1118_v16  ;;  %v1320_v6 = vcombine.high %v1269_v1, %v1283_v2  ;;  %v1319_v7 = vcombine.low %v1269_v1, %v1283_v2  ;;  %v13472_v2 = vld [vmem:[#allocation8 + $0x3e0] ss:$16 sps:$4 sm:$0xff]  }
  0xce   :  { %v1323_v10 = vcombine.low %v1297_v3, %v1311_v4 }
  0xcf   :  { %2659 = vmatpush1.bf16.msra.mxu0 %v13392_v8  ;;  %2998 = vmatpush1.bf16.msra.mxu1 %v13395_v9  ;;  %v13435_v8 = vld [vmem:[#allocation8 + $0x368] ss:$16 sps:$4 sm:$0xff]   ;;  %v1324_v9 = vcombine.high %v1297_v3, %v1311_v4  ;;  %v15039_v11 = vrot.slane %v1320_v6, %v14956_v55  ;;  %v1333_v12 = vrot.slane %v1319_v7, %v14956_v55  ;;  %v13480_v4 = vld [vmem:[#allocation8 + $0x404] ss:$16 sps:$4 sm:$0xff]   ;;  %v13478_v6 = vld [vmem:[#allocation8 + $0x400] ss:$16 sps:$4 sm:$0xff]  }
  0xd0   :  { %2660 = vmatprep.subr.bf16.mxu0 %v13408_v14  ;;  %2999 = vmatprep.subr.bf16.mxu1 %v13411_v15  ;;  %v13451_v14 = vld [vmem:[#allocation8 + $0x38c] ss:$16 sps:$4 sm:$0xff]   ;;  %v1361_v16 = vrot.slane %v1323_v10, %v14956_v55  ;;  %v13475_v3 = vld [vmem:[#allocation8 + $0x3e8] ss:$16 sps:$4 sm:$0xff]   ;;  %v13484_v10 = vld [vmem:[#allocation8 + $0x420] ss:$16 sps:$4 sm:$0xff]  }
  0xd1   :  { %v15043_v15 = vrot.slane %v1324_v9, %v14956_v55  ;;  %v13481_v7 = vld [vmem:[#allocation8 + $0x408] ss:$16 sps:$4 sm:$0xff]   ;;  %v13489_v9 = vld [vmem:[#allocation8 + $0x42c] ss:$16 sps:$4 sm:$0xff]  }
  0xd2   :  { %2604 = vmatmul.mubr.bf16.gmra.mrb[16].mxu0 %v1115_v27  ;;  %2943 = vmatmul.mubr.bf16.gmra.mrb[16].mxu1 %v1115_v27  ;;  %v15048_v33 = vcombine.high %v1333_v12, %v1361_v16 }
  0xd3   :  { %2661 = vmatpush1.bf16.msra.mxu0 %v13406_v28  ;;  %3000 = vmatpush1.bf16.msra.mxu1 %v13409_v30  ;;  %v1386_v27 = vcombine.low %v15039_v11, %v15043_v15  ;;  %v1383_v28 = vcombine.low %v1333_v12, %v1361_v16  ;;  %v13460_v30 = vld [vmem:[#allocation3 + $0x15c] ss:$6 sps:$4 sm:$0xff]   ;;  %v13487_v12 = vld [vmem:[#allocation8 + $0x428] ss:$16 sps:$4 sm:$0xff]  }
  0xd4   :  { %2662 = vmatprep.subr.bf16.mxu0 %v13414_v34  ;;  %3001 = vmatprep.subr.bf16.mxu1 %v13417_v35  ;;  %v1403_v34 = vrot.slane %v13458_v29, %v14956_v55  ;;  %v1417_v35 = vrot.slane %v13460_v30, %v14956_v55  ;;  %v13493_v16 = vld [vmem:[#allocation8 + $0x448] ss:$16 sps:$4 sm:$0xff]   ;;  %v13510_v29 = vld [vmem:[#allocation8 + $0x4a4] ss:$16 sps:$4 sm:$0xff]   ;;  %v13508_v30 = vld [vmem:[#allocation8 + $0x4a0] ss:$16 sps:$4 sm:$0xff]  }
  0xd5   :  { %2613 = vmatprep.mubr.bf16.mxu0 %v1252_v49  ;;  %2952 = vmatprep.mubr.bf16.mxu1 %v1252_v49 }
  0xd6   :  { %v1454_v40 = vcombine.high %v1403_v34, %v1417_v35 }
  0xd7   :  { %2663 = vmatpush1.bf16.msra.mxu0 %v13412_v36  ;;  %3002 = vmatpush1.bf16.msra.mxu1 %v13415_v41  ;;  %v13452_v36 = vld [vmem:[#allocation8 + $0x3a0] ss:$16 sps:$4 sm:$0xff]   ;;  %v1453_v41 = vcombine.low %v1403_v34, %v1417_v35  ;;  %v13517_v35 = vld [vmem:[#allocation8 + $0x4c8] ss:$16 sps:$4 sm:$0xff]  }
  0xd8   :  { %2664 = vmatprep.subr.bf16.mxu0 %v13428_v45  ;;  %3003 = vmatprep.subr.bf16.mxu1 %v13431_v46  ;;  %v1457_v45 = vcombine.low %v1431_v37, %v1445_v38  ;;  %v13468_v46 = vld [vmem:[#allocation8 + $0x3c4] ss:$16 sps:$4 sm:$0xff]   ;;  %v15055_v49 = vrot.slane %v1454_v40, %v14956_v55  ;;  %v13514_v34 = vld [vmem:[#allocation8 + $0x4c0] ss:$16 sps:$4 sm:$0xff]   ;;  %v13523_v38 = vld [vmem:[#allocation8 + $0x4e8] ss:$16 sps:$4 sm:$0xff]  }
  0xd9   :  { %v13520_v37 = vld [vmem:[#allocation8 + $0x4e0] ss:$16 sps:$4 sm:$0xff]  }
  0xda   :  { %2614 = vmatmul.mubr.bf16.gmra.mrb[20].mxu0 %v1249_v54  ;;  %2953 = vmatmul.mubr.bf16.gmra.mrb[20].mxu1 %v1249_v54  ;;  %v1495_v54 = vrot.slane %v1457_v45, %v14956_v55  ;;  %v13526_v40 = vld [vmem:[#allocation8 + $0x500] ss:$16 sps:$4 sm:$0xff]   ;;  %v1253_v45 = vcombine.high %v15023_v42, %v15026_v43  ;;  %v13546_v42 = vld [vmem:[#allocation8 + $0x564] ss:$16 sps:$4 sm:$0xff]  }
  0xdb   :  { %2665 = vmatpush1.bf16.msra.mxu0 %v13426_v51  ;;  %3004 = vmatpush1.bf16.msra.mxu1 %v13429_v52  ;;  %v1467_v51 = vrot.slane %v1453_v41, %v14956_v55  ;;  %v15059_v52 = vrot.slane %v1458_v44, %v14956_v55  ;;  %v13529_v41 = vld [vmem:[#allocation8 + $0x508] ss:$16 sps:$4 sm:$0xff]   ;;  %v13534_v44 = vld [vmem:[#allocation8 + $0x524] ss:$16 sps:$4 sm:$0xff]  }
  0xdc   :  { %2666 = vmatprep.subr.bf16.mxu0 %v13434_v63  ;;  %3005 = vmatprep.subr.bf16.mxu1 %v13437_v0  ;;  %v13474_v63 = vld [vmem:[#allocation8 + $0x3e4] ss:$16 sps:$4 sm:$0xff]   ;;  %v13477_v0 = vld [vmem:[#allocation8 + $0x3ec] ss:$16 sps:$4 sm:$0xff]  }
  0xdd   :  { %2623 = vmatprep.mubr.bf16.mxu0 %v1386_v27  ;;  %2962 = vmatprep.mubr.bf16.mxu1 %v1386_v27  ;;  %v1520_v57 = vcombine.low %v15055_v49, %v15059_v52  ;;  %v1517_v59 = vcombine.low %v1467_v51, %v1495_v54  ;;  %v15064_v1 = vcombine.high %v1467_v51, %v1495_v54  ;;  %v13502_v27 = vld [vmem:[#allocation8 + $0x480] ss:$16 sps:$4 sm:$0xff]   ;;  %v13543_v51 = vld [vmem:[#allocation8 + $0x54c] ss:$16 sps:$4 sm:$0xff]  }
  0xde   :  { %v13316_v54 = vld [vmem:[#allocation3 + $0x4] ss:$6 sps:$4 sm:$0x33]   ;;  %v13325_v43 = vld [vmem:[#allocation3 + $0x28] ss:$6 sps:$4 sm:$0x33]  }
  0xdf   :  { %2667 = vmatpush1.bf16.msra.mxu0 %v13432_v5  ;;  %3006 = vmatpush1.bf16.msra.mxu1 %v13435_v8  ;;  %v13483_v5 = vld [vmem:[#allocation8 + $0x40c] ss:$16 sps:$4 sm:$0xff]   ;;  %v13486_v8 = vld [vmem:[#allocation8 + $0x424] ss:$16 sps:$4 sm:$0xff]  }
  0xe0   :  { %2668 = vmatprep.subr.bf16.mxu0 %v13448_v13  ;;  %3007 = vmatprep.subr.bf16.mxu1 %v13451_v14  ;;  %v13492_v13 = vld [vmem:[#allocation8 + $0x444] ss:$16 sps:$4 sm:$0xff]   ;;  %v13490_v14 = vld [vmem:[#allocation8 + $0x440] ss:$16 sps:$4 sm:$0xff]  }
  0xe2   :  { %2624 = vmatmul.mubr.bf16.gmra.mrb[24].mxu0 %v1383_v28  ;;  %2963 = vmatmul.mubr.bf16.gmra.mrb[24].mxu1 %v1383_v28  ;;  %v13505_v28 = vld [vmem:[#allocation8 + $0x488] ss:$16 sps:$4 sm:$0xff]  }
  0xe3   :  { %2669 = vmatpush1.bf16.msra.mxu0 %v13446_v18  ;;  %3008 = vmatpush1.bf16.msra.mxu1 %v13449_v20  ;;  %v13498_v18 = vld [vmem:[#allocation8 + $0x464] ss:$16 sps:$4 sm:$0xff]   ;;  %v13496_v20 = vld [vmem:[#allocation8 + $0x460] ss:$16 sps:$4 sm:$0xff]  }
  0xe4   :  { %2670 = vmatprep.subr.bf16.mxu0 %v13454_v23  ;;  %3009 = vmatprep.subr.bf16.mxu1 %v13457_v24  ;;  %v13499_v23 = vld [vmem:[#allocation8 + $0x468] ss:$16 sps:$4 sm:$0xff]   ;;  %v13504_v24 = vld [vmem:[#allocation8 + $0x484] ss:$16 sps:$4 sm:$0xff]  }
  0xe5   :  { %2633 = vmatprep.mubr.bf16.mxu0 %v1520_v57  ;;  %2972 = vmatprep.mubr.bf16.mxu1 %v1520_v57  ;;  %v13538_v57 = vld [vmem:[#allocation8 + $0x540] ss:$16 sps:$4 sm:$0xff]  }
  0xe7   :  { %2671 = vmatpush1.bf16.msra.mxu0 %v13452_v36  ;;  %3010 = vmatpush1.bf16.msra.mxu1 %v13455_v39  ;;  %v13522_v36 = vld [vmem:[#allocation8 + $0x4e4] ss:$16 sps:$4 sm:$0xff]  }
  0xe8   :  { %2672 = vmatprep.subr.bf16.mxu0 %v13468_v46  ;;  %3011 = vmatprep.subr.bf16.mxu1 %v13471_v48  ;;  %v13528_v39 = vld [vmem:[#allocation8 + $0x504] ss:$16 sps:$4 sm:$0xff]   ;;  %v13532_v46 = vld [vmem:[#allocation8 + $0x520] ss:$16 sps:$4 sm:$0xff]   ;;  %v13535_v48 = vld [vmem:[#allocation8 + $0x528] ss:$16 sps:$4 sm:$0xff]  }
  0xea   :  { %2634 = vmatmul.mubr.bf16.gmra.mrb[28].mxu0 %v1517_v59  ;;  %2973 = vmatmul.mubr.bf16.gmra.mrb[28].mxu1 %v1517_v59  ;;  %v13541_v59 = vld [vmem:[#allocation8 + $0x548] ss:$16 sps:$4 sm:$0xff]  }
  0xeb   :  { %2673 = vmatpush1.bf16.msra.mxu0 %v13466_v60  ;;  %3012 = vmatpush1.bf16.msra.mxu1 %v13469_v62  ;;  %v13319_v60 = vld [vmem:[#allocation3 + $0x10] ss:$6 sps:$4 sm:$0x33]   ;;  %v13322_v62 = vld [vmem:[#allocation3 + $0x1c] ss:$6 sps:$4 sm:$0x33]  }
  0xec   :  { %2674 = vmatprep.subr.bf16.mxu0 %v13474_v63  ;;  %3013 = vmatprep.subr.bf16.mxu1 %v13477_v0  ;;  %v1387_v63 = vcombine.high %v15039_v11, %v15043_v15  ;;  %v13544_v0 = vld [vmem:[#allocation8 + $0x560] ss:$16 sps:$4 sm:$0xff]   ;;  %v486_v11 = vrot.slane %v13319_v60, %v14956_v55  ;;  %v500_v15 = vrot.slane %v13322_v62, %v14956_v55  ;;  %v13618_v60 = vld [vmem:[#allocation3 + $0x94] ss:$6 sps:$4 sm:$0x33]  }
  0xed   :  { %2676 = vmatprep.mubr.bf16.mxu0 %v14968_v26  ;;  %3015 = vmatprep.mubr.bf16.mxu1 %v14968_v26  ;;  %v13495_v26 = vld [vmem:[#allocation8 + $0x44c] ss:$16 sps:$4 sm:$0xff]  }
  0xef   :  { %2675 = vmatpush1.bf16.msra.mxu0 %v13472_v2  ;;  %3014 = vmatpush1.bf16.msra.mxu1 %v13475_v3  ;;  %v13547_v2 = vld [vmem:[#allocation8 + $0x568] ss:$16 sps:$4 sm:$0xff]   ;;  %v13552_v3 = vld [vmem:[#allocation8 + $0x584] ss:$16 sps:$4 sm:$0xff]  }
  0xf0   :  { %2757 = vmatprep.subr.bf16.mxu0 %v13480_v4  ;;  %3096 = vmatprep.subr.bf16.mxu1 %v13483_v5  ;;  %v13555_v4 = vld [vmem:[#allocation8 + $0x58c] ss:$16 sps:$4 sm:$0xff]   ;;  %v472_v5 = vrot.slane %v13316_v54, %v14956_v55 }
  0xf2   :  { %2677 = vmatmul.mubr.bf16.vlgmr.msra.gmra.mrb[0].mxu0 %v14966_v21  ;;  %3016 = vmatmul.mubr.bf16.vlgmr.msra.gmra.mrb[0].mxu1 %v14966_v21  ;;  %v13501_v21 = vld [vmem:[#allocation8 + $0x46c] ss:$16 sps:$4 sm:$0xff]  }
  0xf3   :  { %2758 = vmatpush1.bf16.msra.mxu0 %v13478_v6  ;;  %3097 = vmatpush1.bf16.msra.mxu1 %v13481_v7  ;;  %v13550_v6 = vld [vmem:[#allocation8 + $0x580] ss:$16 sps:$4 sm:$0xff]   ;;  %v13553_v7 = vld [vmem:[#allocation8 + $0x588] ss:$16 sps:$4 sm:$0xff]  }
  0xf4   :  { %2759 = vmatprep.subr.bf16.mxu0 %v13486_v8  ;;  %3098 = vmatprep.subr.bf16.mxu1 %v13489_v9  ;;  %v13586_v8 = vld [vmem:[#allocation3 + $0x34] ss:$6 sps:$4 sm:$0x33]  }
  0xf5   :  { %2686 = vmatprep.mubr.bf16.mxu0 %v14978_v50  ;;  %3025 = vmatprep.mubr.bf16.mxu1 %v14978_v50  ;;  %v13507_v50 = vld [vmem:[#allocation8 + $0x48c] ss:$16 sps:$4 sm:$0xff]   ;;  %v13558_v9 = vld [vmem:[#allocation8 + $0x5a4] ss:$16 sps:$4 sm:$0xff]  }
  0xf7   :  { %2760 = vmatpush1.bf16.msra.mxu0 %v13484_v10  ;;  %3099 = vmatpush1.bf16.msra.mxu1 %v13487_v12  ;;  %v13587_v10 = vld [vmem:[#allocation3 + $0x40] ss:$6 sps:$4 sm:$0x33]   ;;  %v13588_v12 = vld [vmem:[#allocation3 + $0x4c] ss:$6 sps:$4 sm:$0x33]  }
  0xf8   :  { %2761 = vmatprep.subr.bf16.mxu0 %v13492_v13  ;;  %3100 = vmatprep.subr.bf16.mxu1 %v13495_v26  ;;  %v13561_v13 = vld [vmem:[#allocation8 + $0x5ac] ss:$16 sps:$4 sm:$0xff]  }
  0xf9   :  { %v13589_v26 = vld [vmem:[#allocation3 + $0x58] ss:$6 sps:$4 sm:$0x33]  }
  0xfa   :  { %2687 = vmatmul.mubr.bf16.gmra.mrb[4].mxu0 %v14980_v56  ;;  %3026 = vmatmul.mubr.bf16.gmra.mrb[4].mxu1 %v14980_v56  ;;  %v13513_v56 = vld [vmem:[#allocation8 + $0x4ac] ss:$16 sps:$4 sm:$0xff]  }
  0xfb   :  { %2762 = vmatpush1.bf16.msra.mxu0 %v13490_v14  ;;  %3101 = vmatpush1.bf16.msra.mxu1 %v13493_v16  ;;  %v1521_v14 = vcombine.high %v15055_v49, %v15059_v52  ;;  %v518_v16 = vcombine.high %v472_v5, %v486_v11  ;;  %v15107_v49 = vrot.slane %v13588_v12, %v14956_v55 }
  0xfc   :  { %2763 = vmatprep.subr.bf16.mxu0 %v13498_v18  ;;  %3102 = vmatprep.subr.bf16.mxu1 %v13501_v21  ;;  %v13556_v21 = vld [vmem:[#allocation8 + $0x5a0] ss:$16 sps:$4 sm:$0xff]   ;;  %v15110_v52 = vrot.slane %v13589_v26, %v14956_v55 }
  0xfd   :  { %2696 = vmatprep.mubr.bf16.mxu0 %v14990_v17  ;;  %3035 = vmatprep.mubr.bf16.mxu1 %v14990_v17  ;;  %v13519_v17 = vld [vmem:[#allocation8 + $0x4cc] ss:$16 sps:$4 sm:$0xff]  }
  0xff   :  { %2764 = vmatpush1.bf16.msra.mxu0 %v13496_v20  ;;  %3103 = vmatpush1.bf16.msra.mxu1 %v13499_v23  ;;  %v13559_v20 = vld [vmem:[#allocation8 + $0x5a8] ss:$16 sps:$4 sm:$0xff]   ;;  %v15101_v23 = vrot.slane %v13586_v8, %v14956_v55 }
 0x100   :  { %2765 = vmatprep.subr.bf16.mxu0 %v13504_v24  ;;  %3104 = vmatprep.subr.bf16.mxu1 %v13507_v50  ;;  %v13564_v24 = vld [vmem:[#allocation8 + $0x5c4] ss:$16 sps:$4 sm:$0xff]   ;;  %v13567_v50 = vld [vmem:[#allocation8 + $0x5cc] ss:$16 sps:$4 sm:$0xff]   ;;  %v13592_v8 = vld [vmem:[#allocation11 + $0x44] ss:$16 sps:$4 sm:$0xff]  }
 0x102   :  { %2697 = vmatmul.mubr.bf16.gmra.mrb[8].mxu0 %v14992_v22  ;;  %3036 = vmatmul.mubr.bf16.gmra.mrb[8].mxu1 %v14992_v22  ;;  %v13525_v22 = vld [vmem:[#allocation8 + $0x4ec] ss:$16 sps:$4 sm:$0xff]  }
 0x103   :  { %2766 = vmatpush1.bf16.msra.mxu0 %v13502_v27  ;;  %3105 = vmatpush1.bf16.msra.mxu1 %v13505_v28  ;;  %v15104_v27 = vrot.slane %v13587_v10, %v14956_v55  ;;  %v13565_v28 = vld [vmem:[#allocation8 + $0x5c8] ss:$16 sps:$4 sm:$0xff]   ;;  %v13595_v10 = vld [vmem:[#allocation11 + $0x4c] ss:$16 sps:$4 sm:$0xff]  }
 0x104   :  { %2767 = vmatprep.subr.bf16.mxu0 %v13510_v29  ;;  %3106 = vmatprep.subr.bf16.mxu1 %v13513_v56  ;;  %v550_v29 = vrot.slane %v518_v16, %v14956_v55 }
 0x105   :  { %2706 = vmatprep.mubr.bf16.mxu0 %v15002_v53  ;;  %3045 = vmatprep.mubr.bf16.mxu1 %v15002_v53  ;;  %v13531_v53 = vld [vmem:[#allocation8 + $0x50c] ss:$16 sps:$4 sm:$0xff]  }
 0x107   :  { %2768 = vmatpush1.bf16.msra.mxu0 %v13508_v30  ;;  %3107 = vmatpush1.bf16.msra.mxu1 %v13511_v31  ;;  %v517_v30 = vcombine.low %v472_v5, %v486_v11 }
 0x108   :  { %2769 = vmatprep.subr.bf16.mxu0 %v13516_v32  ;;  %3108 = vmatprep.subr.bf16.mxu1 %v13519_v17  ;;  %v13602_v32 = vld [vmem:[#allocation3 + $0x64] ss:$6 sps:$4 sm:$0x33]  }
 0x109   :  { %v13570_v17 = vld [vmem:[#allocation8 + $0x5e4] ss:$16 sps:$4 sm:$0xff]  }
 0x10a   :  { %2707 = vmatmul.mubr.bf16.gmra.mrb[12].mxu0 %v15004_v58  ;;  %3046 = vmatmul.mubr.bf16.gmra.mrb[12].mxu1 %v15004_v58  ;;  %v13537_v58 = vld [vmem:[#allocation8 + $0x52c] ss:$16 sps:$4 sm:$0xff]  }
 0x10b   :  { %2770 = vmatpush1.bf16.msra.mxu0 %v13514_v34  ;;  %3109 = vmatpush1.bf16.msra.mxu1 %v13517_v35  ;;  %v13603_v34 = vld [vmem:[#allocation3 + $0x70] ss:$6 sps:$4 sm:$0x33]   ;;  %v13573_v35 = vld [vmem:[#allocation8 + $0x5ec] ss:$16 sps:$4 sm:$0xff]  }
 0x10c   :  { %2771 = vmatprep.subr.bf16.mxu0 %v13522_v36  ;;  %3110 = vmatprep.subr.bf16.mxu1 %v13525_v22  ;;  %v652_v36 = vcombine.high %v15101_v23, %v15104_v27  ;;  %v656_v22 = vcombine.high %v15107_v49, %v15110_v52  ;;  %v754_v54 = vrot.slane %v13603_v34, %v14956_v55  ;;  %v13599_v34 = vld [vmem:[#allocation11 + $0x68] ss:$16 sps:$4 sm:$0xff]  }
 0x10d   :  { %2716 = vmatprep.mubr.bf16.mxu0 %v15014_v19  ;;  %3055 = vmatprep.mubr.bf16.mxu1 %v15014_v19  ;;  %v13540_v19 = vld [vmem:[#allocation8 + $0x544] ss:$16 sps:$4 sm:$0xff]  }
 0x10f   :  { %2772 = vmatpush1.bf16.msra.mxu0 %v13520_v37  ;;  %3111 = vmatpush1.bf16.msra.mxu1 %v13523_v38  ;;  %v13604_v37 = vld [vmem:[#allocation3 + $0x7c] ss:$6 sps:$4 sm:$0x33]  }
 0x110   :  { %2773 = vmatprep.subr.bf16.mxu0 %v13528_v39  ;;  %3112 = vmatprep.subr.bf16.mxu1 %v13531_v53  ;;  %v13605_v39 = vld [vmem:[#allocation3 + $0x88] ss:$6 sps:$4 sm:$0x33]   ;;  %v536_v53 = vrot.slane %v517_v30, %v14956_v55 }
 0x111   :  { %v13637_v30 = vld [vmem:[#allocation3 + $0xe8] ss:$6 sps:$4 sm:$0x33]  }
 0x112   :  { %2717 = vmatmul.mubr.bf16.gmra.mrb[16].mxu0 %v15016_v25  ;;  %3056 = vmatmul.mubr.bf16.gmra.mrb[16].mxu1 %v15016_v25  ;;  %v13549_v25 = vld [vmem:[#allocation8 + $0x56c] ss:$16 sps:$4 sm:$0xff]  }
 0x113   :  { %2774 = vmatpush1.bf16.msra.mxu0 %v13526_v40  ;;  %3113 = vmatpush1.bf16.msra.mxu1 %v13529_v41  ;;  %v13568_v41 = vld [vmem:[#allocation8 + $0x5e0] ss:$16 sps:$4 sm:$0xff]  }
 0x114   :  { %2775 = vmatprep.subr.bf16.mxu0 %v13534_v44  ;;  %3114 = vmatprep.subr.bf16.mxu1 %v13537_v58  ;;  %v13571_v44 = vld [vmem:[#allocation8 + $0x5e8] ss:$16 sps:$4 sm:$0xff]  }
 0x115   :  { %2726 = vmatprep.mubr.bf16.mxu0 %v1253_v45  ;;  %3065 = vmatprep.mubr.bf16.mxu1 %v1253_v45  ;;  %v13576_v58 = vld [vmem:[#allocation11 + $0x4] ss:$16 sps:$4 sm:$0xff]   ;;  %v13579_v45 = vld [vmem:[#allocation11 + $0xc] ss:$16 sps:$4 sm:$0xff]  }
 0x117   :  { %2776 = vmatpush1.bf16.msra.mxu0 %v13532_v46  ;;  %3115 = vmatpush1.bf16.msra.mxu1 %v13535_v48  ;;  %v684_v46 = vrot.slane %v652_v36, %v14956_v55  ;;  %v712_v48 = vrot.slane %v656_v22, %v14956_v55  ;;  %v13611_v36 = vld [vmem:[#allocation11 + $0x8c] ss:$16 sps:$4 sm:$0xff]  }
 0x118   :  { %2777 = vmatprep.subr.bf16.mxu0 %v13540_v19  ;;  %3116 = vmatprep.subr.bf16.mxu1 %v13543_v51  ;;  %v15125_v19 = vrot.slane %v13602_v32, %v14956_v55  ;;  %v13577_v51 = vld [vmem:[#allocation11 + $0x8] ss:$16 sps:$4 sm:$0xff]  }
 0x11a   :  { %2727 = vmatmul.mubr.bf16.gmra.mrb[20].mxu0 %v15032_v61  ;;  %3066 = vmatmul.mubr.bf16.gmra.mrb[20].mxu1 %v15032_v61  ;;  %v514_v61 = vrot.slane %v13325_v43, %v14956_v55  ;;  %v655_v43 = vcombine.low %v15107_v49, %v15110_v52  ;;  %v786_v5 = vcombine.high %v15125_v19, %v754_v54  ;;  %v13601_v49 = vld [vmem:[#allocation11 + $0x6c] ss:$16 sps:$4 sm:$0xff]  }
 0x11b   :  { %2778 = vmatpush1.bf16.msra.mxu0 %v13538_v57  ;;  %3117 = vmatpush1.bf16.msra.mxu1 %v13541_v59  ;;  %v768_v57 = vrot.slane %v13604_v37, %v14956_v55  ;;  %v782_v59 = vrot.slane %v13605_v39, %v14956_v55  ;;  %v13606_v39 = vld [vmem:[#allocation11 + $0x80] ss:$16 sps:$4 sm:$0xff]  }
 0x11c   :  { %2779 = vmatprep.subr.bf16.mxu0 %v13546_v42  ;;  %3118 = vmatprep.subr.bf16.mxu1 %v13549_v25  ;;  %v522_v18 = vcombine.high %v500_v15, %v514_v61  ;;  %v521_v31 = vcombine.low %v500_v15, %v514_v61  ;;  %v13582_v42 = vld [vmem:[#allocation11 + $0x24] ss:$16 sps:$4 sm:$0xff]   ;;  %v651_v25 = vcombine.low %v15101_v23, %v15104_v27  ;;  %v13583_v61 = vld [vmem:[#allocation11 + $0x28] ss:$16 sps:$4 sm:$0xff]  }
 0x11d   :  { %2736 = vmatprep.mubr.bf16.mxu0 %v1387_v63  ;;  %3075 = vmatprep.mubr.bf16.mxu1 %v1387_v63  ;;  %v13619_v63 = vld [vmem:[#allocation3 + $0xa0] ss:$6 sps:$4 sm:$0x33]   ;;  %v698_v15 = vrot.slane %v655_v43, %v14956_v55  ;;  %v818_v16 = vrot.slane %v786_v5, %v14956_v55  ;;  %v13598_v23 = vld [vmem:[#allocation11 + $0x64] ss:$16 sps:$4 sm:$0xff]  }
 0x11e   :  { %v578_v56 = vrot.slane %v522_v18, %v14956_v55  ;;  %v564_v40 = vrot.slane %v521_v31, %v14956_v55  ;;  %v670_v11 = vrot.slane %v651_v25, %v14956_v55  ;;  %v15141_v12 = vrot.slane %v13619_v63, %v14956_v55  ;;  %v13634_v27 = vld [vmem:[#allocation3 + $0xc4] ss:$6 sps:$4 sm:$0x33]   ;;  %v13615_v25 = vld [vmem:[#allocation11 + $0xa8] ss:$16 sps:$4 sm:$0xff]  }
 0x11f   :  { %2780 = vmatpush1.bf16.msra.mxu0 %v13544_v0  ;;  %3119 = vmatpush1.bf16.msra.mxu1 %v13547_v2  ;;  %v13585_v0 = vld [vmem:[#allocation11 + $0x2c] ss:$16 sps:$4 sm:$0xff]   ;;  %v13596_v31 = vld [vmem:[#allocation11 + $0x60] ss:$16 sps:$4 sm:$0xff]  }
 0x120   :  { %2781 = vmatprep.subr.bf16.mxu0 %v13552_v3  ;;  %3120 = vmatprep.subr.bf16.mxu1 %v13555_v4  ;;  %v584_v38 = vcombine.low %v550_v29, %v578_v56  ;;  %v581_v62 = vcombine.low %v536_v53, %v564_v40  ;;  %v13620_v2 = vld [vmem:[#allocation3 + $0xac] ss:$6 sps:$4 sm:$0x33]   ;;  %v13621_v3 = vld [vmem:[#allocation3 + $0xb8] ss:$6 sps:$4 sm:$0x33]   ;;  %v718_v4 = vcombine.low %v684_v46, %v712_v48 }
 0x121   :  { %v15147_v26 = vrot.slane %v13621_v3, %v14956_v55  ;;  %v13636_v56 = vld [vmem:[#allocation3 + $0xdc] ss:$6 sps:$4 sm:$0x33]   ;;  %v13666_v5 = vld [vmem:[#allocation3 + $0x124] ss:$6 sps:$4 sm:$0x33]  }
 0x122   :  { %2737 = vmatmul.mubr.bf16.gmra.mrb[24].mxu0 %v15048_v33  ;;  %3076 = vmatmul.mubr.bf16.gmra.mrb[24].mxu1 %v15048_v33  ;;  %v13562_v33 = vld [vmem:[#allocation8 + $0x5c0] ss:$16 sps:$4 sm:$0xff]   ;;  %v13609_v53 = vld [vmem:[#allocation11 + $0x88] ss:$16 sps:$4 sm:$0xff]  }
 0x123   :  { %2782 = vmatpush1.bf16.msra.mxu0 %v13550_v6  ;;  %3121 = vmatpush1.bf16.msra.mxu1 %v13553_v7  ;;  %v790_v6 = vcombine.high %v768_v57, %v782_v59  ;;  %v13580_v7 = vld [vmem:[#allocation11 + $0x20] ss:$16 sps:$4 sm:$0xff]  }
 0x124   :  { %2783 = vmatprep.subr.bf16.mxu0 %v13558_v9  ;;  %3122 = vmatprep.subr.bf16.mxu1 %v13561_v13  ;;  %v15138_v9 = vrot.slane %v13618_v60, %v14956_v55  ;;  %v15144_v13 = vrot.slane %v13620_v2, %v14956_v55 }
 0x125   :  { %2746 = vmatprep.mubr.bf16.mxu0 %v1521_v14  ;;  %3085 = vmatprep.mubr.bf16.mxu1 %v1521_v14  ;;  %v13590_v14 = vld [vmem:[#allocation11 + $0x40] ss:$16 sps:$4 sm:$0xff]   ;;  %v846_v18 = vrot.slane %v790_v6, %v14956_v55  ;;  %v13627_v6 = vld [vmem:[#allocation11 + $0xcc] ss:$16 sps:$4 sm:$0xff]  }
 0x126   :  { %v920_v52 = vcombine.high %v15138_v9, %v15141_v12  ;;  %v919_v46 = vcombine.low %v15138_v9, %v15141_v12  ;;  %v923_v48 = vcombine.low %v15144_v13, %v15147_v26  ;;  %v13625_v9 = vld [vmem:[#allocation11 + $0xc8] ss:$16 sps:$4 sm:$0xff]  }
 0x127   :  { %2784 = vmatpush1.bf16.msra.mxu0 %v13556_v21  ;;  %3123 = vmatpush1.bf16.msra.mxu1 %v13559_v20  ;;  %v715_v21 = vcombine.low %v670_v11, %v698_v15  ;;  %v13593_v20 = vld [vmem:[#allocation11 + $0x48] ss:$16 sps:$4 sm:$0xff]   ;;  %v852_v29 = vcombine.low %v818_v16, %v846_v18  ;;  %v13633_v16 = vld [vmem:[#allocation11 + $0xec] ss:$16 sps:$4 sm:$0xff]  }
 0x128   :  { %2785 = vmatprep.subr.bf16.mxu0 %v13564_v24  ;;  %3124 = vmatprep.subr.bf16.mxu1 %v13567_v50  ;;  %v785_v24 = vcombine.low %v15125_v19, %v754_v54  ;;  %v789_v50 = vcombine.low %v768_v57, %v782_v59  ;;  %v952_v22 = vrot.slane %v920_v52, %v14956_v55  ;;  %v13650_v19 = vld [vmem:[#allocation3 + $0xf4] ss:$6 sps:$4 sm:$0x33]   ;;  %v13652_v54 = vld [vmem:[#allocation3 + $0x10c] ss:$6 sps:$4 sm:$0x33]  }
 0x129   :  { %v13653_v57 = vld [vmem:[#allocation3 + $0x118] ss:$6 sps:$4 sm:$0x33]   ;;  %v13612_v59 = vld [vmem:[#allocation11 + $0xa0] ss:$16 sps:$4 sm:$0xff]   ;;  %v938_v43 = vrot.slane %v919_v46, %v14956_v55  ;;  %v966_v63 = vrot.slane %v923_v48, %v14956_v55  ;;  %v15177_v11 = vrot.slane %v13652_v54, %v14956_v55  ;;  %v15195_v52 = vrot.slane %v13666_v5, %v14956_v55 }
 0x12a   :  { %2747 = vmatmul.mubr.bf16.gmra.mrb[28].mxu0 %v15064_v1  ;;  %3086 = vmatmul.mubr.bf16.gmra.mrb[28].mxu1 %v15064_v1  ;;  %v13574_v1 = vld [vmem:[#allocation11] ss:$16 sps:$4 sm:$0xff]   ;;  %v804_v32 = vrot.slane %v785_v24, %v14956_v55  ;;  %v15180_v15 = vrot.slane %v13653_v57, %v14956_v55  ;;  %v13669_v18 = vld [vmem:[#allocation3 + $0x148] ss:$6 sps:$4 sm:$0x33]  }
 0x12b   :  { %2786 = vmatpush1.bf16.msra.mxu0 %v13562_v33  ;;  %3125 = vmatpush1.bf16.msra.mxu1 %v13565_v28  ;;  %v924_v33 = vcombine.high %v15144_v13, %v15147_v26  ;;  %v13635_v28 = vld [vmem:[#allocation3 + $0xd0] ss:$6 sps:$4 sm:$0x33]   ;;  %v13668_v13 = vld [vmem:[#allocation3 + $0x13c] ss:$6 sps:$4 sm:$0x33]   ;;  %v983_v26 = vcombine.low %v938_v43, %v966_v63 }
 0x12c   :  { %2787 = vmatprep.subr.bf16.mxu0 %v13570_v17  ;;  %3126 = vmatprep.subr.bf16.mxu1 %v13573_v35  ;;  %v832_v17 = vrot.slane %v789_v50, %v14956_v55  ;;  %v13608_v35 = vld [vmem:[#allocation11 + $0x84] ss:$16 sps:$4 sm:$0xff]   ;;  %v1022_v40 = vrot.slane %v13635_v28, %v14956_v55  ;;  %v1192_v24 = vcombine.high %v15177_v11, %v15180_v15  ;;  %v13700_v28 = vld [vmem:[#allocation6 + $0x20] ss:$16 sps:$4 sm:$0xff]  }
 0x12d   :  { %2789 = vmatprep.mubr.bf16.mxu0 %v584_v38  ;;  %3128 = vmatprep.mubr.bf16.mxu1 %v584_v38  ;;  %v980_v37 = vrot.slane %v924_v33, %v14956_v55  ;;  %v1008_v38 = vrot.slane %v13634_v27, %v14956_v55  ;;  %v13698_v33 = vld [vmem:[#allocation6] ss:$16 sps:$4 sm:$0xff]   ;;  %v13685_v43 = vld [vmem:[#allocation3 + $0x178] ss:$6 sps:$4 sm:$0x33]  }
 0x12e   :  { %v13683_v46 = vld [vmem:[#allocation3 + $0x160] ss:$6 sps:$4 sm:$0x33]   ;;  %v13684_v57 = vld [vmem:[#allocation3 + $0x16c] ss:$6 sps:$4 sm:$0x33]  }
 0x12f   :  { %2788 = vmatpush1.bf16.msra.mxu0 %v13568_v41  ;;  %3127 = vmatpush1.bf16.msra.mxu1 %v13571_v44  ;;  %v1036_v41 = vrot.slane %v13636_v56, %v14956_v55  ;;  %v1050_v44 = vrot.slane %v13637_v30, %v14956_v55  ;;  %v986_v60 = vcombine.low %v952_v22, %v980_v37  ;;  %v13640_v37 = vld [vmem:[#allocation11 + $0x104] ss:$16 sps:$4 sm:$0xff]  }
 0x130   :  { %9311 = vmatprep.subr.bf16.mxu0 %v13576_v58  ;;  %10215 = vmatprep.subr.bf16.mxu1 %v13579_v45  ;;  %v849_v58 = vcombine.low %v804_v32, %v832_v17  ;;  %v13614_v45 = vld [vmem:[#allocation11 + $0xa4] ss:$16 sps:$4 sm:$0xff]   ;;  %v1053_v2 = vcombine.low %v1008_v38, %v1022_v40  ;;  %v15201_v30 = vrot.slane %v13668_v13, %v14956_v55  ;;  %v13704_v32 = vld [vmem:[#allocation6 + $0x60] ss:$16 sps:$4 sm:$0xff]   ;;  %v13628_v17 = vld [vmem:[#allocation11 + $0xe0] ss:$16 sps:$4 sm:$0xff]  }
 0x131   :  { %v1057_v3 = vcombine.low %v1036_v41, %v1050_v44  ;;  %v15244_v13 = vrot.slane %v13683_v46, %v14956_v55  ;;  %v13738_v46 = vld [vmem:[#allocation6 + $0x100] ss:$16 sps:$4 sm:$0xff]  }
 0x132   :  { %2790 = vmatmul.mubr.bf16.vlgmr.msra.gmra.mrb[0].mxu0 %v581_v62  ;;  %3129 = vmatmul.mubr.bf16.vlgmr.msra.gmra.mrb[0].mxu1 %v581_v62  ;;  %v1054_v62 = vcombine.high %v1008_v38, %v1022_v40  ;;  %v13643_v38 = vld [vmem:[#allocation11 + $0x10c] ss:$16 sps:$4 sm:$0xff]   ;;  %v4503_v40 = vrot.slane %v13704_v32, %v14956_v55  ;;  %v13662_v32 = vld [vmem:[#allocation11 + $0x164] ss:$16 sps:$4 sm:$0xff]  }
 0x133   :  { %9312 = vmatpush1.bf16.msra.mxu0 %v13574_v1  ;;  %10216 = vmatpush1.bf16.msra.mxu1 %v13577_v51  ;;  %v13617_v1 = vld [vmem:[#allocation11 + $0xac] ss:$16 sps:$4 sm:$0xff]  }
 0x134   :  { %9313 = vmatprep.subr.bf16.mxu0 %v13582_v42  ;;  %10217 = vmatprep.subr.bf16.mxu1 %v13585_v0  ;;  %v13651_v51 = vld [vmem:[#allocation3 + $0x100] ss:$6 sps:$4 sm:$0x33]   ;;  %v1058_v42 = vcombine.high %v1036_v41, %v1050_v44  ;;  %v13624_v0 = vld [vmem:[#allocation11 + $0xc4] ss:$16 sps:$4 sm:$0xff]  }
 0x135   :  { %2799 = vmatprep.mubr.bf16.mxu0 %v718_v4  ;;  %3138 = vmatprep.mubr.bf16.mxu1 %v718_v4  ;;  %v15171_v4 = vrot.slane %v13650_v19, %v14956_v55  ;;  %v13638_v44 = vld [vmem:[#allocation11 + $0x100] ss:$16 sps:$4 sm:$0xff]  }
 0x136   :  { %v1114_v12 = vrot.slane %v1058_v42, %v14956_v55 }
 0x137   :  { %9314 = vmatpush1.bf16.msra.mxu0 %v13580_v7  ;;  %10218 = vmatpush1.bf16.msra.mxu1 %v13583_v61  ;;  %v15174_v7 = vrot.slane %v13651_v51, %v14956_v55  ;;  %v13667_v61 = vld [vmem:[#allocation3 + $0x130] ss:$6 sps:$4 sm:$0x33]  }
 0x138   :  { %9315 = vmatprep.subr.bf16.mxu0 %v13592_v8  ;;  %10219 = vmatprep.subr.bf16.mxu1 %v13595_v10  ;;  %v13622_v8 = vld [vmem:[#allocation11 + $0xc0] ss:$16 sps:$4 sm:$0xff]   ;;  %v1086_v10 = vrot.slane %v1054_v62, %v14956_v55  ;;  %v15198_v56 = vrot.slane %v13667_v61, %v14956_v55  ;;  %v13649_v62 = vld [vmem:[#allocation11 + $0x12c] ss:$16 sps:$4 sm:$0xff]  }
 0x139   :  { %v1187_v27 = vcombine.low %v15171_v4, %v15174_v7 }
 0x13a   :  { %2800 = vmatmul.mubr.bf16.gmra.mrb[4].mxu0 %v715_v21  ;;  %3139 = vmatmul.mubr.bf16.gmra.mrb[4].mxu1 %v715_v21  ;;  %v1072_v21 = vrot.slane %v1053_v2, %v14956_v55  ;;  %v1120_v50 = vcombine.low %v1086_v10, %v1114_v12  ;;  %v1322_v51 = vcombine.high %v15195_v52, %v15198_v56 }
 0x13b   :  { %9316 = vmatpush1.bf16.msra.mxu0 %v13590_v14  ;;  %10220 = vmatpush1.bf16.msra.mxu1 %v13593_v20  ;;  %v13630_v14 = vld [vmem:[#allocation11 + $0xe4] ss:$16 sps:$4 sm:$0xff]   ;;  %v1100_v20 = vrot.slane %v1057_v3, %v14956_v55  ;;  %v1206_v42 = vrot.slane %v1187_v27, %v14956_v55  ;;  %v13644_v3 = vld [vmem:[#allocation11 + $0x120] ss:$16 sps:$4 sm:$0xff]   ;;  %v1321_v5 = vcombine.low %v15195_v52, %v15198_v56  ;;  %v13657_v56 = vld [vmem:[#allocation11 + $0x148] ss:$16 sps:$4 sm:$0xff]  }
 0x13c   :  { %9317 = vmatprep.subr.bf16.mxu0 %v13598_v23  ;;  %10221 = vmatprep.subr.bf16.mxu1 %v13601_v49  ;;  %v1188_v23 = vcombine.high %v15171_v4, %v15174_v7  ;;  %v1191_v49 = vcombine.low %v15177_v11, %v15180_v15  ;;  %v13647_v4 = vld [vmem:[#allocation11 + $0x128] ss:$16 sps:$4 sm:$0xff]   ;;  %v1354_v15 = vrot.slane %v1322_v51, %v14956_v55  ;;  %v13740_v51 = vld [vmem:[#allocation6 + $0x120] ss:$16 sps:$4 sm:$0xff]  }
 0x13d   :  { %2809 = vmatprep.mubr.bf16.mxu0 %v852_v29  ;;  %3148 = vmatprep.mubr.bf16.mxu1 %v852_v29  ;;  %v13702_v29 = vld [vmem:[#allocation6 + $0x40] ss:$16 sps:$4 sm:$0xff]   ;;  %v1117_v41 = vcombine.low %v1072_v21, %v1100_v20  ;;  %v15251_v20 = vrot.slane %v13684_v57, %v14956_v55 }
 0x13e   :  { %v4489_v22 = vrot.slane %v13702_v29, %v14956_v55  ;;  %v13659_v21 = vld [vmem:[#allocation11 + $0x14c] ss:$16 sps:$4 sm:$0xff]   ;;  %v13654_v29 = vld [vmem:[#allocation11 + $0x140] ss:$16 sps:$4 sm:$0xff]  }
 0x13f   :  { %9318 = vmatpush1.bf16.msra.mxu0 %v13596_v31  ;;  %10222 = vmatpush1.bf16.msra.mxu1 %v13599_v34  ;;  %v15204_v31 = vrot.slane %v13669_v18, %v14956_v55  ;;  %v13631_v34 = vld [vmem:[#allocation11 + $0xe8] ss:$16 sps:$4 sm:$0xff]   ;;  %v13656_v18 = vld [vmem:[#allocation11 + $0x144] ss:$16 sps:$4 sm:$0xff]   ;;  %v13744_v57 = vld [vmem:[#allocation6 + $0x160] ss:$16 sps:$4 sm:$0xff]  }
 0x140   :  { %9319 = vmatprep.subr.bf16.mxu0 %v13608_v35  ;;  %10223 = vmatprep.subr.bf16.mxu1 %v13611_v36  ;;  %v4461_v35 = vrot.slane %v13698_v33, %v14956_v55  ;;  %v4475_v36 = vrot.slane %v13700_v28, %v14956_v55 }
 0x141   :  { %v1326_v54 = vcombine.high %v15201_v30, %v15204_v31 }
 0x142   :  { %2810 = vmatmul.mubr.bf16.gmra.mrb[8].mxu0 %v849_v58  ;;  %3149 = vmatmul.mubr.bf16.gmra.mrb[8].mxu1 %v849_v58  ;;  %v13641_v58 = vld [vmem:[#allocation11 + $0x108] ss:$16 sps:$4 sm:$0xff]   ;;  %v4511_v48 = vcombine.low %v4461_v35, %v4475_v36  ;;  %v4512_v19 = vcombine.high %v4461_v35, %v4475_v36  ;;  %v1340_v35 = vrot.slane %v1321_v5, %v14956_v55 }
 0x143   :  { %9320 = vmatpush1.bf16.msra.mxu0 %v13606_v39  ;;  %10224 = vmatpush1.bf16.msra.mxu1 %v13609_v53  ;;  %v1220_v39 = vrot.slane %v1188_v23, %v14956_v55  ;;  %v1248_v53 = vrot.slane %v1192_v24, %v14956_v55  ;;  %v1382_v61 = vrot.slane %v1326_v54, %v14956_v55  ;;  %v13742_v54 = vld [vmem:[#allocation6 + $0x140] ss:$16 sps:$4 sm:$0xff]   ;;  %v13673_v5 = vld [vmem:[#allocation11 + $0x188] ss:$16 sps:$4 sm:$0xff]  }
 0x144   :  { %9321 = vmatprep.subr.bf16.mxu0 %v13614_v45  ;;  %10225 = vmatprep.subr.bf16.mxu1 %v13617_v1  ;;  %v13682_v45 = vld [vmem:[#allocation3 + $0x154] ss:$6 sps:$4 sm:$0x33]   ;;  %v15229_v7 = vrot.slane %v4511_v48, %v14956_v55 }
 0x145   :  { %2819 = vmatprep.mubr.bf16.mxu0 %v986_v60  ;;  %3158 = vmatprep.mubr.bf16.mxu1 %v986_v60  ;;  %v13646_v1 = vld [vmem:[#allocation11 + $0x124] ss:$16 sps:$4 sm:$0xff]   ;;  %v4516_v60 = vcombine.high %v4489_v22, %v4503_v40  ;;  %v1254_v63 = vcombine.low %v1220_v39, %v1248_v53  ;;  %v15241_v12 = vrot.slane %v13682_v45, %v14956_v55 }
 0x147   :  { %9322 = vmatpush1.bf16.msra.mxu0 %v13612_v59  ;;  %10226 = vmatpush1.bf16.msra.mxu1 %v13615_v25  ;;  %v4515_v59 = vcombine.low %v4489_v22, %v4503_v40  ;;  %v1234_v25 = vrot.slane %v1191_v49, %v14956_v55  ;;  %v15222_v2 = vrot.slane %v4516_v60, %v14956_v55  ;;  %v13660_v22 = vld [vmem:[#allocation11 + $0x160] ss:$16 sps:$4 sm:$0xff]  }
 0x148   :  { %9323 = vmatprep.subr.bf16.mxu0 %v13624_v0  ;;  %10227 = vmatprep.subr.bf16.mxu1 %v13627_v6  ;;  %v15219_v0 = vrot.slane %v4512_v19, %v14956_v55  ;;  %v1325_v6 = vcombine.low %v15201_v30, %v15204_v31 }
 0x149   :  { %v15232_v11 = vrot.slane %v4515_v59, %v14956_v55  ;;  %v1251_v52 = vcombine.low %v1206_v42, %v1234_v25  ;;  %v5005_v42 = vrot.slane %v13738_v46, %v14956_v55 }
 0x14a   :  { %2820 = vmatmul.mubr.bf16.gmra.mrb[12].mxu0 %v983_v26  ;;  %3159 = vmatmul.mubr.bf16.gmra.mrb[12].mxu1 %v983_v26  ;;  %v15238_v10 = vcombine.high %v15219_v0, %v15222_v2  ;;  %v13722_v26 = vld [vmem:[#allocation6 + $0xc0] ss:$16 sps:$4 sm:$0xff]   ;;  %v1368_v36 = vrot.slane %v1325_v6, %v14956_v55  ;;  %v13678_v6 = vld [vmem:[#allocation11 + $0x1a4] ss:$16 sps:$4 sm:$0xff]  }
 0x14b   :  { %9324 = vmatpush1.bf16.msra.mxu0 %v13622_v8  ;;  %10228 = vmatpush1.bf16.msra.mxu1 %v13625_v9  ;;  %v13718_v8 = vld [vmem:[#allocation6 + $0x80] ss:$16 sps:$4 sm:$0xff]   ;;  %v4761_v27 = vrot.slane %v13722_v26, %v14956_v55 }
 0x14c   :  { %9325 = vmatprep.subr.bf16.mxu0 %v13630_v14  ;;  %10229 = vmatprep.subr.bf16.mxu1 %v13633_v16  ;;  %v13720_v9 = vld [vmem:[#allocation6 + $0xa0] ss:$16 sps:$4 sm:$0xff]   ;;  %v15248_v16 = vcombine.high %v15229_v7, %v15232_v11  ;;  %v4733_v23 = vrot.slane %v13718_v8, %v14956_v55  ;;  %v1385_v19 = vcombine.low %v1340_v35, %v1368_v36 }
 0x14d   :  { %2829 = vmatprep.mubr.bf16.mxu0 %v1120_v50  ;;  %3168 = vmatprep.mubr.bf16.mxu1 %v1120_v50  ;;  %v13724_v14 = vld [vmem:[#allocation6 + $0xe0] ss:$16 sps:$4 sm:$0xff]   ;;  %v4747_v24 = vrot.slane %v13720_v9, %v14956_v55  ;;  %v15256_v50 = vrot.slane %v13685_v43, %v14956_v55  ;;  %v5019_v43 = vrot.slane %v13740_v51, %v14956_v55 }
 0x14e   :  { %v4775_v49 = vrot.slane %v13724_v14, %v14956_v55 }
 0x14f   :  { %9326 = vmatpush1.bf16.msra.mxu0 %v13628_v17  ;;  %10230 = vmatpush1.bf16.msra.mxu1 %v13631_v34  ;;  %v4784_v33 = vcombine.high %v4733_v23, %v4747_v24  ;;  %v4783_v28 = vcombine.low %v4733_v23, %v4747_v24  ;;  %v13665_v17 = vld [vmem:[#allocation11 + $0x16c] ss:$16 sps:$4 sm:$0xff]   ;;  %v1388_v34 = vcombine.low %v1354_v15, %v1382_v61 }
 0x150   :  { %9327 = vmatprep.subr.bf16.mxu0 %v13640_v37  ;;  %10231 = vmatprep.subr.bf16.mxu1 %v13643_v38  ;;  %v4788_v30 = vcombine.high %v4761_v27, %v4775_v49  ;;  %v4787_v31 = vcombine.low %v4761_v27, %v4775_v49  ;;  %v13663_v37 = vld [vmem:[#allocation11 + $0x168] ss:$16 sps:$4 sm:$0xff]   ;;  %v1456_v38 = vcombine.high %v15241_v12, %v15244_v13  ;;  %v13681_v15 = vld [vmem:[#allocation11 + $0x1ac] ss:$16 sps:$4 sm:$0xff]  }
 0x151   :  { %v1460_v39 = vcombine.high %v15251_v20, %v15256_v50  ;;  %v15267_v53 = vrot.slane %v4784_v33, %v14956_v55  ;;  %v1459_v25 = vcombine.low %v15251_v20, %v15256_v50  ;;  %v5056_v61 = vcombine.high %v5005_v42, %v5019_v43  ;;  %v13688_v20 = vld [vmem:[#allocation11 + $0x1c4] ss:$16 sps:$4 sm:$0xff]   ;;  %v13691_v23 = vld [vmem:[#allocation11 + $0x1cc] ss:$16 sps:$4 sm:$0xff]  }
 0x152   :  { %2830 = vmatmul.mubr.bf16.gmra.mrb[16].mxu0 %v1117_v41  ;;  %3169 = vmatmul.mubr.bf16.gmra.mrb[16].mxu1 %v1117_v41  ;;  %v15270_v40 = vrot.slane %v4788_v30, %v14956_v55  ;;  %v13672_v41 = vld [vmem:[#allocation11 + $0x184] ss:$16 sps:$4 sm:$0xff]   ;;  %v15276_v45 = vrot.slane %v4787_v31, %v14956_v55  ;;  %v1488_v60 = vrot.slane %v1456_v38, %v14956_v55  ;;  %v13758_v33 = vld [vmem:[#allocation6 + $0x180] ss:$16 sps:$4 sm:$0xff]  }
 0x153   :  { %9328 = vmatpush1.bf16.msra.mxu0 %v13638_v44  ;;  %10232 = vmatpush1.bf16.msra.mxu1 %v13641_v58  ;;  %v13675_v44 = vld [vmem:[#allocation11 + $0x18c] ss:$16 sps:$4 sm:$0xff]   ;;  %v15273_v58 = vrot.slane %v4783_v28, %v14956_v55  ;;  %v5055_v9 = vcombine.low %v5005_v42, %v5019_v43  ;;  %v15299_v24 = vrot.slane %v5056_v61, %v14956_v55  ;;  %v13706_v42 = vld [vmem:[#allocation11 + $0x200] ss:$16 sps:$4 sm:$0xff]   ;;  %v13714_v61 = vld [vmem:[#allocation11 + $0x224] ss:$16 sps:$4 sm:$0xff]  }
 0x154   :  { %9329 = vmatprep.subr.bf16.mxu0 %v13646_v1  ;;  %10233 = vmatprep.subr.bf16.mxu1 %v13649_v62  ;;  %v15280_v48 = vcombine.high %v15267_v53, %v15270_v40  ;;  %v1455_v1 = vcombine.low %v15241_v12, %v15244_v13  ;;  %v1516_v62 = vrot.slane %v1460_v39, %v14956_v55  ;;  %v13676_v12 = vld [vmem:[#allocation11 + $0x1a0] ss:$16 sps:$4 sm:$0xff]   ;;  %v13679_v13 = vld [vmem:[#allocation11 + $0x1a8] ss:$16 sps:$4 sm:$0xff]   ;;  %v13760_v28 = vld [vmem:[#allocation6 + $0x1a0] ss:$16 sps:$4 sm:$0xff]  }
 0x155   :  { %2839 = vmatprep.mubr.bf16.mxu0 %v1254_v63  ;;  %3178 = vmatprep.mubr.bf16.mxu1 %v1254_v63  ;;  %v15286_v59 = vcombine.high %v15273_v58, %v15276_v45  ;;  %v5033_v63 = vrot.slane %v13742_v54, %v14956_v55  ;;  %v15305_v27 = vrot.slane %v5055_v9, %v14956_v55  ;;  %v13764_v31 = vld [vmem:[#allocation6 + $0x1e0] ss:$16 sps:$4 sm:$0xff]   ;;  %v13692_v39 = vld [vmem:[#allocation11 + $0x1e0] ss:$16 sps:$4 sm:$0xff]   ;;  %v13708_v54 = vld [vmem:[#allocation11 + $0x204] ss:$16 sps:$4 sm:$0xff]  }
 0x156   :  { %v1522_v26 = vcombine.low %v1488_v60, %v1516_v62  ;;  %v1474_v14 = vrot.slane %v1455_v1, %v14956_v55  ;;  %v5291_v35 = vrot.slane %v13760_v28, %v14956_v55  ;;  %v5319_v38 = vrot.slane %v13764_v31, %v14956_v55  ;;  %v13731_v28 = vld [vmem:[#allocation11 + $0x24c] ss:$16 sps:$4 sm:$0xff]  }
 0x157   :  { %9330 = vmatpush1.bf16.msra.mxu0 %v13644_v3  ;;  %10234 = vmatpush1.bf16.msra.mxu1 %v13647_v4  ;;  %v5047_v3 = vrot.slane %v13744_v57, %v14956_v55  ;;  %v13670_v4 = vld [vmem:[#allocation11 + $0x180] ss:$16 sps:$4 sm:$0xff]   ;;  %v13711_v57 = vld [vmem:[#allocation11 + $0x20c] ss:$16 sps:$4 sm:$0xff]   ;;  %v4575_v43 = vcombine.low %v15229_v7, %v15232_v11  ;;  %v4851_v9 = vcombine.low %v15267_v53, %v15270_v40  ;;  %v13729_v40 = vld [vmem:[#allocation11 + $0x248] ss:$16 sps:$4 sm:$0xff]  }
 0x158   :  { %9331 = vmatprep.subr.bf16.mxu0 %v13656_v18  ;;  %10235 = vmatprep.subr.bf16.mxu1 %v13659_v21  ;;  %v1502_v21 = vrot.slane %v1459_v25, %v14956_v55  ;;  %v13709_v25 = vld [vmem:[#allocation11 + $0x208] ss:$16 sps:$4 sm:$0xff]   ;;  %v13726_v53 = vld [vmem:[#allocation11 + $0x240] ss:$16 sps:$4 sm:$0xff]   ;;  %v4847_v31 = vcombine.low %v15273_v58, %v15276_v45  ;;  %v13804_v58 = vld [vmem:[#allocation6 + $0x2e0] ss:$16 sps:$4 sm:$0xff]  }
 0x159   :  { %v5060_v8 = vcombine.high %v5033_v63, %v5047_v3  ;;  %v5059_v18 = vcombine.low %v5033_v63, %v5047_v3  ;;  %v13778_v63 = vld [vmem:[#allocation6 + $0x200] ss:$16 sps:$4 sm:$0xff]  }
 0x15a   :  { %2840 = vmatmul.mubr.bf16.gmra.mrb[20].mxu0 %v1251_v52  ;;  %3179 = vmatmul.mubr.bf16.gmra.mrb[20].mxu1 %v1251_v52  ;;  %v1519_v30 = vcombine.low %v1474_v14, %v1502_v21  ;;  %v13780_v3 = vld [vmem:[#allocation6 + $0x220] ss:$16 sps:$4 sm:$0xff]   ;;  %v5549_v7 = vrot.slane %v13778_v63, %v14956_v55  ;;  %v13715_v21 = vld [vmem:[#allocation11 + $0x228] ss:$16 sps:$4 sm:$0xff]  }
 0x15b   :  { %9332 = vmatpush1.bf16.msra.mxu0 %v13654_v29  ;;  %10236 = vmatpush1.bf16.msra.mxu1 %v13657_v56  ;;  %v15302_v50 = vrot.slane %v5060_v8, %v14956_v55  ;;  %v15308_v49 = vrot.slane %v5059_v18, %v14956_v55  ;;  %v13762_v29 = vld [vmem:[#allocation6 + $0x1c0] ss:$16 sps:$4 sm:$0xff]   ;;  %v5563_v11 = vrot.slane %v13780_v3, %v14956_v55  ;;  %v13712_v18 = vld [vmem:[#allocation11 + $0x220] ss:$16 sps:$4 sm:$0xff]  }
 0x15c   :  { %9333 = vmatprep.subr.bf16.mxu0 %v13662_v32  ;;  %10237 = vmatprep.subr.bf16.mxu1 %v13665_v17  ;;  %v13686_v32 = vld [vmem:[#allocation11 + $0x1c0] ss:$16 sps:$4 sm:$0xff]   ;;  %v13689_v17 = vld [vmem:[#allocation11 + $0x1c8] ss:$16 sps:$4 sm:$0xff]   ;;  %v5305_v36 = vrot.slane %v13762_v29, %v14956_v55  ;;  %v13717_v8 = vld [vmem:[#allocation11 + $0x22c] ss:$16 sps:$4 sm:$0xff]  }
 0x15d   :  { %2849 = vmatprep.mubr.bf16.mxu0 %v1388_v34  ;;  %3188 = vmatprep.mubr.bf16.mxu1 %v1388_v34  ;;  %v15312_v52 = vcombine.high %v15299_v24, %v15302_v50  ;;  %v15316_v56 = vcombine.high %v15305_v27, %v15308_v49  ;;  %v5277_v34 = vrot.slane %v13758_v33, %v14956_v55  ;;  %v13728_v33 = vld [vmem:[#allocation11 + $0x244] ss:$16 sps:$4 sm:$0xff]  }
 0x15e   :  { %v5332_v1 = vcombine.high %v5305_v36, %v5319_v38  ;;  %v5331_v51 = vcombine.low %v5305_v36, %v5319_v38  ;;  %v5599_v14 = vcombine.low %v5549_v7, %v5563_v11  ;;  %v13798_v36 = vld [vmem:[#allocation6 + $0x280] ss:$16 sps:$4 sm:$0xff]   ;;  %v5119_v3 = vcombine.low %v15305_v27, %v15308_v49 }
 0x15f   :  { %9334 = vmatpush1.bf16.msra.mxu0 %v13660_v22  ;;  %10238 = vmatpush1.bf16.msra.mxu1 %v13663_v37  ;;  %v13694_v22 = vld [vmem:[#allocation11 + $0x1e4] ss:$16 sps:$4 sm:$0xff]   ;;  %v13697_v37 = vld [vmem:[#allocation11 + $0x1ec] ss:$16 sps:$4 sm:$0xff]   ;;  %v5327_v46 = vcombine.low %v5277_v34, %v5291_v35 }
 0x160   :  { %9335 = vmatprep.subr.bf16.mxu0 %v13672_v41  ;;  %10239 = vmatprep.subr.bf16.mxu1 %v13675_v44  ;;  %v4579_v41 = vcombine.low %v15219_v0, %v15222_v2  ;;  %v5328_v44 = vcombine.high %v5277_v34, %v5291_v35  ;;  %v15328_v62 = vrot.slane %v5332_v1, %v14956_v55  ;;  %v13802_v38 = vld [vmem:[#allocation6 + $0x2c0] ss:$16 sps:$4 sm:$0xff]   ;;  %v13732_v1 = vld [vmem:[#allocation11 + $0x260] ss:$16 sps:$4 sm:$0xff]  }
 0x161   :  { %v15331_v0 = vrot.slane %v5327_v46, %v14956_v55  ;;  %v15334_v2 = vrot.slane %v5331_v51, %v14956_v55  ;;  %v15361_v34 = vrot.slane %v5599_v14, %v14956_v55  ;;  %v5849_v46 = vrot.slane %v13802_v38, %v14956_v55  ;;  %v13735_v51 = vld [vmem:[#allocation11 + $0x268] ss:$16 sps:$4 sm:$0xff]   ;;  %v13824_v14 = vld [vmem:[#allocation6 + $0x360] ss:$16 sps:$4 sm:$0xff]   ;;  %v13774_v38 = vld [vmem:[#allocation11 + $0x2e4] ss:$16 sps:$4 sm:$0xff]  }
 0x162   :  { %2850 = vmatmul.mubr.bf16.gmra.mrb[24].mxu0 %v1385_v19  ;;  %3189 = vmatmul.mubr.bf16.gmra.mrb[24].mxu1 %v1385_v19  ;;  %v13695_v19 = vld [vmem:[#allocation11 + $0x1e8] ss:$16 sps:$4 sm:$0xff]   ;;  %v15325_v60 = vrot.slane %v5328_v44, %v14956_v55 }
 0x163   :  { %9336 = vmatpush1.bf16.msra.mxu0 %v13670_v4  ;;  %10240 = vmatpush1.bf16.msra.mxu1 %v13673_v5  ;;  %v15344_v5 = vcombine.high %v15331_v0, %v15334_v2 }
 0x164   :  { %9337 = vmatprep.subr.bf16.mxu0 %v13678_v6  ;;  %10241 = vmatprep.subr.bf16.mxu1 %v13681_v15  ;;  %v15340_v4 = vcombine.high %v15325_v60, %v15328_v62  ;;  %v13782_v6 = vld [vmem:[#allocation6 + $0x240] ss:$16 sps:$4 sm:$0xff]   ;;  %v5395_v49 = vcombine.low %v15325_v60, %v15328_v62  ;;  %v13768_v62 = vld [vmem:[#allocation11 + $0x2c4] ss:$16 sps:$4 sm:$0xff]  }
 0x165   :  { %2859 = vmatprep.mubr.bf16.mxu0 %v1522_v26  ;;  %3198 = vmatprep.mubr.bf16.mxu1 %v1522_v26  ;;  %v13784_v15 = vld [vmem:[#allocation6 + $0x260] ss:$16 sps:$4 sm:$0xff]   ;;  %v5600_v26 = vcombine.high %v5549_v7, %v5563_v11 }
 0x167   :  { %9338 = vmatpush1.bf16.msra.mxu0 %v13676_v12  ;;  %10242 = vmatpush1.bf16.msra.mxu1 %v13679_v13  ;;  %v5577_v12 = vrot.slane %v13782_v6, %v14956_v55  ;;  %v5591_v13 = vrot.slane %v13784_v15, %v14956_v55  ;;  %v15353_v29 = vrot.slane %v5600_v26, %v14956_v55  ;;  %v13754_v6 = vld [vmem:[#allocation11 + $0x2a4] ss:$16 sps:$4 sm:$0xff]   ;;  %v13757_v15 = vld [vmem:[#allocation11 + $0x2ac] ss:$16 sps:$4 sm:$0xff]  }
 0x168   :  { %9339 = vmatprep.subr.bf16.mxu0 %v13688_v20  ;;  %10243 = vmatprep.subr.bf16.mxu1 %v13691_v23 }
 0x169   :  { %v5604_v20 = vcombine.high %v5577_v12, %v5591_v13  ;;  %v5603_v23 = vcombine.low %v5577_v12, %v5591_v13  ;;  %v13820_v12 = vld [vmem:[#allocation6 + $0x320] ss:$16 sps:$4 sm:$0xff]  }
 0x16a   :  { %2860 = vmatmul.mubr.bf16.gmra.mrb[28].mxu0 %v1519_v30  ;;  %3199 = vmatmul.mubr.bf16.gmra.mrb[28].mxu1 %v1519_v30  ;;  %v13822_v13 = vld [vmem:[#allocation6 + $0x340] ss:$16 sps:$4 sm:$0xff]  }
 0x16b   :  { %9340 = vmatpush1.bf16.msra.mxu0 %v13686_v32  ;;  %10244 = vmatpush1.bf16.msra.mxu1 %v13689_v17  ;;  %v15356_v30 = vrot.slane %v5604_v20, %v14956_v55  ;;  %v13734_v32 = vld [vmem:[#allocation11 + $0x264] ss:$16 sps:$4 sm:$0xff]   ;;  %v13737_v17 = vld [vmem:[#allocation11 + $0x26c] ss:$16 sps:$4 sm:$0xff]   ;;  %v15364_v35 = vrot.slane %v5603_v23, %v14956_v55  ;;  %v6107_v23 = vrot.slane %v13820_v12, %v14956_v55 }
 0x16c   :  { %9341 = vmatprep.subr.bf16.mxu0 %v13694_v22  ;;  %10245 = vmatprep.subr.bf16.mxu1 %v13697_v37  ;;  %v13800_v37 = vld [vmem:[#allocation6 + $0x2a0] ss:$16 sps:$4 sm:$0xff]   ;;  %v6121_v60 = vrot.slane %v13822_v13, %v14956_v55 }
 0x16d   :  { %9343 = vmatprep.mubr.bf16.mxu0 %v4579_v41  ;;  %10247 = vmatprep.mubr.bf16.mxu1 %v4579_v41  ;;  %v15368_v22 = vcombine.high %v15353_v29, %v15356_v30  ;;  %v15372_v45 = vcombine.high %v15361_v34, %v15364_v35  ;;  %v5821_v41 = vrot.slane %v13798_v36, %v14956_v55 }
 0x16e   :  { %v5835_v44 = vrot.slane %v13800_v37, %v14956_v55 }
 0x16f   :  { %9342 = vmatpush1.bf16.msra.mxu0 %v13692_v39  ;;  %10246 = vmatpush1.bf16.msra.mxu1 %v13695_v19  ;;  %v5123_v39 = vcombine.low %v15299_v24, %v15302_v50  ;;  %v5863_v19 = vrot.slane %v13804_v58, %v14956_v55  ;;  %v13777_v58 = vld [vmem:[#allocation11 + $0x2ec] ss:$16 sps:$4 sm:$0xff]  }
 0x170   :  { %9424 = vmatprep.subr.bf16.mxu0 %v13708_v54  ;;  %10328 = vmatprep.subr.bf16.mxu1 %v13711_v57  ;;  %v13748_v54 = vld [vmem:[#allocation11 + $0x284] ss:$16 sps:$4 sm:$0xff]   ;;  %v13751_v57 = vld [vmem:[#allocation11 + $0x28c] ss:$16 sps:$4 sm:$0xff]   ;;  %v5871_v50 = vcombine.low %v5821_v41, %v5835_v44 }
 0x171   :  { %v5876_v24 = vcombine.high %v5849_v46, %v5863_v19  ;;  %v5875_v63 = vcombine.low %v5849_v46, %v5863_v19  ;;  %v13775_v46 = vld [vmem:[#allocation11 + $0x2e8] ss:$16 sps:$4 sm:$0xff]  }
 0x172   :  { %9344 = vmatmul.mubr.bf16.vlgmr.msra.gmra.mrb[32].mxu0 %v4575_v43  ;;  %10248 = vmatmul.mubr.bf16.vlgmr.msra.gmra.mrb[32].mxu1 %v4575_v43  ;;  %v13749_v43 = vld [vmem:[#allocation11 + $0x288] ss:$16 sps:$4 sm:$0xff]   ;;  %v15389_v7 = vrot.slane %v5871_v50, %v14956_v55 }
 0x173   :  { %9425 = vmatpush1.bf16.msra.mxu0 %v13706_v42  ;;  %10329 = vmatpush1.bf16.msra.mxu1 %v13709_v25  ;;  %v5872_v42 = vcombine.high %v5821_v41, %v5835_v44  ;;  %v13746_v25 = vld [vmem:[#allocation11 + $0x280] ss:$16 sps:$4 sm:$0xff]   ;;  %v15392_v11 = vrot.slane %v5875_v63, %v14956_v55 }
 0x174   :  { %9426 = vmatprep.subr.bf16.mxu0 %v13714_v61  ;;  %10330 = vmatprep.subr.bf16.mxu1 %v13717_v8  ;;  %v15386_v8 = vrot.slane %v5876_v24, %v14956_v55  ;;  %v13772_v44 = vld [vmem:[#allocation11 + $0x2e0] ss:$16 sps:$4 sm:$0xff]   ;;  %v13791_v24 = vld [vmem:[#allocation11 + $0x30c] ss:$16 sps:$4 sm:$0xff]  }
 0x175   :  { %9353 = vmatprep.mubr.bf16.mxu0 %v4851_v9  ;;  %10257 = vmatprep.mubr.bf16.mxu1 %v4851_v9  ;;  %v15383_v61 = vrot.slane %v5872_v42, %v14956_v55  ;;  %v13818_v9 = vld [vmem:[#allocation6 + $0x300] ss:$16 sps:$4 sm:$0xff]   ;;  %v15402_v26 = vcombine.high %v15389_v7, %v15392_v11 }
 0x176   :  { %v6093_v20 = vrot.slane %v13818_v9, %v14956_v55  ;;  %v13844_v42 = vld [vmem:[#allocation6 + $0x3e0] ss:$16 sps:$4 sm:$0xff]   ;;  %v13789_v9 = vld [vmem:[#allocation11 + $0x308] ss:$16 sps:$4 sm:$0xff]  }
 0x177   :  { %9427 = vmatpush1.bf16.msra.mxu0 %v13712_v18  ;;  %10331 = vmatpush1.bf16.msra.mxu1 %v13715_v21  ;;  %v15396_v27 = vcombine.high %v15383_v61, %v15386_v8  ;;  %v13752_v18 = vld [vmem:[#allocation11 + $0x2a0] ss:$16 sps:$4 sm:$0xff]   ;;  %v13755_v21 = vld [vmem:[#allocation11 + $0x2a8] ss:$16 sps:$4 sm:$0xff]   ;;  %v6407_v63 = vrot.slane %v13844_v42, %v14956_v55  ;;  %v13851_v42 = vld [vmem:[#allocation11 + $0x3cc] ss:$16 sps:$4 sm:$0xff]  }
 0x178   :  { %9428 = vmatprep.subr.bf16.mxu0 %v13728_v33  ;;  %10332 = vmatprep.subr.bf16.mxu1 %v13731_v28  ;;  %v13771_v33 = vld [vmem:[#allocation11 + $0x2cc] ss:$16 sps:$4 sm:$0xff]   ;;  %v6135_v28 = vrot.slane %v13824_v14, %v14956_v55  ;;  %v13794_v14 = vld [vmem:[#allocation11 + $0x324] ss:$16 sps:$4 sm:$0xff]  }
 0x17a   :  { %9354 = vmatmul.mubr.bf16.gmra.mrb[36].mxu0 %v4847_v31  ;;  %10258 = vmatmul.mubr.bf16.gmra.mrb[36].mxu1 %v4847_v31  ;;  %v6143_v31 = vcombine.low %v6093_v20, %v6107_v23  ;;  %v6148_v36 = vcombine.high %v6121_v60, %v6135_v28  ;;  %v6147_v37 = vcombine.low %v6121_v60, %v6135_v28  ;;  %v13792_v60 = vld [vmem:[#allocation11 + $0x320] ss:$16 sps:$4 sm:$0xff]   ;;  %v13808_v28 = vld [vmem:[#allocation11 + $0x344] ss:$16 sps:$4 sm:$0xff]  }
 0x17b   :  { %9429 = vmatpush1.bf16.msra.mxu0 %v13726_v53  ;;  %10333 = vmatpush1.bf16.msra.mxu1 %v13729_v40  ;;  %v13766_v53 = vld [vmem:[#allocation11 + $0x2c0] ss:$16 sps:$4 sm:$0xff]   ;;  %v6144_v40 = vcombine.high %v6093_v20, %v6107_v23 }
 0x17c   :  { %9430 = vmatprep.subr.bf16.mxu0 %v13734_v32  ;;  %10334 = vmatprep.subr.bf16.mxu1 %v13737_v17  ;;  %v5391_v32 = vcombine.low %v15331_v0, %v15334_v2  ;;  %v13769_v17 = vld [vmem:[#allocation11 + $0x2c8] ss:$16 sps:$4 sm:$0xff]   ;;  %v15414_v41 = vrot.slane %v6148_v36, %v14956_v55  ;;  %v5667_v0 = vcombine.low %v15353_v29, %v15356_v30  ;;  %v13788_v30 = vld [vmem:[#allocation11 + $0x304] ss:$16 sps:$4 sm:$0xff]  }
 0x17d   :  { %9363 = vmatprep.mubr.bf16.mxu0 %v5123_v39  ;;  %10267 = vmatprep.mubr.bf16.mxu1 %v5123_v39  ;;  %v15411_v39 = vrot.slane %v6144_v40, %v14956_v55  ;;  %v15419_v2 = vrot.slane %v6143_v31, %v14956_v55  ;;  %v15422_v19 = vrot.slane %v6147_v37, %v14956_v55  ;;  %v13806_v40 = vld [vmem:[#allocation11 + $0x340] ss:$16 sps:$4 sm:$0xff]   ;;  %v13809_v31 = vld [vmem:[#allocation11 + $0x348] ss:$16 sps:$4 sm:$0xff]  }
 0x17e   :  { %v13812_v37 = vld [vmem:[#allocation11 + $0x360] ss:$16 sps:$4 sm:$0xff]  }
 0x17f   :  { %9431 = vmatpush1.bf16.msra.mxu0 %v13732_v1  ;;  %10335 = vmatpush1.bf16.msra.mxu1 %v13735_v51  ;;  %v13838_v1 = vld [vmem:[#allocation6 + $0x380] ss:$16 sps:$4 sm:$0xff]   ;;  %v15430_v29 = vcombine.high %v15419_v2, %v15422_v19  ;;  %v6211_v36 = vcombine.low %v15411_v39, %v15414_v41 }
 0x180   :  { %9432 = vmatprep.subr.bf16.mxu0 %v13748_v54  ;;  %10336 = vmatprep.subr.bf16.mxu1 %v13751_v57  ;;  %v13840_v51 = vld [vmem:[#allocation6 + $0x3a0] ss:$16 sps:$4 sm:$0xff]   ;;  %v15426_v54 = vcombine.high %v15411_v39, %v15414_v41  ;;  %v6365_v50 = vrot.slane %v13838_v1, %v14956_v55  ;;  %v13834_v39 = vld [vmem:[#allocation11 + $0x3a4] ss:$16 sps:$4 sm:$0xff]   ;;  %v13832_v1 = vld [vmem:[#allocation11 + $0x3a0] ss:$16 sps:$4 sm:$0xff]  }
 0x181   :  { %v13842_v57 = vld [vmem:[#allocation6 + $0x3c0] ss:$16 sps:$4 sm:$0xff]  }
 0x182   :  { %9364 = vmatmul.mubr.bf16.gmra.mrb[40].mxu0 %v5119_v3  ;;  %10268 = vmatmul.mubr.bf16.gmra.mrb[40].mxu1 %v5119_v3  ;;  %v5663_v3 = vcombine.low %v15361_v34, %v15364_v35  ;;  %v13837_v41 = vld [vmem:[#allocation11 + $0x3ac] ss:$16 sps:$4 sm:$0xff]  }
 0x183   :  { %9433 = vmatpush1.bf16.msra.mxu0 %v13746_v25  ;;  %10337 = vmatpush1.bf16.msra.mxu1 %v13749_v43  ;;  %v6379_v25 = vrot.slane %v13840_v51, %v14956_v55  ;;  %v6393_v43 = vrot.slane %v13842_v57, %v14956_v55  ;;  %v13835_v51 = vld [vmem:[#allocation11 + $0x3a8] ss:$16 sps:$4 sm:$0xff]   ;;  %v13848_v57 = vld [vmem:[#allocation11 + $0x3c4] ss:$16 sps:$4 sm:$0xff]  }
 0x184   :  { %9434 = vmatprep.subr.bf16.mxu0 %v13754_v6  ;;  %10338 = vmatprep.subr.bf16.mxu1 %v13757_v15 }
 0x185   :  { %9373 = vmatprep.mubr.bf16.mxu0 %v5395_v49  ;;  %10277 = vmatprep.mubr.bf16.mxu1 %v5395_v49  ;;  %v6416_v6 = vcombine.high %v6365_v50, %v6379_v25  ;;  %v6415_v15 = vcombine.low %v6365_v50, %v6379_v25  ;;  %v13786_v49 = vld [vmem:[#allocation11 + $0x300] ss:$16 sps:$4 sm:$0xff]   ;;  %v6420_v12 = vcombine.high %v6393_v43, %v6407_v63  ;;  %v13857_v50 = vld [vmem:[#allocation11 + $0x3ec] ss:$16 sps:$4 sm:$0xff]  }
 0x186   :  { %v6419_v13 = vcombine.low %v6393_v43, %v6407_v63  ;;  %v13852_v25 = vld [vmem:[#allocation11 + $0x3e0] ss:$16 sps:$4 sm:$0xff]   ;;  %v13855_v43 = vld [vmem:[#allocation11 + $0x3e8] ss:$16 sps:$4 sm:$0xff]   ;;  %v13860_v63 = vld [vmem:[#allocation11 + $0x404] ss:$16 sps:$4 sm:$0xff]  }
 0x187   :  { %9435 = vmatpush1.bf16.msra.mxu0 %v13752_v18  ;;  %10339 = vmatpush1.bf16.msra.mxu1 %v13755_v21  ;;  %v13797_v18 = vld [vmem:[#allocation11 + $0x32c] ss:$16 sps:$4 sm:$0xff]   ;;  %v5939_v21 = vcombine.low %v15383_v61, %v15386_v8  ;;  %v6443_v20 = vrot.slane %v6416_v6, %v14956_v55  ;;  %v6471_v23 = vrot.slane %v6420_v12, %v14956_v55  ;;  %v13858_v6 = vld [vmem:[#allocation11 + $0x400] ss:$16 sps:$4 sm:$0xff]  }
 0x188   :  { %9436 = vmatprep.subr.bf16.mxu0 %v13768_v62  ;;  %10340 = vmatprep.subr.bf16.mxu1 %v13771_v33  ;;  %v6429_v34 = vrot.slane %v6415_v15, %v14956_v55  ;;  %v6457_v35 = vrot.slane %v6419_v13, %v14956_v55  ;;  %v13795_v62 = vld [vmem:[#allocation11 + $0x328] ss:$16 sps:$4 sm:$0xff]   ;;  %v13811_v61 = vld [vmem:[#allocation11 + $0x34c] ss:$16 sps:$4 sm:$0xff]   ;;  %v13864_v12 = vld [vmem:[#allocation11 + $0x420] ss:$16 sps:$4 sm:$0xff]  }
 0x189   :  { %v15444_v33 = vcombine.high %v6443_v20, %v6471_v23  ;;  %v13861_v15 = vld [vmem:[#allocation11 + $0x408] ss:$16 sps:$4 sm:$0xff]  }
 0x18a   :  { %9374 = vmatmul.mubr.bf16.gmra.mrb[44].mxu0 %v5391_v32  ;;  %10278 = vmatmul.mubr.bf16.gmra.mrb[44].mxu1 %v5391_v32  ;;  %v15446_v8 = vcombine.high %v6429_v34, %v6457_v35  ;;  %v13814_v32 = vld [vmem:[#allocation11 + $0x364] ss:$16 sps:$4 sm:$0xff]   ;;  %v13867_v13 = vld [vmem:[#allocation11 + $0x428] ss:$16 sps:$4 sm:$0xff]  }
 0x18b   :  { %9437 = vmatpush1.bf16.msra.mxu0 %v13766_v53  ;;  %10341 = vmatpush1.bf16.msra.mxu1 %v13769_v17  ;;  %v5935_v53 = vcombine.low %v15389_v7, %v15392_v11  ;;  %v13817_v17 = vld [vmem:[#allocation11 + $0x36c] ss:$16 sps:$4 sm:$0xff]   ;;  %v13828_v7 = vld [vmem:[#allocation11 + $0x384] ss:$16 sps:$4 sm:$0xff]  }
 0x18c   :  { %9438 = vmatprep.subr.bf16.mxu0 %v13774_v38  ;;  %10342 = vmatprep.subr.bf16.mxu1 %v13777_v58  ;;  %v13815_v38 = vld [vmem:[#allocation11 + $0x368] ss:$16 sps:$4 sm:$0xff]   ;;  %v13831_v11 = vld [vmem:[#allocation11 + $0x38c] ss:$16 sps:$4 sm:$0xff]   ;;  %v6207_v58 = vcombine.low %v15419_v2, %v15422_v19  ;;  %v6479_v2 = vcombine.low %v6429_v34, %v6457_v35  ;;  %v13846_v19 = vld [vmem:[#allocation11 + $0x3c0] ss:$16 sps:$4 sm:$0xff]  }
 0x18d   :  { %9383 = vmatprep.mubr.bf16.mxu0 %v5667_v0  ;;  %10287 = vmatprep.mubr.bf16.mxu1 %v5667_v0  ;;  %v6483_v0 = vcombine.low %v6443_v20, %v6471_v23  ;;  %v13878_v20 = vld [vmem:[#allocation11 + $0x464] ss:$16 sps:$4 sm:$0xff]   ;;  %v13876_v23 = vld [vmem:[#allocation11 + $0x460] ss:$16 sps:$4 sm:$0xff]   ;;  %v13879_v34 = vld [vmem:[#allocation11 + $0x468] ss:$16 sps:$4 sm:$0xff]  }
 0x18e   :  { %v13884_v35 = vld [vmem:[#allocation11 + $0x484] ss:$16 sps:$4 sm:$0xff]  }
 0x18f   :  { %9439 = vmatpush1.bf16.msra.mxu0 %v13772_v44  ;;  %10343 = vmatpush1.bf16.msra.mxu1 %v13775_v46  ;;  %v13826_v44 = vld [vmem:[#allocation11 + $0x380] ss:$16 sps:$4 sm:$0xff]   ;;  %v13829_v46 = vld [vmem:[#allocation11 + $0x388] ss:$16 sps:$4 sm:$0xff]  }
 0x190   :  { %9440 = vmatprep.subr.bf16.mxu0 %v13788_v30  ;;  %10344 = vmatprep.subr.bf16.mxu1 %v13791_v24  ;;  %v13849_v30 = vld [vmem:[#allocation11 + $0x3c8] ss:$16 sps:$4 sm:$0xff]   ;;  %v13854_v24 = vld [vmem:[#allocation11 + $0x3e4] ss:$16 sps:$4 sm:$0xff]  }
 0x192   :  { %9384 = vmatmul.mubr.bf16.gmra.mrb[48].mxu0 %v5663_v3  ;;  %10288 = vmatmul.mubr.bf16.gmra.mrb[48].mxu1 %v5663_v3  ;;  %v13863_v3 = vld [vmem:[#allocation11 + $0x40c] ss:$16 sps:$4 sm:$0xff]  }
 0x193   :  { %9441 = vmatpush1.bf16.msra.mxu0 %v13786_v49  ;;  %10345 = vmatpush1.bf16.msra.mxu1 %v13789_v9  ;;  %v13866_v49 = vld [vmem:[#allocation11 + $0x424] ss:$16 sps:$4 sm:$0xff]   ;;  %v13869_v9 = vld [vmem:[#allocation11 + $0x42c] ss:$16 sps:$4 sm:$0xff]  }
 0x194   :  { %9442 = vmatprep.subr.bf16.mxu0 %v13794_v14  ;;  %10346 = vmatprep.subr.bf16.mxu1 %v13797_v18  ;;  %v13872_v14 = vld [vmem:[#allocation11 + $0x444] ss:$16 sps:$4 sm:$0xff]   ;;  %v13870_v18 = vld [vmem:[#allocation11 + $0x440] ss:$16 sps:$4 sm:$0xff]  }
 0x195   :  { %9393 = vmatprep.mubr.bf16.mxu0 %v5939_v21  ;;  %10297 = vmatprep.mubr.bf16.mxu1 %v5939_v21  ;;  %v13873_v21 = vld [vmem:[#allocation11 + $0x448] ss:$16 sps:$4 sm:$0xff]  }
 0x197   :  { %9443 = vmatpush1.bf16.msra.mxu0 %v13792_v60  ;;  %10347 = vmatpush1.bf16.msra.mxu1 %v13795_v62  ;;  %v13887_v60 = vld [vmem:[#allocation11 + $0x48c] ss:$16 sps:$4 sm:$0xff]   ;;  %v13954_v62 = vld [vmem:[#allocation6 + $0x4] ss:$16 sps:$4 sm:$0xff]  }
 0x198   :  { %9444 = vmatprep.subr.bf16.mxu0 %v13808_v28  ;;  %10348 = vmatprep.subr.bf16.mxu1 %v13811_v61  ;;  %v13956_v28 = vld [vmem:[#allocation6 + $0x44] ss:$16 sps:$4 sm:$0xff]  }
 0x199   :  { %v13957_v61 = vld [vmem:[#allocation6 + $0x64] ss:$16 sps:$4 sm:$0xff]  }
 0x19a   :  { %9394 = vmatmul.mubr.bf16.gmra.mrb[52].mxu0 %v5935_v53  ;;  %10298 = vmatmul.mubr.bf16.gmra.mrb[52].mxu1 %v5935_v53  ;;  %v4468_v53 = vrot.slane %v13954_v62, %v14956_v55  ;;  %v13911_v62 = vld [vmem:[#allocation11 + $0x50c] ss:$16 sps:$4 sm:$0xff]  }
 0x19b   :  { %9445 = vmatpush1.bf16.msra.mxu0 %v13806_v40  ;;  %10349 = vmatpush1.bf16.msra.mxu1 %v13809_v31  ;;  %v4510_v31 = vrot.slane %v13957_v61, %v14956_v55 }
 0x19c   :  { %9446 = vmatprep.subr.bf16.mxu0 %v13814_v32  ;;  %10350 = vmatprep.subr.bf16.mxu1 %v13817_v17  ;;  %v13882_v32 = vld [vmem:[#allocation11 + $0x480] ss:$16 sps:$4 sm:$0xff]   ;;  %v13885_v17 = vld [vmem:[#allocation11 + $0x488] ss:$16 sps:$4 sm:$0xff]  }
 0x19d   :  { %9403 = vmatprep.mubr.bf16.mxu0 %v6211_v36  ;;  %10307 = vmatprep.mubr.bf16.mxu1 %v6211_v36  ;;  %v13890_v36 = vld [vmem:[#allocation11 + $0x4a4] ss:$16 sps:$4 sm:$0xff]  }
 0x19f   :  { %9447 = vmatpush1.bf16.msra.mxu0 %v13812_v37  ;;  %10351 = vmatpush1.bf16.msra.mxu1 %v13815_v38  ;;  %v13893_v37 = vld [vmem:[#allocation11 + $0x4ac] ss:$16 sps:$4 sm:$0xff]  }
 0x1a0   :  { %9448 = vmatprep.subr.bf16.mxu0 %v13828_v7  ;;  %10352 = vmatprep.subr.bf16.mxu1 %v13831_v11 }
 0x1a2   :  { %9404 = vmatmul.mubr.bf16.gmra.mrb[56].mxu0 %v6207_v58  ;;  %10308 = vmatmul.mubr.bf16.gmra.mrb[56].mxu1 %v6207_v58 }
 0x1a3   :  { %9449 = vmatpush1.bf16.msra.mxu0 %v13826_v44  ;;  %10353 = vmatpush1.bf16.msra.mxu1 %v13829_v46  ;;  %v13891_v44 = vld [vmem:[#allocation11 + $0x4a8] ss:$16 sps:$4 sm:$0xff]   ;;  %v13970_v46 = vld [vmem:[#allocation6 + $0x84] ss:$16 sps:$4 sm:$0xff]  }
 0x1a4   :  { %9450 = vmatprep.subr.bf16.mxu0 %v13834_v39  ;;  %10354 = vmatprep.subr.bf16.mxu1 %v13837_v41  ;;  %v13971_v39 = vld [vmem:[#allocation6 + $0xa4] ss:$16 sps:$4 sm:$0xff]  }
 0x1a5   :  { %9413 = vmatprep.mubr.bf16.mxu0 %v6483_v0  ;;  %10317 = vmatprep.mubr.bf16.mxu1 %v6483_v0 }
 0x1a7   :  { %9451 = vmatpush1.bf16.msra.mxu0 %v13832_v1  ;;  %10355 = vmatpush1.bf16.msra.mxu1 %v13835_v51  ;;  %v13972_v51 = vld [vmem:[#allocation6 + $0xc4] ss:$16 sps:$4 sm:$0xff]  }
 0x1a8   :  { %9452 = vmatprep.subr.bf16.mxu0 %v13848_v57  ;;  %10356 = vmatprep.subr.bf16.mxu1 %v13851_v42  ;;  %v13973_v57 = vld [vmem:[#allocation6 + $0xe4] ss:$16 sps:$4 sm:$0xff]   ;;  %v13896_v42 = vld [vmem:[#allocation11 + $0x4c4] ss:$16 sps:$4 sm:$0xff]  }
 0x1aa   :  { %9414 = vmatmul.mubr.bf16.gmra.mrb[60].mxu0 %v6479_v2  ;;  %10318 = vmatmul.mubr.bf16.gmra.mrb[60].mxu1 %v6479_v2 }
 0x1ab   :  { %9453 = vmatpush1.bf16.msra.mxu0 %v13846_v19  ;;  %10357 = vmatpush1.bf16.msra.mxu1 %v13849_v30  ;;  %v4740_v19 = vrot.slane %v13970_v46, %v14956_v55  ;;  %v4754_v30 = vrot.slane %v13971_v39, %v14956_v55  ;;  %v14005_v46 = vld [vmem:[#allocation6 + $0x1e4] ss:$16 sps:$4 sm:$0xff]  }
 0x1ac   :  { %9454 = vmatprep.subr.bf16.mxu0 %v13854_v24  ;;  %10358 = vmatprep.subr.bf16.mxu1 %v13857_v50  ;;  %v4768_v24 = vrot.slane %v13972_v51, %v14956_v55  ;;  %v4782_v50 = vrot.slane %v13973_v57, %v14956_v55  ;;  %v13912_v39 = vld [vmem:[#allocation11 + $0x520] ss:$16 sps:$4 sm:$0xff]  }
 0x1ad   :  { %9456 = vmatprep.mubr.bf16.mxu0 %v15238_v10  ;;  %10360 = vmatprep.mubr.bf16.mxu1 %v15238_v10  ;;  %v13875_v10 = vld [vmem:[#allocation11 + $0x44c] ss:$16 sps:$4 sm:$0xff]  }
 0x1af   :  { %9455 = vmatpush1.bf16.msra.mxu0 %v13852_v25  ;;  %10359 = vmatpush1.bf16.msra.mxu1 %v13855_v43  ;;  %v4786_v25 = vcombine.high %v4740_v19, %v4754_v30  ;;  %v4785_v43 = vcombine.low %v4740_v19, %v4754_v30  ;;  %v13920_v19 = vld [vmem:[#allocation11 + $0x544] ss:$16 sps:$4 sm:$0xff]  }
 0x1b0   :  { %9537 = vmatprep.subr.bf16.mxu0 %v13860_v63  ;;  %10441 = vmatprep.subr.bf16.mxu1 %v13863_v3 }
 0x1b2   :  { %9457 = vmatmul.mubr.bf16.vlgmr.msra.gmra.mrb[32].mxu0 %v15248_v16  ;;  %10361 = vmatmul.mubr.bf16.vlgmr.msra.gmra.mrb[32].mxu1 %v15248_v16  ;;  %v13881_v16 = vld [vmem:[#allocation11 + $0x46c] ss:$16 sps:$4 sm:$0xff]  }
 0x1b3   :  { %9538 = vmatpush1.bf16.msra.mxu0 %v13858_v6  ;;  %10442 = vmatpush1.bf16.msra.mxu1 %v13861_v15  ;;  %v13894_v6 = vld [vmem:[#allocation11 + $0x4c0] ss:$16 sps:$4 sm:$0xff]   ;;  %v13897_v15 = vld [vmem:[#allocation11 + $0x4c8] ss:$16 sps:$4 sm:$0xff]  }
 0x1b4   :  { %9539 = vmatprep.subr.bf16.mxu0 %v13866_v49  ;;  %10443 = vmatprep.subr.bf16.mxu1 %v13869_v9  ;;  %v4790_v49 = vcombine.high %v4768_v24, %v4782_v50  ;;  %v13902_v9 = vld [vmem:[#allocation11 + $0x4e4] ss:$16 sps:$4 sm:$0xff]  }
 0x1b5   :  { %9466 = vmatprep.mubr.bf16.mxu0 %v15280_v48  ;;  %10370 = vmatprep.mubr.bf16.mxu1 %v15280_v48  ;;  %v13955_v48 = vld [vmem:[#allocation6 + $0x24] ss:$16 sps:$4 sm:$0xff]  }
 0x1b6   :  { %v4482_v40 = vrot.slane %v13955_v48, %v14956_v55 }
 0x1b7   :  { %9540 = vmatpush1.bf16.msra.mxu0 %v13864_v12  ;;  %10444 = vmatpush1.bf16.msra.mxu1 %v13867_v13  ;;  %v13905_v12 = vld [vmem:[#allocation11 + $0x4ec] ss:$16 sps:$4 sm:$0xff]   ;;  %v13986_v13 = vld [vmem:[#allocation6 + $0x104] ss:$16 sps:$4 sm:$0xff]  }
 0x1b8   :  { %9541 = vmatprep.subr.bf16.mxu0 %v13872_v14  ;;  %10445 = vmatprep.subr.bf16.mxu1 %v13875_v10  ;;  %v4513_v38 = vcombine.low %v4468_v53, %v4482_v40  ;;  %v4514_v7 = vcombine.high %v4468_v53, %v4482_v40  ;;  %v13987_v14 = vld [vmem:[#allocation6 + $0x124] ss:$16 sps:$4 sm:$0xff]  }
 0x1b9   :  { %v13988_v10 = vld [vmem:[#allocation6 + $0x144] ss:$16 sps:$4 sm:$0xff]   ;;  %v5026_v48 = vrot.slane %v13987_v14, %v14956_v55 }
 0x1ba   :  { %9467 = vmatmul.mubr.bf16.gmra.mrb[36].mxu0 %v15286_v59  ;;  %10371 = vmatmul.mubr.bf16.gmra.mrb[36].mxu1 %v15286_v59  ;;  %v4496_v59 = vrot.slane %v13956_v28, %v14956_v55  ;;  %v15471_v41 = vrot.slane %v4514_v7, %v14956_v55  ;;  %v15474_v0 = vrot.slane %v4513_v38, %v14956_v55  ;;  %v13917_v38 = vld [vmem:[#allocation11 + $0x52c] ss:$16 sps:$4 sm:$0xff]   ;;  %v14018_v14 = vld [vmem:[#allocation6 + $0x204] ss:$16 sps:$4 sm:$0xff]  }
 0x1bb   :  { %9542 = vmatpush1.bf16.msra.mxu0 %v13870_v18  ;;  %10446 = vmatpush1.bf16.msra.mxu1 %v13873_v21  ;;  %v15499_v18 = vrot.slane %v4786_v25, %v14956_v55  ;;  %v15502_v21 = vrot.slane %v4785_v43, %v14956_v55  ;;  %v5040_v28 = vrot.slane %v13988_v10, %v14956_v55 }
 0x1bc   :  { %9543 = vmatprep.subr.bf16.mxu0 %v13878_v20  ;;  %10447 = vmatprep.subr.bf16.mxu1 %v13881_v16  ;;  %v4517_v11 = vcombine.low %v4496_v59, %v4510_v31  ;;  %v4518_v58 = vcombine.high %v4496_v59, %v4510_v31  ;;  %v13989_v20 = vld [vmem:[#allocation6 + $0x164] ss:$16 sps:$4 sm:$0xff]   ;;  %v13909_v31 = vld [vmem:[#allocation11 + $0x508] ss:$16 sps:$4 sm:$0xff]  }
 0x1bd   :  { %9476 = vmatprep.mubr.bf16.mxu0 %v15312_v52  ;;  %10380 = vmatprep.mubr.bf16.mxu1 %v15312_v52  ;;  %v13888_v52 = vld [vmem:[#allocation11 + $0x4a0] ss:$16 sps:$4 sm:$0xff]   ;;  %v5054_v61 = vrot.slane %v13989_v20, %v14956_v55 }
 0x1be   :  { %v15477_v1 = vrot.slane %v4517_v11, %v14956_v55  ;;  %v15480_v2 = vrot.slane %v4518_v58, %v14956_v55  ;;  %v13900_v16 = vld [vmem:[#allocation11 + $0x4e0] ss:$16 sps:$4 sm:$0xff]  }
 0x1bf   :  { %9544 = vmatpush1.bf16.msra.mxu0 %v13876_v23  ;;  %10448 = vmatpush1.bf16.msra.mxu1 %v13879_v34  ;;  %v13903_v23 = vld [vmem:[#allocation11 + $0x4e8] ss:$16 sps:$4 sm:$0xff]   ;;  %v15505_v34 = vrot.slane %v4790_v49, %v14956_v55  ;;  %v13906_v59 = vld [vmem:[#allocation11 + $0x500] ss:$16 sps:$4 sm:$0xff]   ;;  %v5061_v7 = vcombine.low %v5040_v28, %v5054_v61 }
 0x1c0   :  { %9545 = vmatprep.subr.bf16.mxu0 %v13884_v35  ;;  %10449 = vmatprep.subr.bf16.mxu1 %v13887_v60  ;;  %v15490_v63 = vcombine.high %v15471_v41, %v15480_v2  ;;  %v15494_v3 = vcombine.high %v15474_v0, %v15477_v1  ;;  %v5012_v60 = vrot.slane %v13986_v13, %v14956_v55  ;;  %v14003_v11 = vld [vmem:[#allocation6 + $0x1a4] ss:$16 sps:$4 sm:$0xff]   ;;  %v13926_v13 = vld [vmem:[#allocation11 + $0x564] ss:$16 sps:$4 sm:$0xff]  }
 0x1c1   :  { %v15518_v53 = vcombine.high %v15499_v18, %v15505_v34  ;;  %v15538_v30 = vrot.slane %v5061_v7, %v14956_v55  ;;  %v13935_v7 = vld [vmem:[#allocation11 + $0x58c] ss:$16 sps:$4 sm:$0xff]  }
 0x1c2   :  { %9477 = vmatmul.mubr.bf16.gmra.mrb[40].mxu0 %v15316_v56  ;;  %10381 = vmatmul.mubr.bf16.gmra.mrb[40].mxu1 %v15316_v56  ;;  %v13899_v56 = vld [vmem:[#allocation11 + $0x4cc] ss:$16 sps:$4 sm:$0xff]  }
 0x1c3   :  { %9546 = vmatpush1.bf16.msra.mxu0 %v13882_v32  ;;  %10450 = vmatpush1.bf16.msra.mxu1 %v13885_v17  ;;  %v5058_v32 = vcombine.high %v5012_v60, %v5026_v48  ;;  %v5062_v17 = vcombine.high %v5040_v28, %v5054_v61 }
 0x1c4   :  { %9547 = vmatprep.subr.bf16.mxu0 %v13890_v36  ;;  %10451 = vmatprep.subr.bf16.mxu1 %v13893_v37  ;;  %v5057_v36 = vcombine.low %v5012_v60, %v5026_v48  ;;  %v13914_v37 = vld [vmem:[#allocation11 + $0x524] ss:$16 sps:$4 sm:$0xff]   ;;  %v13929_v60 = vld [vmem:[#allocation11 + $0x56c] ss:$16 sps:$4 sm:$0xff]   ;;  %v5556_v48 = vrot.slane %v14018_v14, %v14956_v55  ;;  %v13936_v14 = vld [vmem:[#allocation11 + $0x5a0] ss:$16 sps:$4 sm:$0xff]  }
 0x1c5   :  { %9486 = vmatprep.mubr.bf16.mxu0 %v15340_v4  ;;  %10390 = vmatprep.mubr.bf16.mxu1 %v15340_v4  ;;  %v4789_v4 = vcombine.low %v4768_v24, %v4782_v50  ;;  %v15525_v58 = vrot.slane %v5058_v32, %v14956_v55  ;;  %v5326_v50 = vrot.slane %v14005_v46, %v14956_v55  ;;  %v14034_v46 = vld [vmem:[#allocation6 + $0x284] ss:$16 sps:$4 sm:$0xff]  }
 0x1c6   :  { %v15533_v51 = vrot.slane %v5057_v36, %v14956_v55  ;;  %v13927_v36 = vld [vmem:[#allocation11 + $0x568] ss:$16 sps:$4 sm:$0xff]  }
 0x1c7   :  { %9548 = vmatpush1.bf16.msra.mxu0 %v13888_v52  ;;  %10452 = vmatpush1.bf16.msra.mxu1 %v13891_v44  ;;  %v15508_v35 = vrot.slane %v4789_v4, %v14956_v55  ;;  %v14004_v52 = vld [vmem:[#allocation6 + $0x1c4] ss:$16 sps:$4 sm:$0xff]   ;;  %v15528_v44 = vrot.slane %v5062_v17, %v14956_v55 }
 0x1c8   :  { %9549 = vmatprep.subr.bf16.mxu0 %v13896_v42  ;;  %10453 = vmatprep.subr.bf16.mxu1 %v13899_v56  ;;  %v5298_v42 = vrot.slane %v14003_v11, %v14956_v55  ;;  %v13915_v56 = vld [vmem:[#allocation11 + $0x528] ss:$16 sps:$4 sm:$0xff]   ;;  %v5312_v24 = vrot.slane %v14004_v52, %v14956_v55  ;;  %v13930_v52 = vld [vmem:[#allocation11 + $0x580] ss:$16 sps:$4 sm:$0xff]  }
 0x1c9   :  { %v15522_v40 = vcombine.high %v15502_v21, %v15508_v35 }
 0x1ca   :  { %9487 = vmatmul.mubr.bf16.gmra.mrb[44].mxu0 %v15344_v5  ;;  %10391 = vmatmul.mubr.bf16.gmra.mrb[44].mxu1 %v15344_v5  ;;  %v13908_v5 = vld [vmem:[#allocation11 + $0x504] ss:$16 sps:$4 sm:$0xff]   ;;  %v5334_v49 = vcombine.high %v5312_v24, %v5326_v50  ;;  %v5333_v4 = vcombine.low %v5312_v24, %v5326_v50 }
 0x1cb   :  { %9550 = vmatpush1.bf16.msra.mxu0 %v13894_v6  ;;  %10454 = vmatpush1.bf16.msra.mxu1 %v13897_v15  ;;  %v15544_v6 = vcombine.high %v15525_v58, %v15528_v44  ;;  %v13918_v15 = vld [vmem:[#allocation11 + $0x540] ss:$16 sps:$4 sm:$0xff]   ;;  %v13938_v24 = vld [vmem:[#allocation11 + $0x5a4] ss:$16 sps:$4 sm:$0xff]  }
 0x1cc   :  { %9551 = vmatprep.subr.bf16.mxu0 %v13902_v9  ;;  %10455 = vmatprep.subr.bf16.mxu1 %v13905_v12  ;;  %v15550_v9 = vcombine.high %v15533_v51, %v15538_v30  ;;  %v13921_v12 = vld [vmem:[#allocation11 + $0x548] ss:$16 sps:$4 sm:$0xff]  }
 0x1cd   :  { %9496 = vmatprep.mubr.bf16.mxu0 %v15368_v22  ;;  %10400 = vmatprep.mubr.bf16.mxu1 %v15368_v22  ;;  %v14002_v22 = vld [vmem:[#allocation6 + $0x184] ss:$16 sps:$4 sm:$0xff]  }
 0x1ce   :  { %v5284_v57 = vrot.slane %v14002_v22, %v14956_v55 }
 0x1cf   :  { %9552 = vmatpush1.bf16.msra.mxu0 %v13900_v16  ;;  %10456 = vmatpush1.bf16.msra.mxu1 %v13903_v23  ;;  %v14019_v16 = vld [vmem:[#allocation6 + $0x224] ss:$16 sps:$4 sm:$0xff]  }
 0x1d0   :  { %9553 = vmatprep.subr.bf16.mxu0 %v13908_v5  ;;  %10457 = vmatprep.subr.bf16.mxu1 %v13911_v62  ;;  %v5330_v25 = vcombine.high %v5284_v57, %v5298_v42  ;;  %v5329_v43 = vcombine.low %v5284_v57, %v5298_v42  ;;  %v14021_v23 = vld [vmem:[#allocation6 + $0x264] ss:$16 sps:$4 sm:$0xff]   ;;  %v15559_v5 = vrot.slane %v5334_v49, %v14956_v55 }
 0x1d1   :  { %v15562_v62 = vrot.slane %v5333_v4, %v14956_v55  ;;  %v5570_v28 = vrot.slane %v14019_v16, %v14956_v55  ;;  %v14036_v42 = vld [vmem:[#allocation6 + $0x2c4] ss:$16 sps:$4 sm:$0xff]   ;;  %v13939_v16 = vld [vmem:[#allocation11 + $0x5a8] ss:$16 sps:$4 sm:$0xff]  }
 0x1d2   :  { %9497 = vmatmul.mubr.bf16.gmra.mrb[48].mxu0 %v15372_v45  ;;  %10401 = vmatmul.mubr.bf16.gmra.mrb[48].mxu1 %v15372_v45  ;;  %v13923_v45 = vld [vmem:[#allocation11 + $0x54c] ss:$16 sps:$4 sm:$0xff]   ;;  %v15553_v10 = vrot.slane %v5330_v25, %v14956_v55  ;;  %v15556_v20 = vrot.slane %v5329_v43, %v14956_v55  ;;  %v5856_v49 = vrot.slane %v14036_v42, %v14956_v55 }
 0x1d3   :  { %9554 = vmatpush1.bf16.msra.mxu0 %v13906_v59  ;;  %10458 = vmatpush1.bf16.msra.mxu1 %v13909_v31  ;;  %v13924_v59 = vld [vmem:[#allocation11 + $0x560] ss:$16 sps:$4 sm:$0xff]   ;;  %v5598_v31 = vrot.slane %v14021_v23, %v14956_v55  ;;  %v5601_v22 = vcombine.low %v5556_v48, %v5570_v28  ;;  %v13944_v23 = vld [vmem:[#allocation11 + $0x5c4] ss:$16 sps:$4 sm:$0xff]  }
 0x1d4   :  { %9555 = vmatprep.subr.bf16.mxu0 %v13914_v37  ;;  %10459 = vmatprep.subr.bf16.mxu1 %v13917_v38  ;;  %v15572_v32 = vcombine.high %v15553_v10, %v15559_v5  ;;  %v15576_v17 = vcombine.high %v15556_v20, %v15562_v62  ;;  %v13932_v37 = vld [vmem:[#allocation11 + $0x584] ss:$16 sps:$4 sm:$0xff]   ;;  %v5602_v38 = vcombine.high %v5556_v48, %v5570_v28 }
 0x1d5   :  { %9506 = vmatprep.mubr.bf16.mxu0 %v15396_v27  ;;  %10410 = vmatprep.mubr.bf16.mxu1 %v15396_v27  ;;  %v14020_v27 = vld [vmem:[#allocation6 + $0x244] ss:$16 sps:$4 sm:$0xff]   ;;  %v15589_v43 = vrot.slane %v5601_v22, %v14956_v55 }
 0x1d6   :  { %v5584_v61 = vrot.slane %v14020_v27, %v14956_v55  ;;  %v15581_v57 = vrot.slane %v5602_v38, %v14956_v55  ;;  %v13942_v38 = vld [vmem:[#allocation11 + $0x5c0] ss:$16 sps:$4 sm:$0xff]  }
 0x1d7   :  { %9556 = vmatpush1.bf16.msra.mxu0 %v13912_v39  ;;  %10460 = vmatpush1.bf16.msra.mxu1 %v13915_v56  ;;  %v14035_v39 = vld [vmem:[#allocation6 + $0x2a4] ss:$16 sps:$4 sm:$0xff]  }
 0x1d8   :  { %9557 = vmatprep.subr.bf16.mxu0 %v13920_v19  ;;  %10461 = vmatprep.subr.bf16.mxu1 %v13923_v45  ;;  %v5605_v11 = vcombine.low %v5584_v61, %v5598_v31  ;;  %v14037_v56 = vld [vmem:[#allocation6 + $0x2e4] ss:$16 sps:$4 sm:$0xff]   ;;  %v13933_v19 = vld [vmem:[#allocation11 + $0x588] ss:$16 sps:$4 sm:$0xff]   ;;  %v5828_v45 = vrot.slane %v14034_v46, %v14956_v55  ;;  %v5842_v25 = vrot.slane %v14035_v39, %v14956_v55  ;;  %v13950_v46 = vld [vmem:[#allocation11 + $0x5e4] ss:$16 sps:$4 sm:$0xff]  }
 0x1d9   :  { %v5870_v4 = vrot.slane %v14037_v56, %v14956_v55  ;;  %v13953_v56 = vld [vmem:[#allocation11 + $0x5ec] ss:$16 sps:$4 sm:$0xff]  }
 0x1da   :  { %9507 = vmatmul.mubr.bf16.gmra.mrb[52].mxu0 %v15402_v26  ;;  %10411 = vmatmul.mubr.bf16.gmra.mrb[52].mxu1 %v15402_v26  ;;  %v5606_v26 = vcombine.high %v5584_v61, %v5598_v31  ;;  %v5873_v28 = vcombine.low %v5828_v45, %v5842_v25  ;;  %v14051_v31 = vld [vmem:[#allocation6 + $0x324] ss:$16 sps:$4 sm:$0xff]  }
 0x1db   :  { %9558 = vmatpush1.bf16.msra.mxu0 %v13918_v15  ;;  %10462 = vmatpush1.bf16.msra.mxu1 %v13921_v12  ;;  %v15592_v15 = vrot.slane %v5605_v11, %v14956_v55  ;;  %v5874_v12 = vcombine.high %v5828_v45, %v5842_v25  ;;  %v5878_v48 = vcombine.high %v5856_v49, %v5870_v4  ;;  %v13948_v25 = vld [vmem:[#allocation11 + $0x5e0] ss:$16 sps:$4 sm:$0xff]  }
 0x1dc   :  { %9559 = vmatprep.subr.bf16.mxu0 %v13926_v13  ;;  %10463 = vmatprep.subr.bf16.mxu1 %v13929_v60  ;;  %v15584_v50 = vrot.slane %v5606_v26, %v14956_v55  ;;  %v13947_v60 = vld [vmem:[#allocation11 + $0x5cc] ss:$16 sps:$4 sm:$0xff]   ;;  %v5877_v61 = vcombine.low %v5856_v49, %v5870_v4  ;;  %v6114_v22 = vrot.slane %v14051_v31, %v14956_v55 }
 0x1dd   :  { %9516 = vmatprep.mubr.bf16.mxu0 %v15426_v54  ;;  %10420 = vmatprep.mubr.bf16.mxu1 %v15426_v54  ;;  %v13941_v54 = vld [vmem:[#allocation11 + $0x5ac] ss:$16 sps:$4 sm:$0xff]   ;;  %v15604_v27 = vcombine.high %v15589_v43, %v15592_v15 }
 0x1de   :  { %v15598_v13 = vcombine.high %v15581_v57, %v15584_v50  ;;  %v15621_v39 = vrot.slane %v5877_v61, %v14956_v55  ;;  %v13963_v61 = vld [vmem:[#allocation11 + $0x60c] ss:$16 sps:$4 sm:$0xff]  }
 0x1df   :  { %9560 = vmatpush1.bf16.msra.mxu0 %v13924_v59  ;;  %10464 = vmatpush1.bf16.msra.mxu1 %v13927_v36  ;;  %v14050_v59 = vld [vmem:[#allocation6 + $0x304] ss:$16 sps:$4 sm:$0xff]  }
 0x1e0   :  { %9561 = vmatprep.subr.bf16.mxu0 %v13932_v37  ;;  %10465 = vmatprep.subr.bf16.mxu1 %v13935_v7  ;;  %v14052_v36 = vld [vmem:[#allocation6 + $0x344] ss:$16 sps:$4 sm:$0xff]   ;;  %v15612_v7 = vrot.slane %v5878_v48, %v14956_v55  ;;  %v6100_v26 = vrot.slane %v14050_v59, %v14956_v55 }
 0x1e1   :  { %v14053_v37 = vld [vmem:[#allocation6 + $0x364] ss:$16 sps:$4 sm:$0xff]   ;;  %v6128_v11 = vrot.slane %v14052_v36, %v14956_v55  ;;  %v4577_v36 = vcombine.low %v15474_v0, %v15477_v1 }
 0x1e2   :  { %9517 = vmatmul.mubr.bf16.gmra.mrb[56].mxu0 %v15430_v29  ;;  %10421 = vmatmul.mubr.bf16.gmra.mrb[56].mxu1 %v15430_v29  ;;  %v15609_v29 = vrot.slane %v5874_v12, %v14956_v55  ;;  %v6142_v42 = vrot.slane %v14053_v37, %v14956_v55  ;;  %v14068_v48 = vld [vmem:[#allocation6 + $0x3c4] ss:$16 sps:$4 sm:$0xff]  }
 0x1e3   :  { %9562 = vmatpush1.bf16.msra.mxu0 %v13930_v52  ;;  %10466 = vmatpush1.bf16.msra.mxu1 %v13933_v19  ;;  %v13945_v52 = vld [vmem:[#allocation11 + $0x5c8] ss:$16 sps:$4 sm:$0xff]   ;;  %v6146_v19 = vcombine.high %v6100_v26, %v6114_v22 }
 0x1e4   :  { %9563 = vmatprep.subr.bf16.mxu0 %v13938_v24  ;;  %10467 = vmatprep.subr.bf16.mxu1 %v13941_v54  ;;  %v6145_v24 = vcombine.low %v6100_v26, %v6114_v22  ;;  %v15626_v45 = vcombine.high %v15609_v29, %v15612_v7  ;;  %v4581_v54 = vcombine.low %v15471_v41, %v15480_v2  ;;  %v14067_v2 = vld [vmem:[#allocation6 + $0x3a4] ss:$16 sps:$4 sm:$0xff]  }
 0x1e5   :  { %9526 = vmatprep.mubr.bf16.mxu0 %v15444_v33  ;;  %10430 = vmatprep.mubr.bf16.mxu1 %v15444_v33  ;;  %v15618_v33 = vrot.slane %v5873_v28, %v14956_v55  ;;  %v6150_v49 = vcombine.high %v6128_v11, %v6142_v42  ;;  %v6149_v4 = vcombine.low %v6128_v11, %v6142_v42  ;;  %v14069_v28 = vld [vmem:[#allocation6 + $0x3e4] ss:$16 sps:$4 sm:$0xff]   ;;  %v13966_v42 = vld [vmem:[#allocation11 + $0x624] ss:$16 sps:$4 sm:$0xff]  }
 0x1e6   :  { %v15640_v41 = vrot.slane %v6145_v24, %v14956_v55  ;;  %v6386_v37 = vrot.slane %v14067_v2, %v14956_v55  ;;  %v6400_v26 = vrot.slane %v14068_v48, %v14956_v55  ;;  %v6414_v22 = vrot.slane %v14069_v28, %v14956_v55 }
 0x1e7   :  { %9564 = vmatpush1.bf16.msra.mxu0 %v13936_v14  ;;  %10468 = vmatpush1.bf16.msra.mxu1 %v13939_v16  ;;  %v15632_v12 = vcombine.high %v15618_v33, %v15621_v39  ;;  %v13951_v14 = vld [vmem:[#allocation11 + $0x5e8] ss:$16 sps:$4 sm:$0xff]   ;;  %v13960_v16 = vld [vmem:[#allocation11 + $0x604] ss:$16 sps:$4 sm:$0xff]   ;;  %v15643_v59 = vrot.slane %v6150_v49, %v14956_v55  ;;  %v13964_v49 = vld [vmem:[#allocation11 + $0x620] ss:$16 sps:$4 sm:$0xff]   ;;  %v4849_v28 = vcombine.low %v15502_v21, %v15508_v35 }
 0x1e8   :  { %9565 = vmatprep.subr.bf16.mxu0 %v13944_v23  ;;  %10469 = vmatprep.subr.bf16.mxu1 %v13947_v60  ;;  %v14066_v23 = vld [vmem:[#allocation6 + $0x384] ss:$16 sps:$4 sm:$0xff]   ;;  %v15637_v60 = vrot.slane %v6146_v19, %v14956_v55  ;;  %v6422_v19 = vcombine.high %v6400_v26, %v6414_v22  ;;  %v6421_v24 = vcombine.low %v6400_v26, %v6414_v22  ;;  %v13983_v22 = vld [vmem:[#allocation11 + $0x668] ss:$16 sps:$4 sm:$0xff]   ;;  %v13995_v21 = vld [vmem:[#allocation11 + $0x68c] ss:$16 sps:$4 sm:$0xff]  }
 0x1e9   :  { %v6372_v31 = vrot.slane %v14066_v23, %v14956_v55  ;;  %v13980_v26 = vld [vmem:[#allocation11 + $0x660] ss:$16 sps:$4 sm:$0xff]   ;;  %v17300_v35 = vsub.s32 0, %v14953_v47 }
 0x1ea   :  { %9527 = vmatmul.mubr.bf16.gmra.mrb[60].mxu0 %v15446_v8  ;;  %10431 = vmatmul.mubr.bf16.gmra.mrb[60].mxu1 %v15446_v8  ;;  %v15646_v8 = vrot.slane %v6149_v4, %v14956_v55  ;;  %v15656_v11 = vcombine.high %v15637_v60, %v15643_v59  ;;  %v15674_v2 = vrot.slane %v6421_v24, %v14956_v55  ;;  %v14001_v24 = vld [vmem:[#allocation11 + $0x6ac] ss:$16 sps:$4 sm:$0xff]  }
 0x1eb   :  { %9566 = vmatpush1.bf16.msra.mxu0 %v13942_v38  ;;  %10470 = vmatpush1.bf16.msra.mxu1 %v13945_v52  ;;  %v13958_v38 = vld [vmem:[#allocation11 + $0x600] ss:$16 sps:$4 sm:$0xff]   ;;  %v6418_v0 = vcombine.high %v6372_v31, %v6386_v37  ;;  %v6417_v1 = vcombine.low %v6372_v31, %v6386_v37  ;;  %v13977_v31 = vld [vmem:[#allocation11 + $0x648] ss:$16 sps:$4 sm:$0xff]   ;;  %v13985_v37 = vld [vmem:[#allocation11 + $0x66c] ss:$16 sps:$4 sm:$0xff]  }
 0x1ec   :  { %9567 = vmatprep.subr.bf16.mxu0 %v13950_v46  ;;  %10471 = vmatprep.subr.bf16.mxu1 %v13953_v56  ;;  %v15660_v52 = vcombine.high %v15640_v41, %v15646_v8  ;;  %v13961_v46 = vld [vmem:[#allocation11 + $0x608] ss:$16 sps:$4 sm:$0xff]   ;;  %v13969_v56 = vld [vmem:[#allocation11 + $0x62c] ss:$16 sps:$4 sm:$0xff]  }
 0x1ed   :  { %9569 = vmatprep.mubr.bf16.mxu0 %v4581_v54  ;;  %10473 = vmatprep.mubr.bf16.mxu1 %v4581_v54  ;;  %v4853_v54 = vcombine.low %v15499_v18, %v15505_v34  ;;  %v15665_v4 = vrot.slane %v6418_v0, %v14956_v55  ;;  %v15671_v23 = vrot.slane %v6417_v1, %v14956_v55  ;;  %v13979_v18 = vld [vmem:[#allocation11 + $0x64c] ss:$16 sps:$4 sm:$0xff]   ;;  %v13990_v0 = vld [vmem:[#allocation11 + $0x680] ss:$16 sps:$4 sm:$0xff]   ;;  %v13993_v1 = vld [vmem:[#allocation11 + $0x688] ss:$16 sps:$4 sm:$0xff]  }
 0x1ef   :  { %9568 = vmatpush1.bf16.msra.mxu0 %v13948_v25  ;;  %10472 = vmatpush1.bf16.msra.mxu1 %v13951_v14  ;;  %v15668_v25 = vrot.slane %v6422_v19, %v14956_v55  ;;  %v13967_v14 = vld [vmem:[#allocation11 + $0x628] ss:$16 sps:$4 sm:$0xff]   ;;  %v15682_v48 = vcombine.high %v15671_v23, %v15674_v2  ;;  %v13998_v19 = vld [vmem:[#allocation11 + $0x6a4] ss:$16 sps:$4 sm:$0xff]  }
 0x1f0   :  { %9650 = vmatprep.subr.bf16.mxu0 %v13960_v16  ;;  %10554 = vmatprep.subr.bf16.mxu1 %v13963_v61  ;;  %v13976_v16 = vld [vmem:[#allocation11 + $0x644] ss:$16 sps:$4 sm:$0xff]   ;;  %v13974_v61 = vld [vmem:[#allocation11 + $0x640] ss:$16 sps:$4 sm:$0xff]  }
 0x1f1   :  { %v15678_v34 = vcombine.high %v15665_v4, %v15668_v25 }
 0x1f2   :  { %9570 = vmatmul.mubr.bf16.vlgmr.msra.gmra.mrb[32].mxu0 %v4577_v36  ;;  %10474 = vmatmul.mubr.bf16.vlgmr.msra.gmra.mrb[32].mxu1 %v4577_v36  ;;  %v13982_v36 = vld [vmem:[#allocation11 + $0x664] ss:$16 sps:$4 sm:$0xff]  }
 0x1f3   :  { %9651 = vmatpush1.bf16.msra.mxu0 %v13958_v38  ;;  %10555 = vmatpush1.bf16.msra.mxu1 %v13961_v46  ;;  %v5125_v38 = vcombine.low %v15525_v58, %v15528_v44  ;;  %v13992_v46 = vld [vmem:[#allocation11 + $0x684] ss:$16 sps:$4 sm:$0xff]   ;;  %v17299_v58 = vsub.s32 2, %v14953_v47  ;;  %v365_v44 = vld [vmem:[#allocation9] sm:$0xf] }
 0x1f4   :  { %9652 = vmatprep.subr.bf16.mxu0 %v13966_v42  ;;  %10556 = vmatprep.subr.bf16.mxu1 %v13969_v56  ;;  %v5121_v42 = vcombine.low %v15533_v51, %v15538_v30  ;;  %v17298_v56 = vsub.s32 1, %v14953_v47  ;;  %v15698_v51 = vrot.slane %v365_v44, %v17300_v35 }
 0x1f5   :  { %9579 = vmatprep.mubr.bf16.mxu0 %v4853_v54  ;;  %10483 = vmatprep.mubr.bf16.mxu1 %v4853_v54  ;;  %v17297_v54 = vsub.s32 3, %v14953_v47  ;;  %v15702_v30 = vrot.slane %v365_v44, %v17299_v58 }
 0x1f7   :  { %9653 = vmatpush1.bf16.msra.mxu0 %v13964_v49  ;;  %10557 = vmatpush1.bf16.msra.mxu1 %v13967_v14  ;;  %v5397_v49 = vcombine.low %v15553_v10, %v15559_v5  ;;  %v15706_v14 = vrot.slane %v365_v44, %v17298_v56  ;;  %v14008_v10 = vld [vmem:[#allocation11 + $0x6c4] ss:$16 sps:$4 sm:$0xff]  }
 0x1f8   :  { %9654 = vmatprep.subr.bf16.mxu0 %v13976_v16  ;;  %10558 = vmatprep.subr.bf16.mxu1 %v13979_v18  ;;  %v13996_v16 = vld [vmem:[#allocation11 + $0x6a0] ss:$16 sps:$4 sm:$0xff]   ;;  %v13999_v18 = vld [vmem:[#allocation11 + $0x6a8] ss:$16 sps:$4 sm:$0xff]  }
 0x1fa   :  { %9580 = vmatmul.mubr.bf16.gmra.mrb[36].mxu0 %v4849_v28  ;;  %10484 = vmatmul.mubr.bf16.gmra.mrb[36].mxu1 %v4849_v28 }
 0x1fb   :  { %9655 = vmatpush1.bf16.msra.mxu0 %v13974_v61  ;;  %10559 = vmatpush1.bf16.msra.mxu1 %v13977_v31  ;;  %v15710_v61 = vrot.slane %v365_v44, %v17297_v54  ;;  %v14011_v31 = vld [vmem:[#allocation11 + $0x6cc] ss:$16 sps:$4 sm:$0xff]   ;;  %v14014_v44 = vld [vmem:[#allocation11 + $0x6e4] ss:$16 sps:$4 sm:$0xff]  }
 0x1fc   :  { %9656 = vmatprep.subr.bf16.mxu0 %v13982_v36  ;;  %10560 = vmatprep.subr.bf16.mxu1 %v13985_v37 }
 0x1fd   :  { %9589 = vmatprep.mubr.bf16.mxu0 %v5125_v38  ;;  %10493 = vmatprep.mubr.bf16.mxu1 %v5125_v38 }
 0x1ff   :  { %9657 = vmatpush1.bf16.msra.mxu0 %v13980_v26  ;;  %10561 = vmatpush1.bf16.msra.mxu1 %v13983_v22  ;;  %v5393_v26 = vcombine.low %v15556_v20, %v15562_v62  ;;  %v14006_v22 = vld [vmem:[#allocation11 + $0x6c0] ss:$16 sps:$4 sm:$0xff]  }
 0x200   :  { %9658 = vmatprep.subr.bf16.mxu0 %v13992_v46  ;;  %10562 = vmatprep.subr.bf16.mxu1 %v13995_v21  ;;  %v14009_v46 = vld [vmem:[#allocation11 + $0x6c8] ss:$16 sps:$4 sm:$0xff]  }
 0x202   :  { %9590 = vmatmul.mubr.bf16.gmra.mrb[40].mxu0 %v5121_v42  ;;  %10494 = vmatmul.mubr.bf16.gmra.mrb[40].mxu1 %v5121_v42 }
 0x203   :  { %9659 = vmatpush1.bf16.msra.mxu0 %v13990_v0  ;;  %10563 = vmatpush1.bf16.msra.mxu1 %v13993_v1 }
 0x204   :  { %9660 = vmatprep.subr.bf16.mxu0 %v13998_v19  ;;  %10564 = vmatprep.subr.bf16.mxu1 %v14001_v24 }
 0x205   :  { %v2791_v5 = vpop.f32.mrb[0].mxu0  ;;  %v3130_v28 = vpop.f32.mrb[0].mxu1  ;;  %9599 = vmatprep.mubr.bf16.mxu0 %v5397_v49  ;;  %10503 = vmatprep.mubr.bf16.mxu1 %v5397_v49  ;;  %v14017_v49 = vld [vmem:[#allocation11 + $0x6ec] ss:$16 sps:$4 sm:$0xff]  }
 0x206   :  { %v15713_v36 = vadd.f32 %v2791_v5, %v15698_v51  ;;  %v2793_v37 = vpop.f32.mrb[1].mxu0  ;;  %v3132_v38 = vpop.f32.mrb[1].mxu1  ;;  %v15718_v21 = vadd.f32 %v3130_v28, %v15702_v30 }
 0x207   :  { %v15721_v42 = vadd.f32 %v2793_v37, %v15706_v14  ;;  %v2795_v0 = vpop.f32.mrb[2].mxu0  ;;  %v3134_v1 = vpop.f32.mrb[2].mxu1  ;;  %9661 = vmatpush1.bf16.msra.mxu0 %v13996_v16  ;;  %10565 = vmatpush1.bf16.msra.mxu1 %v13999_v18  ;;  %v15731_v28 = vadd.f32 %v3132_v38, %v15710_v61  ;;  %v5669_v18 = vcombine.low %v15581_v57, %v15584_v50  ;;  %v14024_v57 = vld [vmem:[#allocation11 + $0x704] ss:$16 sps:$4 sm:$0xff]  }
 0x208   :  { %v3209_v19 = vmul.f32 %v15713_v36, %v15713_v36  ;;  %v15726_v24 = vadd.f32 %v2795_v0, %v15698_v51  ;;  %v2797_v20 = vpop.f32.mrb[3].mxu0  ;;  %v3136_v62 = vpop.f32.mrb[3].mxu1  ;;  %9662 = vmatprep.subr.bf16.mxu0 %v14008_v10  ;;  %10566 = vmatprep.subr.bf16.mxu1 %v14011_v31  ;;  %v14012_v10 = vld [vmem:[#allocation11 + $0x6e0] ss:$16 sps:$4 sm:$0xff]   ;;  %v3211_v0 = vmul.f32 %v15718_v21, %v15718_v21 }
 0x209   :  { %v3210_v5 = vmul.f32 %v15721_v42, %v15721_v42  ;;  %v15734_v16 = vadd.f32 %v2797_v20, %v15706_v14  ;;  %v14015_v20 = vld [vmem:[#allocation11 + $0x6e8] ss:$16 sps:$4 sm:$0xff]   ;;  %v15745_v31 = vadd.f32 %v3134_v1, %v15702_v30  ;;  %v15750_v35 = vadd.f32 %v3136_v62, %v15710_v61 }
 0x20a   :  { %v3213_v37 = vmul.f32 %v15726_v24, %v15726_v24  ;;  %9600 = vmatmul.mubr.bf16.gmra.mrb[44].mxu0 %v5393_v26  ;;  %10504 = vmatmul.mubr.bf16.gmra.mrb[44].mxu1 %v5393_v26  ;;  %v3212_v26 = vmul.f32 %v15731_v28, %v15731_v28 }
 0x20b   :  { %v3214_v38 = vmul.f32 %v15734_v16, %v15734_v16  ;;  %9663 = vmatpush1.bf16.msra.mxu0 %v14006_v22  ;;  %10567 = vmatpush1.bf16.msra.mxu1 %v14009_v46  ;;  %v3273_v54 = vadd.f32 %v3210_v5, %v3209_v19  ;;  %17405 = vst [vmem:[#allocation24_spill] sm:$0xff] %v15745_v31  ;;  %v14022_v19 = vld [vmem:[#allocation11 + $0x700] ss:$16 sps:$4 sm:$0xff]  }
 0x20c   :  { %9664 = vmatprep.subr.bf16.mxu0 %v14014_v44  ;;  %10568 = vmatprep.subr.bf16.mxu1 %v14017_v49  ;;  %v5665_v44 = vcombine.low %v15589_v43, %v15592_v15  ;;  %v3215_v47 = vmul.f32 %v15745_v31, %v15745_v31 }
 0x20d   :  { %v2801_v50 = vpop.f32.mrb[4].mxu0  ;;  %v3140_v56 = vpop.f32.mrb[4].mxu1  ;;  %9609 = vmatprep.mubr.bf16.mxu0 %v5669_v18  ;;  %10513 = vmatprep.mubr.bf16.mxu1 %v5669_v18  ;;  %v3274_v58 = vadd.f32 %v3273_v54, %v3211_v0  ;;  %v3278_v49 = vadd.f32 %v3214_v38, %v3213_v37 }
 0x20e   :  { %v15753_v22 = vadd.f32 %v2801_v50, %v15698_v51  ;;  %v2803_v46 = vpop.f32.mrb[5].mxu0  ;;  %v3142_v1 = vpop.f32.mrb[5].mxu1  ;;  %v15758_v5 = vadd.f32 %v3140_v56, %v15702_v30  ;;  %v14027_v50 = vld [vmem:[#allocation11 + $0x70c] ss:$16 sps:$4 sm:$0xff]  }
 0x20f   :  { %v15761_v18 = vadd.f32 %v2803_v46, %v15706_v14  ;;  %v2805_v54 = vpop.f32.mrb[6].mxu0  ;;  %v3144_v0 = vpop.f32.mrb[6].mxu1  ;;  %9665 = vmatpush1.bf16.msra.mxu0 %v14012_v10  ;;  %10569 = vmatpush1.bf16.msra.mxu1 %v14015_v20  ;;  %v3275_v62 = vadd.f32 %v3274_v58, %v3212_v26  ;;  %v15768_v15 = vadd.f32 %v3142_v1, %v15710_v61  ;;  %v14025_v46 = vld [vmem:[#allocation11 + $0x708] ss:$16 sps:$4 sm:$0xff]   ;;  %v14030_v10 = vld [vmem:[#allocation11 + $0x724] ss:$16 sps:$4 sm:$0xff]  }
 0x210   :  { %17406 = vst [vmem:[#allocation25_spill] sm:$0xff] %v15753_v22  ;;  %v3217_v43 = vmul.f32 %v15753_v22, %v15753_v22  ;;  %v15771_v56 = vadd.f32 %v2805_v54, %v15698_v51  ;;  %v2807_v37 = vpop.f32.mrb[7].mxu0  ;;  %v3146_v38 = vpop.f32.mrb[7].mxu1  ;;  %9666 = vmatprep.subr.bf16.mxu0 %v14024_v57  ;;  %v15776_v20 = vadd.f32 %v3144_v0, %v15702_v30  ;;  %v14033_v1 = vld [vmem:[#allocation11 + $0x72c] ss:$16 sps:$4 sm:$0xff]  }
 0x211   :  { %17407 = vst [vmem:[#allocation26_spill] sm:$0xff] %v15761_v18  ;;  %v3218_v58 = vmul.f32 %v15761_v18, %v15761_v18  ;;  %v15779_v26 = vadd.f32 %v2807_v37, %v15706_v14  ;;  %3276 = vadd.xlane.f32.xlu0 %v3275_v62  ;;  %v5941_v54 = vcombine.low %v15609_v29, %v15612_v7  ;;  %v14028_v37 = vld [vmem:[#allocation11 + $0x720] ss:$16 sps:$4 sm:$0xff]  }
 0x212   :  { %17408 = vst [vmem:[#allocation27_spill] sm:$0xff] %v15771_v56  ;;  %v3221_v22 = vmul.f32 %v15771_v56, %v15771_v56  ;;  %9610 = vmatmul.mubr.bf16.gmra.mrb[48].mxu0 %v5665_v44  ;;  %10514 = vmatmul.mubr.bf16.gmra.mrb[48].mxu1 %v5665_v44  ;;  %v3216_v57 = vmul.f32 %v15750_v35, %v15750_v35 }
 0x213   :  { %17409 = vst [vmem:[#allocation28_spill] sm:$0xff] %v15779_v26  ;;  %v3279_v18 = vadd.f32 %v3278_v49, %v3215_v47  ;;  %v3219_v0 = vmul.f32 %v15758_v5, %v15758_v5  ;;  %v3283_v31 = vadd.f32 %v3218_v58, %v3217_v43  ;;  %v3222_v62 = vmul.f32 %v15779_v26, %v15779_v26  ;;  %v14031_v47 = vld [vmem:[#allocation11 + $0x728] ss:$16 sps:$4 sm:$0xff]  }
 0x214   :  { %10570 = vmatprep.subr.bf16.mxu1 %v14027_v50  ;;  %9667 = vmatpush1.bf16.msra.mxu0 %v14022_v19  ;;  %v3220_v29 = vmul.f32 %v15768_v15, %v15768_v15  ;;  %v15794_v7 = vadd.f32 %v3146_v38, %v15710_v61  ;;  %v3223_v49 = vmul.f32 %v15776_v20, %v15776_v20 }
 0x215   :  { %10571 = vmatpush1.bf16.msra.mxu1 %v14025_v46  ;;  %v3280_v44 = vadd.f32 %v3279_v18, %v3216_v57  ;;  %9668 = vmatprep.subr.bf16.mxu0 %v14030_v10  ;;  %v3288_v43 = vadd.f32 %v3222_v62, %v3221_v22  ;;  %v2811_v58 = vpop.f32.mrb[8].mxu0  ;;  %v3150_v56 = vpop.f32.mrb[8].mxu1  ;;  %v3284_v19 = vadd.f32 %v3283_v31, %v3219_v0  ;;  %v14040_v46 = vld [vmem:[#allocation11 + $0x744] ss:$16 sps:$4 sm:$0xff]   ;;  %v14038_v0 = vld [vmem:[#allocation11 + $0x740] ss:$16 sps:$4 sm:$0xff]  }
 0x216   :  { %10572 = vmatprep.subr.bf16.mxu1 %v14033_v1  ;;  %9619 = vmatprep.mubr.bf16.mxu0 %v5941_v54  ;;  %v15799_v50 = vadd.f32 %v2811_v58, %v15698_v51  ;;  %v2813_v26 = vpop.f32.mrb[9].mxu0  ;;  %v3152_v38 = vpop.f32.mrb[9].mxu1  ;;  %v5937_v18 = vcombine.low %v15618_v33, %v15621_v39  ;;  %v15804_v10 = vadd.f32 %v3150_v56, %v15702_v30  ;;  %v14043_v62 = vld [vmem:[#allocation11 + $0x74c] ss:$16 sps:$4 sm:$0xff]  }
 0x217   :  { %3281 = vadd.xlane.f32.xlu1 %v3280_v44  ;;  %10523 = vmatprep.mubr.bf16.mxu1 %v5941_v54  ;;  %v15807_v22 = vadd.f32 %v2813_v26, %v15706_v14  ;;  %v2815_v1 = vpop.f32.mrb[10].mxu0  ;;  %v3154_v57 = vpop.f32.mrb[10].mxu1  ;;  %v3285_v31 = vadd.f32 %v3284_v19, %v3220_v29  ;;  %v3289_v44 = vadd.f32 %v3288_v43, %v3223_v49  ;;  %v14046_v19 = vld [vmem:[#allocation11 + $0x764] ss:$16 sps:$4 sm:$0xff]  }
 0x218   :  { %17410 = vst [vmem:[#allocation29_spill] sm:$0xff] %v15799_v50  ;;  %17411 = vst [vmem:[#allocation30_spill] sm:$0xff] %v15804_v10  ;;  %9669 = vmatpush1.bf16.msra.mxu0 %v14028_v37  ;;  %v3224_v54 = vmul.f32 %v15794_v7, %v15794_v7  ;;  %v3225_v33 = vmul.f32 %v15799_v50, %v15799_v50  ;;  %v15814_v39 = vadd.f32 %v3152_v38, %v15710_v61  ;;  %v2817_v26 = vpop.f32.mrb[11].mxu0  ;;  %v3156_v58 = vpop.f32.mrb[11].mxu1  ;;  %v14041_v37 = vld [vmem:[#allocation11 + $0x748] ss:$16 sps:$4 sm:$0xff]  }
 0x219   :  { %17412 = vst [vmem:[#allocation31_spill] sm:$0xff] %v15807_v22  ;;  %v15817_v56 = vadd.f32 %v2815_v1, %v15698_v51  ;;  %10573 = vmatpush1.bf16.msra.mxu1 %v14031_v47  ;;  %v3226_v29 = vmul.f32 %v15807_v22, %v15807_v22  ;;  %v15822_v49 = vadd.f32 %v3154_v57, %v15702_v30  ;;  %v14049_v1 = vld [vmem:[#allocation11 + $0x76c] ss:$16 sps:$4 sm:$0xff]  }
 0x21a   :  { %17413 = vst [vmem:[#allocation32_spill] sm:$0xff] %v15814_v39  ;;  %v15825_v43 = vadd.f32 %v2817_v26, %v15706_v14  ;;  %3286 = vadd.xlane.f32.xlu0 %v3285_v31  ;;  %9620 = vmatmul.mubr.bf16.gmra.mrb[52].mxu0 %v5937_v18  ;;  %v3290_v47 = vadd.f32 %v3289_v44, %v3224_v54  ;;  %v14044_v31 = vld [vmem:[#allocation11 + $0x760] ss:$16 sps:$4 sm:$0xff]   ;;  %v14047_v44 = vld [vmem:[#allocation11 + $0x768] ss:$16 sps:$4 sm:$0xff]  }
 0x21b   :  { %17414 = vst [vmem:[#allocation33_spill] sm:$0xff] %v15817_v56  ;;  %17415 = vst [vmem:[#allocation34_spill] sm:$0xff] %v15822_v49  ;;  %v3229_v38 = vmul.f32 %v15817_v56, %v15817_v56  ;;  %9670 = vmatprep.subr.bf16.mxu0 %v14040_v46  ;;  %v6213_v50 = vcombine.low %v15637_v60, %v15643_v59  ;;  %v3227_v22 = vmul.f32 %v15804_v10, %v15804_v10 }
 0x21c   :  { %17416 = vst [vmem:[#allocation35_spill] sm:$0xff] %v15825_v43  ;;  %v3293_v57 = vadd.f32 %v3226_v29, %v3225_v33  ;;  %v3230_v26 = vmul.f32 %v15825_v43, %v15825_v43  ;;  %10524 = vmatmul.mubr.bf16.gmra.mrb[52].mxu1 %v5937_v18  ;;  %10574 = vmatprep.subr.bf16.mxu1 %v14043_v62  ;;  %v14056_v62 = vld [vmem:[#allocation11 + $0x784] ss:$16 sps:$4 sm:$0xff]  }
 0x21d   :  { %v3228_v56 = vmul.f32 %v15814_v39, %v15814_v39  ;;  %v15838_v46 = vadd.f32 %v3156_v58, %v15710_v61  ;;  %9671 = vmatpush1.bf16.msra.mxu0 %v14038_v0  ;;  %10575 = vmatpush1.bf16.msra.mxu1 %v14041_v37  ;;  %v3231_v60 = vmul.f32 %v15822_v49, %v15822_v49  ;;  %v2821_v54 = vpop.f32.mrb[12].mxu0  ;;  %v3160_v33 = vpop.f32.mrb[12].mxu1 }
 0x21e   :  { %v3298_v59 = vadd.f32 %v3230_v26, %v3229_v38  ;;  %3291 = vadd.xlane.f32.xlu1 %v3290_v47  ;;  %9672 = vmatprep.subr.bf16.mxu0 %v14046_v19  ;;  %v3294_v18 = vadd.f32 %v3293_v57, %v3227_v22  ;;  %v15843_v29 = vadd.f32 %v2821_v54, %v15698_v51  ;;  %v2823_v43 = vpop.f32.mrb[13].mxu0  ;;  %v3162_v39 = vpop.f32.mrb[13].mxu1  ;;  %v14054_v54 = vld [vmem:[#allocation11 + $0x780] ss:$16 sps:$4 sm:$0xff]  }
 0x21f   :  { %17417 = vst [vmem:[#allocation36_spill] sm:$0xff] %v15838_v46  ;;  %10576 = vmatprep.subr.bf16.mxu1 %v14049_v1  ;;  %9629 = vmatprep.mubr.bf16.mxu0 %v6213_v50  ;;  %v6209_v0 = vcombine.low %v15640_v41, %v15646_v8  ;;  %v15848_v58 = vadd.f32 %v3160_v33, %v15702_v30  ;;  %v2825_v38 = vpop.f32.mrb[14].mxu0  ;;  %v3164_v19 = vpop.f32.mrb[14].mxu1 }
 0x220   :  { %17418 = vst [vmem:[#allocation37_spill] sm:$0xff] %v15843_v29  ;;  %v15851_v37 = vadd.f32 %v2823_v43, %v15706_v14  ;;  %10533 = vmatprep.mubr.bf16.mxu1 %v6213_v50  ;;  %v3295_v22 = vadd.f32 %v3294_v18, %v3228_v56  ;;  %v3299_v47 = vadd.f32 %v3298_v59, %v3231_v60  ;;  %v2827_v41 = vpop.f32.mrb[15].mxu0  ;;  %v3166_v8 = vpop.f32.mrb[15].mxu1  ;;  %v14059_v43 = vld [vmem:[#allocation11 + $0x78c] ss:$16 sps:$4 sm:$0xff]  }
 0x221   :  { %17419 = vst [vmem:[#allocation38_spill] sm:$0xff] %v15848_v58  ;;  %v3232_v57 = vmul.f32 %v15838_v46, %v15838_v46  ;;  %v3233_v1 = vmul.f32 %v15843_v29, %v15843_v29  ;;  %v15858_v26 = vadd.f32 %v2825_v38, %v15698_v51  ;;  %9673 = vmatpush1.bf16.msra.mxu0 %v14044_v31  ;;  %v14057_v60 = vld [vmem:[#allocation11 + $0x788] ss:$16 sps:$4 sm:$0xff]   ;;  %v14062_v18 = vld [vmem:[#allocation11 + $0x7a4] ss:$16 sps:$4 sm:$0xff]  }
 0x222   :  { %17420 = vst [vmem:[#allocation39_spill] sm:$0xff] %v15851_v37  ;;  %v3234_v33 = vmul.f32 %v15851_v37, %v15851_v37  ;;  %v15863_v50 = vadd.f32 %v3162_v39, %v15710_v61  ;;  %10577 = vmatpush1.bf16.msra.mxu1 %v14047_v44  ;;  %v15866_v56 = vadd.f32 %v2827_v41, %v15706_v14  ;;  %v14065_v38 = vld [vmem:[#allocation11 + $0x7ac] ss:$16 sps:$4 sm:$0xff]  }
 0x223   :  { %17421 = vst [vmem:[#allocation40_spill] sm:$0xff] %v15858_v26  ;;  %v3237_v59 = vmul.f32 %v15858_v26, %v15858_v26  ;;  %3296 = vadd.xlane.f32.xlu0 %v3295_v22  ;;  %9630 = vmatmul.mubr.bf16.gmra.mrb[56].mxu0 %v6209_v0  ;;  %v3300_v31 = vadd.f32 %v3299_v47, %v3232_v57  ;;  %v14060_v22 = vld [vmem:[#allocation11 + $0x7a0] ss:$16 sps:$4 sm:$0xff]   ;;  %v14063_v57 = vld [vmem:[#allocation11 + $0x7a8] ss:$16 sps:$4 sm:$0xff]  }
 0x224   :  { %17422 = vst [vmem:[#allocation41_spill] sm:$0xff] %v15863_v50  ;;  %17423 = vst [vmem:[#allocation42_spill] sm:$0xff] %v15866_v56  ;;  %v6485_v29 = vcombine.low %v15665_v4, %v15668_v25  ;;  %v3235_v39 = vmul.f32 %v15848_v58, %v15848_v58  ;;  %v3303_v37 = vadd.f32 %v3234_v33, %v3233_v1  ;;  %9674 = vmatprep.subr.bf16.mxu0 %v14056_v62  ;;  %v14072_v62 = vld [vmem:[#allocation11 + $0x7c4] ss:$16 sps:$4 sm:$0xff]   ;;  %v14151_v58 = vld [vmem:[#allocation11 + $0x968] ss:$16 sps:$4 sm:$0xff]  }
 0x225   :  { %v3238_v44 = vmul.f32 %v15866_v56, %v15866_v56  ;;  %10534 = vmatmul.mubr.bf16.gmra.mrb[56].mxu1 %v6209_v0  ;;  %v15877_v41 = vadd.f32 %v3164_v19, %v15702_v30  ;;  %10578 = vmatprep.subr.bf16.mxu1 %v14059_v43  ;;  %v3236_v47 = vmul.f32 %v15863_v50, %v15863_v50  ;;  %v2831_v4 = vpop.f32.mrb[16].mxu0  ;;  %v3170_v25 = vpop.f32.mrb[16].mxu1  ;;  %v14159_v46 = vld [vmem:[#allocation11 + $0x98c] ss:$16 sps:$4 sm:$0xff]  }
 0x226   :  { %9675 = vmatpush1.bf16.msra.mxu0 %v14054_v54  ;;  %10579 = vmatpush1.bf16.msra.mxu1 %v14057_v60  ;;  %v3304_v1 = vadd.f32 %v3303_v37, %v3235_v39  ;;  %v6481_v33 = vcombine.low %v15671_v23, %v15674_v2  ;;  %v15884_v19 = vadd.f32 %v3166_v8, %v15710_v61  ;;  %v2833_v43 = vpop.f32.mrb[17].mxu0  ;;  %v3172_v56 = vpop.f32.mrb[17].mxu1  ;;  %v14070_v60 = vld [vmem:[#allocation11 + $0x7c0] ss:$16 sps:$4 sm:$0xff]   ;;  %v14078_v39 = vld [vmem:[#allocation11 + $0x7e4] ss:$16 sps:$4 sm:$0xff]  }
 0x227   :  { %17424 = vst [vmem:[#allocation43_spill] sm:$0xff] %v15877_v41  ;;  %3301 = vadd.xlane.f32.xlu1 %v3300_v31  ;;  %v3308_v0 = vadd.f32 %v3238_v44, %v3237_v59  ;;  %v15887_v54 = vadd.f32 %v2831_v4, %v15698_v51  ;;  %9676 = vmatprep.subr.bf16.mxu0 %v14062_v18  ;;  %v14075_v31 = vld [vmem:[#allocation11 + $0x7cc] ss:$16 sps:$4 sm:$0xff]   ;;  %v2835_v23 = vpop.f32.mrb[18].mxu0  ;;  %v3174_v2 = vpop.f32.mrb[18].mxu1 }
 0x228   :  { %17425 = vst [vmem:[#allocation44_spill] sm:$0xff] %v15884_v19  ;;  %10580 = vmatprep.subr.bf16.mxu1 %v14065_v38  ;;  %v15890_v26 = vadd.f32 %v3170_v25, %v15702_v30  ;;  %v15893_v37 = vadd.f32 %v2833_v43, %v15706_v14  ;;  %9639 = vmatprep.mubr.bf16.mxu0 %v6485_v29  ;;  %v14073_v59 = vld [vmem:[#allocation11 + $0x7c8] ss:$16 sps:$4 sm:$0xff]   ;;  %v2837_v4 = vpop.f32.mrb[19].mxu0  ;;  %v3176_v25 = vpop.f32.mrb[19].mxu1 }
 0x229   :  { %17426 = vst [vmem:[#allocation45_spill] sm:$0xff] %v15887_v54  ;;  %10543 = vmatprep.mubr.bf16.mxu1 %v6485_v29  ;;  %v3305_v8 = vadd.f32 %v3304_v1, %v3236_v47  ;;  %v3239_v44 = vmul.f32 %v15877_v41, %v15877_v41  ;;  %v3241_v18 = vmul.f32 %v15887_v54, %v15887_v54  ;;  %v14081_v54 = vld [vmem:[#allocation11 + $0x7ec] ss:$16 sps:$4 sm:$0xff]  }
 0x22a   :  { %17427 = vst [vmem:[#allocation46_spill] sm:$0xff] %v15890_v26  ;;  %17428 = vst [vmem:[#allocation47_spill] sm:$0xff] %v15893_v37  ;;  %v15900_v38 = vadd.f32 %v2835_v23, %v15698_v51  ;;  %9677 = vmatpush1.bf16.msra.mxu0 %v14060_v22  ;;  %v3242_v43 = vmul.f32 %v15893_v37, %v15893_v37  ;;  %v15905_v29 = vadd.f32 %v3172_v56, %v15710_v61 }
 0x22b   :  { %10581 = vmatpush1.bf16.msra.mxu1 %v14063_v57  ;;  %v15908_v47 = vadd.f32 %v2837_v4, %v15706_v14  ;;  %v3240_v1 = vmul.f32 %v15884_v19, %v15884_v19  ;;  %3306 = vadd.xlane.f32.xlu0 %v3305_v8  ;;  %v3309_v22 = vadd.f32 %v3308_v0, %v3239_v44  ;;  %v14136_v19 = vld [vmem:[#allocation11 + $0x920] ss:$16 sps:$4 sm:$0xff]  }
 0x22c   :  { %17429 = vst [vmem:[#allocation48_spill] sm:$0xff] %v15900_v38  ;;  %17430 = vst [vmem:[#allocation49_spill] sm:$0xff] %v15905_v29  ;;  %v3245_v23 = vmul.f32 %v15900_v38, %v15900_v38  ;;  %9640 = vmatmul.mubr.bf16.gmra.mrb[60].mxu0 %v6481_v33  ;;  %v3243_v37 = vmul.f32 %v15890_v26, %v15890_v26  ;;  %v3313_v41 = vadd.f32 %v3242_v43, %v3241_v18  ;;  %v14076_v38 = vld [vmem:[#allocation11 + $0x7e0] ss:$16 sps:$4 sm:$0xff]   ;;  %v14079_v18 = vld [vmem:[#allocation11 + $0x7e8] ss:$16 sps:$4 sm:$0xff]  }
 0x22d   :  { %17431 = vst [vmem:[#allocation50_spill] sm:$0xff] %v15908_v47  ;;  %v3246_v56 = vmul.f32 %v15908_v47, %v15908_v47  ;;  %9678 = vmatprep.subr.bf16.mxu0 %v14072_v62  ;;  %10544 = vmatmul.mubr.bf16.gmra.mrb[60].mxu1 %v6481_v33  ;;  %v15919_v57 = vadd.f32 %v3174_v2, %v15702_v30  ;;  %v2841_v8 = vpop.f32.mrb[20].mxu0  ;;  %v3180_v44 = vpop.f32.mrb[20].mxu1  ;;  %v14082_v2 = vld [vmem:[#allocation11 + $0x800] ss:$16 sps:$4 sm:$0xff]  }
 0x22e   :  { %10582 = vmatprep.subr.bf16.mxu1 %v14075_v31  ;;  %9679 = vmatpush1.bf16.msra.mxu0 %v14070_v60  ;;  %v3310_v4 = vadd.f32 %v3309_v22, %v3240_v1  ;;  %v3244_v0 = vmul.f32 %v15905_v29, %v15905_v29  ;;  %v3314_v43 = vadd.f32 %v3313_v41, %v3243_v37  ;;  %v2843_v60 = vpop.f32.mrb[21].mxu0  ;;  %v3182_v31 = vpop.f32.mrb[21].mxu1  ;;  %v14084_v1 = vld [vmem:[#allocation11 + $0x804] ss:$16 sps:$4 sm:$0xff]   ;;  %v14087_v22 = vld [vmem:[#allocation11 + $0x80c] ss:$16 sps:$4 sm:$0xff]  }
 0x22f   :  { %17432 = vst [vmem:[#allocation51_spill] sm:$0xff] %v15919_v57  ;;  %10583 = vmatpush1.bf16.msra.mxu1 %v14073_v59  ;;  %9680 = vmatprep.subr.bf16.mxu0 %v14078_v39  ;;  %v3318_v26 = vadd.f32 %v3246_v56, %v3245_v23  ;;  %v15924_v62 = vadd.f32 %v3176_v25, %v15710_v61  ;;  %v2845_v41 = vpop.f32.mrb[22].mxu0  ;;  %v3184_v37 = vpop.f32.mrb[22].mxu1  ;;  %v14085_v23 = vld [vmem:[#allocation11 + $0x808] ss:$16 sps:$4 sm:$0xff]  }
 0x230   :  { %3311 = vadd.xlane.f32.xlu1 %v3310_v4  ;;  %v15927_v33 = vadd.f32 %v2841_v8, %v15698_v51  ;;  %10584 = vmatprep.subr.bf16.mxu1 %v14081_v54  ;;  %v15930_v59 = vadd.f32 %v3180_v44, %v15702_v30  ;;  %v15933_v39 = vadd.f32 %v2843_v60, %v15706_v14  ;;  %v2847_v8 = vpop.f32.mrb[23].mxu0  ;;  %v3186_v44 = vpop.f32.mrb[23].mxu1  ;;  %v14090_v60 = vld [vmem:[#allocation11 + $0x824] ss:$16 sps:$4 sm:$0xff]  }
 0x231   :  { %17433 = vst [vmem:[#allocation52_spill] sm:$0xff] %v15924_v62  ;;  %9682 = vmatprep.mubr.bf16.mxu0 %v15490_v63  ;;  %10586 = vmatprep.mubr.bf16.mxu1 %v15490_v63  ;;  %v3315_v25 = vadd.f32 %v3314_v43, %v3244_v0  ;;  %v3247_v54 = vmul.f32 %v15919_v57, %v15919_v57  ;;  %v14093_v43 = vld [vmem:[#allocation11 + $0x82c] ss:$16 sps:$4 sm:$0xff]  }
 0x232   :  { %17434 = vst [vmem:[#allocation53_spill] sm:$0xff] %v15927_v33  ;;  %17435 = vst [vmem:[#allocation54_spill] sm:$0xff] %v15930_v59  ;;  %v3249_v56 = vmul.f32 %v15927_v33, %v15927_v33  ;;  %v15942_v4 = vadd.f32 %v2845_v41, %v15698_v51  ;;  %9681 = vmatpush1.bf16.msra.mxu0 %v14076_v38  ;;  %v3250_v47 = vmul.f32 %v15933_v39, %v15933_v39 }
 0x233   :  { %17436 = vst [vmem:[#allocation55_spill] sm:$0xff] %v15933_v39  ;;  %v15947_v63 = vadd.f32 %v3182_v31, %v15710_v61  ;;  %10585 = vmatpush1.bf16.msra.mxu1 %v14079_v18  ;;  %v15950_v0 = vadd.f32 %v2847_v8, %v15706_v14  ;;  %v3248_v33 = vmul.f32 %v15924_v62, %v15924_v62 }
 0x234   :  { %17437 = vst [vmem:[#allocation56_spill] sm:$0xff] %v15942_v4  ;;  %v3253_v38 = vmul.f32 %v15942_v4, %v15942_v4  ;;  %3316 = vadd.xlane.f32.xlu0 %v3315_v25  ;;  %9763 = vmatprep.subr.bf16.mxu0 %v14084_v1  ;;  %v3319_v41 = vadd.f32 %v3318_v26, %v3247_v54  ;;  %v14088_v25 = vld [vmem:[#allocation11 + $0x820] ss:$16 sps:$4 sm:$0xff]   ;;  %v14091_v1 = vld [vmem:[#allocation11 + $0x828] ss:$16 sps:$4 sm:$0xff]  }
 0x235   :  { %17438 = vst [vmem:[#allocation57_spill] sm:$0xff] %v15947_v63  ;;  %17439 = vst [vmem:[#allocation58_spill] sm:$0xff] %v15950_v0  ;;  %v3251_v39 = vmul.f32 %v15930_v59, %v15930_v59  ;;  %v3323_v57 = vadd.f32 %v3250_v47, %v3249_v56  ;;  %v3254_v18 = vmul.f32 %v15950_v0, %v15950_v0  ;;  %9683 = vmatmul.mubr.bf16.vlgmr.msra.gmra.mrb[32].mxu0 %v15494_v3  ;;  %v2851_v47 = vpop.f32.mrb[24].mxu0  ;;  %v3190_v54 = vpop.f32.mrb[24].mxu1  ;;  %v14178_v0 = vld [vmem:[#allocation6 + $0x8] ss:$16 sps:$4 sm:$0xff]  }
 0x236   :  { %10667 = vmatprep.subr.bf16.mxu1 %v14087_v22  ;;  %v15962_v31 = vadd.f32 %v3184_v37, %v15702_v30  ;;  %10587 = vmatmul.mubr.bf16.vlgmr.msra.gmra.mrb[32].mxu1 %v15494_v3  ;;  %v3320_v8 = vadd.f32 %v3319_v41, %v3248_v33  ;;  %v3252_v26 = vmul.f32 %v15947_v63, %v15947_v63  ;;  %v2853_v33 = vpop.f32.mrb[25].mxu0  ;;  %v14094_v37 = vld [vmem:[#allocation11 + $0x840] ss:$16 sps:$4 sm:$0xff]   ;;  %v14096_v41 = vld [vmem:[#allocation11 + $0x844] ss:$16 sps:$4 sm:$0xff]  }
 0x237   :  { %9764 = vmatpush1.bf16.msra.mxu0 %v14082_v2  ;;  %10668 = vmatpush1.bf16.msra.mxu1 %v14085_v23  ;;  %v3324_v56 = vadd.f32 %v3323_v57, %v3251_v39  ;;  %v3328_v4 = vadd.f32 %v3254_v18, %v3253_v38  ;;  %v15968_v22 = vadd.f32 %v3186_v44, %v15710_v61  ;;  %v3192_v2 = vpop.f32.mrb[25].mxu1  ;;  %v2855_v57 = vpop.f32.mrb[26].mxu0  ;;  %v14097_v38 = vld [vmem:[#allocation11 + $0x848] ss:$16 sps:$4 sm:$0xff]   ;;  %v14099_v18 = vld [vmem:[#allocation11 + $0x84c] ss:$16 sps:$4 sm:$0xff]  }
 0x238   :  { %17440 = vst [vmem:[#allocation59_spill] sm:$0xff] %v15962_v31  ;;  %9765 = vmatprep.subr.bf16.mxu0 %v14090_v60  ;;  %3321 = vadd.xlane.f32.xlu1 %v3320_v8  ;;  %v15971_v3 = vadd.f32 %v2851_v47, %v15698_v51  ;;  %v15974_v23 = vadd.f32 %v3190_v54, %v15702_v30  ;;  %v3194_v39 = vpop.f32.mrb[26].mxu1  ;;  %v2857_v54 = vpop.f32.mrb[27].mxu0  ;;  %v14180_v63 = vld [vmem:[#allocation6 + $0x28] ss:$16 sps:$4 sm:$0xff]  }
 0x239   :  { %17441 = vst [vmem:[#allocation60_spill] sm:$0xff] %v15968_v22  ;;  %10669 = vmatprep.subr.bf16.mxu1 %v14093_v43  ;;  %v15977_v60 = vadd.f32 %v2853_v33, %v15706_v14  ;;  %9692 = vmatprep.mubr.bf16.mxu0 %v15518_v53  ;;  %v3325_v44 = vadd.f32 %v3324_v56, %v3252_v26  ;;  %v3196_v33 = vpop.f32.mrb[27].mxu1  ;;  %v14102_v56 = vld [vmem:[#allocation11 + $0x864] ss:$16 sps:$4 sm:$0xff]  }
 0x23a   :  { %17442 = vst [vmem:[#allocation61_spill] sm:$0xff] %v15971_v3  ;;  %17443 = vst [vmem:[#allocation62_spill] sm:$0xff] %v15974_v23  ;;  %10596 = vmatprep.mubr.bf16.mxu1 %v15518_v53  ;;  %v3255_v43 = vmul.f32 %v15962_v31, %v15962_v31  ;;  %v3257_v8 = vmul.f32 %v15971_v3, %v15971_v3  ;;  %v15986_v47 = vadd.f32 %v2855_v57, %v15698_v51  ;;  %v14100_v31 = vld [vmem:[#allocation11 + $0x860] ss:$16 sps:$4 sm:$0xff]  }
 0x23b   :  { %17444 = vst [vmem:[#allocation63_spill] sm:$0xff] %v15977_v60  ;;  %9766 = vmatpush1.bf16.msra.mxu0 %v14088_v25  ;;  %v3258_v59 = vmul.f32 %v15977_v60, %v15977_v60  ;;  %v15991_v53 = vadd.f32 %v3192_v2, %v15710_v61  ;;  %10670 = vmatpush1.bf16.msra.mxu1 %v14091_v1  ;;  %v14105_v2 = vld [vmem:[#allocation11 + $0x86c] ss:$16 sps:$4 sm:$0xff]  }
 0x23c   :  { %17445 = vst [vmem:[#allocation64_spill] sm:$0xff] %v15986_v47  ;;  %v15994_v26 = vadd.f32 %v2857_v54, %v15706_v14  ;;  %v15997_v3 = vrot.slane %v14178_v0, %v14956_v55  ;;  %v3256_v25 = vmul.f32 %v15968_v22, %v15968_v22  ;;  %v3261_v57 = vmul.f32 %v15986_v47, %v15986_v47  ;;  %v14103_v0 = vld [vmem:[#allocation11 + $0x868] ss:$16 sps:$4 sm:$0xff]   ;;  %v14182_v47 = vld [vmem:[#allocation6 + $0x48] ss:$16 sps:$4 sm:$0xff]  }
 0x23d   :  { %17446 = vst [vmem:[#allocation65_spill] sm:$0xff] %v15991_v53  ;;  %3326 = vadd.xlane.f32.xlu0 %v3325_v44  ;;  %9767 = vmatprep.subr.bf16.mxu0 %v14096_v41  ;;  %v3329_v60 = vadd.f32 %v3328_v4, %v3255_v43  ;;  %v3259_v1 = vmul.f32 %v15974_v23, %v15974_v23  ;;  %v14108_v41 = vld [vmem:[#allocation11 + $0x884] ss:$16 sps:$4 sm:$0xff]  }
 0x23e   :  { %17447 = vst [vmem:[#allocation66_spill] sm:$0xff] %v15994_v26  ;;  %v3333_v54 = vadd.f32 %v3258_v59, %v3257_v8  ;;  %v3262_v62 = vmul.f32 %v15994_v26, %v15994_v26  ;;  %9693 = vmatmul.mubr.bf16.gmra.mrb[36].mxu0 %v15522_v40  ;;  %10671 = vmatprep.subr.bf16.mxu1 %v14099_v18  ;;  %v2861_v18 = vpop.f32.mrb[28].mxu0  ;;  %v3200_v8 = vpop.f32.mrb[28].mxu1  ;;  %v14111_v26 = vld [vmem:[#allocation11 + $0x88c] ss:$16 sps:$4 sm:$0xff]  }
 0x23f   :  { %v16009_v22 = vadd.f32 %v3194_v39, %v15702_v30  ;;  %10597 = vmatmul.mubr.bf16.gmra.mrb[36].mxu1 %v15522_v40  ;;  %9768 = vmatpush1.bf16.msra.mxu0 %v14094_v37  ;;  %v3330_v4 = vadd.f32 %v3329_v60, %v3256_v25  ;;  %v16013_v44 = vrot.slane %v14180_v63, %v14956_v55  ;;  %v2863_v60 = vpop.f32.mrb[29].mxu0  ;;  %v3202_v25 = vpop.f32.mrb[29].mxu1 }
 0x240   :  { %v3260_v59 = vmul.f32 %v15991_v53, %v15991_v53  ;;  %v16018_v43 = vadd.f32 %v3196_v33, %v15710_v61  ;;  %10672 = vmatpush1.bf16.msra.mxu1 %v14097_v38  ;;  %9769 = vmatprep.subr.bf16.mxu0 %v14102_v56  ;;  %v3334_v39 = vadd.f32 %v3333_v54, %v3259_v1  ;;  %v14106_v33 = vld [vmem:[#allocation11 + $0x880] ss:$16 sps:$4 sm:$0xff]   ;;  %v14184_v53 = vld [vmem:[#allocation6 + $0x68] ss:$16 sps:$4 sm:$0xff]   ;;  %v14109_v54 = vld [vmem:[#allocation11 + $0x888] ss:$16 sps:$4 sm:$0xff]  }
 0x241   :  { %17448 = vst [vmem:[#allocation67_spill] sm:$0xff] %v16009_v22  ;;  %v3338_v40 = vadd.f32 %v3262_v62, %v3261_v57  ;;  %3331 = vadd.xlane.f32.xlu1 %v3330_v4  ;;  %v16021_v37 = vadd.f32 %v2861_v18, %v15698_v51  ;;  %v16024_v63 = vadd.f32 %v3200_v8, %v15702_v30  ;;  %v14198_v38 = vld [vmem:[#allocation6 + $0x88] ss:$16 sps:$4 sm:$0xff]   ;;  %v2865_v62 = vpop.f32.mrb[30].mxu0  ;;  %v3204_v57 = vpop.f32.mrb[30].mxu1 }
 0x242   :  { %17449 = vst [vmem:[#allocation68_spill] sm:$0xff] %v16018_v43  ;;  %10673 = vmatprep.subr.bf16.mxu1 %v14105_v2  ;;  %v16027_v23 = vadd.f32 %v2863_v60, %v15706_v14  ;;  %v16030_v56 = vadd.f32 %v3202_v25, %v15710_v61  ;;  %9702 = vmatprep.mubr.bf16.mxu0 %v15544_v6  ;;  %v14114_v4 = vld [vmem:[#allocation11 + $0x8a4] ss:$16 sps:$4 sm:$0xff]   ;;  %v2867_v25 = vpop.f32.mrb[31].mxu0 }
 0x243   :  { %17450 = vst [vmem:[#allocation69_spill] sm:$0xff] %v16021_v37  ;;  %17451 = vst [vmem:[#allocation70_spill] sm:$0xff] %v16024_v63  ;;  %10606 = vmatprep.mubr.bf16.mxu1 %v15544_v6  ;;  %v3335_v1 = vadd.f32 %v3334_v39, %v3260_v59  ;;  %v14200_v18 = vld [vmem:[#allocation6 + $0xa8] ss:$16 sps:$4 sm:$0xff]   ;;  %v3263_v2 = vmul.f32 %v16009_v22, %v16009_v22  ;;  %v16037_v8 = vadd.f32 %v2865_v62, %v15698_v51  ;;  %v14117_v63 = vld [vmem:[#allocation11 + $0x8ac] ss:$16 sps:$4 sm:$0xff]  }
 0x244   :  { %17452 = vst [vmem:[#allocation71_spill] sm:$0xff] %v16027_v23  ;;  %17453 = vst [vmem:[#allocation72_spill] sm:$0xff] %v16030_v56  ;;  %v16040_v60 = vadd.f32 %v3204_v57, %v15702_v30  ;;  %9770 = vmatpush1.bf16.msra.mxu0 %v14100_v31  ;;  %v3206_v56 = vpop.f32.mrb[31].mxu1  ;;  %v14202_v23 = vld [vmem:[#allocation6 + $0xc8] ss:$16 sps:$4 sm:$0xff]   ;;  %10674 = vmatpush1.bf16.msra.mxu1 %v14103_v0  ;;  %v16043_v6 = vadd.f32 %v2867_v25, %v15706_v14 }
 0x245   :  { %17454 = vst [vmem:[#allocation73_spill] sm:$0xff] %v16037_v8  ;;  %v14204_v37 = vld [vmem:[#allocation6 + $0xe8] ss:$16 sps:$4 sm:$0xff]   ;;  %v16046_v59 = vadd.f32 %v3206_v56, %v15710_v61  ;;  %v16049_v39 = vrot.slane %v14182_v47, %v14956_v55  ;;  %v3264_v30 = vmul.f32 %v16018_v43, %v16018_v43  ;;  %3336 = vadd.xlane.f32.xlu0 %v3335_v1  ;;  %v14112_v57 = vld [vmem:[#allocation11 + $0x8a0] ss:$16 sps:$4 sm:$0xff]  }
 0x246   :  { %17455 = vst [vmem:[#allocation74_spill] sm:$0xff] %v16040_v60  ;;  %17456 = vst [vmem:[#allocation75_spill] sm:$0xff] %v16043_v6  ;;  %v14218_v51 = vld [vmem:[#allocation6 + $0x108] ss:$16 sps:$4 sm:$0xff]   ;;  %9771 = vmatprep.subr.bf16.mxu0 %v14108_v41  ;;  %v3339_v31 = vadd.f32 %v3338_v40, %v3263_v2  ;;  %v4639_v0 = vrot.slane %v14184_v53, %v14956_v55  ;;  %9703 = vmatmul.mubr.bf16.gmra.mrb[40].mxu0 %v15550_v9  ;;  %v14115_v14 = vld [vmem:[#allocation11 + $0x8a8] ss:$16 sps:$4 sm:$0xff]  }
 0x247   :  { %17457 = vst [vmem:[#allocation76_spill] sm:$0xff] %v16046_v59  ;;  %v14220_v62 = vld [vmem:[#allocation6 + $0x128] ss:$16 sps:$4 sm:$0xff]   ;;  %10675 = vmatprep.subr.bf16.mxu1 %v14111_v26  ;;  %v4648_v47 = vcombine.high %v15997_v3, %v16013_v44  ;;  %v4869_v56 = vrot.slane %v14198_v38, %v14956_v55  ;;  %v4883_v25 = vrot.slane %v14200_v18, %v14956_v55  ;;  %v14123_v40 = vld [vmem:[#allocation11 + $0x8cc] ss:$16 sps:$4 sm:$0xff]  }
 0x248   :  { %v14222_v60 = vld [vmem:[#allocation6 + $0x148] ss:$16 sps:$4 sm:$0xff]   ;;  %10607 = vmatmul.mubr.bf16.gmra.mrb[40].mxu1 %v15550_v9  ;;  %9772 = vmatpush1.bf16.msra.mxu0 %v14106_v33  ;;  %v3340_v41 = vadd.f32 %v3339_v31, %v3264_v30  ;;  %v4897_v53 = vrot.slane %v14202_v23, %v14956_v55  ;;  %v4911_v1 = vrot.slane %v14204_v37, %v14956_v55  ;;  %v14129_v31 = vld [vmem:[#allocation11 + $0x8ec] ss:$16 sps:$4 sm:$0xff]  }
 0x249   :  { %v14120_v61 = vld [vmem:[#allocation11 + $0x8c4] ss:$16 sps:$4 sm:$0xff]   ;;  %10676 = vmatpush1.bf16.msra.mxu1 %v14109_v54  ;;  %9773 = vmatprep.subr.bf16.mxu0 %v14114_v4  ;;  %v4647_v6 = vcombine.low %v15997_v3, %v16013_v44  ;;  %v4651_v38 = vcombine.low %v16049_v39, %v4639_v0  ;;  %v4652_v9 = vcombine.high %v16049_v39, %v4639_v0  ;;  %v14121_v4 = vld [vmem:[#allocation11 + $0x8c8] ss:$16 sps:$4 sm:$0xff]  }
 0x24a   :  { %v14224_v59 = vld [vmem:[#allocation6 + $0x168] ss:$16 sps:$4 sm:$0xff]   ;;  %3341 = vadd.xlane.f32.xlu1 %v3340_v41  ;;  %10677 = vmatprep.subr.bf16.mxu1 %v14117_v63  ;;  %v5141_v33 = vrot.slane %v14218_v51, %v14956_v55  ;;  %v16070_v23 = vrot.slane %v4648_v47, %v14956_v55  ;;  %v5155_v37 = vrot.slane %v14220_v62, %v14956_v55  ;;  %v14118_v63 = vld [vmem:[#allocation11 + $0x8c0] ss:$16 sps:$4 sm:$0xff]  }
 0x24b   :  { %v14238_v26 = vld [vmem:[#allocation6 + $0x188] ss:$16 sps:$4 sm:$0xff]   ;;  %9712 = vmatprep.mubr.bf16.mxu0 %v15572_v32  ;;  %10616 = vmatprep.mubr.bf16.mxu1 %v15572_v32  ;;  %v16074_v54 = vrot.slane %v14222_v60, %v14956_v55  ;;  %v4920_v18 = vcombine.high %v4869_v56, %v4883_v25  ;;  %v4924_v39 = vcombine.high %v4897_v53, %v4911_v1 }
 0x24c   :  { %v14240_v2 = vld [vmem:[#allocation6 + $0x1a8] ss:$16 sps:$4 sm:$0xff]   ;;  %9774 = vmatpush1.bf16.msra.mxu0 %v14112_v57  ;;  %v4919_v51 = vcombine.low %v4869_v56, %v4883_v25  ;;  %v5183_v30 = vrot.slane %v14224_v59, %v14956_v55  ;;  %v4923_v0 = vcombine.low %v4897_v53, %v4911_v1  ;;  %v16078_v62 = vrot.slane %v14238_v26, %v14956_v55  ;;  %v14124_v57 = vld [vmem:[#allocation11 + $0x8e0] ss:$16 sps:$4 sm:$0xff]  }
 0x24d   :  { %v14242_v3 = vld [vmem:[#allocation6 + $0x1c8] ss:$16 sps:$4 sm:$0xff]   ;;  %10678 = vmatpush1.bf16.msra.mxu1 %v14115_v14  ;;  %9775 = vmatprep.subr.bf16.mxu0 %v14120_v61  ;;  %v16081_v60 = vrot.slane %v14240_v2, %v14956_v55  ;;  %v16084_v47 = vrot.slane %v4652_v9, %v14956_v55  ;;  %v5192_v41 = vcombine.high %v5141_v33, %v5155_v37  ;;  %v14127_v61 = vld [vmem:[#allocation11 + $0x8e8] ss:$16 sps:$4 sm:$0xff]  }
 0x24e   :  { %v14244_v44 = vld [vmem:[#allocation6 + $0x1e8] ss:$16 sps:$4 sm:$0xff]   ;;  %10679 = vmatprep.subr.bf16.mxu1 %v14123_v40  ;;  %v5196_v56 = vcombine.high %v16074_v54, %v5183_v30  ;;  %v5191_v59 = vcombine.low %v5141_v33, %v5155_v37  ;;  %9713 = vmatmul.mubr.bf16.gmra.mrb[44].mxu0 %v15576_v17  ;;  %v16089_v25 = vrot.slane %v4647_v6, %v14956_v55 }
 0x24f   :  { %v14126_v32 = vld [vmem:[#allocation11 + $0x8e4] ss:$16 sps:$4 sm:$0xff]   ;;  %v16092_v53 = vrot.slane %v4651_v38, %v14956_v55  ;;  %v5441_v40 = vrot.slane %v14242_v3, %v14956_v55  ;;  %v5455_v1 = vrot.slane %v14244_v44, %v14956_v55  ;;  %v16098_v2 = vrot.slane %v4920_v18, %v14956_v55  ;;  %v14135_v3 = vld [vmem:[#allocation11 + $0x90c] ss:$16 sps:$4 sm:$0xff]   ;;  %9722 = vmatprep.mubr.bf16.mxu0 %v15598_v13  ;;  %v14130_v18 = vld [vmem:[#allocation11 + $0x900] ss:$16 sps:$4 sm:$0xff]  }
 0x250   :  { %v14258_v14 = vld [vmem:[#allocation6 + $0x208] ss:$16 sps:$4 sm:$0xff]   ;;  %10617 = vmatmul.mubr.bf16.gmra.mrb[44].mxu1 %v15576_v17  ;;  %9776 = vmatpush1.bf16.msra.mxu0 %v14118_v63  ;;  %v16101_v9 = vrot.slane %v4924_v39, %v14956_v55  ;;  %v16104_v6 = vrot.slane %v4919_v51, %v14956_v55  ;;  %v16107_v44 = vrot.slane %v4923_v0, %v14956_v55 }
 0x251   :  { %v14260_v26 = vld [vmem:[#allocation6 + $0x228] ss:$16 sps:$4 sm:$0xff]   ;;  %10680 = vmatpush1.bf16.msra.mxu1 %v14121_v4  ;;  %9777 = vmatprep.subr.bf16.mxu0 %v14126_v32  ;;  %v5195_v17 = vcombine.low %v16074_v54, %v5183_v30  ;;  %v5464_v63 = vcombine.high %v16078_v62, %v16081_v60  ;;  %v16114_v39 = vrot.slane %v5192_v41, %v14956_v55  ;;  %v14133_v32 = vld [vmem:[#allocation11 + $0x908] ss:$16 sps:$4 sm:$0xff]  }
 0x252   :  { %v14262_v33 = vld [vmem:[#allocation6 + $0x248] ss:$16 sps:$4 sm:$0xff]   ;;  %10681 = vmatprep.subr.bf16.mxu1 %v14129_v31  ;;  %v16117_v4 = vrot.slane %v5196_v56, %v14956_v55  ;;  %v16120_v51 = vrot.slane %v5191_v59, %v14956_v55  ;;  %10626 = vmatprep.mubr.bf16.mxu1 %v15598_v13  ;;  %v5468_v30 = vcombine.high %v5441_v40, %v5455_v1 }
 0x253   :  { %v14264_v38 = vld [vmem:[#allocation6 + $0x268] ss:$16 sps:$4 sm:$0xff]   ;;  %v5463_v31 = vcombine.low %v16078_v62, %v16081_v60  ;;  %v5467_v0 = vcombine.low %v5441_v40, %v5455_v1  ;;  %v5685_v8 = vrot.slane %v14258_v14, %v14956_v55  ;;  %v5699_v41 = vrot.slane %v14260_v26, %v14956_v55  ;;  %v14141_v1 = vld [vmem:[#allocation11 + $0x92c] ss:$16 sps:$4 sm:$0xff]  }
 0x254   :  { %v14132_v37 = vld [vmem:[#allocation11 + $0x904] ss:$16 sps:$4 sm:$0xff]   ;;  %9778 = vmatpush1.bf16.msra.mxu0 %v14124_v57  ;;  %v5713_v56 = vrot.slane %v14262_v33, %v14956_v55  ;;  %v5727_v43 = vrot.slane %v14264_v38, %v14956_v55  ;;  %v16131_v13 = vcombine.high %v16070_v23, %v16084_v47  ;;  %v16134_v22 = vrot.slane %v5195_v17, %v14956_v55 }
 0x255   :  { %v14138_v54 = vld [vmem:[#allocation11 + $0x924] ss:$16 sps:$4 sm:$0xff]   ;;  %10682 = vmatpush1.bf16.msra.mxu1 %v14127_v61  ;;  %9779 = vmatprep.subr.bf16.mxu0 %v14132_v37  ;;  %v16137_v62 = vrot.slane %v5464_v63, %v14956_v55  ;;  %v16141_v40 = vcombine.high %v16089_v25, %v16092_v53  ;;  %v5736_v26 = vcombine.high %v5685_v8, %v5699_v41 }
 0x256   :  { %v14278_v59 = vld [vmem:[#allocation6 + $0x288] ss:$16 sps:$4 sm:$0xff]   ;;  %10683 = vmatprep.subr.bf16.mxu1 %v14135_v3  ;;  %v5740_v33 = vcombine.high %v5713_v56, %v5727_v43  ;;  %v5735_v38 = vcombine.low %v5685_v8, %v5699_v41  ;;  %v5739_v61 = vcombine.low %v5713_v56, %v5727_v43  ;;  %9723 = vmatmul.mubr.bf16.gmra.mrb[48].mxu0 %v15604_v27  ;;  %v14139_v41 = vld [vmem:[#allocation11 + $0x928] ss:$16 sps:$4 sm:$0xff]  }
 0x257   :  { %v14280_v60 = vld [vmem:[#allocation6 + $0x2a8] ss:$16 sps:$4 sm:$0xff]   ;;  %v5957_v37 = vrot.slane %v14278_v59, %v14956_v55  ;;  %v16150_v3 = vrot.slane %v5468_v30, %v14956_v55  ;;  %v16153_v8 = vrot.slane %v5463_v31, %v14956_v55  ;;  %v16156_v43 = vrot.slane %v5467_v0, %v14956_v55  ;;  %9732 = vmatprep.mubr.bf16.mxu0 %v15626_v45  ;;  %v14147_v30 = vld [vmem:[#allocation11 + $0x94c] ss:$16 sps:$4 sm:$0xff]  }
 0x258   :  { %v14282_v57 = vld [vmem:[#allocation6 + $0x2c8] ss:$16 sps:$4 sm:$0xff]   ;;  %v5971_v17 = vrot.slane %v14280_v60, %v14956_v55  ;;  %10627 = vmatmul.mubr.bf16.gmra.mrb[48].mxu1 %v15604_v27  ;;  %9780 = vmatpush1.bf16.msra.mxu0 %v14130_v18  ;;  %v16159_v59 = vrot.slane %v5736_v26, %v14956_v55  ;;  %v14142_v18 = vld [vmem:[#allocation11 + $0x940] ss:$16 sps:$4 sm:$0xff]   ;;  %v16163_v31 = vrot.slane %v5740_v33, %v14956_v55  ;;  %v14153_v33 = vld [vmem:[#allocation11 + $0x96c] ss:$16 sps:$4 sm:$0xff]  }
 0x259   :  { %v14284_v14 = vld [vmem:[#allocation6 + $0x2e8] ss:$16 sps:$4 sm:$0xff]   ;;  %v5985_v63 = vrot.slane %v14282_v57, %v14956_v55  ;;  %10684 = vmatpush1.bf16.msra.mxu1 %v14133_v32  ;;  %9781 = vmatprep.subr.bf16.mxu0 %v14138_v54  ;;  %v14145_v32 = vld [vmem:[#allocation11 + $0x948] ss:$16 sps:$4 sm:$0xff]   ;;  %v16170_v26 = vrot.slane %v5739_v61, %v14956_v55  ;;  %v16177_v50 = vcombine.high %v16098_v2, %v16101_v9 }
 0x25a   :  { %v5999_v29 = vrot.slane %v14284_v14, %v14956_v55  ;;  %v14144_v56 = vld [vmem:[#allocation11 + $0x944] ss:$16 sps:$4 sm:$0xff]   ;;  %v6008_v60 = vcombine.high %v5957_v37, %v5971_v17  ;;  %10685 = vmatprep.subr.bf16.mxu1 %v14141_v1  ;;  %v6007_v57 = vcombine.low %v5957_v37, %v5971_v17  ;;  %10636 = vmatprep.mubr.bf16.mxu1 %v15626_v45 }
 0x25b   :  { %v14150_v54 = vld [vmem:[#allocation11 + $0x964] ss:$16 sps:$4 sm:$0xff]   ;;  %v16167_v14 = vrot.slane %v5735_v38, %v14956_v55  ;;  %v16187_v38 = vcombine.high %v16104_v6, %v16107_v44  ;;  %v16191_v61 = vcombine.high %v16114_v39, %v16117_v4  ;;  %v16202_v17 = vcombine.high %v16137_v62, %v16150_v3 }
 0x25c   :  { %v6012_v27 = vcombine.high %v5985_v63, %v5999_v29  ;;  %v6011_v0 = vcombine.low %v5985_v63, %v5999_v29  ;;  %v16173_v1 = vrot.slane %v6008_v60, %v14956_v55  ;;  %9782 = vmatpush1.bf16.msra.mxu0 %v14136_v19  ;;  %v16183_v45 = vrot.slane %v6007_v57, %v14956_v55  ;;  %v14298_v63 = vld [vmem:[#allocation6 + $0x308] ss:$16 sps:$4 sm:$0xff]  }
 0x25d   :  { %17458 = vst [vmem:[#allocation77_spill] sm:$0xff] %v16187_v38  ;;  %17459 = vst [vmem:[#allocation78_spill] sm:$0xff] %v16191_v61  ;;  %10686 = vmatpush1.bf16.msra.mxu1 %v14139_v41  ;;  %9783 = vmatprep.subr.bf16.mxu0 %v14144_v56  ;;  %v16198_v19 = vcombine.high %v16120_v51, %v16134_v22  ;;  %v14300_v60 = vld [vmem:[#allocation6 + $0x328] ss:$16 sps:$4 sm:$0xff]   ;;  %v16206_v57 = vcombine.high %v16153_v8, %v16156_v43 }
 0x25e   :  { %v16180_v29 = vrot.slane %v6012_v27, %v14956_v55  ;;  %v16194_v37 = vrot.slane %v6011_v0, %v14956_v55  ;;  %17461 = vst [vmem:[#allocation80_spill] sm:$0xff] %v16202_v17  ;;  %10687 = vmatprep.subr.bf16.mxu1 %v14147_v30  ;;  %v14302_v27 = vld [vmem:[#allocation6 + $0x348] ss:$16 sps:$4 sm:$0xff]   ;;  %v16210_v41 = vcombine.high %v16159_v59, %v16163_v31 }
 0x25f   :  { %17460 = vst [vmem:[#allocation79_spill] sm:$0xff] %v16198_v19  ;;  %17462 = vst [vmem:[#allocation81_spill] sm:$0xff] %v16206_v57  ;;  %v16214_v56 = vcombine.high %v16167_v14, %v16170_v26  ;;  %9733 = vmatmul.mubr.bf16.gmra.mrb[52].mxu0 %v15632_v12  ;;  %v14304_v0 = vld [vmem:[#allocation6 + $0x368] ss:$16 sps:$4 sm:$0xff]   ;;  %v14148_v57 = vld [vmem:[#allocation11 + $0x960] ss:$16 sps:$4 sm:$0xff]   ;;  %v6243_v19 = vrot.slane %v14300_v60, %v14956_v55  ;;  %v4715_v10 = vcombine.low %v16070_v23, %v16084_v47 }
 0x260   :  { %17463 = vst [vmem:[#allocation82_spill] sm:$0xff] %v16210_v41  ;;  %v16219_v30 = vcombine.high %v16173_v1, %v16180_v29  ;;  %v16223_v17 = vcombine.high %v16183_v45, %v16194_v37  ;;  %10637 = vmatmul.mubr.bf16.gmra.mrb[52].mxu1 %v15632_v12  ;;  %9784 = vmatpush1.bf16.msra.mxu0 %v14142_v18  ;;  %v14156_v61 = vld [vmem:[#allocation11 + $0x984] ss:$16 sps:$4 sm:$0xff]   ;;  %v14175_v47 = vld [vmem:[#allocation11 + $0x9e8] ss:$16 sps:$4 sm:$0xff]  }
 0x261   :  { %17464 = vst [vmem:[#allocation83_spill] sm:$0xff] %v16214_v56  ;;  %v6229_v41 = vrot.slane %v14298_v63, %v14956_v55  ;;  %v6257_v56 = vrot.slane %v14302_v27, %v14956_v55  ;;  %10688 = vmatpush1.bf16.msra.mxu1 %v14145_v32  ;;  %9785 = vmatprep.subr.bf16.mxu0 %v14150_v54  ;;  %v14157_v63 = vld [vmem:[#allocation11 + $0x988] ss:$16 sps:$4 sm:$0xff]   ;;  %v14162_v27 = vld [vmem:[#allocation11 + $0x9a4] ss:$16 sps:$4 sm:$0xff]  }
 0x262   :  { %17465 = vst [vmem:[#allocation84_spill] sm:$0xff] %v16219_v30  ;;  %17466 = vst [vmem:[#allocation85_spill] sm:$0xff] %v16223_v17  ;;  %v6271_v30 = vrot.slane %v14304_v0, %v14956_v55  ;;  %10689 = vmatprep.subr.bf16.mxu1 %v14153_v33  ;;  %9742 = vmatprep.mubr.bf16.mxu0 %v15656_v11  ;;  %v14154_v17 = vld [vmem:[#allocation11 + $0x980] ss:$16 sps:$4 sm:$0xff]   ;;  %v14165_v32 = vld [vmem:[#allocation11 + $0x9ac] ss:$16 sps:$4 sm:$0xff]  }
 0x263   :  { %v6280_v12 = vcombine.high %v6229_v41, %v6243_v19  ;;  %v6279_v18 = vcombine.low %v6229_v41, %v6243_v19  ;;  %10646 = vmatprep.mubr.bf16.mxu1 %v15656_v11  ;;  %v14160_v11 = vld [vmem:[#allocation11 + $0x9a0] ss:$16 sps:$4 sm:$0xff]   ;;  %v14320_v41 = vld [vmem:[#allocation6 + $0x3a8] ss:$16 sps:$4 sm:$0xff]  }
 0x264   :  { %v6284_v49 = vcombine.high %v6257_v56, %v6271_v30  ;;  %v6283_v60 = vcombine.low %v6257_v56, %v6271_v30  ;;  %9786 = vmatpush1.bf16.msra.mxu0 %v14148_v57  ;;  %v14318_v57 = vld [vmem:[#allocation6 + $0x388] ss:$16 sps:$4 sm:$0xff]  }
 0x265   :  { %v16233_v54 = vrot.slane %v6280_v12, %v14956_v55  ;;  %10690 = vmatpush1.bf16.msra.mxu1 %v14151_v58  ;;  %9787 = vmatprep.subr.bf16.mxu0 %v14156_v61  ;;  %v16239_v0 = vrot.slane %v6279_v18, %v14956_v55  ;;  %v14322_v58 = vld [vmem:[#allocation6 + $0x3c8] ss:$16 sps:$4 sm:$0xff]   ;;  %v6501_v12 = vrot.slane %v14318_v57, %v14956_v55  ;;  %v14169_v57 = vld [vmem:[#allocation11 + $0x9c8] ss:$16 sps:$4 sm:$0xff]  }
 0x266   :  { %v16236_v33 = vrot.slane %v6284_v49, %v14956_v55  ;;  %v16242_v19 = vrot.slane %v6283_v60, %v14956_v55  ;;  %10691 = vmatprep.subr.bf16.mxu1 %v14159_v46  ;;  %v14324_v61 = vld [vmem:[#allocation6 + $0x3e8] ss:$16 sps:$4 sm:$0xff]   ;;  %v14163_v46 = vld [vmem:[#allocation11 + $0x9a8] ss:$16 sps:$4 sm:$0xff]   ;;  %v6515_v18 = vrot.slane %v14320_v41, %v14956_v55  ;;  %v14171_v60 = vld [vmem:[#allocation11 + $0x9cc] ss:$16 sps:$4 sm:$0xff]  }
 0x267   :  { %9743 = vmatmul.mubr.bf16.gmra.mrb[56].mxu0 %v15660_v52  ;;  %v14168_v30 = vld [vmem:[#allocation11 + $0x9c4] ss:$16 sps:$4 sm:$0xff]  }
 0x268   :  { %v16247_v56 = vcombine.high %v16233_v54, %v16236_v33  ;;  %v16251_v49 = vcombine.high %v16239_v0, %v16242_v19  ;;  %10647 = vmatmul.mubr.bf16.gmra.mrb[56].mxu1 %v15660_v52  ;;  %9788 = vmatpush1.bf16.msra.mxu0 %v14154_v17  ;;  %v6552_v52 = vcombine.high %v6501_v12, %v6515_v18  ;;  %v14174_v41 = vld [vmem:[#allocation11 + $0x9e4] ss:$16 sps:$4 sm:$0xff]  }
 0x269   :  { %10692 = vmatpush1.bf16.msra.mxu1 %v14157_v63  ;;  %9789 = vmatprep.subr.bf16.mxu0 %v14162_v27  ;;  %v6551_v17 = vcombine.low %v6501_v12, %v6515_v18  ;;  %v14166_v63 = vld [vmem:[#allocation11 + $0x9c0] ss:$16 sps:$4 sm:$0xff]   ;;  %v14189_v12 = vld [vmem:[#allocation11 + $0xa08] ss:$16 sps:$4 sm:$0xff]   ;;  %v14194_v18 = vld [vmem:[#allocation11 + $0xa24] ss:$16 sps:$4 sm:$0xff]  }
 0x26a   :  { %17467 = vst [vmem:[#allocation86_spill] sm:$0xff] %v16247_v56  ;;  %17468 = vst [vmem:[#allocation87_spill] sm:$0xff] %v16251_v49  ;;  %10693 = vmatprep.subr.bf16.mxu1 %v14165_v32  ;;  %9752 = vmatprep.mubr.bf16.mxu0 %v15678_v34  ;;  %v6529_v56 = vrot.slane %v14322_v58, %v14956_v55  ;;  %v6543_v49 = vrot.slane %v14324_v61, %v14956_v55  ;;  %v14177_v32 = vld [vmem:[#allocation11 + $0x9ec] ss:$16 sps:$4 sm:$0xff]   ;;  %v14188_v61 = vld [vmem:[#allocation11 + $0xa04] ss:$16 sps:$4 sm:$0xff]  }
 0x26b   :  { %10656 = vmatprep.mubr.bf16.mxu1 %v15678_v34  ;;  %v16263_v58 = vrot.slane %v6552_v52, %v14956_v55  ;;  %v4987_v52 = vcombine.low %v16098_v2, %v16101_v9  ;;  %v14209_v2 = vld [vmem:[#allocation11 + $0xa48] ss:$16 sps:$4 sm:$0xff]   ;;  %v14214_v9 = vld [vmem:[#allocation11 + $0xa64] ss:$16 sps:$4 sm:$0xff]  }
 0x26c   :  { %9790 = vmatpush1.bf16.msra.mxu0 %v14160_v11  ;;  %v6556_v27 = vcombine.high %v6529_v56, %v6543_v49  ;;  %v6555_v38 = vcombine.low %v6529_v56, %v6543_v49  ;;  %v16270_v11 = vrot.slane %v6551_v17, %v14956_v55  ;;  %v14172_v49 = vld [vmem:[#allocation11 + $0x9e0] ss:$16 sps:$4 sm:$0xff]  }
 0x26d   :  { %10694 = vmatpush1.bf16.msra.mxu1 %v14163_v46  ;;  %9791 = vmatprep.subr.bf16.mxu0 %v14168_v30  ;;  %v14186_v30 = vld [vmem:[#allocation11 + $0xa00] ss:$16 sps:$4 sm:$0xff]  }
 0x26e   :  { %10695 = vmatprep.subr.bf16.mxu1 %v14171_v60  ;;  %v16266_v34 = vrot.slane %v6556_v27, %v14956_v55  ;;  %v16273_v56 = vrot.slane %v6555_v38, %v14956_v55  ;;  %v14191_v38 = vld [vmem:[#allocation11 + $0xa0c] ss:$16 sps:$4 sm:$0xff]   ;;  %v14192_v17 = vld [vmem:[#allocation11 + $0xa20] ss:$16 sps:$4 sm:$0xff]  }
 0x26f   :  { %9753 = vmatmul.mubr.bf16.gmra.mrb[60].mxu0 %v15682_v48  ;;  %v14197_v60 = vld [vmem:[#allocation11 + $0xa2c] ss:$16 sps:$4 sm:$0xff]   ;;  %v14206_v27 = vld [vmem:[#allocation11 + $0xa40] ss:$16 sps:$4 sm:$0xff]  }
 0x270   :  { %10657 = vmatmul.mubr.bf16.gmra.mrb[60].mxu1 %v15682_v48  ;;  %9792 = vmatpush1.bf16.msra.mxu0 %v14166_v63  ;;  %v16278_v23 = vcombine.high %v16263_v58, %v16266_v34  ;;  %v16282_v46 = vcombine.high %v16270_v11, %v16273_v56  ;;  %v4711_v48 = vcombine.low %v16089_v25, %v16092_v53  ;;  %v14208_v63 = vld [vmem:[#allocation11 + $0xa44] ss:$16 sps:$4 sm:$0xff]   ;;  %v14211_v25 = vld [vmem:[#allocation11 + $0xa4c] ss:$16 sps:$4 sm:$0xff]  }
 0x271   :  { %10696 = vmatpush1.bf16.msra.mxu1 %v14169_v57  ;;  %9793 = vmatprep.subr.bf16.mxu0 %v14174_v41  ;;  %v4983_v53 = vcombine.low %v16104_v6, %v16107_v44  ;;  %v14217_v57 = vld [vmem:[#allocation11 + $0xa6c] ss:$16 sps:$4 sm:$0xff]   ;;  %v5259_v41 = vcombine.low %v16114_v39, %v16117_v4  ;;  %v5255_v44 = vcombine.low %v16120_v51, %v16134_v22  ;;  %v14229_v39 = vld [vmem:[#allocation11 + $0xa88] ss:$16 sps:$4 sm:$0xff]   ;;  %v14234_v4 = vld [vmem:[#allocation11 + $0xaa4] ss:$16 sps:$4 sm:$0xff]  }
 0x272   :  { %10697 = vmatprep.subr.bf16.mxu1 %v14177_v32  ;;  %9795 = vmatprep.mubr.bf16.mxu0 %v4715_v10  ;;  %v14212_v32 = vld [vmem:[#allocation11 + $0xa60] ss:$16 sps:$4 sm:$0xff]   ;;  %v14231_v6 = vld [vmem:[#allocation11 + $0xa8c] ss:$16 sps:$4 sm:$0xff]   ;;  %v5527_v51 = vcombine.low %v16153_v8, %v16156_v43  ;;  %v5799_v43 = vcombine.low %v16167_v14, %v16170_v26  ;;  %v6071_v26 = vcombine.low %v16183_v45, %v16194_v37 }
 0x273   :  { %10699 = vmatprep.mubr.bf16.mxu1 %v4715_v10  ;;  %v14195_v10 = vld [vmem:[#allocation11 + $0xa28] ss:$16 sps:$4 sm:$0xff]   ;;  %v14251_v22 = vld [vmem:[#allocation11 + $0xacc] ss:$16 sps:$4 sm:$0xff]  }
 0x274   :  { %9794 = vmatpush1.bf16.msra.mxu0 %v14172_v49  ;;  %v14215_v49 = vld [vmem:[#allocation11 + $0xa68] ss:$16 sps:$4 sm:$0xff]   ;;  %v14271_v8 = vld [vmem:[#allocation11 + $0xb0c] ss:$16 sps:$4 sm:$0xff]  }
 0x275   :  { %10698 = vmatpush1.bf16.msra.mxu1 %v14175_v47  ;;  %9876 = vmatprep.subr.bf16.mxu0 %v14188_v61  ;;  %v14228_v47 = vld [vmem:[#allocation11 + $0xa84] ss:$16 sps:$4 sm:$0xff]   ;;  %v14226_v61 = vld [vmem:[#allocation11 + $0xa80] ss:$16 sps:$4 sm:$0xff]   ;;  %v14291_v14 = vld [vmem:[#allocation11 + $0xb4c] ss:$16 sps:$4 sm:$0xff]  }
 0x276   :  { %10780 = vmatprep.subr.bf16.mxu1 %v14191_v38  ;;  %v14237_v38 = vld [vmem:[#allocation11 + $0xaac] ss:$16 sps:$4 sm:$0xff]  }
 0x277   :  { %9796 = vmatmul.mubr.bf16.vlgmr.msra.gmra.mrb[32].mxu0 %v4711_v48  ;;  %v14311_v37 = vld [vmem:[#allocation11 + $0xb8c] ss:$16 sps:$4 sm:$0xff]  }
 0x278   :  { %10700 = vmatmul.mubr.bf16.vlgmr.msra.gmra.mrb[32].mxu1 %v4711_v48  ;;  %9877 = vmatpush1.bf16.msra.mxu0 %v14186_v30  ;;  %v5531_v48 = vcombine.low %v16137_v62, %v16150_v3  ;;  %v14232_v30 = vld [vmem:[#allocation11 + $0xaa0] ss:$16 sps:$4 sm:$0xff]   ;;  %v14249_v62 = vld [vmem:[#allocation11 + $0xac8] ss:$16 sps:$4 sm:$0xff]   ;;  %v14254_v3 = vld [vmem:[#allocation11 + $0xae4] ss:$16 sps:$4 sm:$0xff]  }
 0x279   :  { %10781 = vmatpush1.bf16.msra.mxu1 %v14189_v12  ;;  %9878 = vmatprep.subr.bf16.mxu0 %v14194_v18  ;;  %v14235_v12 = vld [vmem:[#allocation11 + $0xaa8] ss:$16 sps:$4 sm:$0xff]   ;;  %v14248_v18 = vld [vmem:[#allocation11 + $0xac4] ss:$16 sps:$4 sm:$0xff]  }
 0x27a   :  { %10782 = vmatprep.subr.bf16.mxu1 %v14197_v60  ;;  %9805 = vmatprep.mubr.bf16.mxu0 %v4987_v52  ;;  %v14246_v60 = vld [vmem:[#allocation11 + $0xac0] ss:$16 sps:$4 sm:$0xff]  }
 0x27b   :  { %10709 = vmatprep.mubr.bf16.mxu1 %v4987_v52  ;;  %v14257_v52 = vld [vmem:[#allocation11 + $0xaec] ss:$16 sps:$4 sm:$0xff]  }
 0x27c   :  { %9879 = vmatpush1.bf16.msra.mxu0 %v14192_v17  ;;  %v5803_v17 = vcombine.low %v16159_v59, %v16163_v31  ;;  %v14269_v59 = vld [vmem:[#allocation11 + $0xb08] ss:$16 sps:$4 sm:$0xff]   ;;  %v14274_v31 = vld [vmem:[#allocation11 + $0xb24] ss:$16 sps:$4 sm:$0xff]  }
 0x27d   :  { %10783 = vmatpush1.bf16.msra.mxu1 %v14195_v10  ;;  %9880 = vmatprep.subr.bf16.mxu0 %v14208_v63  ;;  %v14252_v10 = vld [vmem:[#allocation11 + $0xae0] ss:$16 sps:$4 sm:$0xff]   ;;  %v14255_v63 = vld [vmem:[#allocation11 + $0xae8] ss:$16 sps:$4 sm:$0xff]  }
 0x27e   :  { %10784 = vmatprep.subr.bf16.mxu1 %v14211_v25  ;;  %v14268_v25 = vld [vmem:[#allocation11 + $0xb04] ss:$16 sps:$4 sm:$0xff]  }
 0x27f   :  { %9806 = vmatmul.mubr.bf16.gmra.mrb[36].mxu0 %v4983_v53 }
 0x280   :  { %10710 = vmatmul.mubr.bf16.gmra.mrb[36].mxu1 %v4983_v53  ;;  %9881 = vmatpush1.bf16.msra.mxu0 %v14206_v27  ;;  %v14266_v53 = vld [vmem:[#allocation11 + $0xb00] ss:$16 sps:$4 sm:$0xff]   ;;  %v14277_v27 = vld [vmem:[#allocation11 + $0xb2c] ss:$16 sps:$4 sm:$0xff]  }
 0x281   :  { %10785 = vmatpush1.bf16.msra.mxu1 %v14209_v2  ;;  %9882 = vmatprep.subr.bf16.mxu0 %v14214_v9  ;;  %v6075_v2 = vcombine.low %v16173_v1, %v16180_v29  ;;  %v14272_v9 = vld [vmem:[#allocation11 + $0xb20] ss:$16 sps:$4 sm:$0xff]   ;;  %v14289_v1 = vld [vmem:[#allocation11 + $0xb48] ss:$16 sps:$4 sm:$0xff]   ;;  %v14294_v29 = vld [vmem:[#allocation11 + $0xb64] ss:$16 sps:$4 sm:$0xff]  }
 0x282   :  { %10786 = vmatprep.subr.bf16.mxu1 %v14217_v57  ;;  %9815 = vmatprep.mubr.bf16.mxu0 %v5259_v41  ;;  %v14275_v57 = vld [vmem:[#allocation11 + $0xb28] ss:$16 sps:$4 sm:$0xff]  }
 0x283   :  { %10719 = vmatprep.mubr.bf16.mxu1 %v5259_v41  ;;  %v14288_v41 = vld [vmem:[#allocation11 + $0xb44] ss:$16 sps:$4 sm:$0xff]  }
 0x284   :  { %9883 = vmatpush1.bf16.msra.mxu0 %v14212_v32  ;;  %v14286_v32 = vld [vmem:[#allocation11 + $0xb40] ss:$16 sps:$4 sm:$0xff]  }
 0x285   :  { %10787 = vmatpush1.bf16.msra.mxu1 %v14215_v49  ;;  %9884 = vmatprep.subr.bf16.mxu0 %v14228_v47  ;;  %v14297_v49 = vld [vmem:[#allocation11 + $0xb6c] ss:$16 sps:$4 sm:$0xff]   ;;  %v6347_v47 = vcombine.low %v16233_v54, %v16236_v33  ;;  %v14309_v54 = vld [vmem:[#allocation11 + $0xb88] ss:$16 sps:$4 sm:$0xff]   ;;  %v14314_v33 = vld [vmem:[#allocation11 + $0xba4] ss:$16 sps:$4 sm:$0xff]  }
 0x286   :  { %10788 = vmatprep.subr.bf16.mxu1 %v14231_v6  ;;  %v14292_v6 = vld [vmem:[#allocation11 + $0xb60] ss:$16 sps:$4 sm:$0xff]  }
 0x287   :  { %9816 = vmatmul.mubr.bf16.gmra.mrb[40].mxu0 %v5255_v44 }
 0x288   :  { %10720 = vmatmul.mubr.bf16.gmra.mrb[40].mxu1 %v5255_v44  ;;  %9885 = vmatpush1.bf16.msra.mxu0 %v14226_v61  ;;  %v14295_v44 = vld [vmem:[#allocation11 + $0xb68] ss:$16 sps:$4 sm:$0xff]   ;;  %v14308_v61 = vld [vmem:[#allocation11 + $0xb84] ss:$16 sps:$4 sm:$0xff]  }
 0x289   :  { %10789 = vmatpush1.bf16.msra.mxu1 %v14229_v39  ;;  %9886 = vmatprep.subr.bf16.mxu0 %v14234_v4  ;;  %v6343_v39 = vcombine.low %v16239_v0, %v16242_v19  ;;  %v14306_v4 = vld [vmem:[#allocation11 + $0xb80] ss:$16 sps:$4 sm:$0xff]   ;;  %v14315_v0 = vld [vmem:[#allocation11 + $0xba8] ss:$16 sps:$4 sm:$0xff]   ;;  %v14328_v19 = vld [vmem:[#allocation11 + $0xbc4] ss:$16 sps:$4 sm:$0xff]  }
 0x28a   :  { %10790 = vmatprep.subr.bf16.mxu1 %v14237_v38  ;;  %9825 = vmatprep.mubr.bf16.mxu0 %v5531_v48  ;;  %v14317_v38 = vld [vmem:[#allocation11 + $0xbac] ss:$16 sps:$4 sm:$0xff]  }
 0x28b   :  { %10729 = vmatprep.mubr.bf16.mxu1 %v5531_v48  ;;  %v6619_v48 = vcombine.low %v16263_v58, %v16266_v34  ;;  %v14326_v58 = vld [vmem:[#allocation11 + $0xbc0] ss:$16 sps:$4 sm:$0xff]  }
 0x28c   :  { %9887 = vmatpush1.bf16.msra.mxu0 %v14232_v30 }
 0x28d   :  { %10791 = vmatpush1.bf16.msra.mxu1 %v14235_v12  ;;  %9888 = vmatprep.subr.bf16.mxu0 %v14248_v18  ;;  %v14312_v12 = vld [vmem:[#allocation11 + $0xba0] ss:$16 sps:$4 sm:$0xff]  }
 0x28e   :  { %10792 = vmatprep.subr.bf16.mxu1 %v14251_v22  ;;  %v14331_v22 = vld [vmem:[#allocation11 + $0xbcc] ss:$16 sps:$4 sm:$0xff]  }
 0x28f   :  { %9826 = vmatmul.mubr.bf16.gmra.mrb[44].mxu0 %v5527_v51 }
 0x290   :  { %10730 = vmatmul.mubr.bf16.gmra.mrb[44].mxu1 %v5527_v51  ;;  %9889 = vmatpush1.bf16.msra.mxu0 %v14246_v60  ;;  %v6615_v51 = vcombine.low %v16270_v11, %v16273_v56  ;;  %v14329_v60 = vld [vmem:[#allocation11 + $0xbc8] ss:$16 sps:$4 sm:$0xff]  }
 0x291   :  { %10793 = vmatpush1.bf16.msra.mxu1 %v14249_v62  ;;  %9890 = vmatprep.subr.bf16.mxu0 %v14254_v3  ;;  %v14334_v62 = vld [vmem:[#allocation11 + $0xbe4] ss:$16 sps:$4 sm:$0xff]  }
 0x292   :  { %10794 = vmatprep.subr.bf16.mxu1 %v14257_v52  ;;  %9835 = vmatprep.mubr.bf16.mxu0 %v5803_v17 }
 0x293   :  { %10739 = vmatprep.mubr.bf16.mxu1 %v5803_v17 }
 0x294   :  { %9891 = vmatpush1.bf16.msra.mxu0 %v14252_v10 }
 0x295   :  { %10795 = vmatpush1.bf16.msra.mxu1 %v14255_v63  ;;  %9892 = vmatprep.subr.bf16.mxu0 %v14268_v25  ;;  %v14337_v25 = vld [vmem:[#allocation11 + $0xbec] ss:$16 sps:$4 sm:$0xff]  }
 0x296   :  { %10796 = vmatprep.subr.bf16.mxu1 %v14271_v8  ;;  %v14332_v8 = vld [vmem:[#allocation11 + $0xbe0] ss:$16 sps:$4 sm:$0xff]  }
 0x297   :  { %9836 = vmatmul.mubr.bf16.gmra.mrb[48].mxu0 %v5799_v43 }
 0x298   :  { %10740 = vmatmul.mubr.bf16.gmra.mrb[48].mxu1 %v5799_v43  ;;  %9893 = vmatpush1.bf16.msra.mxu0 %v14266_v53  ;;  %v14335_v43 = vld [vmem:[#allocation11 + $0xbe8] ss:$16 sps:$4 sm:$0xff]  }
 0x299   :  { %10797 = vmatpush1.bf16.msra.mxu1 %v14269_v59  ;;  %9894 = vmatprep.subr.bf16.mxu0 %v14274_v31  ;;  %v14434_v53 = vld [vmem:[#allocation6 + $0xc] ss:$16 sps:$4 sm:$0xff]  }
 0x29a   :  { %10798 = vmatprep.subr.bf16.mxu1 %v14277_v27  ;;  %9845 = vmatprep.mubr.bf16.mxu0 %v6075_v2  ;;  %v17469_v27 = vld [vmem:[#allocation24_spill] sm:$0xff] }
 0x29b   :  { %10749 = vmatprep.mubr.bf16.mxu1 %v6075_v2 }
 0x29c   :  { %9895 = vmatpush1.bf16.msra.mxu0 %v14272_v9 }
 0x29d   :  { %10799 = vmatpush1.bf16.msra.mxu1 %v14275_v57  ;;  %9896 = vmatprep.subr.bf16.mxu0 %v14288_v41  ;;  %v14341_v41 = vld [vmem:[#allocation11 + $0xc08] ss:$16 sps:$4 sm:$0xff]  }
 0x29e   :  { %10800 = vmatprep.subr.bf16.mxu1 %v14291_v14  ;;  %v3277_v45 = vpop.xlane.xlu0 %3276  ;;  %v14346_v14 = vld [vmem:[#allocation11 + $0xc24] ss:$16 sps:$4 sm:$0xff]  }
 0x29f   :  { %9846 = vmatmul.mubr.bf16.gmra.mrb[52].mxu0 %v6071_v26  ;;  %14562 = vrsqrt.f32 %v3277_v45  ;;  %v17471_v45 = vld [vmem:[#allocation26_spill] sm:$0xff] }
 0x2a0   :  { %10750 = vmatmul.mubr.bf16.gmra.mrb[52].mxu1 %v6071_v26  ;;  %9897 = vmatpush1.bf16.msra.mxu0 %v14286_v32  ;;  %v14435_v26 = vld [vmem:[#allocation6 + $0x2c] ss:$16 sps:$4 sm:$0xff]  }
 0x2a1   :  { %10801 = vmatpush1.bf16.msra.mxu1 %v14289_v1  ;;  %9898 = vmatprep.subr.bf16.mxu0 %v14294_v29  ;;  %v14436_v32 = vld [vmem:[#allocation6 + $0x4c] ss:$16 sps:$4 sm:$0xff]  }
 0x2a2   :  { %10802 = vmatprep.subr.bf16.mxu1 %v14297_v49  ;;  %9855 = vmatprep.mubr.bf16.mxu0 %v6347_v47  ;;  %v14437_v1 = vld [vmem:[#allocation6 + $0x6c] ss:$16 sps:$4 sm:$0xff]  }
 0x2a3   :  { %10759 = vmatprep.mubr.bf16.mxu1 %v6347_v47  ;;  %v14450_v29 = vld [vmem:[#allocation6 + $0x8c] ss:$16 sps:$4 sm:$0xff]  }
 0x2a4   :  { %9899 = vmatpush1.bf16.msra.mxu0 %v14292_v6  ;;  %v3282_v30 = vpop.xlane.xlu1 %3281  ;;  %v14451_v49 = vld [vmem:[#allocation6 + $0xac] ss:$16 sps:$4 sm:$0xff]  }
 0x2a5   :  { %10803 = vmatpush1.bf16.msra.mxu1 %v14295_v44  ;;  %9900 = vmatprep.subr.bf16.mxu0 %v14308_v61  ;;  %14564 = vrsqrt.f32 %v3282_v30  ;;  %v14453_v44 = vld [vmem:[#allocation6 + $0xec] ss:$16 sps:$4 sm:$0xff]   ;;  %v16339_v30 = vrot.slane %v14437_v1, %v14956_v55  ;;  %v17477_v1 = vld [vmem:[#allocation32_spill] sm:$0xff] }
 0x2a6   :  { %10804 = vmatprep.subr.bf16.mxu1 %v14311_v37 }
 0x2a7   :  { %9856 = vmatmul.mubr.bf16.gmra.mrb[56].mxu0 %v6343_v39  ;;  %v3287_v18 = vpop.xlane.xlu0 %3286 }
 0x2a8   :  { %10760 = vmatmul.mubr.bf16.gmra.mrb[56].mxu1 %v6343_v39  ;;  %9901 = vmatpush1.bf16.msra.mxu0 %v14306_v4  ;;  %14566 = vrsqrt.f32 %v3287_v18  ;;  %v14347_v18 = vld [vmem:[#allocation11 + $0xc28] ss:$16 sps:$4 sm:$0xff]  }
 0x2a9   :  { %10805 = vmatpush1.bf16.msra.mxu1 %v14309_v54  ;;  %9902 = vmatprep.subr.bf16.mxu0 %v14314_v33  ;;  %v14563_v34 = vpop.eup %14562  ;;  %v14349_v33 = vld [vmem:[#allocation11 + $0xc2c] ss:$16 sps:$4 sm:$0xff]  }
 0x2aa   :  { %10806 = vmatprep.subr.bf16.mxu1 %v14317_v38  ;;  %9865 = vmatprep.mubr.bf16.mxu0 %v6619_v48  ;;  %v3369_v3 = vmul.f32 %v14563_v34, %v15713_v36  ;;  %v3370_v52 = vmul.f32 %v14563_v34, %v15721_v42  ;;  %v3371_v17 = vmul.f32 %v14563_v34, %v15718_v21  ;;  %v14340_v36 = vld [vmem:[#allocation11 + $0xc04] ss:$16 sps:$4 sm:$0xff]   ;;  %v14338_v21 = vld [vmem:[#allocation11 + $0xc00] ss:$16 sps:$4 sm:$0xff]  }
 0x2ab   :  { %10769 = vmatprep.mubr.bf16.mxu1 %v6619_v48  ;;  %v3372_v10 = vmul.f32 %v14563_v34, %v15731_v28  ;;  %v3292_v63 = vpop.xlane.xlu1 %3291  ;;  %v14343_v28 = vld [vmem:[#allocation11 + $0xc0c] ss:$16 sps:$4 sm:$0xff]   ;;  %v16333_v38 = vrot.slane %v14435_v26, %v14956_v55  ;;  %v16336_v48 = vrot.slane %v14436_v32, %v14956_v55  ;;  %v16352_v34 = vrot.slane %v14453_v44, %v14956_v55 }
 0x2ac   :  { %9903 = vmatpush1.bf16.msra.mxu0 %v14312_v12  ;;  %14568 = vrsqrt.f32 %v3292_v63  ;;  %v12437_v11 = vpack.c.bf16 %v3370_v52, %v3369_v3  ;;  %v14355_v63 = vld [vmem:[#allocation11 + $0xc4c] ss:$16 sps:$4 sm:$0xff]  }
 0x2ad   :  { %10807 = vmatpush1.bf16.msra.mxu1 %v14315_v0  ;;  %9904 = vmatprep.subr.bf16.mxu0 %v14328_v19  ;;  %v12438_v56 = vpack.c.bf16 %v3372_v10, %v3371_v17  ;;  %v16343_v0 = vrot.slane %v14450_v29, %v14956_v55  ;;  %v14350_v10 = vld [vmem:[#allocation11 + $0xc40] ss:$16 sps:$4 sm:$0xff]  }
 0x2ae   :  { %10808 = vmatprep.subr.bf16.mxu1 %v14331_v22  ;;  %3625 = vst [vmem:[#allocation14] sm:$0xff] %v12437_v11  ;;  %v14352_v22 = vld [vmem:[#allocation11 + $0xc44] ss:$16 sps:$4 sm:$0xff]   ;;  %v14353_v11 = vld [vmem:[#allocation11 + $0xc48] ss:$16 sps:$4 sm:$0xff]   ;;  %v17476_v26 = vld [vmem:[#allocation30_spill] sm:$0xff] }
 0x2af   :  { %9866 = vmatmul.mubr.bf16.gmra.mrb[60].mxu0 %v6615_v51  ;;  %v14565_v42 = vpop.eup %14564  ;;  %3626 = vst [vmem:[#allocation14 + $0x8] sm:$0xff] %v12438_v56  ;;  %v14466_v56 = vld [vmem:[#allocation6 + $0x10c] ss:$16 sps:$4 sm:$0xff]  }
 0x2b0   :  { %10770 = vmatmul.mubr.bf16.gmra.mrb[60].mxu1 %v6615_v51  ;;  %9905 = vmatpush1.bf16.msra.mxu0 %v14326_v58  ;;  %v3373_v59 = vmul.f32 %v14565_v42, %v15726_v24  ;;  %v3374_v31 = vmul.f32 %v14565_v42, %v15734_v16  ;;  %v3375_v2 = vmul.f32 %v14565_v42, %v17469_v27  ;;  %v3297_v57 = vpop.xlane.xlu0 %3296 }
 0x2b1   :  { %10809 = vmatpush1.bf16.msra.mxu1 %v14329_v60  ;;  %9906 = vmatprep.subr.bf16.mxu0 %v14334_v62  ;;  %v3376_v9 = vmul.f32 %v14565_v42, %v15750_v35  ;;  %14570 = vrsqrt.f32 %v3297_v57  ;;  %v16325_v16 = vrot.slane %v14434_v53, %v14956_v55  ;;  %v14452_v35 = vld [vmem:[#allocation6 + $0xcc] ss:$16 sps:$4 sm:$0xff]   ;;  %v16346_v51 = vrot.slane %v14451_v49, %v14956_v55  ;;  %v17473_v62 = vld [vmem:[#allocation28_spill] sm:$0xff] }
 0x2b2   :  { %10810 = vmatprep.subr.bf16.mxu1 %v14337_v25  ;;  %9908 = vmatprep.mubr.bf16.mxu0 %v16131_v13  ;;  %v14567_v47 = vpop.eup %14566  ;;  %v12439_v24 = vpack.c.bf16 %v3374_v31, %v3373_v59  ;;  %v16349_v58 = vrot.slane %v14452_v35, %v14956_v55  ;;  %v14468_v53 = vld [vmem:[#allocation6 + $0x14c] ss:$16 sps:$4 sm:$0xff]   ;;  %v4653_v59 = vcombine.low %v16336_v48, %v16339_v30 }
 0x2b3   :  { %10812 = vmatprep.mubr.bf16.mxu1 %v16131_v13  ;;  %v12440_v6 = vpack.c.bf16 %v3376_v9, %v3375_v2  ;;  %v17470_v13 = vld [vmem:[#allocation25_spill] sm:$0xff]  ;;  %v3378_v37 = vmul.f32 %v14567_v47, %v17471_v45  ;;  %v3379_v39 = vmul.f32 %v14567_v47, %v15758_v5  ;;  %v3380_v4 = vmul.f32 %v14567_v47, %v15768_v15  ;;  %v14344_v15 = vld [vmem:[#allocation11 + $0xc20] ss:$16 sps:$4 sm:$0xff]  }
 0x2b4   :  { %9907 = vmatpush1.bf16.msra.mxu0 %v14332_v8  ;;  %v3377_v61 = vmul.f32 %v14567_v47, %v17470_v13  ;;  %v3302_v54 = vpop.xlane.xlu1 %3301  ;;  %3627 = vst [vmem:[#allocation14 + $0x10] sm:$0xff] %v12439_v24  ;;  %v4650_v42 = vcombine.high %v16325_v16, %v16333_v38  ;;  %v4654_v31 = vcombine.high %v16336_v48, %v16339_v30  ;;  %v17474_v9 = vld [vmem:[#allocation29_spill] sm:$0xff]  ;;  %v14356_v24 = vld [vmem:[#allocation11 + $0xc60] ss:$16 sps:$4 sm:$0xff]   ;;  %v17480_v48 = vld [vmem:[#allocation35_spill] sm:$0xff] }
 0x2b5   :  { %10811 = vmatpush1.bf16.msra.mxu1 %v14335_v43  ;;  %9989 = vmatprep.subr.bf16.mxu0 %v14340_v36  ;;  %3628 = vst [vmem:[#allocation14 + $0x18] sm:$0xff] %v12440_v6  ;;  %14572 = vrsqrt.f32 %v3302_v54  ;;  %v12442_v12 = vpack.c.bf16 %v3380_v4, %v3379_v39  ;;  %v14467_v36 = vld [vmem:[#allocation6 + $0x12c] ss:$16 sps:$4 sm:$0xff]   ;;  %v4921_v27 = vcombine.low %v16343_v0, %v16346_v51  ;;  %v14367_v39 = vld [vmem:[#allocation11 + $0xc8c] ss:$16 sps:$4 sm:$0xff]  }
 0x2b6   :  { %10893 = vmatprep.subr.bf16.mxu1 %v14343_v28  ;;  %v12441_v5 = vpack.c.bf16 %v3378_v37, %v3377_v61  ;;  %v14569_v19 = vpop.eup %14568  ;;  %v4925_v2 = vcombine.low %v16349_v58, %v16352_v34  ;;  %v17478_v47 = vld [vmem:[#allocation77_spill] sm:$0xff]  ;;  %v16382_v35 = vrot.slane %v14467_v36, %v14956_v55  ;;  %v16385_v44 = vrot.slane %v14468_v53, %v14956_v55 }
 0x2b7   :  { %9909 = vmatmul.mubr.bf16.vlgmr.msra.gmra.mrb[32].mxu0 %v16141_v40  ;;  %3630 = vst [vmem:[#allocation14 + $0x28] sm:$0xff] %v12442_v12  ;;  %v3382_v3 = vmul.f32 %v14569_v19, %v17473_v62  ;;  %v3383_v52 = vmul.f32 %v14569_v19, %v15776_v20  ;;  %v3384_v17 = vmul.f32 %v14569_v19, %v15794_v7  ;;  %v14358_v20 = vld [vmem:[#allocation11 + $0xc64] ss:$16 sps:$4 sm:$0xff]   ;;  %v14359_v6 = vld [vmem:[#allocation11 + $0xc68] ss:$16 sps:$4 sm:$0xff]  }
 0x2b8   :  { %10813 = vmatmul.mubr.bf16.vlgmr.msra.gmra.mrb[32].mxu1 %v16141_v40  ;;  %9990 = vmatpush1.bf16.msra.mxu0 %v14338_v21  ;;  %3629 = vst [vmem:[#allocation14 + $0x20] sm:$0xff] %v12441_v5  ;;  %v17472_v40 = vld [vmem:[#allocation27_spill] sm:$0xff]  ;;  %v3307_v25 = vpop.xlane.xlu0 %3306  ;;  %v4649_v7 = vcombine.low %v16325_v16, %v16333_v38  ;;  %v16379_v16 = vrot.slane %v14466_v56, %v14956_v55  ;;  %v17481_v5 = vld [vmem:[#allocation34_spill] sm:$0xff] }
 0x2b9   :  { %10894 = vmatpush1.bf16.msra.mxu1 %v14341_v41  ;;  %9991 = vmatprep.subr.bf16.mxu0 %v14346_v14  ;;  %v3381_v60 = vmul.f32 %v14569_v19, %v17472_v40  ;;  %v12444_v43 = vpack.c.bf16 %v3384_v17, %v3383_v52  ;;  %14574 = vrsqrt.f32 %v3307_v25  ;;  %v14469_v21 = vld [vmem:[#allocation6 + $0x16c] ss:$16 sps:$4 sm:$0xff]   ;;  %v14364_v37 = vld [vmem:[#allocation11 + $0xc84] ss:$16 sps:$4 sm:$0xff]   ;;  %v16397_v52 = vrot.slane %v4650_v42, %v14956_v55  ;;  %v14373_v25 = vld [vmem:[#allocation11 + $0xcac] ss:$16 sps:$4 sm:$0xff]  }
 0x2ba   :  { %10895 = vmatprep.subr.bf16.mxu1 %v14349_v33  ;;  %9918 = vmatprep.mubr.bf16.mxu0 %v16177_v50  ;;  %v17475_v41 = vld [vmem:[#allocation31_spill] sm:$0xff]  ;;  %v16388_v4 = vrot.slane %v14469_v21, %v14956_v55  ;;  %v17479_v33 = vld [vmem:[#allocation33_spill] sm:$0xff]  ;;  %v16406_v36 = vrot.slane %v4653_v59, %v14956_v55  ;;  %v16409_v53 = vrot.slane %v4921_v27, %v14956_v55 }
 0x2bb   :  { %10822 = vmatprep.mubr.bf16.mxu1 %v16177_v50  ;;  %v12443_v8 = vpack.c.bf16 %v3382_v3, %v3381_v60  ;;  %v14571_v28 = vpop.eup %14570  ;;  %3632 = vst [vmem:[#allocation14 + $0x38] sm:$0xff] %v12444_v43  ;;  %v14361_v50 = vld [vmem:[#allocation11 + $0xc6c] ss:$16 sps:$4 sm:$0xff]   ;;  %v14482_v54 = vld [vmem:[#allocation6 + $0x18c] ss:$16 sps:$4 sm:$0xff]   ;;  %v16403_v43 = vrot.slane %v4654_v31, %v14956_v55 }
 0x2bc   :  { %9992 = vmatpush1.bf16.msra.mxu0 %v14344_v15  ;;  %v3385_v57 = vmul.f32 %v14571_v28, %v17474_v9  ;;  %v3386_v14 = vmul.f32 %v14571_v28, %v17475_v41  ;;  %v3387_v32 = vmul.f32 %v14571_v28, %v17476_v26  ;;  %v3388_v29 = vmul.f32 %v14571_v28, %v17477_v1  ;;  %v17482_v15 = vld [vmem:[#allocation36_spill] sm:$0xff]  ;;  %v17483_v60 = vld [vmem:[#allocation78_spill] sm:$0xff]  ;;  %v14365_v62 = vld [vmem:[#allocation11 + $0xc88] ss:$16 sps:$4 sm:$0xff]  }
 0x2bd   :  { %10896 = vmatpush1.bf16.msra.mxu1 %v14347_v18  ;;  %9993 = vmatprep.subr.bf16.mxu0 %v14352_v22  ;;  %3631 = vst [vmem:[#allocation14 + $0x30] sm:$0xff] %v12443_v8  ;;  %v3312_v49 = vpop.xlane.xlu1 %3311  ;;  %v14362_v18 = vld [vmem:[#allocation11 + $0xc80] ss:$16 sps:$4 sm:$0xff]   ;;  %v14483_v22 = vld [vmem:[#allocation6 + $0x1ac] ss:$16 sps:$4 sm:$0xff]   ;;  %v5193_v28 = vcombine.low %v16379_v16, %v16382_v35  ;;  %v16419_v59 = vrot.slane %v14482_v54, %v14956_v55 }
 0x2be   :  { %10897 = vmatprep.subr.bf16.mxu1 %v14355_v63  ;;  %14576 = vrsqrt.f32 %v3312_v49  ;;  %v12445_v61 = vpack.c.bf16 %v3386_v14, %v3385_v57  ;;  %v12446_v45 = vpack.c.bf16 %v3388_v29, %v3387_v32  ;;  %v14370_v3 = vld [vmem:[#allocation11 + $0xca4] ss:$16 sps:$4 sm:$0xff]   ;;  %v14484_v17 = vld [vmem:[#allocation6 + $0x1cc] ss:$16 sps:$4 sm:$0xff]   ;;  %v17486_v14 = vld [vmem:[#allocation38_spill] sm:$0xff] }
 0x2bf   :  { %9919 = vmatmul.mubr.bf16.gmra.mrb[36].mxu0 %v17478_v47  ;;  %v14573_v13 = vpop.eup %14572  ;;  %v14485_v56 = vld [vmem:[#allocation6 + $0x1ec] ss:$16 sps:$4 sm:$0xff]   ;;  %v14368_v49 = vld [vmem:[#allocation11 + $0xca0] ss:$16 sps:$4 sm:$0xff]  }
 0x2c0   :  { %10823 = vmatmul.mubr.bf16.gmra.mrb[36].mxu1 %v17478_v47  ;;  %9994 = vmatpush1.bf16.msra.mxu0 %v14350_v10  ;;  %v3389_v38 = vmul.f32 %v14573_v13, %v17479_v33  ;;  %v3390_v30 = vmul.f32 %v14573_v13, %v17480_v48  ;;  %v3391_v12 = vmul.f32 %v14573_v13, %v17481_v5  ;;  %v14498_v8 = vld [vmem:[#allocation6 + $0x20c] ss:$16 sps:$4 sm:$0xff]   ;;  %v17489_v48 = vld [vmem:[#allocation80_spill] sm:$0xff] }
 0x2c1   :  { %10898 = vmatpush1.bf16.msra.mxu1 %v14353_v11  ;;  %9995 = vmatprep.subr.bf16.mxu0 %v14358_v20  ;;  %v3392_v19 = vmul.f32 %v14573_v13, %v17482_v15  ;;  %3633 = vst [vmem:[#allocation14 + $0x40] sm:$0xff] %v12445_v61  ;;  %3634 = vst [vmem:[#allocation14 + $0x48] sm:$0xff] %v12446_v45  ;;  %v3317_v40 = vpop.xlane.xlu0 %3316  ;;  %v16400_v11 = vrot.slane %v4649_v7, %v14956_v55  ;;  %v14499_v20 = vld [vmem:[#allocation6 + $0x22c] ss:$16 sps:$4 sm:$0xff]  }
 0x2c2   :  { %10899 = vmatprep.subr.bf16.mxu1 %v14361_v50  ;;  %9928 = vmatprep.mubr.bf16.mxu0 %v17483_v60  ;;  %v12447_v10 = vpack.c.bf16 %v3390_v30, %v3389_v38  ;;  %14578 = vrsqrt.f32 %v3317_v40  ;;  %v14500_v42 = vld [vmem:[#allocation6 + $0x24c] ss:$16 sps:$4 sm:$0xff]   ;;  %v16412_v7 = vrot.slane %v4925_v2, %v14956_v55  ;;  %v5197_v50 = vcombine.low %v16385_v44, %v16388_v4 }
 0x2c3   :  { %10832 = vmatprep.mubr.bf16.mxu1 %v17483_v60  ;;  %v12448_v63 = vpack.c.bf16 %v3392_v19, %v3391_v12  ;;  %v14575_v21 = vpop.eup %14574  ;;  %v14501_v31 = vld [vmem:[#allocation6 + $0x26c] ss:$16 sps:$4 sm:$0xff]   ;;  %v16431_v13 = vrot.slane %v14484_v17, %v14956_v55  ;;  %v16434_v61 = vrot.slane %v14485_v56, %v14956_v55  ;;  %v16437_v54 = vrot.slane %v14498_v8, %v14956_v55  ;;  %v17490_v19 = vld [vmem:[#allocation40_spill] sm:$0xff] }
 0x2c4   :  { %9996 = vmatpush1.bf16.msra.mxu0 %v14356_v24  ;;  %3635 = vst [vmem:[#allocation14 + $0x50] sm:$0xff] %v12447_v10  ;;  %v17484_v27 = vld [vmem:[#allocation37_spill] sm:$0xff]  ;;  %v17485_v57 = vld [vmem:[#allocation39_spill] sm:$0xff]  ;;  %v3395_v26 = vmul.f32 %v14575_v21, %v17486_v14  ;;  %v16441_v30 = vrot.slane %v14499_v20, %v14956_v55  ;;  %v16444_v5 = vrot.slane %v14500_v42, %v14956_v55 }
 0x2c5   :  { %10900 = vmatpush1.bf16.msra.mxu1 %v14359_v6  ;;  %9997 = vmatprep.subr.bf16.mxu0 %v14364_v37  ;;  %3636 = vst [vmem:[#allocation14 + $0x58] sm:$0xff] %v12448_v63  ;;  %v3393_v9 = vmul.f32 %v14575_v21, %v17484_v27  ;;  %v3394_v41 = vmul.f32 %v14575_v21, %v17485_v57  ;;  %v17487_v32 = vld [vmem:[#allocation41_spill] sm:$0xff]  ;;  %v3322_v2 = vpop.xlane.xlu1 %3321  ;;  %v17488_v29 = vld [vmem:[#allocation79_spill] sm:$0xff]  ;;  %v14374_v63 = vld [vmem:[#allocation11 + $0xcc0] ss:$16 sps:$4 sm:$0xff]  }
 0x2c6   :  { %10901 = vmatprep.subr.bf16.mxu1 %v14367_v39  ;;  %v3396_v1 = vmul.f32 %v14575_v21, %v17487_v32  ;;  %14580 = vrsqrt.f32 %v3322_v2  ;;  %v14371_v47 = vld [vmem:[#allocation11 + $0xca8] ss:$16 sps:$4 sm:$0xff]   ;;  %v14376_v24 = vld [vmem:[#allocation11 + $0xcc4] ss:$16 sps:$4 sm:$0xff]   ;;  %v16428_v6 = vrot.slane %v14483_v22, %v14956_v55  ;;  %v14379_v39 = vld [vmem:[#allocation11 + $0xccc] ss:$16 sps:$4 sm:$0xff]   ;;  %v16447_v12 = vrot.slane %v14501_v31, %v14956_v55 }
 0x2c7   :  { %9929 = vmatmul.mubr.bf16.gmra.mrb[40].mxu0 %v17488_v29  ;;  %v12449_v45 = vpack.c.bf16 %v3394_v41, %v3393_v9  ;;  %v14514_v33 = vld [vmem:[#allocation6 + $0x28c] ss:$16 sps:$4 sm:$0xff]   ;;  %v17491_v22 = vld [vmem:[#allocation42_spill] sm:$0xff]  ;;  %v16458_v56 = vrot.slane %v5197_v50, %v14956_v55  ;;  %v14382_v9 = vld [vmem:[#allocation11 + $0xce4] ss:$16 sps:$4 sm:$0xff]   ;;  %v5469_v57 = vcombine.low %v16431_v13, %v16434_v61  ;;  %v5737_v50 = vcombine.low %v16437_v54, %v16441_v30 }
 0x2c8   :  { %10833 = vmatmul.mubr.bf16.gmra.mrb[40].mxu1 %v17488_v29  ;;  %9998 = vmatpush1.bf16.msra.mxu0 %v14362_v18  ;;  %v12450_v37 = vpack.c.bf16 %v3396_v1, %v3395_v26  ;;  %v14577_v38 = vpop.eup %14576  ;;  %v14515_v15 = vld [vmem:[#allocation6 + $0x2ac] ss:$16 sps:$4 sm:$0xff]   ;;  %v5465_v8 = vcombine.low %v16419_v59, %v16428_v6  ;;  %v5741_v14 = vcombine.low %v16444_v5, %v16447_v12 }
 0x2c9   :  { %10902 = vmatpush1.bf16.msra.mxu1 %v14365_v62  ;;  %9999 = vmatprep.subr.bf16.mxu0 %v14370_v3  ;;  %3637 = vst [vmem:[#allocation14 + $0x60] sm:$0xff] %v12449_v45  ;;  %v3397_v18 = vmul.f32 %v14577_v38, %v17490_v19  ;;  %v3398_v40 = vmul.f32 %v14577_v38, %v17491_v22  ;;  %v17492_v60 = vld [vmem:[#allocation43_spill] sm:$0xff]  ;;  %v17493_v3 = vld [vmem:[#allocation44_spill] sm:$0xff]  ;;  %v17494_v1 = vld [vmem:[#allocation45_spill] sm:$0xff] }
 0x2ca   :  { %10903 = vmatprep.subr.bf16.mxu1 %v14373_v25  ;;  %9938 = vmatprep.mubr.bf16.mxu0 %v17489_v48  ;;  %3638 = vst [vmem:[#allocation14 + $0x68] sm:$0xff] %v12450_v37  ;;  %v3399_v62 = vmul.f32 %v14577_v38, %v17492_v60  ;;  %v3400_v17 = vmul.f32 %v14577_v38, %v17493_v3  ;;  %v3327_v10 = vpop.xlane.xlu0 %3326  ;;  %v14516_v20 = vld [vmem:[#allocation6 + $0x2cc] ss:$16 sps:$4 sm:$0xff]   ;;  %v14388_v3 = vld [vmem:[#allocation11 + $0xd04] ss:$16 sps:$4 sm:$0xff]  }
 0x2cb   :  { %10842 = vmatprep.mubr.bf16.mxu1 %v17489_v48  ;;  %14582 = vrsqrt.f32 %v3327_v10  ;;  %v16455_v25 = vrot.slane %v5193_v28, %v14956_v55  ;;  %v14517_v42 = vld [vmem:[#allocation6 + $0x2ec] ss:$16 sps:$4 sm:$0xff]   ;;  %v12451_v21 = vpack.c.bf16 %v3398_v40, %v3397_v18  ;;  %v14385_v28 = vld [vmem:[#allocation11 + $0xcec] ss:$16 sps:$4 sm:$0xff]   ;;  %v16469_v26 = vrot.slane %v14514_v33, %v14956_v55  ;;  %v14380_v33 = vld [vmem:[#allocation11 + $0xce0] ss:$16 sps:$4 sm:$0xff]  }
 0x2cc   :  { %10000 = vmatpush1.bf16.msra.mxu0 %v14368_v49  ;;  %v12452_v31 = vpack.c.bf16 %v3400_v17, %v3399_v62  ;;  %v14377_v27 = vld [vmem:[#allocation11 + $0xcc8] ss:$16 sps:$4 sm:$0xff]   ;;  %v14579_v41 = vpop.eup %14578  ;;  %v16472_v32 = vrot.slane %v14515_v15, %v14956_v55  ;;  %v16481_v48 = vrot.slane %v5465_v8, %v14956_v55  ;;  %v16484_v15 = vrot.slane %v14516_v20, %v14956_v55  ;;  %v14391_v8 = vld [vmem:[#allocation11 + $0xd0c] ss:$16 sps:$4 sm:$0xff]  }
 0x2cd   :  { %10904 = vmatpush1.bf16.msra.mxu1 %v14371_v47  ;;  %10001 = vmatprep.subr.bf16.mxu0 %v14376_v24  ;;  %3639 = vst [vmem:[#allocation14 + $0x70] sm:$0xff] %v12451_v21  ;;  %v3401_v2 = vmul.f32 %v14579_v41, %v17494_v1  ;;  %v17495_v29 = vld [vmem:[#allocation47_spill] sm:$0xff]  ;;  %v17496_v47 = vld [vmem:[#allocation46_spill] sm:$0xff]  ;;  %v17497_v45 = vld [vmem:[#allocation49_spill] sm:$0xff]  ;;  %v16487_v19 = vrot.slane %v14517_v42, %v14956_v55 }
 0x2ce   :  { %10905 = vmatprep.subr.bf16.mxu1 %v14379_v39  ;;  %3640 = vst [vmem:[#allocation14 + $0x78] sm:$0xff] %v12452_v31  ;;  %v3402_v49 = vmul.f32 %v14579_v41, %v17495_v29  ;;  %v3403_v24 = vmul.f32 %v14579_v41, %v17496_v47  ;;  %v3404_v37 = vmul.f32 %v14579_v41, %v17497_v45  ;;  %v3332_v39 = vpop.xlane.xlu1 %3331  ;;  %v17498_v38 = vld [vmem:[#allocation81_spill] sm:$0xff]  ;;  %v17501_v41 = vld [vmem:[#allocation50_spill] sm:$0xff]  ;;  %v17502_v1 = vld [vmem:[#allocation51_spill] sm:$0xff] }
 0x2cf   :  { %9939 = vmatmul.mubr.bf16.gmra.mrb[44].mxu0 %v17498_v38  ;;  %14584 = vrsqrt.f32 %v3332_v39  ;;  %v14530_v18 = vld [vmem:[#allocation6 + $0x30c] ss:$16 sps:$4 sm:$0xff]   ;;  %v16490_v17 = vrot.slane %v5469_v57, %v14956_v55  ;;  %v16494_v20 = vrot.slane %v5737_v50, %v14956_v55  ;;  %v16497_v42 = vrot.slane %v5741_v14, %v14956_v55  ;;  %v17503_v29 = vld [vmem:[#allocation52_spill] sm:$0xff] }
 0x2d0   :  { %10843 = vmatmul.mubr.bf16.gmra.mrb[44].mxu1 %v17498_v38  ;;  %10002 = vmatpush1.bf16.msra.mxu0 %v14374_v63  ;;  %v14531_v22 = vld [vmem:[#allocation6 + $0x32c] ss:$16 sps:$4 sm:$0xff]   ;;  %v12453_v40 = vpack.c.bf16 %v3402_v49, %v3401_v2  ;;  %v12454_v60 = vpack.c.bf16 %v3404_v37, %v3403_v24  ;;  %v14581_v10 = vpop.eup %14580  ;;  %v17499_v63 = vld [vmem:[#allocation82_spill] sm:$0xff]  ;;  %v6009_v21 = vcombine.low %v16469_v26, %v16472_v32 }
 0x2d1   :  { %10906 = vmatpush1.bf16.msra.mxu1 %v14377_v27  ;;  %10003 = vmatprep.subr.bf16.mxu0 %v14382_v9  ;;  %v14383_v62 = vld [vmem:[#allocation11 + $0xce8] ss:$16 sps:$4 sm:$0xff]   ;;  %v17500_v9 = vld [vmem:[#allocation48_spill] sm:$0xff]  ;;  %v3407_v2 = vmul.f32 %v14581_v10, %v17502_v1  ;;  %v3408_v49 = vmul.f32 %v14581_v10, %v17503_v29  ;;  %v6013_v47 = vcombine.low %v16484_v15, %v16487_v19 }
 0x2d2   :  { %10907 = vmatprep.subr.bf16.mxu1 %v14385_v28  ;;  %9948 = vmatprep.mubr.bf16.mxu0 %v17499_v63  ;;  %v14532_v31 = vld [vmem:[#allocation6 + $0x34c] ss:$16 sps:$4 sm:$0xff]   ;;  %3641 = vst [vmem:[#allocation14 + $0x80] sm:$0xff] %v12453_v40  ;;  %3642 = vst [vmem:[#allocation14 + $0x88] sm:$0xff] %v12454_v60  ;;  %v3405_v57 = vmul.f32 %v14581_v10, %v17500_v9  ;;  %v3406_v28 = vmul.f32 %v14581_v10, %v17501_v41  ;;  %v3337_v50 = vpop.xlane.xlu0 %3336  ;;  %v14386_v14 = vld [vmem:[#allocation11 + $0xd00] ss:$16 sps:$4 sm:$0xff]  }
 0x2d3   :  { %v14533_v27 = vld [vmem:[#allocation6 + $0x36c] ss:$16 sps:$4 sm:$0xff]   ;;  %10852 = vmatprep.mubr.bf16.mxu1 %v17499_v63  ;;  %14586 = vrsqrt.f32 %v3337_v50  ;;  %v16509_v24 = vrot.slane %v14530_v18, %v14956_v55  ;;  %v16512_v45 = vrot.slane %v14531_v22, %v14956_v55  ;;  %v12456_v39 = vpack.c.bf16 %v3408_v49, %v3407_v2  ;;  %v14394_v40 = vld [vmem:[#allocation11 + $0xd24] ss:$16 sps:$4 sm:$0xff]   ;;  %v14397_v10 = vld [vmem:[#allocation11 + $0xd2c] ss:$16 sps:$4 sm:$0xff]  }
 0x2d4   :  { %10004 = vmatpush1.bf16.msra.mxu0 %v14380_v33  ;;  %v12455_v37 = vpack.c.bf16 %v3406_v28, %v3405_v57  ;;  %v14389_v38 = vld [vmem:[#allocation11 + $0xd08] ss:$16 sps:$4 sm:$0xff]   ;;  %v16516_v60 = vcombine.high %v16397_v52, %v16403_v43  ;;  %v16519_v63 = vrot.slane %v6009_v21, %v14956_v55  ;;  %v16522_v18 = vrot.slane %v14532_v31, %v14956_v55  ;;  %v17511_v41 = vld [vmem:[#allocation54_spill] sm:$0xff] }
 0x2d5   :  { %10908 = vmatpush1.bf16.msra.mxu1 %v14383_v62  ;;  %10005 = vmatprep.subr.bf16.mxu0 %v14388_v3  ;;  %v14583_v33 = vpop.eup %14582  ;;  %v16525_v22 = vrot.slane %v14533_v27, %v14956_v55  ;;  %v16529_v62 = vcombine.high %v16400_v11, %v16406_v36  ;;  %3644 = vst [vmem:[#allocation14 + $0x98] sm:$0xff] %v12456_v39  ;;  %v17509_v3 = vld [vmem:[#allocation53_spill] sm:$0xff]  ;;  %v17510_v57 = vld [vmem:[#allocation55_spill] sm:$0xff]  ;;  %v14392_v27 = vld [vmem:[#allocation11 + $0xd20] ss:$16 sps:$4 sm:$0xff]  }
 0x2d6   :  { %17504 = vst [vmem:[#allocation24_spill] sm:$0xff] %v16516_v60  ;;  %10909 = vmatprep.subr.bf16.mxu1 %v14391_v8  ;;  %17505 = vst [vmem:[#allocation25_spill] sm:$0xff] %v16519_v63  ;;  %v3409_v9 = vmul.f32 %v14583_v33, %v17509_v3  ;;  %v3410_v8 = vmul.f32 %v14583_v33, %v17510_v57  ;;  %v3411_v28 = vmul.f32 %v14583_v33, %v17511_v41  ;;  %v17512_v21 = vld [vmem:[#allocation57_spill] sm:$0xff]  ;;  %v17513_v31 = vld [vmem:[#allocation83_spill] sm:$0xff] }
 0x2d7   :  { %17506 = vst [vmem:[#allocation26_spill] sm:$0xff] %v16522_v18  ;;  %17507 = vst [vmem:[#allocation27_spill] sm:$0xff] %v16525_v22  ;;  %v3412_v1 = vmul.f32 %v14583_v33, %v17512_v21  ;;  %v3342_v2 = vpop.xlane.xlu1 %3341  ;;  %9949 = vmatmul.mubr.bf16.gmra.mrb[48].mxu0 %v17513_v31  ;;  %v14395_v29 = vld [vmem:[#allocation11 + $0xd28] ss:$16 sps:$4 sm:$0xff]   ;;  %v6281_v49 = vcombine.low %v16509_v24, %v16512_v45  ;;  %v16541_v50 = vcombine.high %v16409_v53, %v16412_v7  ;;  %v14400_v3 = vld [vmem:[#allocation11 + $0xd44] ss:$16 sps:$4 sm:$0xff]  }
 0x2d8   :  { %17508 = vst [vmem:[#allocation28_spill] sm:$0xff] %v16529_v62  ;;  %3643 = vst [vmem:[#allocation14 + $0x90] sm:$0xff] %v12455_v37  ;;  %14588 = vrsqrt.f32 %v3342_v2  ;;  %10853 = vmatmul.mubr.bf16.gmra.mrb[48].mxu1 %v17513_v31  ;;  %10006 = vmatpush1.bf16.msra.mxu0 %v14386_v14  ;;  %v16545_v37 = vcombine.high %v16455_v25, %v16458_v56  ;;  %v12457_v39 = vpack.c.bf16 %v3410_v8, %v3409_v9  ;;  %v14403_v57 = vld [vmem:[#allocation11 + $0xd4c] ss:$16 sps:$4 sm:$0xff]   ;;  %v14546_v41 = vld [vmem:[#allocation6 + $0x38c] ss:$16 sps:$4 sm:$0xff]  }
 0x2d9   :  { %17514 = vst [vmem:[#allocation29_spill] sm:$0xff] %v16541_v50  ;;  %v12458_v33 = vpack.c.bf16 %v3412_v1, %v3411_v28  ;;  %10910 = vmatpush1.bf16.msra.mxu1 %v14389_v38  ;;  %10007 = vmatprep.subr.bf16.mxu0 %v14394_v40  ;;  %v16548_v14 = vrot.slane %v6013_v47, %v14956_v55  ;;  %v14585_v21 = vpop.eup %14584  ;;  %v17516_v2 = vld [vmem:[#allocation84_spill] sm:$0xff]  ;;  %v14547_v50 = vld [vmem:[#allocation6 + $0x3ac] ss:$16 sps:$4 sm:$0xff]   ;;  %v17520_v9 = vld [vmem:[#allocation58_spill] sm:$0xff] }
 0x2da   :  { %17515 = vst [vmem:[#allocation31_spill] sm:$0xff] %v16545_v37  ;;  %10911 = vmatprep.subr.bf16.mxu1 %v14397_v10  ;;  %9958 = vmatprep.mubr.bf16.mxu0 %v17516_v2  ;;  %v6285_v31 = vcombine.low %v16522_v18, %v16525_v22  ;;  %v14548_v62 = vld [vmem:[#allocation6 + $0x3cc] ss:$16 sps:$4 sm:$0xff]   ;;  %v16555_v38 = vcombine.high %v16481_v48, %v16490_v17  ;;  %3645 = vst [vmem:[#allocation14 + $0xa0] sm:$0xff] %v12457_v39  ;;  %v17519_v47 = vld [vmem:[#allocation56_spill] sm:$0xff] }
 0x2db   :  { %v14549_v37 = vld [vmem:[#allocation6 + $0x3ec] ss:$16 sps:$4 sm:$0xff]   ;;  %v16559_v40 = vcombine.high %v16494_v20, %v16497_v42  ;;  %3646 = vst [vmem:[#allocation14 + $0xa8] sm:$0xff] %v12458_v33  ;;  %v3413_v10 = vmul.f32 %v14585_v21, %v17519_v47  ;;  %v3414_v8 = vmul.f32 %v14585_v21, %v17520_v9  ;;  %v17522_v60 = vld [vmem:[#allocation60_spill] sm:$0xff]  ;;  %10862 = vmatprep.mubr.bf16.mxu1 %v17516_v2  ;;  %v14406_v9 = vld [vmem:[#allocation11 + $0xd64] ss:$16 sps:$4 sm:$0xff]  }
 0x2dc   :  { %17517 = vst [vmem:[#allocation30_spill] sm:$0xff] %v16555_v38  ;;  %v17521_v28 = vld [vmem:[#allocation59_spill] sm:$0xff]  ;;  %v3416_v18 = vmul.f32 %v14585_v21, %v17522_v60  ;;  %10008 = vmatpush1.bf16.msra.mxu0 %v14392_v27  ;;  %v14398_v22 = vld [vmem:[#allocation11 + $0xd40] ss:$16 sps:$4 sm:$0xff]   ;;  %v16567_v38 = vrot.slane %v6281_v49, %v14956_v55  ;;  %v14409_v27 = vld [vmem:[#allocation11 + $0xd6c] ss:$16 sps:$4 sm:$0xff]   ;;  %v16580_v49 = vrot.slane %v14547_v50, %v14956_v55 }
 0x2dd   :  { %17518 = vst [vmem:[#allocation32_spill] sm:$0xff] %v16559_v40  ;;  %v3415_v1 = vmul.f32 %v14585_v21, %v17521_v28  ;;  %v16571_v40 = vcombine.high %v16519_v63, %v16548_v14  ;;  %v12459_v39 = vpack.c.bf16 %v3414_v8, %v3413_v10  ;;  %10912 = vmatpush1.bf16.msra.mxu1 %v14395_v29  ;;  %v14401_v47 = vld [vmem:[#allocation11 + $0xd48] ss:$16 sps:$4 sm:$0xff]   ;;  %v14587_v60 = vpop.eup %14586 }
 0x2de   :  { %17523 = vst [vmem:[#allocation77_spill] sm:$0xff] %v16567_v38  ;;  %10009 = vmatprep.subr.bf16.mxu0 %v14400_v3  ;;  %v16574_v28 = vrot.slane %v14546_v41, %v14956_v55  ;;  %10913 = vmatprep.subr.bf16.mxu1 %v14403_v57  ;;  %v16577_v21 = vrot.slane %v6285_v31, %v14956_v55  ;;  %v17527_v29 = vld [vmem:[#allocation61_spill] sm:$0xff]  ;;  %v17528_v41 = vld [vmem:[#allocation63_spill] sm:$0xff]  ;;  %v17529_v57 = vld [vmem:[#allocation62_spill] sm:$0xff] }
 0x2df   :  { %17524 = vst [vmem:[#allocation33_spill] sm:$0xff] %v16571_v40  ;;  %v12460_v33 = vpack.c.bf16 %v3416_v18, %v3415_v1  ;;  %v16583_v2 = vrot.slane %v14548_v62, %v14956_v55  ;;  %v16586_v18 = vrot.slane %v14549_v37, %v14956_v55  ;;  %3647 = vst [vmem:[#allocation14 + $0xb0] sm:$0xff] %v12459_v39  ;;  %v17530_v1 = vld [vmem:[#allocation65_spill] sm:$0xff]  ;;  %v14404_v62 = vld [vmem:[#allocation11 + $0xd60] ss:$16 sps:$4 sm:$0xff]  }
 0x2e0   :  { %17525 = vst [vmem:[#allocation35_spill] sm:$0xff] %v16577_v21  ;;  %v3417_v3 = vmul.f32 %v14587_v60, %v17527_v29  ;;  %v3418_v10 = vmul.f32 %v14587_v60, %v17528_v41  ;;  %v3419_v8 = vmul.f32 %v14587_v60, %v17529_v57  ;;  %v3420_v31 = vmul.f32 %v14587_v60, %v17530_v1  ;;  %v17531_v40 = vld [vmem:[#allocation85_spill] sm:$0xff]  ;;  %v17533_v41 = vld [vmem:[#allocation86_spill] sm:$0xff]  ;;  %v17536_v57 = vld [vmem:[#allocation67_spill] sm:$0xff] }
 0x2e1   :  { %17526 = vst [vmem:[#allocation34_spill] sm:$0xff] %v16583_v2  ;;  %3648 = vst [vmem:[#allocation14 + $0xb8] sm:$0xff] %v12460_v33  ;;  %9959 = vmatmul.mubr.bf16.gmra.mrb[52].mxu0 %v17531_v40  ;;  %10863 = vmatmul.mubr.bf16.gmra.mrb[52].mxu1 %v17531_v40  ;;  %v14407_v37 = vld [vmem:[#allocation11 + $0xd68] ss:$16 sps:$4 sm:$0xff]   ;;  %v14412_v39 = vld [vmem:[#allocation11 + $0xd84] ss:$16 sps:$4 sm:$0xff]   ;;  %v16596_v33 = vcombine.high %v16567_v38, %v16577_v21  ;;  %v6553_v40 = vcombine.low %v16574_v28, %v16580_v49 }
 0x2e2   :  { %10010 = vmatpush1.bf16.msra.mxu0 %v14398_v22  ;;  %v12461_v50 = vpack.c.bf16 %v3418_v10, %v3417_v3  ;;  %v12462_v63 = vpack.c.bf16 %v3420_v31, %v3419_v8  ;;  %10914 = vmatpush1.bf16.msra.mxu1 %v14401_v47  ;;  %v14589_v29 = vpop.eup %14588  ;;  %v14415_v60 = vld [vmem:[#allocation11 + $0xd8c] ss:$16 sps:$4 sm:$0xff]   ;;  %v6557_v22 = vcombine.low %v16583_v2, %v16586_v18  ;;  %v14413_v21 = vld [vmem:[#allocation11 + $0xd88] ss:$16 sps:$4 sm:$0xff]   ;;  %v14418_v2 = vld [vmem:[#allocation11 + $0xda4] ss:$16 sps:$4 sm:$0xff]  }
 0x2e3   :  { %10011 = vmatprep.subr.bf16.mxu0 %v14406_v9  ;;  %17532 = vst [vmem:[#allocation36_spill] sm:$0xff] %v16596_v33  ;;  %10915 = vmatprep.subr.bf16.mxu1 %v14409_v27  ;;  %v17534_v47 = vld [vmem:[#allocation64_spill] sm:$0xff]  ;;  %v17535_v3 = vld [vmem:[#allocation66_spill] sm:$0xff]  ;;  %v3423_v8 = vmul.f32 %v14589_v29, %v17536_v57 }
 0x2e4   :  { %9968 = vmatprep.mubr.bf16.mxu0 %v17533_v41  ;;  %3649 = vst [vmem:[#allocation14 + $0xc0] sm:$0xff] %v12461_v50  ;;  %3650 = vst [vmem:[#allocation14 + $0xc8] sm:$0xff] %v12462_v63  ;;  %v3421_v9 = vmul.f32 %v14589_v29, %v17534_v47  ;;  %v3422_v10 = vmul.f32 %v14589_v29, %v17535_v3  ;;  %v17537_v1 = vld [vmem:[#allocation68_spill] sm:$0xff]  ;;  %10872 = vmatprep.mubr.bf16.mxu1 %v17533_v41  ;;  %v17538_v50 = vld [vmem:[#allocation87_spill] sm:$0xff] }
 0x2e5   :  { %v3424_v31 = vmul.f32 %v14589_v29, %v17537_v1  ;;  %v14410_v27 = vld [vmem:[#allocation11 + $0xd80] ss:$16 sps:$4 sm:$0xff]   ;;  %v14421_v63 = vld [vmem:[#allocation11 + $0xdac] ss:$16 sps:$4 sm:$0xff]   ;;  %v16610_v47 = vrot.slane %v6553_v40, %v14956_v55  ;;  %v16613_v29 = vrot.slane %v6557_v22, %v14956_v55  ;;  %v14430_v40 = vld [vmem:[#allocation11 + $0xde4] ss:$16 sps:$4 sm:$0xff]   ;;  %v4922_v22 = vcombine.high %v16343_v0, %v16346_v51 }
 0x2e6   :  { %10012 = vmatpush1.bf16.msra.mxu0 %v14404_v62  ;;  %v12463_v33 = vpack.c.bf16 %v3422_v10, %v3421_v9  ;;  %10916 = vmatpush1.bf16.msra.mxu1 %v14407_v37  ;;  %v14416_v62 = vld [vmem:[#allocation11 + $0xda0] ss:$16 sps:$4 sm:$0xff]   ;;  %v14419_v37 = vld [vmem:[#allocation11 + $0xda8] ss:$16 sps:$4 sm:$0xff]   ;;  %v4926_v9 = vcombine.high %v16349_v58, %v16352_v34  ;;  %v14440_v10 = vld [vmem:[#allocation11 + $0xe04] ss:$16 sps:$4 sm:$0xff]   ;;  %v4713_v51 = vcombine.low %v16400_v11, %v16406_v36 }
 0x2e7   :  { %v12464_v38 = vpack.c.bf16 %v3424_v31, %v3423_v8  ;;  %10013 = vmatprep.subr.bf16.mxu0 %v14412_v39  ;;  %10917 = vmatprep.subr.bf16.mxu1 %v14415_v60  ;;  %v14424_v39 = vld [vmem:[#allocation11 + $0xdc4] ss:$16 sps:$4 sm:$0xff]   ;;  %v14422_v41 = vld [vmem:[#allocation11 + $0xdc0] ss:$16 sps:$4 sm:$0xff]   ;;  %v14425_v60 = vld [vmem:[#allocation11 + $0xdc8] ss:$16 sps:$4 sm:$0xff]   ;;  %v5194_v1 = vcombine.high %v16379_v16, %v16382_v35  ;;  %v5198_v31 = vcombine.high %v16385_v44, %v16388_v4 }
 0x2e8   :  { %3651 = vst [vmem:[#allocation14 + $0xd0] sm:$0xff] %v12463_v33  ;;  %v16618_v33 = vcombine.high %v16610_v47, %v16613_v29  ;;  %v14431_v3 = vld [vmem:[#allocation11 + $0xde8] ss:$16 sps:$4 sm:$0xff]   ;;  %v14443_v57 = vld [vmem:[#allocation11 + $0xe0c] ss:$16 sps:$4 sm:$0xff]   ;;  %v16634_v0 = vrot.slane %v4926_v9, %v14956_v55  ;;  %v4985_v16 = vcombine.low %v16409_v53, %v16412_v7 }
 0x2e9   :  { %3652 = vst [vmem:[#allocation14 + $0xd8] sm:$0xff] %v12464_v38  ;;  %9969 = vmatmul.mubr.bf16.gmra.mrb[56].mxu0 %v17538_v50  ;;  %10873 = vmatmul.mubr.bf16.gmra.mrb[56].mxu1 %v17538_v50  ;;  %v14427_v38 = vld [vmem:[#allocation11 + $0xdcc] ss:$16 sps:$4 sm:$0xff]   ;;  %v14441_v58 = vld [vmem:[#allocation11 + $0xe08] ss:$16 sps:$4 sm:$0xff]   ;;  %v16645_v50 = vrot.slane %v5194_v1, %v14956_v55 }
 0x2ea   :  { %10014 = vmatpush1.bf16.msra.mxu0 %v14410_v27  ;;  %10918 = vmatpush1.bf16.msra.mxu1 %v14413_v21  ;;  %v14433_v21 = vld [vmem:[#allocation11 + $0xdec] ss:$16 sps:$4 sm:$0xff]   ;;  %v14446_v34 = vld [vmem:[#allocation11 + $0xe24] ss:$16 sps:$4 sm:$0xff]   ;;  %v14444_v11 = vld [vmem:[#allocation11 + $0xe20] ss:$16 sps:$4 sm:$0xff]  }
 0x2eb   :  { %10015 = vmatprep.subr.bf16.mxu0 %v14418_v2  ;;  %10919 = vmatprep.subr.bf16.mxu1 %v14421_v63  ;;  %v4717_v2 = vcombine.low %v16397_v52, %v16403_v43  ;;  %v16631_v52 = vrot.slane %v4922_v22, %v14956_v55  ;;  %v14449_v43 = vld [vmem:[#allocation11 + $0xe2c] ss:$16 sps:$4 sm:$0xff]   ;;  %v14447_v36 = vld [vmem:[#allocation11 + $0xe28] ss:$16 sps:$4 sm:$0xff]   ;;  %v14456_v27 = vld [vmem:[#allocation11 + $0xe44] ss:$16 sps:$4 sm:$0xff]  }
 0x2ec   :  { %9978 = vmatprep.mubr.bf16.mxu0 %v16278_v23  ;;  %10882 = vmatprep.mubr.bf16.mxu1 %v16278_v23  ;;  %v14428_v23 = vld [vmem:[#allocation11 + $0xde0] ss:$16 sps:$4 sm:$0xff]   ;;  %v14459_v63 = vld [vmem:[#allocation11 + $0xe4c] ss:$16 sps:$4 sm:$0xff]   ;;  %v14457_v44 = vld [vmem:[#allocation11 + $0xe48] ss:$16 sps:$4 sm:$0xff]  }
 0x2ed   :  { %v4989_v8 = vcombine.low %v16631_v52, %v16634_v0  ;;  %v14454_v35 = vld [vmem:[#allocation11 + $0xe40] ss:$16 sps:$4 sm:$0xff]   ;;  %v14462_v4 = vld [vmem:[#allocation11 + $0xe64] ss:$16 sps:$4 sm:$0xff]   ;;  %v14463_v7 = vld [vmem:[#allocation11 + $0xe68] ss:$16 sps:$4 sm:$0xff]  }
 0x2ee   :  { %10016 = vmatpush1.bf16.msra.mxu0 %v14416_v62  ;;  %10920 = vmatpush1.bf16.msra.mxu1 %v14419_v37  ;;  %v16648_v62 = vrot.slane %v5198_v31, %v14956_v55  ;;  %v14465_v37 = vld [vmem:[#allocation11 + $0xe6c] ss:$16 sps:$4 sm:$0xff]   ;;  %v14460_v53 = vld [vmem:[#allocation11 + $0xe60] ss:$16 sps:$4 sm:$0xff]   ;;  %v14504_v1 = vld [vmem:[#allocation11 + $0xf04] ss:$16 sps:$4 sm:$0xff]  }
 0x2ef   :  { %10017 = vmatprep.subr.bf16.mxu0 %v14424_v39  ;;  %10921 = vmatprep.subr.bf16.mxu1 %v14427_v38  ;;  %v5466_v38 = vcombine.high %v16419_v59, %v16428_v6  ;;  %v5257_v59 = vcombine.low %v16455_v25, %v16458_v56  ;;  %v14470_v6 = vld [vmem:[#allocation11 + $0xe80] ss:$16 sps:$4 sm:$0xff]   ;;  %v14481_v22 = vld [vmem:[#allocation11 + $0xeac] ss:$16 sps:$4 sm:$0xff]   ;;  %v14479_v56 = vld [vmem:[#allocation11 + $0xea8] ss:$16 sps:$4 sm:$0xff]  }
 0x2f0   :  { %v5261_v39 = vcombine.low %v16645_v50, %v16648_v62  ;;  %v14476_v25 = vld [vmem:[#allocation11 + $0xea0] ss:$16 sps:$4 sm:$0xff]   ;;  %v14507_v31 = vld [vmem:[#allocation11 + $0xf0c] ss:$16 sps:$4 sm:$0xff]  }
 0x2f1   :  { %9979 = vmatmul.mubr.bf16.gmra.mrb[60].mxu0 %v16282_v46  ;;  %10883 = vmatmul.mubr.bf16.gmra.mrb[60].mxu1 %v16282_v46  ;;  %v14438_v46 = vld [vmem:[#allocation11 + $0xe00] ss:$16 sps:$4 sm:$0xff]  }
 0x2f2   :  { %10018 = vmatpush1.bf16.msra.mxu0 %v14422_v41  ;;  %10922 = vmatpush1.bf16.msra.mxu1 %v14425_v60  ;;  %v5470_v41 = vcombine.high %v16431_v13, %v16434_v61  ;;  %v14472_v60 = vld [vmem:[#allocation11 + $0xe84] ss:$16 sps:$4 sm:$0xff]   ;;  %v14473_v13 = vld [vmem:[#allocation11 + $0xe88] ss:$16 sps:$4 sm:$0xff]  }
 0x2f3   :  { %10019 = vmatprep.subr.bf16.mxu0 %v14430_v40  ;;  %10923 = vmatprep.subr.bf16.mxu1 %v14433_v21  ;;  %v14475_v40 = vld [vmem:[#allocation11 + $0xe8c] ss:$16 sps:$4 sm:$0xff]   ;;  %v16659_v21 = vrot.slane %v5466_v38, %v14956_v55  ;;  %v14478_v61 = vld [vmem:[#allocation11 + $0xea4] ss:$16 sps:$4 sm:$0xff]  }
 0x2f4   :  { %10021 = vmatprep.mubr.bf16.mxu0 %v4717_v2  ;;  %10925 = vmatprep.mubr.bf16.mxu1 %v4717_v2  ;;  %v16662_v2 = vrot.slane %v5470_v41, %v14956_v55 }
 0x2f6   :  { %10020 = vmatpush1.bf16.msra.mxu0 %v14428_v23  ;;  %10924 = vmatpush1.bf16.msra.mxu1 %v14431_v3  ;;  %v5533_v9 = vcombine.low %v16659_v21, %v16662_v2  ;;  %v5738_v23 = vcombine.high %v16437_v54, %v16441_v30  ;;  %v5742_v3 = vcombine.high %v16444_v5, %v16447_v12  ;;  %v14486_v30 = vld [vmem:[#allocation11 + $0xec0] ss:$16 sps:$4 sm:$0xff]   ;;  %v14489_v5 = vld [vmem:[#allocation11 + $0xec8] ss:$16 sps:$4 sm:$0xff]   ;;  %v14494_v12 = vld [vmem:[#allocation11 + $0xee4] ss:$16 sps:$4 sm:$0xff]  }
 0x2f7   :  { %10102 = vmatprep.subr.bf16.mxu0 %v14440_v10  ;;  %11006 = vmatprep.subr.bf16.mxu1 %v14443_v57  ;;  %v14488_v10 = vld [vmem:[#allocation11 + $0xec4] ss:$16 sps:$4 sm:$0xff]   ;;  %v14491_v57 = vld [vmem:[#allocation11 + $0xecc] ss:$16 sps:$4 sm:$0xff]   ;;  %v5529_v54 = vcombine.low %v16481_v48, %v16490_v17  ;;  %v14492_v48 = vld [vmem:[#allocation11 + $0xee0] ss:$16 sps:$4 sm:$0xff]  }
 0x2f8   :  { %v14495_v17 = vld [vmem:[#allocation11 + $0xee8] ss:$16 sps:$4 sm:$0xff]  }
 0x2f9   :  { %10022 = vmatmul.mubr.bf16.vlgmr.msra.gmra.mrb[32].mxu0 %v4713_v51  ;;  %10926 = vmatmul.mubr.bf16.vlgmr.msra.gmra.mrb[32].mxu1 %v4713_v51  ;;  %v16673_v51 = vrot.slane %v5738_v23, %v14956_v55  ;;  %v14539_v23 = vld [vmem:[#allocation11 + $0xf8c] ss:$16 sps:$4 sm:$0xff]  }
 0x2fa   :  { %10103 = vmatpush1.bf16.msra.mxu0 %v14438_v46  ;;  %11007 = vmatpush1.bf16.msra.mxu1 %v14441_v58  ;;  %v16676_v46 = vrot.slane %v5742_v3, %v14956_v55  ;;  %v14497_v58 = vld [vmem:[#allocation11 + $0xeec] ss:$16 sps:$4 sm:$0xff]  }
 0x2fb   :  { %10104 = vmatprep.subr.bf16.mxu0 %v14446_v34  ;;  %11008 = vmatprep.subr.bf16.mxu1 %v14449_v43  ;;  %v6010_v43 = vcombine.high %v16469_v26, %v16472_v32  ;;  %v5801_v26 = vcombine.low %v16494_v20, %v16497_v42  ;;  %v14502_v32 = vld [vmem:[#allocation11 + $0xf00] ss:$16 sps:$4 sm:$0xff]   ;;  %v14511_v42 = vld [vmem:[#allocation11 + $0xf28] ss:$16 sps:$4 sm:$0xff]  }
 0x2fc   :  { %10031 = vmatprep.mubr.bf16.mxu0 %v4989_v8  ;;  %10935 = vmatprep.mubr.bf16.mxu1 %v4989_v8  ;;  %v5805_v34 = vcombine.low %v16673_v51, %v16676_v46  ;;  %v6014_v8 = vcombine.high %v16484_v15, %v16487_v19  ;;  %v14505_v15 = vld [vmem:[#allocation11 + $0xf08] ss:$16 sps:$4 sm:$0xff]   ;;  %v14510_v19 = vld [vmem:[#allocation11 + $0xf24] ss:$16 sps:$4 sm:$0xff]   ;;  %v14508_v20 = vld [vmem:[#allocation11 + $0xf20] ss:$16 sps:$4 sm:$0xff]  }
 0x2fe   :  { %10105 = vmatpush1.bf16.msra.mxu0 %v14444_v11  ;;  %11009 = vmatpush1.bf16.msra.mxu1 %v14447_v36  ;;  %v16687_v11 = vrot.slane %v6010_v43, %v14956_v55  ;;  %v16690_v36 = vrot.slane %v6014_v8, %v14956_v55  ;;  %v14550_v43 = vld [vmem:[#allocation11 + $0xfc0] ss:$16 sps:$4 sm:$0xff]   ;;  %v14553_v8 = vld [vmem:[#allocation11 + $0xfc8] ss:$16 sps:$4 sm:$0xff]  }
 0x2ff   :  { %10106 = vmatprep.subr.bf16.mxu0 %v14456_v27  ;;  %11010 = vmatprep.subr.bf16.mxu1 %v14459_v63  ;;  %v14513_v27 = vld [vmem:[#allocation11 + $0xf2c] ss:$16 sps:$4 sm:$0xff]  }
 0x300   :  { %v6077_v63 = vcombine.low %v16687_v11, %v16690_v36 }
 0x301   :  { %10032 = vmatmul.mubr.bf16.gmra.mrb[36].mxu0 %v4985_v16  ;;  %10936 = vmatmul.mubr.bf16.gmra.mrb[36].mxu1 %v4985_v16  ;;  %v6282_v16 = vcombine.high %v16509_v24, %v16512_v45  ;;  %v17541_v24 = vld [vmem:[#allocation25_spill] sm:$0xff] }
 0x302   :  { %10107 = vmatpush1.bf16.msra.mxu0 %v14454_v35  ;;  %11011 = vmatpush1.bf16.msra.mxu1 %v14457_v44  ;;  %v17539_v35 = vld [vmem:[#allocation27_spill] sm:$0xff]  ;;  %v17540_v44 = vld [vmem:[#allocation26_spill] sm:$0xff]  ;;  %v6073_v45 = vcombine.low %v17541_v24, %v16548_v14 }
 0x303   :  { %10108 = vmatprep.subr.bf16.mxu0 %v14462_v4  ;;  %11012 = vmatprep.subr.bf16.mxu1 %v14465_v37  ;;  %v6286_v4 = vcombine.high %v17540_v44, %v17539_v35  ;;  %v14520_v37 = vld [vmem:[#allocation11 + $0xf44] ss:$16 sps:$4 sm:$0xff]   ;;  %v16701_v38 = vrot.slane %v6282_v16, %v14956_v55  ;;  %v14524_v14 = vld [vmem:[#allocation11 + $0xf60] ss:$16 sps:$4 sm:$0xff]  }
 0x304   :  { %10041 = vmatprep.mubr.bf16.mxu0 %v5261_v39  ;;  %10945 = vmatprep.mubr.bf16.mxu1 %v5261_v39  ;;  %v14523_v39 = vld [vmem:[#allocation11 + $0xf4c] ss:$16 sps:$4 sm:$0xff]  }
 0x305   :  { %v16704_v41 = vrot.slane %v6286_v4, %v14956_v55 }
 0x306   :  { %10109 = vmatpush1.bf16.msra.mxu0 %v14460_v53  ;;  %11013 = vmatpush1.bf16.msra.mxu1 %v14463_v7  ;;  %v14518_v53 = vld [vmem:[#allocation11 + $0xf40] ss:$16 sps:$4 sm:$0xff]   ;;  %v14521_v7 = vld [vmem:[#allocation11 + $0xf48] ss:$16 sps:$4 sm:$0xff]  }
 0x307   :  { %10110 = vmatprep.subr.bf16.mxu0 %v14472_v60  ;;  %11014 = vmatprep.subr.bf16.mxu1 %v14475_v40  ;;  %v14526_v60 = vld [vmem:[#allocation11 + $0xf64] ss:$16 sps:$4 sm:$0xff]   ;;  %v14529_v40 = vld [vmem:[#allocation11 + $0xf6c] ss:$16 sps:$4 sm:$0xff]  }
 0x309   :  { %10042 = vmatmul.mubr.bf16.gmra.mrb[40].mxu0 %v5257_v59  ;;  %10946 = vmatmul.mubr.bf16.gmra.mrb[40].mxu1 %v5257_v59  ;;  %v6349_v59 = vcombine.low %v16701_v38, %v16704_v41 }
 0x30a   :  { %10111 = vmatpush1.bf16.msra.mxu0 %v14470_v6  ;;  %11015 = vmatpush1.bf16.msra.mxu1 %v14473_v13  ;;  %v6554_v6 = vcombine.high %v16574_v28, %v16580_v49  ;;  %v17542_v13 = vld [vmem:[#allocation34_spill] sm:$0xff]  ;;  %v17543_v28 = vld [vmem:[#allocation35_spill] sm:$0xff]  ;;  %v17544_v49 = vld [vmem:[#allocation77_spill] sm:$0xff] }
 0x30b   :  { %10112 = vmatprep.subr.bf16.mxu0 %v14478_v61  ;;  %11016 = vmatprep.subr.bf16.mxu1 %v14481_v22  ;;  %v6558_v61 = vcombine.high %v17542_v13, %v16586_v18  ;;  %v14527_v22 = vld [vmem:[#allocation11 + $0xf68] ss:$16 sps:$4 sm:$0xff]   ;;  %v6345_v18 = vcombine.low %v17544_v49, %v17543_v28 }
 0x30c   :  { %10051 = vmatprep.mubr.bf16.mxu0 %v5533_v9  ;;  %10955 = vmatprep.mubr.bf16.mxu1 %v5533_v9  ;;  %v14536_v9 = vld [vmem:[#allocation11 + $0xf84] ss:$16 sps:$4 sm:$0xff]   ;;  %v16715_v3 = vrot.slane %v6554_v6, %v14956_v55 }
 0x30e   :  { %10113 = vmatpush1.bf16.msra.mxu0 %v14476_v25  ;;  %11017 = vmatpush1.bf16.msra.mxu1 %v14479_v56  ;;  %v16718_v25 = vrot.slane %v6558_v61, %v14956_v55  ;;  %v14534_v56 = vld [vmem:[#allocation11 + $0xf80] ss:$16 sps:$4 sm:$0xff]  }
 0x30f   :  { %10114 = vmatprep.subr.bf16.mxu0 %v14488_v10  ;;  %11018 = vmatprep.subr.bf16.mxu1 %v14491_v57  ;;  %v14537_v10 = vld [vmem:[#allocation11 + $0xf88] ss:$16 sps:$4 sm:$0xff]   ;;  %v14542_v57 = vld [vmem:[#allocation11 + $0xfa4] ss:$16 sps:$4 sm:$0xff]   ;;  %v14540_v55 = vld [vmem:[#allocation11 + $0xfa0] ss:$16 sps:$4 sm:$0xff]  }
 0x311   :  { %10052 = vmatmul.mubr.bf16.gmra.mrb[44].mxu0 %v5529_v54  ;;  %10956 = vmatmul.mubr.bf16.gmra.mrb[44].mxu1 %v5529_v54  ;;  %v14545_v54 = vld [vmem:[#allocation11 + $0xfac] ss:$16 sps:$4 sm:$0xff]  }
 0x312   :  { %10115 = vmatpush1.bf16.msra.mxu0 %v14486_v30  ;;  %11019 = vmatpush1.bf16.msra.mxu1 %v14489_v5  ;;  %v6621_v30 = vcombine.low %v16715_v3, %v16718_v25  ;;  %v14543_v5 = vld [vmem:[#allocation11 + $0xfa8] ss:$16 sps:$4 sm:$0xff]  }
 0x313   :  { %10116 = vmatprep.subr.bf16.mxu0 %v14494_v12  ;;  %11020 = vmatprep.subr.bf16.mxu1 %v14497_v58  ;;  %v14552_v12 = vld [vmem:[#allocation11 + $0xfc4] ss:$16 sps:$4 sm:$0xff]   ;;  %v14555_v58 = vld [vmem:[#allocation11 + $0xfcc] ss:$16 sps:$4 sm:$0xff]  }
 0x314   :  { %10061 = vmatprep.mubr.bf16.mxu0 %v5805_v34  ;;  %10965 = vmatprep.mubr.bf16.mxu1 %v5805_v34  ;;  %v6617_v34 = vcombine.low %v16610_v47, %v16613_v29  ;;  %v4990_v47 = vcombine.high %v16631_v52, %v16634_v0  ;;  %v17546_v29 = vld [vmem:[#allocation28_spill] sm:$0xff]  ;;  %v17548_v52 = vld [vmem:[#allocation31_spill] sm:$0xff]  ;;  %v5806_v0 = vcombine.high %v16673_v51, %v16676_v46 }
 0x315   :  { %v6622_v51 = vcombine.high %v16715_v3, %v16718_v25  ;;  %v17552_v46 = vld [vmem:[#allocation36_spill] sm:$0xff] }
 0x316   :  { %10117 = vmatpush1.bf16.msra.mxu0 %v14492_v48  ;;  %11021 = vmatpush1.bf16.msra.mxu1 %v14495_v17  ;;  %v14558_v48 = vld [vmem:[#allocation11 + $0xfe4] ss:$16 sps:$4 sm:$0xff]   ;;  %v14561_v17 = vld [vmem:[#allocation11 + $0xfec] ss:$16 sps:$4 sm:$0xff]  }
 0x317   :  { %10118 = vmatprep.subr.bf16.mxu0 %v14504_v1  ;;  %11022 = vmatprep.subr.bf16.mxu1 %v14507_v31  ;;  %v14556_v1 = vld [vmem:[#allocation11 + $0xfe0] ss:$16 sps:$4 sm:$0xff]   ;;  %v14559_v31 = vld [vmem:[#allocation11 + $0xfe8] ss:$16 sps:$4 sm:$0xff]  }
 0x319   :  { %10062 = vmatmul.mubr.bf16.gmra.mrb[48].mxu0 %v5801_v26  ;;  %10966 = vmatmul.mubr.bf16.gmra.mrb[48].mxu1 %v5801_v26  ;;  %v17545_v26 = vld [vmem:[#allocation24_spill] sm:$0xff] }
 0x31a   :  { %10119 = vmatpush1.bf16.msra.mxu0 %v14502_v32  ;;  %11023 = vmatpush1.bf16.msra.mxu1 %v14505_v15  ;;  %v5262_v32 = vcombine.high %v16645_v50, %v16648_v62  ;;  %v17547_v15 = vld [vmem:[#allocation29_spill] sm:$0xff]  ;;  %v6078_v50 = vcombine.high %v16687_v11, %v16690_v36  ;;  %v17550_v62 = vld [vmem:[#allocation32_spill] sm:$0xff]  ;;  %v4297_v11 = vld [vmem:[#allocation12] sm:$0xf] }
 0x31b   :  { %10120 = vmatprep.subr.bf16.mxu0 %v14510_v19  ;;  %11024 = vmatprep.subr.bf16.mxu1 %v14513_v27  ;;  %v5534_v19 = vcombine.high %v16659_v21, %v16662_v2  ;;  %v17549_v27 = vld [vmem:[#allocation30_spill] sm:$0xff]  ;;  %v6350_v21 = vcombine.high %v16701_v38, %v16704_v41  ;;  %v17551_v2 = vld [vmem:[#allocation33_spill] sm:$0xff]  ;;  %v17553_v36 = vld [vmem:[#allocation23_spill] sm:$0xff] }
 0x31c   :  { %10071 = vmatprep.mubr.bf16.mxu0 %v6077_v63  ;;  %10975 = vmatprep.mubr.bf16.mxu1 %v6077_v63  ;;  %v17554_v63 = vsub.s32 0, %v17553_v36  ;;  %v17555_v35 = vsub.s32 2, %v17553_v36  ;;  %v17556_v4 = vsub.s32 1, %v17553_v36 }
 0x31e   :  { %10121 = vmatpush1.bf16.msra.mxu0 %v14508_v20  ;;  %11025 = vmatpush1.bf16.msra.mxu1 %v14511_v42  ;;  %v16760_v16 = vrot.slane %v4297_v11, %v17554_v63  ;;  %v16764_v44 = vrot.slane %v4297_v11, %v17555_v35  ;;  %v16768_v20 = vrot.slane %v4297_v11, %v17556_v4 }
 0x31f   :  { %10122 = vmatprep.subr.bf16.mxu0 %v14520_v37  ;;  %11026 = vmatprep.subr.bf16.mxu1 %v14523_v39  ;;  %v17557_v37 = vsub.s32 3, %v17553_v36 }
 0x321   :  { %10072 = vmatmul.mubr.bf16.gmra.mrb[52].mxu0 %v6073_v45  ;;  %10976 = vmatmul.mubr.bf16.gmra.mrb[52].mxu1 %v6073_v45  ;;  %v16772_v39 = vrot.slane %v4297_v11, %v17557_v37 }
 0x322   :  { %10123 = vmatpush1.bf16.msra.mxu0 %v14518_v53  ;;  %11027 = vmatpush1.bf16.msra.mxu1 %v14521_v7 }
 0x323   :  { %10124 = vmatprep.subr.bf16.mxu0 %v14526_v60  ;;  %11028 = vmatprep.subr.bf16.mxu1 %v14529_v40 }
 0x324   :  { %10081 = vmatprep.mubr.bf16.mxu0 %v6349_v59  ;;  %10985 = vmatprep.mubr.bf16.mxu1 %v6349_v59 }
 0x326   :  { %10125 = vmatpush1.bf16.msra.mxu0 %v14524_v14  ;;  %11029 = vmatpush1.bf16.msra.mxu1 %v14527_v22 }
 0x327   :  { %10126 = vmatprep.subr.bf16.mxu0 %v14536_v9  ;;  %11030 = vmatprep.subr.bf16.mxu1 %v14539_v23 }
 0x329   :  { %10082 = vmatmul.mubr.bf16.gmra.mrb[56].mxu0 %v6345_v18  ;;  %10986 = vmatmul.mubr.bf16.gmra.mrb[56].mxu1 %v6345_v18 }
 0x32a   :  { %10127 = vmatpush1.bf16.msra.mxu0 %v14534_v56  ;;  %11031 = vmatpush1.bf16.msra.mxu1 %v14537_v10 }
 0x32b   :  { %10128 = vmatprep.subr.bf16.mxu0 %v14542_v57  ;;  %11032 = vmatprep.subr.bf16.mxu1 %v14545_v54 }
 0x32c   :  { %10091 = vmatprep.mubr.bf16.mxu0 %v6621_v30  ;;  %10995 = vmatprep.mubr.bf16.mxu1 %v6621_v30 }
 0x32e   :  { %10129 = vmatpush1.bf16.msra.mxu0 %v14540_v55  ;;  %11033 = vmatpush1.bf16.msra.mxu1 %v14543_v5 }
 0x32f   :  { %10130 = vmatprep.subr.bf16.mxu0 %v14552_v12  ;;  %11034 = vmatprep.subr.bf16.mxu1 %v14555_v58 }
 0x331   :  { %10092 = vmatmul.mubr.bf16.gmra.mrb[60].mxu0 %v6617_v34  ;;  %10996 = vmatmul.mubr.bf16.gmra.mrb[60].mxu1 %v6617_v34 }
 0x332   :  { %10131 = vmatpush1.bf16.msra.mxu0 %v14550_v43  ;;  %11035 = vmatpush1.bf16.msra.mxu1 %v14553_v8 }
 0x333   :  { %10132 = vmatprep.subr.bf16.mxu0 %v14558_v48  ;;  %11036 = vmatprep.subr.bf16.mxu1 %v14561_v17 }
 0x334   :  { %10134 = vmatprep.mubr.bf16.mxu0 %v17545_v26  ;;  %11038 = vmatprep.mubr.bf16.mxu1 %v17545_v26 }
 0x336   :  { %10133 = vmatpush1.bf16.msra.mxu0 %v14556_v1  ;;  %11037 = vmatpush1.bf16.msra.mxu1 %v14559_v31 }
 0x339   :  { %10135 = vmatmul.mubr.bf16.vlgmr.msra.gmra.mrb[32].mxu0 %v17546_v29  ;;  %11039 = vmatmul.mubr.bf16.vlgmr.msra.gmra.mrb[32].mxu1 %v17546_v29 }
 0x33a   :  { %10144 = vmatprep.mubr.bf16.mxu0 %v4990_v47  ;;  %11048 = vmatprep.mubr.bf16.mxu1 %v4990_v47 }
 0x341   :  { %10145 = vmatmul.mubr.bf16.gmra.mrb[36].mxu0 %v17547_v15  ;;  %11049 = vmatmul.mubr.bf16.gmra.mrb[36].mxu1 %v17547_v15 }
 0x342   :  { %10154 = vmatprep.mubr.bf16.mxu0 %v5262_v32  ;;  %11058 = vmatprep.mubr.bf16.mxu1 %v5262_v32 }
 0x349   :  { %10155 = vmatmul.mubr.bf16.gmra.mrb[40].mxu0 %v17548_v52  ;;  %11059 = vmatmul.mubr.bf16.gmra.mrb[40].mxu1 %v17548_v52 }
 0x34a   :  { %10164 = vmatprep.mubr.bf16.mxu0 %v5534_v19  ;;  %11068 = vmatprep.mubr.bf16.mxu1 %v5534_v19 }
 0x351   :  { %10165 = vmatmul.mubr.bf16.gmra.mrb[44].mxu0 %v17549_v27  ;;  %11069 = vmatmul.mubr.bf16.gmra.mrb[44].mxu1 %v17549_v27 }
 0x352   :  { %10174 = vmatprep.mubr.bf16.mxu0 %v5806_v0  ;;  %11078 = vmatprep.mubr.bf16.mxu1 %v5806_v0 }
 0x359   :  { %10175 = vmatmul.mubr.bf16.gmra.mrb[48].mxu0 %v17550_v62  ;;  %11079 = vmatmul.mubr.bf16.gmra.mrb[48].mxu1 %v17550_v62 }
 0x35a   :  { %10184 = vmatprep.mubr.bf16.mxu0 %v6078_v50  ;;  %11088 = vmatprep.mubr.bf16.mxu1 %v6078_v50 }
 0x361   :  { %10185 = vmatmul.mubr.bf16.gmra.mrb[52].mxu0 %v17551_v2  ;;  %11089 = vmatmul.mubr.bf16.gmra.mrb[52].mxu1 %v17551_v2 }
 0x362   :  { %10194 = vmatprep.mubr.bf16.mxu0 %v6350_v21  ;;  %11098 = vmatprep.mubr.bf16.mxu1 %v6350_v21 }
 0x369   :  { %10195 = vmatmul.mubr.bf16.gmra.mrb[56].mxu0 %v17552_v46  ;;  %11099 = vmatmul.mubr.bf16.gmra.mrb[56].mxu1 %v17552_v46 }
 0x36a   :  { %10204 = vmatprep.mubr.bf16.mxu0 %v6622_v51  ;;  %11108 = vmatprep.mubr.bf16.mxu1 %v6622_v51 }
 0x371   :  { %10205 = vmatmul.mubr.bf16.gmra.mrb[60].mxu0 %v16618_v33  ;;  %11109 = vmatmul.mubr.bf16.gmra.mrb[60].mxu1 %v16618_v33 }
 0x40c   :  { %v10136_v42 = vpop.f32.mrb[32].mxu0  ;;  %v11040_v38 = vpop.f32.mrb[32].mxu1 }
 0x40d   :  { %v16775_v33 = vadd.f32 %v10136_v42, %v16760_v16  ;;  %v10138_v41 = vpop.f32.mrb[33].mxu0  ;;  %v16778_v24 = vadd.f32 %v11040_v38, %v16764_v44  ;;  %v11042_v53 = vpop.f32.mrb[33].mxu1 }
 0x40e   :  { %v16781_v45 = vadd.f32 %v10138_v41, %v16768_v20  ;;  %v10140_v7 = vpop.f32.mrb[34].mxu0  ;;  %v11044_v59 = vpop.f32.mrb[34].mxu1  ;;  %v16791_v61 = vadd.f32 %v11042_v53, %v16772_v39 }
 0x40f   :  { %v11119_v60 = vmul.f32 %v16775_v33, %v16775_v33  ;;  %v16786_v40 = vadd.f32 %v10140_v7, %v16760_v16  ;;  %v10142_v6 = vpop.f32.mrb[35].mxu0  ;;  %v16794_v14 = vadd.f32 %v11044_v59, %v16764_v44  ;;  %v11046_v9 = vpop.f32.mrb[35].mxu1  ;;  %v11121_v3 = vmul.f32 %v16778_v24, %v16778_v24 }
 0x410   :  { %v11120_v13 = vmul.f32 %v16781_v45, %v16781_v45  ;;  %v16797_v22 = vadd.f32 %v10142_v6, %v16768_v20  ;;  %v16806_v49 = vadd.f32 %v11046_v9, %v16772_v39  ;;  %v11122_v18 = vmul.f32 %v16791_v61, %v16791_v61 }
 0x411   :  { %v11123_v23 = vmul.f32 %v16786_v40, %v16786_v40  ;;  %v11125_v56 = vmul.f32 %v16794_v14, %v16794_v14 }
 0x412   :  { %v11183_v25 = vadd.f32 %v11120_v13, %v11119_v60  ;;  %v11124_v28 = vmul.f32 %v16797_v22, %v16797_v22  ;;  %v11126_v17 = vmul.f32 %v16806_v49, %v16806_v49 }
 0x414   :  { %v11188_v10 = vadd.f32 %v11124_v28, %v11123_v23  ;;  %v10146_v57 = vpop.f32.mrb[36].mxu0  ;;  %v11184_v54 = vadd.f32 %v11183_v25, %v11121_v3  ;;  %v11050_v55 = vpop.f32.mrb[36].mxu1 }
 0x415   :  { %v16813_v30 = vadd.f32 %v10146_v57, %v16760_v16  ;;  %v10148_v5 = vpop.f32.mrb[37].mxu0  ;;  %v16816_v12 = vadd.f32 %v11050_v55, %v16764_v44  ;;  %v11052_v34 = vpop.f32.mrb[37].mxu1 }
 0x416   :  { %v16819_v58 = vadd.f32 %v10148_v5, %v16768_v20  ;;  %v10150_v43 = vpop.f32.mrb[38].mxu0  ;;  %v11185_v8 = vadd.f32 %v11184_v54, %v11122_v18  ;;  %v11189_v48 = vadd.f32 %v11188_v10, %v11125_v56  ;;  %v11054_v26 = vpop.f32.mrb[38].mxu1  ;;  %v16831_v32 = vadd.f32 %v11052_v34, %v16772_v39 }
 0x417   :  { %v11127_v1 = vmul.f32 %v16813_v30, %v16813_v30  ;;  %v16826_v31 = vadd.f32 %v10150_v43, %v16760_v16  ;;  %v10152_v47 = vpop.f32.mrb[39].mxu0  ;;  %v16834_v15 = vadd.f32 %v11054_v26, %v16764_v44  ;;  %v11056_v52 = vpop.f32.mrb[39].mxu1  ;;  %v11129_v27 = vmul.f32 %v16816_v12, %v16816_v12 }
 0x418   :  { %v11128_v29 = vmul.f32 %v16819_v58, %v16819_v58  ;;  %v16837_v19 = vadd.f32 %v10152_v47, %v16768_v20  ;;  %11186 = vadd.xlane.f32.xlu0 %v11185_v8  ;;  %v11190_v21 = vadd.f32 %v11189_v48, %v11126_v17  ;;  %v16846_v2 = vadd.f32 %v11056_v52, %v16772_v39 }
 0x419   :  { %v11131_v0 = vmul.f32 %v16826_v31, %v16826_v31  ;;  %v11130_v51 = vmul.f32 %v16831_v32, %v16831_v32  ;;  %v11133_v46 = vmul.f32 %v16834_v15, %v16834_v15 }
 0x41a   :  { %v11193_v50 = vadd.f32 %v11128_v29, %v11127_v1  ;;  %v11132_v62 = vmul.f32 %v16837_v19, %v16837_v19  ;;  %v11134_v59 = vmul.f32 %v16846_v2, %v16846_v2 }
 0x41c   :  { %v11198_v11 = vadd.f32 %v11132_v62, %v11131_v0  ;;  %v10156_v36 = vpop.f32.mrb[40].mxu0  ;;  %11191 = vadd.xlane.f32.xlu0 %v11190_v21  ;;  %v11194_v63 = vadd.f32 %v11193_v50, %v11129_v27  ;;  %v11060_v4 = vpop.f32.mrb[40].mxu1 }
 0x41d   :  { %v16853_v35 = vadd.f32 %v10156_v36, %v16760_v16  ;;  %v10158_v42 = vpop.f32.mrb[41].mxu0  ;;  %v16856_v37 = vadd.f32 %v11060_v4, %v16764_v44  ;;  %v11062_v41 = vpop.f32.mrb[41].mxu1 }
 0x41e   :  { %v16859_v38 = vadd.f32 %v10158_v42, %v16768_v20  ;;  %v10160_v53 = vpop.f32.mrb[42].mxu0  ;;  %v11195_v7 = vadd.f32 %v11194_v63, %v11130_v51  ;;  %v11199_v60 = vadd.f32 %v11198_v11, %v11133_v46  ;;  %v11064_v9 = vpop.f32.mrb[42].mxu1  ;;  %v16871_v25 = vadd.f32 %v11062_v41, %v16772_v39 }
 0x41f   :  { %v11135_v6 = vmul.f32 %v16853_v35, %v16853_v35  ;;  %v16866_v13 = vadd.f32 %v10160_v53, %v16760_v16  ;;  %v10162_v23 = vpop.f32.mrb[43].mxu0  ;;  %v16874_v28 = vadd.f32 %v11064_v9, %v16764_v44  ;;  %v11066_v56 = vpop.f32.mrb[43].mxu1  ;;  %v11137_v57 = vmul.f32 %v16856_v37, %v16856_v37 }
 0x420   :  { %v11136_v3 = vmul.f32 %v16859_v38, %v16859_v38  ;;  %v16877_v18 = vadd.f32 %v10162_v23, %v16768_v20  ;;  %11196 = vadd.xlane.f32.xlu1 %v11195_v7  ;;  %v11200_v5 = vadd.f32 %v11199_v60, %v11134_v59  ;;  %v16886_v34 = vadd.f32 %v11066_v56, %v16772_v39 }
 0x421   :  { %v11139_v10 = vmul.f32 %v16866_v13, %v16866_v13  ;;  %v11138_v43 = vmul.f32 %v16871_v25, %v16871_v25  ;;  %v11141_v8 = vmul.f32 %v16874_v28, %v16874_v28 }
 0x422   :  { %v11203_v54 = vadd.f32 %v11136_v3, %v11135_v6  ;;  %v11140_v55 = vmul.f32 %v16877_v18, %v16877_v18  ;;  %v11142_v51 = vmul.f32 %v16886_v34, %v16886_v34 }
 0x424   :  { %v11208_v48 = vadd.f32 %v11140_v55, %v11139_v10  ;;  %v10166_v17 = vpop.f32.mrb[44].mxu0  ;;  %11201 = vadd.xlane.f32.xlu1 %v11200_v5  ;;  %v11204_v1 = vadd.f32 %v11203_v54, %v11137_v57  ;;  %v11070_v47 = vpop.f32.mrb[44].mxu1 }
 0x425   :  { %v16893_v26 = vadd.f32 %v10166_v17, %v16760_v16  ;;  %v10168_v29 = vpop.f32.mrb[45].mxu0  ;;  %v16896_v52 = vadd.f32 %v11070_v47, %v16764_v44  ;;  %v11072_v27 = vpop.f32.mrb[45].mxu1 }
 0x426   :  { %v16899_v0 = vadd.f32 %v10168_v29, %v16768_v20  ;;  %v10170_v50 = vpop.f32.mrb[46].mxu0  ;;  %v11205_v62 = vadd.f32 %v11204_v1, %v11138_v43  ;;  %v11209_v21 = vadd.f32 %v11208_v48, %v11141_v8  ;;  %v11074_v36 = vpop.f32.mrb[46].mxu1  ;;  %v16911_v42 = vadd.f32 %v11072_v27, %v16772_v39 }
 0x427   :  { %v11143_v46 = vmul.f32 %v16893_v26, %v16893_v26  ;;  %v16906_v11 = vadd.f32 %v10170_v50, %v16760_v16  ;;  %v10172_v63 = vpop.f32.mrb[47].mxu0  ;;  %v16914_v41 = vadd.f32 %v11074_v36, %v16764_v44  ;;  %v11076_v7 = vpop.f32.mrb[47].mxu1  ;;  %v11145_v6 = vmul.f32 %v16896_v52, %v16896_v52 }
 0x428   :  { %v11144_v4 = vmul.f32 %v16899_v0, %v16899_v0  ;;  %v16917_v53 = vadd.f32 %v10172_v63, %v16768_v20  ;;  %11206 = vadd.xlane.f32.xlu0 %v11205_v62  ;;  %v11210_v59 = vadd.f32 %v11209_v21, %v11142_v51  ;;  %v16926_v3 = vadd.f32 %v11076_v7, %v16772_v39 }
 0x429   :  { %v11147_v60 = vmul.f32 %v16906_v11, %v16906_v11  ;;  %v11146_v56 = vmul.f32 %v16911_v42, %v16911_v42  ;;  %v11149_v10 = vmul.f32 %v16914_v41, %v16914_v41 }
 0x42a   :  { %v11213_v9 = vadd.f32 %v11144_v4, %v11143_v46  ;;  %v11148_v23 = vmul.f32 %v16917_v53, %v16917_v53  ;;  %11211 = vadd.xlane.f32.xlu1 %v11210_v59  ;;  %v11150_v50 = vmul.f32 %v16926_v3, %v16926_v3 }
 0x42c   :  { %v11218_v57 = vadd.f32 %v11148_v23, %v11147_v60  ;;  %v10176_v54 = vpop.f32.mrb[48].mxu0  ;;  %v11214_v55 = vadd.f32 %v11213_v9, %v11145_v6  ;;  %v11080_v43 = vpop.f32.mrb[48].mxu1 }
 0x42d   :  { %v16933_v5 = vadd.f32 %v10176_v54, %v16760_v16  ;;  %v10178_v8 = vpop.f32.mrb[49].mxu0  ;;  %v16936_v48 = vadd.f32 %v11080_v43, %v16764_v44  ;;  %v11082_v1 = vpop.f32.mrb[49].mxu1 }
 0x42e   :  { %v16939_v17 = vadd.f32 %v10178_v8, %v16768_v20  ;;  %v10180_v47 = vpop.f32.mrb[50].mxu0  ;;  %v11215_v29 = vadd.f32 %v11214_v55, %v11146_v56  ;;  %v11219_v27 = vadd.f32 %v11218_v57, %v11149_v10  ;;  %v11084_v51 = vpop.f32.mrb[50].mxu1  ;;  %v16951_v63 = vadd.f32 %v11082_v1, %v16772_v39 }
 0x42f   :  { %v11151_v62 = vmul.f32 %v16933_v5, %v16933_v5  ;;  %v16946_v21 = vadd.f32 %v10180_v47, %v16760_v16  ;;  %v10182_v46 = vpop.f32.mrb[51].mxu0  ;;  %v16954_v4 = vadd.f32 %v11084_v51, %v16764_v44  ;;  %v11086_v60 = vpop.f32.mrb[51].mxu1  ;;  %v11153_v9 = vmul.f32 %v16936_v48, %v16936_v48 }
 0x430   :  { %v11152_v36 = vmul.f32 %v16939_v17, %v16939_v17  ;;  %v16957_v7 = vadd.f32 %v10182_v46, %v16768_v20  ;;  %11216 = vadd.xlane.f32.xlu0 %v11215_v29  ;;  %v11220_v6 = vadd.f32 %v11219_v27, %v11150_v50  ;;  %v16966_v10 = vadd.f32 %v11086_v60, %v16772_v39 }
 0x431   :  { %17558 = vst [vmem:[#allocation78_spill] sm:$0xff] %v16954_v4  ;;  %v11155_v59 = vmul.f32 %v16946_v21, %v16946_v21  ;;  %v11154_v57 = vmul.f32 %v16951_v63, %v16951_v63  ;;  %v11157_v54 = vmul.f32 %v16954_v4, %v16954_v4 }
 0x432   :  { %17559 = vst [vmem:[#allocation37_spill] sm:$0xff] %v16957_v7  ;;  %v11223_v23 = vadd.f32 %v11152_v36, %v11151_v62  ;;  %v11156_v56 = vmul.f32 %v16957_v7, %v16957_v7  ;;  %17560 = vst [vmem:[#allocation39_spill] sm:$0xff] %v16966_v10  ;;  %11221 = vadd.xlane.f32.xlu1 %v11220_v6  ;;  %v11158_v60 = vmul.f32 %v16966_v10, %v16966_v10 }
 0x434   :  { %v11228_v55 = vadd.f32 %v11156_v56, %v11155_v59  ;;  %v10186_v43 = vpop.f32.mrb[52].mxu0  ;;  %v11224_v8 = vadd.f32 %v11223_v23, %v11153_v9  ;;  %v11090_v47 = vpop.f32.mrb[52].mxu1 }
 0x435   :  { %v16973_v1 = vadd.f32 %v10186_v43, %v16760_v16  ;;  %v10188_v29 = vpop.f32.mrb[53].mxu0  ;;  %v16976_v27 = vadd.f32 %v11090_v47, %v16764_v44  ;;  %v11092_v62 = vpop.f32.mrb[53].mxu1 }
 0x436   :  { %v16979_v50 = vadd.f32 %v10188_v29, %v16768_v20  ;;  %v10190_v51 = vpop.f32.mrb[54].mxu0  ;;  %v11225_v46 = vadd.f32 %v11224_v8, %v11154_v57  ;;  %v11229_v36 = vadd.f32 %v11228_v55, %v11157_v54  ;;  %v11094_v9 = vpop.f32.mrb[54].mxu1  ;;  %v16991_v43 = vadd.f32 %v11092_v62, %v16772_v39 }
 0x437   :  { %17561 = vst [vmem:[#allocation38_spill] sm:$0xff] %v16973_v1  ;;  %17562 = vst [vmem:[#allocation41_spill] sm:$0xff] %v16976_v27  ;;  %v11159_v59 = vmul.f32 %v16973_v1, %v16973_v1  ;;  %v16986_v6 = vadd.f32 %v10190_v51, %v16760_v16  ;;  %v10192_v23 = vpop.f32.mrb[55].mxu0  ;;  %v16994_v57 = vadd.f32 %v11094_v9, %v16764_v44  ;;  %v11096_v55 = vpop.f32.mrb[55].mxu1 }
 0x438   :  { %17563 = vst [vmem:[#allocation79_spill] sm:$0xff] %v16979_v50  ;;  %v11160_v56 = vmul.f32 %v16979_v50, %v16979_v50  ;;  %17565 = vst [vmem:[#allocation40_spill] sm:$0xff] %v16991_v43  ;;  %v16997_v54 = vadd.f32 %v10192_v23, %v16768_v20  ;;  %11226 = vadd.xlane.f32.xlu0 %v11225_v46  ;;  %v11230_v47 = vadd.f32 %v11229_v36, %v11158_v60 }
 0x439   :  { %17564 = vst [vmem:[#allocation80_spill] sm:$0xff] %v16986_v6  ;;  %17566 = vst [vmem:[#allocation42_spill] sm:$0xff] %v16994_v57  ;;  %v11163_v8 = vmul.f32 %v16986_v6, %v16986_v6  ;;  %v11161_v29 = vmul.f32 %v16976_v27, %v16976_v27  ;;  %v17006_v50 = vadd.f32 %v11096_v55, %v16772_v39 }
 0x43a   :  { %17567 = vst [vmem:[#allocation43_spill] sm:$0xff] %v16997_v54  ;;  %v11233_v51 = vadd.f32 %v11160_v56, %v11159_v59  ;;  %v11164_v62 = vmul.f32 %v16997_v54, %v16997_v54  ;;  %11231 = vadd.xlane.f32.xlu1 %v11230_v47  ;;  %v11162_v9 = vmul.f32 %v16991_v43, %v16991_v43 }
 0x43b   :  { %17568 = vst [vmem:[#allocation44_spill] sm:$0xff] %v17006_v50  ;;  %v11165_v46 = vmul.f32 %v16994_v57, %v16994_v57 }
 0x43c   :  { %v11238_v23 = vadd.f32 %v11164_v62, %v11163_v8  ;;  %v10196_v6 = vpop.f32.mrb[56].mxu0  ;;  %v11234_v36 = vadd.f32 %v11233_v51, %v11161_v29  ;;  %v11100_v59 = vpop.f32.mrb[56].mxu1  ;;  %v11166_v8 = vmul.f32 %v17006_v50, %v17006_v50 }
 0x43d   :  { %v17013_v60 = vadd.f32 %v10196_v6, %v16760_v16  ;;  %v10198_v56 = vpop.f32.mrb[57].mxu0  ;;  %v17016_v54 = vadd.f32 %v11100_v59, %v16764_v44  ;;  %v11102_v47 = vpop.f32.mrb[57].mxu1 }
 0x43e   :  { %v17019_v55 = vadd.f32 %v10198_v56, %v16768_v20  ;;  %v10200_v27 = vpop.f32.mrb[58].mxu0  ;;  %v11235_v43 = vadd.f32 %v11234_v36, %v11162_v9  ;;  %v11239_v1 = vadd.f32 %v11238_v23, %v11165_v46  ;;  %v11104_v51 = vpop.f32.mrb[58].mxu1  ;;  %v17031_v56 = vadd.f32 %v11102_v47, %v16772_v39 }
 0x43f   :  { %17569 = vst [vmem:[#allocation45_spill] sm:$0xff] %v17013_v60  ;;  %17570 = vst [vmem:[#allocation47_spill] sm:$0xff] %v17016_v54  ;;  %v11167_v29 = vmul.f32 %v17013_v60, %v17013_v60  ;;  %v17026_v6 = vadd.f32 %v10200_v27, %v16760_v16  ;;  %v10202_v62 = vpop.f32.mrb[59].mxu0  ;;  %v17034_v9 = vadd.f32 %v11104_v51, %v16764_v44  ;;  %v11106_v23 = vpop.f32.mrb[59].mxu1 }
 0x440   :  { %17571 = vst [vmem:[#allocation46_spill] sm:$0xff] %v17019_v55  ;;  %v11168_v59 = vmul.f32 %v17019_v55, %v17019_v55  ;;  %17573 = vst [vmem:[#allocation81_spill] sm:$0xff] %v17031_v56  ;;  %v17037_v46 = vadd.f32 %v10202_v62, %v16768_v20  ;;  %11236 = vadd.xlane.f32.xlu0 %v11235_v43  ;;  %v11240_v36 = vadd.f32 %v11239_v1, %v11166_v8  ;;  %v17576_v8 = vld [vmem:[#allocation69_spill] sm:$0xff] }
 0x441   :  { %17572 = vst [vmem:[#allocation49_spill] sm:$0xff] %v17026_v6  ;;  %17574 = vst [vmem:[#allocation82_spill] sm:$0xff] %v17034_v9  ;;  %v11171_v27 = vmul.f32 %v17026_v6, %v17026_v6  ;;  %v11169_v60 = vmul.f32 %v17016_v54, %v17016_v54  ;;  %v17046_v55 = vadd.f32 %v11106_v23, %v16772_v39 }
 0x442   :  { %17575 = vst [vmem:[#allocation48_spill] sm:$0xff] %v17037_v46  ;;  %v11243_v50 = vadd.f32 %v11168_v59, %v11167_v29  ;;  %v11172_v47 = vmul.f32 %v17037_v46, %v17037_v46  ;;  %11241 = vadd.xlane.f32.xlu1 %v11240_v36  ;;  %v11170_v51 = vmul.f32 %v17031_v56, %v17031_v56  ;;  %v17577_v29 = vld [vmem:[#allocation71_spill] sm:$0xff]  ;;  %v17578_v46 = vld [vmem:[#allocation73_spill] sm:$0xff] }
 0x443   :  { %v11173_v43 = vmul.f32 %v17034_v9, %v17034_v9  ;;  %v3265_v54 = vmul.f32 %v17576_v8, %v17576_v8  ;;  %v3266_v59 = vmul.f32 %v17577_v29, %v17577_v29  ;;  %v3269_v23 = vmul.f32 %v17578_v46, %v17578_v46  ;;  %v17581_v9 = vld [vmem:[#allocation75_spill] sm:$0xff] }
 0x444   :  { %v11248_v62 = vadd.f32 %v11172_v47, %v11171_v27  ;;  %v10206_v6 = vpop.f32.mrb[60].mxu0  ;;  %v11244_v1 = vadd.f32 %v11243_v50, %v11169_v60  ;;  %v11110_v57 = vpop.f32.mrb[60].mxu1  ;;  %v3270_v29 = vmul.f32 %v17581_v9, %v17581_v9  ;;  %v11174_v46 = vmul.f32 %v17046_v55, %v17046_v55 }
 0x445   :  { %v17059_v36 = vadd.f32 %v10206_v6, %v16760_v16  ;;  %v10208_v56 = vpop.f32.mrb[61].mxu0  ;;  %v17062_v10 = vadd.f32 %v11110_v57, %v16764_v44  ;;  %v11112_v50 = vpop.f32.mrb[61].mxu1  ;;  %v3343_v9 = vadd.f32 %v3266_v59, %v3265_v54 }
 0x446   :  { %v17065_v27 = vadd.f32 %v10208_v56, %v16768_v20  ;;  %v10210_v60 = vpop.f32.mrb[62].mxu0  ;;  %v11245_v47 = vadd.f32 %v11244_v1, %v11170_v51  ;;  %v11249_v8 = vadd.f32 %v11248_v62, %v11173_v43  ;;  %v11114_v57 = vpop.f32.mrb[62].mxu1  ;;  %v17079_v51 = vadd.f32 %v11112_v50, %v16772_v39 }
 0x447   :  { %17579 = vst [vmem:[#allocation50_spill] sm:$0xff] %v17059_v36  ;;  %v11175_v6 = vmul.f32 %v17059_v36, %v17059_v36  ;;  %v17074_v4 = vadd.f32 %v10210_v60, %v16760_v16  ;;  %v10212_v7 = vpop.f32.mrb[63].mxu0  ;;  %v17082_v43 = vadd.f32 %v11114_v57, %v16764_v44  ;;  %v11116_v1 = vpop.f32.mrb[63].mxu1  ;;  %v11177_v36 = vmul.f32 %v17062_v10, %v17062_v10  ;;  %v17585_v57 = vld [vmem:[#allocation70_spill] sm:$0xff] }
 0x448   :  { %17580 = vst [vmem:[#allocation51_spill] sm:$0xff] %v17065_v27  ;;  %v11176_v56 = vmul.f32 %v17065_v27, %v17065_v27  ;;  %v17085_v62 = vadd.f32 %v10212_v7, %v16768_v20  ;;  %11246 = vadd.xlane.f32.xlu0 %v11245_v47  ;;  %v11250_v60 = vadd.f32 %v11249_v8, %v11174_v46  ;;  %v17586_v47 = vld [vmem:[#allocation74_spill] sm:$0xff] }
 0x449   :  { %17582 = vst [vmem:[#allocation52_spill] sm:$0xff] %v17074_v4  ;;  %17583 = vst [vmem:[#allocation53_spill] sm:$0xff] %v17082_v43  ;;  %v11179_v16 = vmul.f32 %v17074_v4, %v17074_v4  ;;  %v17094_v44 = vadd.f32 %v11116_v1, %v16772_v39  ;;  %v3267_v20 = vmul.f32 %v17585_v57, %v17585_v57  ;;  %v17587_v57 = vld [vmem:[#allocation72_spill] sm:$0xff] }
 0x44a   :  { %17584 = vst [vmem:[#allocation55_spill] sm:$0xff] %v17085_v62  ;;  %v11253_v27 = vadd.f32 %v11176_v56, %v11175_v6  ;;  %v11180_v50 = vmul.f32 %v17085_v62, %v17085_v62  ;;  %v3348_v7 = vadd.f32 %v3270_v29, %v3269_v23  ;;  %11251 = vadd.xlane.f32.xlu1 %v11250_v60  ;;  %v17588_v4 = vld [vmem:[#allocation76_spill] sm:$0xff] }
 0x44b   :  { %v11178_v54 = vmul.f32 %v17079_v51, %v17079_v51  ;;  %v11181_v46 = vmul.f32 %v17082_v43, %v17082_v43  ;;  %v3271_v6 = vmul.f32 %v17586_v47, %v17586_v47  ;;  %v11182_v39 = vmul.f32 %v17094_v44, %v17094_v44 }
 0x44c   :  { %v11258_v8 = vadd.f32 %v11180_v50, %v11179_v16  ;;  %v11254_v59 = vadd.f32 %v11253_v27, %v11177_v36  ;;  %v3344_v62 = vadd.f32 %v3343_v9, %v3267_v20  ;;  %v3268_v29 = vmul.f32 %v17587_v57, %v17587_v57 }
 0x44d   :  { %v3349_v60 = vadd.f32 %v3348_v7, %v3271_v6  ;;  %v3272_v43 = vmul.f32 %v17588_v4, %v17588_v4  ;;  %v17113_v20 = vstv %s17288_s0  ;;  %s14825_s0 = smov [#allocation15]  }
 0x44e   :  { %v11255_v56 = vadd.f32 %v11254_v59, %v11178_v54  ;;  %v11259_v1 = vadd.f32 %v11258_v8, %v11181_v46  ;;  %v3345_v36 = vadd.f32 %v3344_v62, %v3268_v29  ;;  %s11650_s13 = sshll.u32 %s14825_s0, 4  ;;  %s11651_s13 = int_to_ptr.vmem [resolvable:$true] %s11650_s13 }
 0x44f   :  { %v3350_v27 = vadd.f32 %v3349_v60, %v3272_v43  ;;  %s14758_s17 = scalar_lea.vmem %s11651_s13, 4096  ;;  %p14763_p7 = scmp.lt.s32.totalorder %s11651_s13, %s11651_s13 }
 0x450   :  { %11256 = vadd.xlane.f32.xlu0 %v11255_v56  ;;  %v11260_v23 = vadd.f32 %v11259_v1, %v11182_v39  ;;  %p14759_p6 = scmp.ne.s32.totalorder %s11651_s13, %s14758_s17  ;;  %p14764_p8 = scmp.lt.s32.totalorder %s14758_s17, %s14758_s17 }
 0x452   :  { %11261 = vadd.xlane.f32.xlu1 %v11260_v23  ;;  %p14765_p9 = por %p14764_p8, %p14763_p7 }
 0x454   :  { %3346 = vadd.xlane.f32.xlu0 %v3345_v36  ;;  %p14766_p10 = pnand %p14765_p9, %p14759_p6 }
 0x456   :  { %3351 = vadd.xlane.f32.xlu1 %v3350_v27 }
 0x4a5   :  { %v11187_v16 = vpop.xlane.xlu0 %11186 }
 0x4a6   :  { %14590 = vrsqrt.f32 %v11187_v16 }
 0x4a9   :  { %v11192_v50 = vpop.xlane.xlu0 %11191 }
 0x4aa   :  { %14592 = vrsqrt.f32 %v11192_v50 }
 0x4ad   :  { %v11197_v54 = vpop.xlane.xlu1 %11196 }
 0x4ae   :  { %14594 = vrsqrt.f32 %v11197_v54 }
 0x4b0   :  { %v14591_v9 = vpop.eup %14590 }
 0x4b1   :  { %v11279_v7 = vmul.f32 %v14591_v9, %v16775_v33  ;;  %v11280_v46 = vmul.f32 %v14591_v9, %v16781_v45  ;;  %v11281_v62 = vmul.f32 %v14591_v9, %v16778_v24  ;;  %v11282_v43 = vmul.f32 %v14591_v9, %v16791_v61  ;;  %v11202_v8 = vpop.xlane.xlu1 %11201 }
 0x4b2   :  { %14596 = vrsqrt.f32 %v11202_v8 }
 0x4b3   :  { %v11345_v59 = vmul.f32 %v17113_v20, %v11279_v7  ;;  %v11346_v6 = vmul.f32 %v17113_v20, %v11280_v46  ;;  %v11347_v39 = vmul.f32 %v17113_v20, %v11281_v62  ;;  %v11348_v56 = vmul.f32 %v17113_v20, %v11282_v43 }
 0x4b4   :  { %v14593_v1 = vpop.eup %14592 }
 0x4b5   :  { %v12469_v29 = vpack.c.bf16 %v11346_v6, %v11345_v59  ;;  %v12470_v23 = vpack.c.bf16 %v11348_v56, %v11347_v39  ;;  %v11283_v33 = vmul.f32 %v14593_v1, %v16786_v40  ;;  %v11284_v45 = vmul.f32 %v14593_v1, %v16797_v22  ;;  %v11207_v24 = vpop.xlane.xlu0 %11206 }
 0x4b6   :  { %v11285_v61 = vmul.f32 %v14593_v1, %v16794_v14  ;;  %v11286_v60 = vmul.f32 %v14593_v1, %v16806_v49  ;;  %14598 = vrsqrt.f32 %v11207_v24 }
 0x4b7   :  { %11601 = vst [vmem:[#allocation15] sm:$0xff] %v12469_v29  ;;  %11602 = vst [vmem:[#allocation15 + $0x8] sm:$0xff] %v12470_v23  ;;  %v11349_v36 = vmul.f32 %v17113_v20, %v11283_v33  ;;  %v11350_v27 = vmul.f32 %v17113_v20, %v11284_v45  ;;  %v11212_v40 = vpop.xlane.xlu1 %11211 }
 0x4b8   :  { %v14595_v16 = vpop.eup %14594  ;;  %v11351_v50 = vmul.f32 %v17113_v20, %v11285_v61  ;;  %v11352_v54 = vmul.f32 %v17113_v20, %v11286_v60  ;;  %14600 = vrsqrt.f32 %v11212_v40 }
 0x4b9   :  { %v12471_v9 = vpack.c.bf16 %v11350_v27, %v11349_v36  ;;  %v11287_v22 = vmul.f32 %v14595_v16, %v16813_v30  ;;  %v11288_v14 = vmul.f32 %v14595_v16, %v16819_v58  ;;  %v11289_v49 = vmul.f32 %v14595_v16, %v16816_v12 }
 0x4ba   :  { %v12472_v7 = vpack.c.bf16 %v11352_v54, %v11351_v50  ;;  %v11290_v46 = vmul.f32 %v14595_v16, %v16831_v32 }
 0x4bb   :  { %11603 = vst [vmem:[#allocation15 + $0x10] sm:$0xff] %v12471_v9  ;;  %v11353_v62 = vmul.f32 %v17113_v20, %v11287_v22  ;;  %v11354_v43 = vmul.f32 %v17113_v20, %v11288_v14  ;;  %v11355_v8 = vmul.f32 %v17113_v20, %v11289_v49 }
 0x4bc   :  { %v14597_v59 = vpop.eup %14596  ;;  %11604 = vst [vmem:[#allocation15 + $0x18] sm:$0xff] %v12472_v7  ;;  %v11356_v6 = vmul.f32 %v17113_v20, %v11290_v46 }
 0x4bd   :  { %v12473_v30 = vpack.c.bf16 %v11354_v43, %v11353_v62  ;;  %v11291_v58 = vmul.f32 %v14597_v59, %v16826_v31  ;;  %v11292_v12 = vmul.f32 %v14597_v59, %v16837_v19  ;;  %v11293_v39 = vmul.f32 %v14597_v59, %v16834_v15  ;;  %v11217_v32 = vpop.xlane.xlu0 %11216 }
 0x4be   :  { %v12474_v56 = vpack.c.bf16 %v11356_v6, %v11355_v8  ;;  %v11294_v1 = vmul.f32 %v14597_v59, %v16846_v2  ;;  %14602 = vrsqrt.f32 %v11217_v32 }
 0x4bf   :  { %11605 = vst [vmem:[#allocation15 + $0x20] sm:$0xff] %v12473_v30  ;;  %v11357_v29 = vmul.f32 %v17113_v20, %v11291_v58  ;;  %v11358_v23 = vmul.f32 %v17113_v20, %v11292_v12  ;;  %v11359_v33 = vmul.f32 %v17113_v20, %v11293_v39  ;;  %v11222_v24 = vpop.xlane.xlu1 %11221 }
 0x4c0   :  { %v14599_v45 = vpop.eup %14598  ;;  %11606 = vst [vmem:[#allocation15 + $0x28] sm:$0xff] %v12474_v56  ;;  %v11360_v31 = vmul.f32 %v17113_v20, %v11294_v1  ;;  %14604 = vrsqrt.f32 %v11222_v24 }
 0x4c1   :  { %v12475_v19 = vpack.c.bf16 %v11358_v23, %v11357_v29  ;;  %v11295_v15 = vmul.f32 %v14599_v45, %v16853_v35  ;;  %v11296_v61 = vmul.f32 %v14599_v45, %v16859_v38  ;;  %v11297_v2 = vmul.f32 %v14599_v45, %v16856_v37 }
 0x4c2   :  { %v12476_v60 = vpack.c.bf16 %v11360_v31, %v11359_v33  ;;  %v11298_v36 = vmul.f32 %v14599_v45, %v16871_v25  ;;  %v14601_v54 = vpop.eup %14600 }
 0x4c3   :  { %11607 = vst [vmem:[#allocation15 + $0x30] sm:$0xff] %v12475_v19  ;;  %v11361_v27 = vmul.f32 %v17113_v20, %v11295_v15  ;;  %v11362_v16 = vmul.f32 %v17113_v20, %v11296_v61  ;;  %v11363_v50 = vmul.f32 %v17113_v20, %v11297_v2  ;;  %v11299_v38 = vmul.f32 %v14601_v54, %v16866_v13 }
 0x4c4   :  { %11608 = vst [vmem:[#allocation15 + $0x38] sm:$0xff] %v12476_v60  ;;  %v11364_v40 = vmul.f32 %v17113_v20, %v11298_v36  ;;  %v11300_v37 = vmul.f32 %v14601_v54, %v16877_v18  ;;  %v11301_v9 = vmul.f32 %v14601_v54, %v16874_v28  ;;  %v11302_v14 = vmul.f32 %v14601_v54, %v16886_v34  ;;  %v17590_v54 = vld [vmem:[#allocation78_spill] sm:$0xff] }
 0x4c5   :  { %v12477_v35 = vpack.c.bf16 %v11362_v16, %v11361_v27  ;;  %v11227_v25 = vpop.xlane.xlu0 %11226  ;;  %v11365_v49 = vmul.f32 %v17113_v20, %v11299_v38  ;;  %v17591_v38 = vld [vmem:[#allocation39_spill] sm:$0xff] }
 0x4c6   :  { %v12478_v22 = vpack.c.bf16 %v11364_v40, %v11363_v50  ;;  %14606 = vrsqrt.f32 %v11227_v25  ;;  %v11366_v7 = vmul.f32 %v17113_v20, %v11300_v37  ;;  %v11367_v46 = vmul.f32 %v17113_v20, %v11301_v9  ;;  %v17589_v50 = vld [vmem:[#allocation37_spill] sm:$0xff] }
 0x4c7   :  { %11609 = vst [vmem:[#allocation15 + $0x40] sm:$0xff] %v12477_v35  ;;  %v11368_v13 = vmul.f32 %v17113_v20, %v11302_v14  ;;  %v11232_v43 = vpop.xlane.xlu1 %11231 }
 0x4c8   :  { %v14603_v62 = vpop.eup %14602  ;;  %11610 = vst [vmem:[#allocation15 + $0x48] sm:$0xff] %v12478_v22  ;;  %v12479_v18 = vpack.c.bf16 %v11366_v7, %v11365_v49  ;;  %14608 = vrsqrt.f32 %v11232_v43 }
 0x4c9   :  { %v11303_v28 = vmul.f32 %v14603_v62, %v16893_v26  ;;  %v11304_v8 = vmul.f32 %v14603_v62, %v16899_v0  ;;  %v11305_v34 = vmul.f32 %v14603_v62, %v16896_v52  ;;  %v12480_v59 = vpack.c.bf16 %v11368_v13, %v11367_v46  ;;  %v17592_v46 = vld [vmem:[#allocation38_spill] sm:$0xff]  ;;  %v17593_v13 = vld [vmem:[#allocation79_spill] sm:$0xff] }
 0x4ca   :  { %v11306_v6 = vmul.f32 %v14603_v62, %v16911_v42  ;;  %11611 = vst [vmem:[#allocation15 + $0x50] sm:$0xff] %v12479_v18  ;;  %v14605_v39 = vpop.eup %14604  ;;  %v17594_v18 = vld [vmem:[#allocation41_spill] sm:$0xff] }
 0x4cb   :  { %v11369_v30 = vmul.f32 %v17113_v20, %v11303_v28  ;;  %v11370_v58 = vmul.f32 %v17113_v20, %v11304_v8  ;;  %v11371_v12 = vmul.f32 %v17113_v20, %v11305_v34  ;;  %11612 = vst [vmem:[#allocation15 + $0x58] sm:$0xff] %v12480_v59  ;;  %v11307_v0 = vmul.f32 %v14605_v39, %v16906_v11  ;;  %v17595_v34 = vld [vmem:[#allocation40_spill] sm:$0xff] }
 0x4cc   :  { %v11372_v32 = vmul.f32 %v17113_v20, %v11306_v6  ;;  %v11308_v52 = vmul.f32 %v14605_v39, %v16917_v53  ;;  %v11309_v56 = vmul.f32 %v14605_v39, %v16914_v41  ;;  %v11310_v29 = vmul.f32 %v14605_v39, %v16926_v3 }
 0x4cd   :  { %v12481_v26 = vpack.c.bf16 %v11370_v58, %v11369_v30  ;;  %v11237_v42 = vpop.xlane.xlu0 %11236  ;;  %v11373_v23 = vmul.f32 %v17113_v20, %v11307_v0 }
 0x4ce   :  { %v12482_v1 = vpack.c.bf16 %v11372_v32, %v11371_v12  ;;  %14610 = vrsqrt.f32 %v11237_v42  ;;  %v11374_v33 = vmul.f32 %v17113_v20, %v11308_v52  ;;  %v11375_v45 = vmul.f32 %v17113_v20, %v11309_v56  ;;  %v17597_v52 = vld [vmem:[#allocation43_spill] sm:$0xff]  ;;  %v17598_v42 = vld [vmem:[#allocation42_spill] sm:$0xff] }
 0x4cf   :  { %11613 = vst [vmem:[#allocation15 + $0x60] sm:$0xff] %v12481_v26  ;;  %v11376_v11 = vmul.f32 %v17113_v20, %v11310_v29  ;;  %v11242_v24 = vpop.xlane.xlu1 %11241  ;;  %v17596_v26 = vld [vmem:[#allocation80_spill] sm:$0xff] }
 0x4d0   :  { %v14607_v31 = vpop.eup %14606  ;;  %11614 = vst [vmem:[#allocation15 + $0x68] sm:$0xff] %v12482_v1  ;;  %v12483_v53 = vpack.c.bf16 %v11374_v33, %v11373_v23  ;;  %14612 = vrsqrt.f32 %v11242_v24  ;;  %v17599_v33 = vld [vmem:[#allocation44_spill] sm:$0xff] }
 0x4d1   :  { %v11311_v41 = vmul.f32 %v14607_v31, %v16933_v5  ;;  %v11312_v19 = vmul.f32 %v14607_v31, %v16939_v17  ;;  %v11313_v3 = vmul.f32 %v14607_v31, %v16936_v48  ;;  %v12484_v15 = vpack.c.bf16 %v11376_v11, %v11375_v45 }
 0x4d2   :  { %v11314_v61 = vmul.f32 %v14607_v31, %v16951_v63  ;;  %11615 = vst [vmem:[#allocation15 + $0x70] sm:$0xff] %v12483_v53  ;;  %v14609_v27 = vpop.eup %14608 }
 0x4d3   :  { %v11377_v2 = vmul.f32 %v17113_v20, %v11311_v41  ;;  %v11378_v60 = vmul.f32 %v17113_v20, %v11312_v19  ;;  %v11379_v36 = vmul.f32 %v17113_v20, %v11313_v3  ;;  %11616 = vst [vmem:[#allocation15 + $0x78] sm:$0xff] %v12484_v15  ;;  %v11315_v17 = vmul.f32 %v14609_v27, %v16946_v21  ;;  %v17600_v15 = vld [vmem:[#allocation45_spill] sm:$0xff] }
 0x4d4   :  { %v11380_v16 = vmul.f32 %v17113_v20, %v11314_v61  ;;  %v11316_v48 = vmul.f32 %v14609_v27, %v17589_v50  ;;  %v11317_v40 = vmul.f32 %v14609_v27, %v17590_v54  ;;  %v11318_v37 = vmul.f32 %v14609_v27, %v17591_v38 }
 0x4d5   :  { %v12485_v5 = vpack.c.bf16 %v11378_v60, %v11377_v2  ;;  %v11247_v63 = vpop.xlane.xlu0 %11246  ;;  %v11381_v9 = vmul.f32 %v17113_v20, %v11315_v17  ;;  %v17601_v2 = vld [vmem:[#allocation46_spill] sm:$0xff]  ;;  %v17603_v17 = vld [vmem:[#allocation81_spill] sm:$0xff] }
 0x4d6   :  { %v12486_v35 = vpack.c.bf16 %v11380_v16, %v11379_v36  ;;  %14614 = vrsqrt.f32 %v11247_v63  ;;  %v11382_v25 = vmul.f32 %v17113_v20, %v11316_v48  ;;  %v11383_v22 = vmul.f32 %v17113_v20, %v11317_v40  ;;  %v17602_v36 = vld [vmem:[#allocation47_spill] sm:$0xff] }
 0x4d7   :  { %11617 = vst [vmem:[#allocation15 + $0x80] sm:$0xff] %v12485_v5  ;;  %v11384_v21 = vmul.f32 %v17113_v20, %v11318_v37  ;;  %v11252_v49 = vpop.xlane.xlu1 %11251 }
 0x4d8   :  { %v14611_v14 = vpop.eup %14610  ;;  %11618 = vst [vmem:[#allocation15 + $0x88] sm:$0xff] %v12486_v35  ;;  %v12487_v7 = vpack.c.bf16 %v11382_v25, %v11381_v9  ;;  %14616 = vrsqrt.f32 %v11252_v49  ;;  %v17604_v9 = vld [vmem:[#allocation49_spill] sm:$0xff] }
 0x4d9   :  { %v11319_v62 = vmul.f32 %v14611_v14, %v17592_v46  ;;  %v11320_v43 = vmul.f32 %v14611_v14, %v17593_v13  ;;  %v11321_v28 = vmul.f32 %v14611_v14, %v17594_v18  ;;  %v12488_v8 = vpack.c.bf16 %v11384_v21, %v11383_v22  ;;  %v17605_v22 = vld [vmem:[#allocation48_spill] sm:$0xff]  ;;  %v17606_v21 = vld [vmem:[#allocation82_spill] sm:$0xff] }
 0x4da   :  { %v11322_v59 = vmul.f32 %v14611_v14, %v17595_v34  ;;  %11619 = vst [vmem:[#allocation15 + $0x90] sm:$0xff] %v12487_v7  ;;  %v14613_v12 = vpop.eup %14612  ;;  %v17607_v34 = vld [vmem:[#allocation50_spill] sm:$0xff] }
 0x4db   :  { %v11385_v6 = vmul.f32 %v17113_v20, %v11319_v62  ;;  %v11386_v30 = vmul.f32 %v17113_v20, %v11320_v43  ;;  %v11387_v58 = vmul.f32 %v17113_v20, %v11321_v28  ;;  %11620 = vst [vmem:[#allocation15 + $0x98] sm:$0xff] %v12488_v8  ;;  %v11323_v0 = vmul.f32 %v14613_v12, %v17596_v26 }
 0x4dc   :  { %v11388_v39 = vmul.f32 %v17113_v20, %v11322_v59  ;;  %v11324_v56 = vmul.f32 %v14613_v12, %v17597_v52  ;;  %v11325_v1 = vmul.f32 %v14613_v12, %v17598_v42  ;;  %v11326_v45 = vmul.f32 %v14613_v12, %v17599_v33  ;;  %v17609_v52 = vld [vmem:[#allocation52_spill] sm:$0xff] }
 0x4dd   :  { %v12489_v32 = vpack.c.bf16 %v11386_v30, %v11385_v6  ;;  %v11257_v29 = vpop.xlane.xlu0 %11256  ;;  %v11389_v31 = vmul.f32 %v17113_v20, %v11323_v0  ;;  %v17608_v6 = vld [vmem:[#allocation51_spill] sm:$0xff] }
 0x4de   :  { %v12490_v23 = vpack.c.bf16 %v11388_v39, %v11387_v58  ;;  %14618 = vrsqrt.f32 %v11257_v29  ;;  %v11390_v11 = vmul.f32 %v17113_v20, %v11324_v56  ;;  %v11391_v24 = vmul.f32 %v17113_v20, %v11325_v1  ;;  %v17610_v29 = vld [vmem:[#allocation55_spill] sm:$0xff] }
 0x4df   :  { %11621 = vst [vmem:[#allocation15 + $0xa0] sm:$0xff] %v12489_v32  ;;  %v11262_v53 = vpop.xlane.xlu1 %11261  ;;  %v11392_v19 = vmul.f32 %v17113_v20, %v11326_v45 }
 0x4e0   :  { %v14615_v41 = vpop.eup %14614  ;;  %11622 = vst [vmem:[#allocation15 + $0xa8] sm:$0xff] %v12490_v23  ;;  %14620 = vrsqrt.f32 %v11262_v53  ;;  %v12491_v3 = vpack.c.bf16 %v11390_v11, %v11389_v31  ;;  %v17612_v11 = vld [vmem:[#allocation69_spill] sm:$0xff]  ;;  %v17613_v53 = vld [vmem:[#allocation71_spill] sm:$0xff] }
 0x4e1   :  { %v11327_v61 = vmul.f32 %v14615_v41, %v17600_v15  ;;  %v11328_v60 = vmul.f32 %v14615_v41, %v17601_v2  ;;  %v11329_v27 = vmul.f32 %v14615_v41, %v17602_v36  ;;  %v3347_v16 = vpop.xlane.xlu0 %3346  ;;  %v12492_v5 = vpack.c.bf16 %v11392_v19, %v11391_v24 }
 0x4e2   :  { %v11330_v50 = vmul.f32 %v14615_v41, %v17603_v17  ;;  %14622 = vrsqrt.f32 %v3347_v16  ;;  %11623 = vst [vmem:[#allocation15 + $0xb0] sm:$0xff] %v12491_v3  ;;  %v14617_v35 = vpop.eup %14616  ;;  %v17615_v16 = vld [vmem:[#allocation73_spill] sm:$0xff] }
 0x4e3   :  { %v11393_v48 = vmul.f32 %v17113_v20, %v11327_v61  ;;  %v11394_v54 = vmul.f32 %v17113_v20, %v11328_v60  ;;  %v11395_v40 = vmul.f32 %v17113_v20, %v11329_v27  ;;  %v3352_v63 = vpop.xlane.xlu1 %3351  ;;  %11624 = vst [vmem:[#allocation15 + $0xb8] sm:$0xff] %v12492_v5  ;;  %v11331_v25 = vmul.f32 %v14617_v35, %v17604_v9  ;;  %v17614_v60 = vld [vmem:[#allocation70_spill] sm:$0xff] }
 0x4e4   :  { %v11396_v38 = vmul.f32 %v17113_v20, %v11330_v50  ;;  %14624 = vrsqrt.f32 %v3352_v63  ;;  %v11332_v14 = vmul.f32 %v14617_v35, %v17605_v22  ;;  %v11333_v49 = vmul.f32 %v14617_v35, %v17606_v21 }
 0x4e5   :  { %v12493_v37 = vpack.c.bf16 %v11394_v54, %v11393_v48  ;;  %v11334_v46 = vmul.f32 %v14617_v35, %v17046_v55  ;;  %v11397_v62 = vmul.f32 %v17113_v20, %v11331_v25  ;;  %v17616_v48 = vld [vmem:[#allocation75_spill] sm:$0xff] }
 0x4e6   :  { %v12494_v7 = vpack.c.bf16 %v11396_v38, %v11395_v40  ;;  %v11398_v13 = vmul.f32 %v17113_v20, %v11332_v14  ;;  %v11399_v43 = vmul.f32 %v17113_v20, %v11333_v49 }
 0x4e7   :  { %11625 = vst [vmem:[#allocation15 + $0xc0] sm:$0xff] %v12493_v37  ;;  %v11400_v28 = vmul.f32 %v17113_v20, %v11334_v46 }
 0x4e8   :  { %v14619_v18 = vpop.eup %14618  ;;  %11626 = vst [vmem:[#allocation15 + $0xc8] sm:$0xff] %v12494_v7  ;;  %v12495_v8 = vpack.c.bf16 %v11398_v13, %v11397_v62 }
 0x4e9   :  { %v11335_v59 = vmul.f32 %v14619_v18, %v17607_v34  ;;  %v11336_v30 = vmul.f32 %v14619_v18, %v17608_v6  ;;  %v11337_v58 = vmul.f32 %v14619_v18, %v17062_v10  ;;  %v12496_v55 = vpack.c.bf16 %v11400_v28, %v11399_v43  ;;  %v17611_v10 = vld [vmem:[#allocation53_spill] sm:$0xff] }
 0x4ea   :  { %v14621_v12 = vpop.eup %14620  ;;  %v11338_v39 = vmul.f32 %v14619_v18, %v17079_v51  ;;  %11627 = vst [vmem:[#allocation15 + $0xd0] sm:$0xff] %v12495_v8 }
 0x4eb   :  { %v11401_v32 = vmul.f32 %v17113_v20, %v11335_v59  ;;  %v11402_v26 = vmul.f32 %v17113_v20, %v11336_v30  ;;  %v11403_v0 = vmul.f32 %v17113_v20, %v11337_v58  ;;  %v11339_v56 = vmul.f32 %v14621_v12, %v17609_v52  ;;  %11628 = vst [vmem:[#allocation15 + $0xd8] sm:$0xff] %v12496_v55 }
 0x4ec   :  { %v14623_v42 = vpop.eup %14622  ;;  %v11404_v1 = vmul.f32 %v17113_v20, %v11338_v39  ;;  %v11340_v23 = vmul.f32 %v14621_v12, %v17610_v29  ;;  %v11341_v33 = vmul.f32 %v14621_v12, %v17611_v10  ;;  %v11342_v45 = vmul.f32 %v14621_v12, %v17094_v44 }
 0x4ed   :  { %v12497_v51 = vpack.c.bf16 %v11402_v26, %v11401_v32  ;;  %v11405_v31 = vmul.f32 %v17113_v20, %v11339_v56  ;;  %v3425_v24 = vmul.f32 %v14623_v42, %v17612_v11  ;;  %v3426_v41 = vmul.f32 %v14623_v42, %v17613_v53 }
 0x4ee   :  { %v14625_v19 = vpop.eup %14624  ;;  %v12498_v3 = vpack.c.bf16 %v11404_v1, %v11403_v0  ;;  %v11406_v15 = vmul.f32 %v17113_v20, %v11340_v23  ;;  %v11407_v61 = vmul.f32 %v17113_v20, %v11341_v33  ;;  %v11408_v2 = vmul.f32 %v17113_v20, %v11342_v45 }
 0x4ef   :  { %11629 = vst [vmem:[#allocation15 + $0xe0] sm:$0xff] %v12497_v51  ;;  %v3427_v44 = vmul.f32 %v14623_v42, %v17614_v60  ;;  %v3428_v36 = vmul.f32 %v14623_v42, %v17587_v57  ;;  %v12465_v27 = vpack.c.bf16 %v3426_v41, %v3425_v24  ;;  %v3429_v5 = vmul.f32 %v14625_v19, %v17615_v16 }
 0x4f0   :  { %11630 = vst [vmem:[#allocation15 + $0xe8] sm:$0xff] %v12498_v3  ;;  %v12499_v17 = vpack.c.bf16 %v11406_v15, %v11405_v31  ;;  %v12500_v50 = vpack.c.bf16 %v11408_v2, %v11407_v61  ;;  %v3430_v54 = vmul.f32 %v14625_v19, %v17616_v48  ;;  %v3431_v40 = vmul.f32 %v14625_v19, %v17586_v47 }
 0x4f1   :  { %v12466_v63 = vpack.c.bf16 %v3428_v36, %v3427_v44  ;;  %3653 = vst [vmem:[#allocation14 + $0xe0] sm:$0xff] %v12465_v27  ;;  %v3432_v20 = vmul.f32 %v14625_v19, %v17588_v4 }
 0x4f2   :  { %11631 = vst [vmem:[#allocation15 + $0xf0] sm:$0xff] %v12499_v17  ;;  %11632 = vst [vmem:[#allocation15 + $0xf8] sm:$0xff] %v12500_v50  ;;  %v12467_v57 = vpack.c.bf16 %v3430_v54, %v3429_v5 }
 0x4f3   :  { %3654 = vst [vmem:[#allocation14 + $0xe8] sm:$0xff] %v12466_v63  ;;  %v12468_v35 = vpack.c.bf16 %v3432_v20, %v3431_v40 }
 0x4f4   :  { %14769 = shalt.err (!%p14766_p10)
}
 0x4f5   :  { %s14770_s20 = scalar_lea.hbm %s17296_s8, 4096 }
 0x4f6   :  { %p14771_p11 = scmp.ne.s32.totalorder %s17296_s8, %s14770_s20  ;;  %p14774_p12 = scmp.lt.u32.totalorder %s14770_s20, %s17296_s8 }
 0x4f8   :  { %p14776_p13 = pnand %p14774_p12, %p14771_p11 }
 0x4fa   :  { %14779 = shalt.err (!%p14776_p13)
}
 0x4fb   :  { %11656 = dma.vmem_to_hbm [thread:$0]  %s11651_s13, 4096, %s17296_s8, [#allocation16], %s14818_s28, %s14818_s28, %s14819_s9   ;;  %3655 = vst [vmem:[#allocation14 + $0xf0] sm:$0xff] %v12467_v57  ;;  %3656 = vst [vmem:[#allocation14 + $0xf8] sm:$0xff] %v12468_v35 }
 0x4fc   :  { %s14780_s24 = scalar_lea.vmem %s17251_s16, 4096  ;;  %p14785_p1 = scmp.lt.s32.totalorder %s17251_s16, %s17251_s16 }
 0x4fd   :  { %p14781_p0 = scmp.ne.s32.totalorder %s17251_s16, %s14780_s24  ;;  %p14786_p2 = scmp.lt.s32.totalorder %s14780_s24, %s14780_s24 }
 0x4ff   :  { %p14787_p3 = por %p14786_p2, %p14785_p1 }
 0x501   :  { %p14788_p4 = pnand %p14787_p3, %p14781_p0 }
 0x503   :  { %14791 = shalt.err (!%p14788_p4)
}
 0x504   :  { %s14792_s27 = scalar_lea.hbm %s17295_s7, 4096 }
 0x505   :  { %p14793_p5 = scmp.ne.s32.totalorder %s17295_s7, %s14792_s27  ;;  %p14796_p6 = scmp.lt.u32.totalorder %s14792_s27, %s17295_s7 }
 0x507   :  { %p14798_p7 = pnand %p14796_p6, %p14793_p5 }
 0x509   :  { %14801 = shalt.err (!%p14798_p7)
}
 0x50a   :  { %11644 = dma.vmem_to_hbm [thread:$0]  %s17251_s16, 4096, %s17295_s7, [#allocation5], %s14818_s28, %s14818_s28, %s14819_s9  }
 0x50b   :  { %14810 = dma.done.wait [#allocation5], 4096  }
 0x50c   :  { %14811 = vsyncadd [#allocation5], 4294963200 }
 0x50d   :  { %14812 = dma.done.wait [#allocation16], 4096  }
 0x50e   :  { %14813 = vsyncadd [#allocation16], 4294963200 }
 0x50f   :  { %11663 = vsyncpa [#allocation4], 1 }
 0x510   :  { %11664 = vsyncpa [#allocation7], 1 }
 0x511   :  { %11665 = vsyncpa [#allocation10], 1 }
 0x512   :  { %11666 = vsyncpa [#allocation13], 1 }
 0x513   :  { %11667 = vsyncpa [#allocation5], 1 }
 0x514   :  { %11668 = vsyncpa [#allocation16], 1 }

</bundles_post_ra>
